<compile_context>
chip_gen: v7x
topology: tpu7x:2x2x1
jax: 0.10.0
libtpu: 0.0.40
codegen_flags: <defaults>
</compile_context>

<pallas_src>
import numpy as np
import jax
import jax.numpy as jnp
from jax.experimental import pallas as pl
from jax.experimental.pallas import tpu as pltpu

EMB_DIM = 512            # ArcFace embedding dim
FACE_SIZE = 112          # facenet input resolution
CROP_H = (35, 223)       # x[:, :, 35:223, 32:220]
CROP_W = (32, 220)
PATCH = 16               # surrogate patch size / stride
PATCH_CH = 128           # surrogate per-patch channels (lane-dense)
NTOK = FACE_SIZE // PATCH            # 7 tokens per spatial axis
TOK_ROWS = 8                         # 7 token rows + 1 zero pad row (sublane aligned)
FEAT_W = NTOK * PATCH_CH             # 896 = 7*128, lane-dense stem feature width
NFEAT = TOK_ROWS * FEAT_W            # 7168 head input features per sample


# ----------------------------------------------------------------------------
# Pooling-matrix construction (host numpy; exact AdaptiveAvgPool2d math)
# ----------------------------------------------------------------------------
def _adaptive_pool_matrix(in_size, out_size):
    """(out_size, in_size) matrix implementing torch adaptive average pooling on one axis."""
    m = np.zeros((out_size, in_size), dtype=np.float32)
    for i in range(out_size):
        start = (i * in_size) // out_size
        end = -((-(i + 1) * in_size) // out_size)  # ceil((i+1)*in/out)
        m[i, start:end] = 1.0 / float(end - start)
    return m


def _fused_pool_matrices(h_in, w_in):
    """Mh (112, H), Mw (112, W): pool-to-256 (if H!=256) -> crop -> pool-to-112, per axis."""
    if h_in != 256:       # PyTorch keys the conditional on H for both axes; preserved.
        p1h = _adaptive_pool_matrix(h_in, 256)
        p1w = _adaptive_pool_matrix(w_in, 256)
    else:
        p1h = np.eye(h_in, dtype=np.float32)
        p1w = np.eye(w_in, dtype=np.float32)
    p2 = _adaptive_pool_matrix(CROP_H[1] - CROP_H[0], FACE_SIZE)   # (112, 188)
    mh = p2 @ p1h[CROP_H[0]:CROP_H[1], :]                          # (112, H)
    mw = p2 @ p1w[CROP_W[0]:CROP_W[1], :]                          # (112, W)
    return mh, mw


def _choose_w_tile(w_in, ch_rows):
    """Largest multiple-of-128 divisor of W keeping the f32 x block <= ~4 MiB."""
    divs = [t for t in range(128, w_in + 1, 128) if w_in % t == 0]
    if not divs:
        # TODO(synk): pad W (or use element-offset blocks) for imsizes with no
        # 128-multiple divisor; single full-W tile is used instead.
        return w_in
    fitting = [t for t in divs if ch_rows * t * 4 <= (4 << 20)]
    return max(fitting) if fitting else min(divs)


# ----------------------------------------------------------------------------
# Pallas kernels
# ----------------------------------------------------------------------------
def _pool_stem_kernel(x_ref, mwt_ref, mh2_ref, cw_ref, b_ref, a_ref, o_ref, acc_ref):
    # grid = (B, n_wt): one sample per B step, W is the reduction axis ("arbitrary").
    wi = pl.program_id(1)

    @pl.when(wi == 0)
    def _init():
        acc_ref[...] = jnp.zeros_like(acc_ref)

    # Stage 1 (W axis: pool-256 -> crop -> pool-112), batched over channels and rows:
    #   (C*H, tw) f32 @ (tw, 128) f32  -> accumulate f32.  M = C*H keeps MXU rows full.
    acc_ref[...] += jnp.dot(x_ref[...], mwt_ref[...],
                            preferred_element_type=jnp.float32)

    @pl.when(wi == pl.num_programs(1) - 1)
    def _finalize():
        # Stage 2 (H axis pooling fused with the surrogate per-patch row filter),
        # block-diagonal over channels: one (C*8, C*H) @ (C*H, 128) matmul.
        rowfeat = jnp.dot(mh2_ref[...], acc_ref[...],
                          preferred_element_type=jnp.float32)        # (C*8, 128) f32
        rf = rowfeat.astype(jnp.bfloat16)

        n_rows, feat_w = o_ref.shape                                  # (8, 896)
        n_ch = cw_ref.shape[0]
        f = jnp.zeros((n_rows, feat_w), jnp.float32)
        for c in range(n_ch):                                         # C static -> unrolled
            # block-diagonal column mix: maps 7 groups of 16 pooled columns to
            # 7 groups of 128 channels -> lane-dense (8, 896) token features.
            f = f + jnp.dot(rf[TOK_ROWS * c:TOK_ROWS * (c + 1), :], cw_ref[c],
                            preferred_element_type=jnp.float32)
        f = f + b_ref[...]
        a = a_ref[...]
        o_ref[...] = jnp.where(f > 0.0, f, a * f).astype(o_ref.dtype)   # PReLU


def _head_loss_kernel(f_ref, w_ref, b_ref, g_ref, beta_ref, tgt_ref, emb_ref, loss_ref):
    # Linear -> BatchNorm1d (eval, folded affine) -> l2_norm -> 1 - <e1, e2>
    y = jnp.dot(f_ref[...], w_ref[...], preferred_element_type=jnp.float32) + b_ref[...]
    y = y * g_ref[...] + beta_ref[...]
    ssum = jnp.sum(y * y, axis=-1, keepdims=True)
    inv = jax.lax.rsqrt(jnp.maximum(ssum, 1e-24))          # eps guard (F.normalize eps=1e-12)
    e = y * inv
    emb_ref[...] = e
    loss_ref[...] = 1.0 - jnp.sum(e * tgt_ref[...], axis=-1, keepdims=True)


# ----------------------------------------------------------------------------
# Pallas wrappers
# ----------------------------------------------------------------------------
def pool_stem(x2, mwt, mh2, cw, bias, alpha, *, tw, n_wt, first_tile):
    # x2: (B, C*H, W) f32 (free reshape of the NCHW image), mwt: (n_wt*tw, 128) f32.
    B, CH, _ = x2.shape
    est = (2 * CH * tw * 4            # double-buffered x blocks (f32)
           + 2 * tw * 128 * 4         # mwt blocks
           + CH * 128 * 4             # acc scratch
           + mh2.size * 4
           + 2 * cw.size * 2
           + 2 * TOK_ROWS * FEAT_W * 2
           + (2 << 20))
    vmem_limit = None
    if est > (12 << 20):
        # Cap well below v7x's 64 MiB/TC physical VMEM (the old 56 MiB cap was unsafe there).
        vmem_limit = min(int(est * 1.5), 40 << 20)
    return pl.pallas_call(
        _pool_stem_kernel,
        out_shape=jax.ShapeDtypeStruct((B, TOK_ROWS, FEAT_W), jnp.bfloat16),
        grid=(B, n_wt),
        in_specs=[
            pl.BlockSpec((None, CH, tw), lambda b, w: (b, 0, w + first_tile)),
            pl.BlockSpec((tw, 128), lambda b, w: (w, 0)),
            pl.BlockSpec(mh2.shape, lambda b, w: (0, 0)),
            pl.BlockSpec(cw.shape, lambda b, w: (0, 0, 0)),
            pl.BlockSpec((1, FEAT_W), lambda b, w: (0, 0)),
            pl.BlockSpec((1, FEAT_W), lambda b, w: (0, 0)),
        ],
        out_specs=pl.BlockSpec((None, TOK_ROWS, FEAT_W), lambda b, w: (b, 0, 0)),
        scratch_shapes=[pltpu.VMEM((CH, 128), jnp.float32)],
        compiler_params=pltpu.CompilerParams(
            dimension_semantics=("parallel", "arbitrary"),
            vmem_limit_bytes=vmem_limit),
    )(x2, mwt, mh2, cw, bias, alpha)


def head_and_loss(feats, w, b, gamma, beta, target):
    # Whole batch in one step so the (7168, 512) weight streams through the MXU once.
    B, kdim = feats.shape
    need = 2 * w.size * 2 + B * kdim * 2 * 2 + 4 * B * EMB_DIM * 4 + (8 << 20)
    return pl.pallas_call(
        _head_loss_kernel,
        out_shape=(jax.ShapeDtypeStruct((B, EMB_DIM), jnp.float32),
                   jax.ShapeDtypeStruct((B, 1), jnp.float32)),
        grid=(1,),
        in_specs=[
            pl.BlockSpec((B, kdim), lambda i: (0, 0)),
            pl.BlockSpec((kdim, EMB_DIM), lambda i: (0, 0)),
            pl.BlockSpec((1, EMB_DIM), lambda i: (0, 0)),
            pl.BlockSpec((1, EMB_DIM), lambda i: (0, 0)),
            pl.BlockSpec((1, EMB_DIM), lambda i: (0, 0)),
            pl.BlockSpec((B, EMB_DIM), lambda i: (0, 0)),
        ],
        out_specs=(pl.BlockSpec((B, EMB_DIM), lambda i: (0, 0)),
                   pl.BlockSpec((B, 1), lambda i: (0, 0))),
        compiler_params=pltpu.CompilerParams(
            dimension_semantics=("arbitrary",),
            # double-buffered weight alone is ~14.7 MB: explicit limit clears v5e's
            # 16 MiB default; 40 MiB cap is safe on v7x's 64 MiB physical VMEM.
            vmem_limit_bytes=min(need, 40 << 20)),
    )(feats, w, b, gamma, beta, target)


# ----------------------------------------------------------------------------
# Module
# ----------------------------------------------------------------------------
class SoloFaceIdLoss:
    def __init__(self, imsize, target_img):
        assert imsize >= 256
        self.imsize = imsize
        B, C, H, W = target_img.shape
        CH = C * H

        mh, mw = _fused_pool_matrices(H, W)     # f32 (112, H), (112, W) exact pooling

        # ---- deterministic surrogate "facenet" parameters --------------------------
        # TODO(synk): separable (rank-1 per channel) 16x16 patch filters stand in for the
        # IR-SE-50 body; the flatten order also differs from the real backbone.
        rng = np.random.default_rng(0)
        rw = (0.05 * rng.standard_normal((C, NTOK, PATCH))).astype(np.float32)      # row taps
        cwk = (0.02 * rng.standard_normal((C, PATCH, PATCH_CH))).astype(np.float32) # col taps->ch

        # Fold the H-pool with the per-token-row filter into one block-diag-over-channels
        # matrix:  MH2[c*8+i, c*H+y] = sum_ph rw[c,i,ph] * Mh[16*i+ph, y]   (row i=7 stays 0)
        mh2 = np.zeros((C * TOK_ROWS, CH), np.float32)
        for c in range(C):
            for i in range(NTOK):
                mh2[c * TOK_ROWS + i, c * H:(c + 1) * H] = rw[c, i] @ mh[i * PATCH:(i + 1) * PATCH, :]

        # W-pool matrix transposed, lane-padded 112 -> 128 (zero cols): (W, 128)
        mwt = np.zeros((W, 128), np.float32)
        mwt[:, :FACE_SIZE] = mw.T

        # Column filter as block-diagonal over the 7 W-token groups:
        #   CW[c, j*16+pw, j*128+k] = cwk[c, pw, k]
        cwbig = np.zeros((C, 128, FEAT_W), np.float32)
        for c in range(C):
            for j in range(NTOK):
                cwbig[c, j * PATCH:(j + 1) * PATCH, j * PATCH_CH:(j + 1) * PATCH_CH] = cwk[c]

        b_patch = np.zeros((1, FEAT_W), np.float32)
        alpha = np.full((1, FEAT_W), 0.25, np.float32)                # PReLU init

        # Head Linear(7168 -> 512); rows of the sublane pad token-row (i == 7) zeroed so
        # the padding is inert.  BN1d eval folded to an affine.
        w_head = (0.02 * rng.standard_normal((NFEAT, EMB_DIM))).astype(np.float32)
        w_head[(TOK_ROWS - 1) * FEAT_W:, :] = 0.0
        b_head = np.zeros((1, EMB_DIM), np.float32)
        gamma = np.ones((1, EMB_DIM), np.float32)
        beta = np.zeros((1, EMB_DIM), np.float32)

        # W-tile size and whole-tile skipping of columns outside the crop support band
        # (the crop zeroes mw there, so those tiles never need to be read).
        tw = _choose_w_tile(W, CH)
        wnz = np.nonzero(np.abs(mw).sum(axis=0) > 0.0)[0]
        first_tile = int(wnz[0]) // tw
        last_tile = int(wnz[-1]) // tw
        n_wt = last_tile - first_tile + 1
        mwt_used = mwt[first_tile * tw:(last_tile + 1) * tw, :]

        # device-resident constants (pooling path kept f32 for parity with torch)
        mwt_c = jnp.asarray(mwt_used)
        mh2_c = jnp.asarray(mh2)
        cw_c = jnp.asarray(cwbig, dtype=jnp.bfloat16)
        bp_c = jnp.asarray(b_patch)
        al_c = jnp.asarray(alpha)
        wh_c = jnp.asarray(w_head, dtype=jnp.bfloat16)
        bh_c = jnp.asarray(b_head)
        g_c = jnp.asarray(gamma)
        be_c = jnp.asarray(beta)

        def core(x, target):
            bs = x.shape[0]
            # free contiguous reshape (no copy, no extra HBM traffic) -> (B, C*H, W) f32
            x2 = x.astype(jnp.float32).reshape(bs, CH, W)
            feat = pool_stem(x2, mwt_c, mh2_c, cw_c, bp_c, al_c,
                             tw=tw, n_wt=n_wt, first_tile=first_tile)  # (B, 8, 896) bf16
            feats2d = feat.reshape(bs, NFEAT)                          # free contiguous reshape
            emb, loss = head_and_loss(feats2d, wh_c, bh_c, g_c, be_c, target)
            return emb, loss[:, 0]                                     # (B,512) f32, (B,) f32

        self._core = jax.jit(core)
        # batch mean stays a tiny XLA reduce: folding it into the kernel would force the
        # parallel B grid axis to be serial (loses v7x dual-TC use).
        self._loss_mean = jax.jit(lambda x, t: core(x, t)[1].mean())

        # register_buffer('target_enc', ...)
        self.target_enc = jax.lax.stop_gradient(self.extract_feats(target_img))

    def extract_feats(self, x):
        dummy_target = jnp.zeros((x.shape[0], EMB_DIM), jnp.float32)
        emb, _ = self._core(x, dummy_target)
        return emb                                                     # (B, 512), l2-normalized

    def __call__(self, x, avg_batch=True):
        if avg_batch:
            return self._loss_mean(x, self.target_enc)                 # scalar
        return self._core(x, self.target_enc)[1]                       # (B,)


if __name__ == "__main__":
    imsize = 320
    B = 2
    key = jax.random.PRNGKey(0)
    k_x, k_t = jax.random.split(key, 2)
    x = jax.random.normal(k_x, (B, 3, imsize, imsize), jnp.float32)
    target_img = jax.random.normal(k_t, (B, 3, imsize, imsize), jnp.float32)

    module = SoloFaceIdLoss(imsize, target_img)
    loss = jax.block_until_ready(module(x, avg_batch=True))
    per_sample = jax.block_until_ready(module(x, avg_batch=False))

    assert loss.shape == () and per_sample.shape == (B,)
    assert bool(jnp.isfinite(loss))
    assert bool(jnp.all(jnp.isfinite(per_sample)))
    print("KERNEL_OK")
</pallas_src>

<mosaic_0001>
module attributes {stable_mosaic.version = 11 : i64} {
  func.func @_pool_stem_kernel(%arg0: i32, %arg1: i32, %arg2: memref<1x960x320xf32, #tpu.memory_space<vmem>>, %arg3: memref<320x128xf32, #tpu.memory_space<vmem>>, %arg4: memref<24x960xf32, #tpu.memory_space<vmem>>, %arg5: memref<3x128x896xbf16, #tpu.memory_space<vmem>>, %arg6: memref<1x896xf32, #tpu.memory_space<vmem>>, %arg7: memref<1x896xf32, #tpu.memory_space<vmem>>, %arg8: memref<1x8x896xbf16, #tpu.memory_space<vmem>>, %arg9: memref<960x128xf32, #tpu.memory_space<vmem>>) attributes {dimension_semantics = [#tpu.dimension_semantics<parallel>, #tpu.dimension_semantics<arbitrary>], iteration_bounds = array<i64: 2, 1>, scalar_prefetch = 0 : i64, scratch_operands = 1 : i64, tpu.core_type = #tpu.core_type<tc>, window_params = [{transform_indices = @transform_0, window_bounds = array<i64: 1, 960, 320>}, {transform_indices = @transform_1, window_bounds = array<i64: 320, 128>}, {pipeline_mode = #tpu.pipeline_mode<synchronous>, transform_indices = @transform_2, window_bounds = array<i64: 24, 960>}, {pipeline_mode = #tpu.pipeline_mode<synchronous>, transform_indices = @transform_3, window_bounds = array<i64: 3, 128, 896>}, {pipeline_mode = #tpu.pipeline_mode<synchronous>, transform_indices = @transform_4, window_bounds = array<i64: 1, 896>}, {pipeline_mode = #tpu.pipeline_mode<synchronous>, transform_indices = @transform_5, window_bounds = array<i64: 1, 896>}, {transform_indices = @transform_6, window_bounds = array<i64: 1, 8, 896>}]} {
    %c0_i32 = arith.constant 0 : i32
    %0 = arith.cmpi eq, %arg1, %c0_i32 : i32
    %1 = arith.extui %0 : i1 to i32
    %c0_i32_0 = arith.constant 0 : i32
    %2 = arith.cmpi ne, %1, %c0_i32_0 : i32
    scf.if %2 {
      %cst_11 = arith.constant 0.000000e+00 : f32
      %13 = vector.broadcast %cst_11 : f32 to vector<960x128xf32>
      %c0_12 = arith.constant 0 : index
      %c0_13 = arith.constant 0 : index
      %14 = vector.load %arg9[%c0_12, %c0_13] : memref<960x128xf32, #tpu.memory_space<vmem>>, vector<960x128xf32>
      tpu.vector_store %arg9[%c0_12, %c0_13], %13 {strides = array<i32>} : memref<960x128xf32, #tpu.memory_space<vmem>>, vector<960x128xf32>,
    } else {
    }
    %c0 = arith.constant 0 : index
    %c0_1 = arith.constant 0 : index
    %3 = vector.load %arg9[%c0, %c0_1] : memref<960x128xf32, #tpu.memory_space<vmem>>, vector<960x128xf32>
    %c0_2 = arith.constant 0 : index
    %c0_3 = arith.constant 0 : index
    %c0_4 = arith.constant 0 : index
    %4 = vector.load %arg2[%c0_2, %c0_3, %c0_4] : memref<1x960x320xf32, #tpu.memory_space<vmem>>, vector<1x960x320xf32>
    %5 = vector.shape_cast %4 : vector<1x960x320xf32> to vector<960x320xf32>
    %c0_5 = arith.constant 0 : index
    %c0_6 = arith.constant 0 : index
    %6 = vector.load %arg3[%c0_5, %c0_6] : memref<320x128xf32, #tpu.memory_space<vmem>>, vector<320x128xf32>
    %cst = arith.constant dense<0.000000e+00> : vector<960x128xf32>
    %7 = tpu.matmul %5, %6, %cst {dimension_numbers = #tpu.dot_dimension_numbers<[1], [0], [0], [1], [0, 0, 1, 1], [], []>} : vector<960x320xf32>, vector<320x128xf32>, vector<960x128xf32> -> vector<960x128xf32>
    %8 = arith.addf %3, %7 : vector<960x128xf32>
    %c0_7 = arith.constant 0 : index
    %c0_8 = arith.constant 0 : index
    %9 = vector.load %arg9[%c0_7, %c0_8] : memref<960x128xf32, #tpu.memory_space<vmem>>, vector<960x128xf32>
    tpu.vector_store %arg9[%c0_7, %c0_8], %8 {strides = array<i32>} : memref<960x128xf32, #tpu.memory_space<vmem>>, vector<960x128xf32>,
    %c0_i32_9 = arith.constant 0 : i32
    %10 = arith.cmpi eq, %arg1, %c0_i32_9 : i32
    %11 = arith.extui %10 : i1 to i32
    %c0_i32_10 = arith.constant 0 : i32
    %12 = arith.cmpi ne, %11, %c0_i32_10 : i32
    scf.if %12 {
      %c0_11 = arith.constant 0 : index
      %c0_12 = arith.constant 0 : index
      %13 = vector.load %arg4[%c0_11, %c0_12] : memref<24x960xf32, #tpu.memory_space<vmem>>, vector<24x960xf32>
      %c0_13 = arith.constant 0 : index
      %c0_14 = arith.constant 0 : index
      %14 = vector.load %arg9[%c0_13, %c0_14] : memref<960x128xf32, #tpu.memory_space<vmem>>, vector<960x128xf32>
      %cst_15 = arith.constant dense<0.000000e+00> : vector<24x128xf32>
      %15 = tpu.matmul %13, %14, %cst_15 {dimension_numbers = #tpu.dot_dimension_numbers<[1], [0], [0], [1], [0, 0, 1, 1], [], []>} : vector<24x960xf32>, vector<960x128xf32>, vector<24x128xf32> -> vector<24x128xf32>
      %16 = arith.truncf %15 : vector<24x128xf32> to vector<24x128xbf16>
      %cst_16 = arith.constant 0.000000e+00 : f32
      %17 = vector.broadcast %cst_16 : f32 to vector<8x896xf32>
      %18 = vector.extract_strided_slice %16 {offsets = [0, 0], sizes = [8, 128], strides = [1, 1]} : vector<24x128xbf16> to vector<8x128xbf16>
      %c0_17 = arith.constant 0 : index
      %c0_18 = arith.constant 0 : index
      %c0_19 = arith.constant 0 : index
      %19 = vector.load %arg5[%c0_17, %c0_18, %c0_19] : memref<3x128x896xbf16, #tpu.memory_space<vmem>>, vector<1x128x896xbf16>
      %20 = vector.shape_cast %19 : vector<1x128x896xbf16> to vector<128x896xbf16>
      %cst_20 = arith.constant dense<0.000000e+00> : vector<8x896xf32>
      %21 = tpu.matmul %18, %20, %cst_20 {dimension_numbers = #tpu.dot_dimension_numbers<[1], [0], [0], [1], [0, 0, 1, 1], [], []>} : vector<8x128xbf16>, vector<128x896xbf16>, vector<8x896xf32> -> vector<8x896xf32>
      %22 = arith.addf %17, %21 : vector<8x896xf32>
      %23 = vector.extract_strided_slice %16 {offsets = [8, 0], sizes = [8, 128], strides = [1, 1]} : vector<24x128xbf16> to vector<8x128xbf16>
      %c1 = arith.constant 1 : index
      %c0_21 = arith.constant 0 : index
      %c0_22 = arith.constant 0 : index
      %24 = vector.load %arg5[%c1, %c0_21, %c0_22] : memref<3x128x896xbf16, #tpu.memory_space<vmem>>, vector<1x128x896xbf16>
      %25 = vector.shape_cast %24 : vector<1x128x896xbf16> to vector<128x896xbf16>
      %cst_23 = arith.constant dense<0.000000e+00> : vector<8x896xf32>
      %26 = tpu.matmul %23, %25, %cst_23 {dimension_numbers = #tpu.dot_dimension_numbers<[1], [0], [0], [1], [0, 0, 1, 1], [], []>} : vector<8x128xbf16>, vector<128x896xbf16>, vector<8x896xf32> -> vector<8x896xf32>
      %27 = arith.addf %22, %26 : vector<8x896xf32>
      %28 = vector.extract_strided_slice %16 {offsets = [16, 0], sizes = [8, 128], strides = [1, 1]} : vector<24x128xbf16> to vector<8x128xbf16>
      %c2 = arith.constant 2 : index
      %c0_24 = arith.constant 0 : index
      %c0_25 = arith.constant 0 : index
      %29 = vector.load %arg5[%c2, %c0_24, %c0_25] : memref<3x128x896xbf16, #tpu.memory_space<vmem>>, vector<1x128x896xbf16>
      %30 = vector.shape_cast %29 : vector<1x128x896xbf16> to vector<128x896xbf16>
      %cst_26 = arith.constant dense<0.000000e+00> : vector<8x896xf32>
      %31 = tpu.matmul %28, %30, %cst_26 {dimension_numbers = #tpu.dot_dimension_numbers<[1], [0], [0], [1], [0, 0, 1, 1], [], []>} : vector<8x128xbf16>, vector<128x896xbf16>, vector<8x896xf32> -> vector<8x896xf32>
      %32 = arith.addf %27, %31 : vector<8x896xf32>
      %c0_27 = arith.constant 0 : index
      %c0_28 = arith.constant 0 : index
      %33 = vector.load %arg6[%c0_27, %c0_28] : memref<1x896xf32, #tpu.memory_space<vmem>>, vector<1x896xf32>
      %34 = vector.broadcast %33 : vector<1x896xf32> to vector<8x896xf32>
      %35 = arith.addf %32, %34 : vector<8x896xf32>
      %c0_29 = arith.constant 0 : index
      %c0_30 = arith.constant 0 : index
      %36 = vector.load %arg7[%c0_29, %c0_30] : memref<1x896xf32, #tpu.memory_space<vmem>>, vector<1x896xf32>
      %cst_31 = arith.constant 0.000000e+00 : f32
      %37 = vector.broadcast %cst_31 : f32 to vector<8x896xf32>
      %38 = arith.cmpf ogt, %35, %37 : vector<8x896xf32>
      %39 = vector.broadcast %36 : vector<1x896xf32> to vector<8x896xf32>
      %40 = arith.mulf %39, %35 : vector<8x896xf32>
      %41 = arith.select %38, %35, %40 : vector<8x896xi1>, vector<8x896xf32>
      %42 = arith.truncf %41 : vector<8x896xf32> to vector<8x896xbf16>
      %c0_32 = arith.constant 0 : index
      %c0_33 = arith.constant 0 : index
      %c0_34 = arith.constant 0 : index
      %43 = vector.load %arg8[%c0_32, %c0_33, %c0_34] : memref<1x8x896xbf16, #tpu.memory_space<vmem>>, vector<1x8x896xbf16>
      %44 = vector.shape_cast %43 : vector<1x8x896xbf16> to vector<8x896xbf16>
      %45 = vector.shape_cast %42 : vector<8x896xbf16> to vector<1x8x896xbf16>
      tpu.vector_store %arg8[%c0_32, %c0_33, %c0_34], %45 {strides = array<i32>} : memref<1x8x896xbf16, #tpu.memory_space<vmem>>, vector<1x8x896xbf16>,
    } else {
    }
    return
  }
  func.func @transform_0(%arg0: i32, %arg1: i32) -> (i32, i32, i32) {
    %c0_i32 = arith.constant 0 : i32
    %0 = arith.addi %arg1, %c0_i32 : i32
    %c0_i32_0 = arith.constant 0 : i32
    %c0_i32_1 = arith.constant 0 : i32
    return %arg0, %c0_i32_0, %0 : i32, i32, i32
  }
  func.func @transform_1(%arg0: i32, %arg1: i32) -> (i32, i32) {
    %c0_i32 = arith.constant 0 : i32
    %c0_i32_0 = arith.constant 0 : i32
    return %arg1, %c0_i32 : i32, i32
  }
  func.func @transform_2(%arg0: i32, %arg1: i32) -> (i32, i32) {
    %c0_i32 = arith.constant 0 : i32
    %c0_i32_0 = arith.constant 0 : i32
    %c0_i32_1 = arith.constant 0 : i32
    return %c0_i32, %c0_i32_0 : i32, i32
  }
  func.func @transform_3(%arg0: i32, %arg1: i32) -> (i32, i32, i32) {
    %c0_i32 = arith.constant 0 : i32
    %c0_i32_0 = arith.constant 0 : i32
    %c0_i32_1 = arith.constant 0 : i32
    %c0_i32_2 = arith.constant 0 : i32
    return %c0_i32, %c0_i32_0, %c0_i32_1 : i32, i32, i32
  }
  func.func @transform_4(%arg0: i32, %arg1: i32) -> (i32, i32) {
    %c0_i32 = arith.constant 0 : i32
    %c0_i32_0 = arith.constant 0 : i32
    %c0_i32_1 = arith.constant 0 : i32
    return %c0_i32, %c0_i32_0 : i32, i32
  }
  func.func @transform_5(%arg0: i32, %arg1: i32) -> (i32, i32) {
    %c0_i32 = arith.constant 0 : i32
    %c0_i32_0 = arith.constant 0 : i32
    %c0_i32_1 = arith.constant 0 : i32
    return %c0_i32, %c0_i32_0 : i32, i32
  }
  func.func @transform_6(%arg0: i32, %arg1: i32) -> (i32, i32, i32) {
    %c0_i32 = arith.constant 0 : i32
    %c0_i32_0 = arith.constant 0 : i32
    %c0_i32_1 = arith.constant 0 : i32
    return %arg0, %c0_i32, %c0_i32_0 : i32, i32, i32
  }
}

module attributes {stable_mosaic.version = 11 : i64} {
  func.func @_head_loss_kernel(%arg0: i32, %arg1: memref<2x7168xbf16, #tpu.memory_space<vmem>>, %arg2: memref<7168x512xbf16, #tpu.memory_space<vmem>>, %arg3: memref<1x512xf32, #tpu.memory_space<vmem>>, %arg4: memref<1x512xf32, #tpu.memory_space<vmem>>, %arg5: memref<1x512xf32, #tpu.memory_space<vmem>>, %arg6: memref<2x512xf32, #tpu.memory_space<vmem>>, %arg7: memref<2x512xf32, #tpu.memory_space<vmem>>, %arg8: memref<2x1xf32, #tpu.memory_space<vmem>>) attributes {dimension_semantics = [#tpu.dimension_semantics<arbitrary>], iteration_bounds = array<i64: 1>, scalar_prefetch = 0 : i64, scratch_operands = 0 : i64, tpu.core_type = #tpu.core_type<tc>, window_params = [{pipeline_mode = #tpu.pipeline_mode<synchronous>, transform_indices = @transform_0, window_bounds = array<i64: 2, 7168>}, {pipeline_mode = #tpu.pipeline_mode<synchronous>, transform_indices = @transform_1, window_bounds = array<i64: 7168, 512>}, {pipeline_mode = #tpu.pipeline_mode<synchronous>, transform_indices = @transform_2, window_bounds = array<i64: 1, 512>}, {pipeline_mode = #tpu.pipeline_mode<synchronous>, transform_indices = @transform_3, window_bounds = array<i64: 1, 512>}, {pipeline_mode = #tpu.pipeline_mode<synchronous>, transform_indices = @transform_4, window_bounds = array<i64: 1, 512>}, {pipeline_mode = #tpu.pipeline_mode<synchronous>, transform_indices = @transform_5, window_bounds = array<i64: 2, 512>}, {pipeline_mode = #tpu.pipeline_mode<synchronous>, transform_indices = @transform_6, window_bounds = array<i64: 2, 512>}, {pipeline_mode = #tpu.pipeline_mode<synchronous>, transform_indices = @transform_7, window_bounds = array<i64: 2, 1>}]} {
    %c0 = arith.constant 0 : index
    %c0_0 = arith.constant 0 : index
    %0 = vector.load %arg1[%c0, %c0_0] : memref<2x7168xbf16, #tpu.memory_space<vmem>>, vector<2x7168xbf16>
    %c0_1 = arith.constant 0 : index
    %c0_2 = arith.constant 0 : index
    %1 = vector.load %arg2[%c0_1, %c0_2] : memref<7168x512xbf16, #tpu.memory_space<vmem>>, vector<7168x512xbf16>
    %cst = arith.constant dense<0.000000e+00> : vector<2x512xf32>
    %2 = tpu.matmul %0, %1, %cst {dimension_numbers = #tpu.dot_dimension_numbers<[1], [0], [0], [1], [0, 0, 1, 1], [], []>} : vector<2x7168xbf16>, vector<7168x512xbf16>, vector<2x512xf32> -> vector<2x512xf32>
    %c0_3 = arith.constant 0 : index
    %c0_4 = arith.constant 0 : index
    %3 = vector.load %arg3[%c0_3, %c0_4] : memref<1x512xf32, #tpu.memory_space<vmem>>, vector<1x512xf32>
    %4 = vector.broadcast %3 : vector<1x512xf32> to vector<2x512xf32>
    %5 = arith.addf %2, %4 : vector<2x512xf32>
    %c0_5 = arith.constant 0 : index
    %c0_6 = arith.constant 0 : index
    %6 = vector.load %arg4[%c0_5, %c0_6] : memref<1x512xf32, #tpu.memory_space<vmem>>, vector<1x512xf32>
    %7 = vector.broadcast %6 : vector<1x512xf32> to vector<2x512xf32>
    %8 = arith.mulf %5, %7 : vector<2x512xf32>
    %c0_7 = arith.constant 0 : index
    %c0_8 = arith.constant 0 : index
    %9 = vector.load %arg5[%c0_7, %c0_8] : memref<1x512xf32, #tpu.memory_space<vmem>>, vector<1x512xf32>
    %10 = vector.broadcast %9 : vector<1x512xf32> to vector<2x512xf32>
    %11 = arith.addf %8, %10 : vector<2x512xf32>
    %12 = arith.mulf %11, %11 : vector<2x512xf32>
    %cst_9 = arith.constant dense<0.000000e+00> : vector<2xf32>
    %13 = vector.multi_reduction <add>, %12, %cst_9 [1] : vector<2x512xf32> to vector<2xf32>
    %14 = vector.shape_cast %13 : vector<2xf32> to vector<2x1xf32>
    %cst_10 = arith.constant 1.000000e-24 : f32
    %15 = vector.broadcast %cst_10 : f32 to vector<2x1xf32>
    %16 = arith.maximumf %14, %15 : vector<2x1xf32>
    %17 = math.rsqrt %16 : vector<2x1xf32>
    %18 = vector.broadcast %17 : vector<2x1xf32> to vector<2x512xf32>
    %19 = arith.mulf %11, %18 : vector<2x512xf32>
    %c0_11 = arith.constant 0 : index
    %c0_12 = arith.constant 0 : index
    %20 = vector.load %arg7[%c0_11, %c0_12] : memref<2x512xf32, #tpu.memory_space<vmem>>, vector<2x512xf32>
    tpu.vector_store %arg7[%c0_11, %c0_12], %19 {strides = array<i32>} : memref<2x512xf32, #tpu.memory_space<vmem>>, vector<2x512xf32>,
    %c0_13 = arith.constant 0 : index
    %c0_14 = arith.constant 0 : index
    %21 = vector.load %arg6[%c0_13, %c0_14] : memref<2x512xf32, #tpu.memory_space<vmem>>, vector<2x512xf32>
    %22 = arith.mulf %19, %21 : vector<2x512xf32>
    %cst_15 = arith.constant dense<0.000000e+00> : vector<2xf32>
    %23 = vector.multi_reduction <add>, %22, %cst_15 [1] : vector<2x512xf32> to vector<2xf32>
    %24 = vector.shape_cast %23 : vector<2xf32> to vector<2x1xf32>
    %cst_16 = arith.constant 1.000000e+00 : f32
    %25 = vector.broadcast %cst_16 : f32 to vector<2x1xf32>
    %26 = arith.subf %25, %24 : vector<2x1xf32>
    %c0_17 = arith.constant 0 : index
    %c0_18 = arith.constant 0 : index
    %27 = vector.load %arg8[%c0_17, %c0_18] : memref<2x1xf32, #tpu.memory_space<vmem>>, vector<2x1xf32>
    tpu.vector_store %arg8[%c0_17, %c0_18], %26 {strides = array<i32>} : memref<2x1xf32, #tpu.memory_space<vmem>>, vector<2x1xf32>,
    return
  }
  func.func @transform_0(%arg0: i32) -> (i32, i32) {
    %c0_i32 = arith.constant 0 : i32
    %c0_i32_0 = arith.constant 0 : i32
    %c0_i32_1 = arith.constant 0 : i32
    return %c0_i32, %c0_i32_0 : i32, i32
  }
  func.func @transform_1(%arg0: i32) -> (i32, i32) {
    %c0_i32 = arith.constant 0 : i32
    %c0_i32_0 = arith.constant 0 : i32
    %c0_i32_1 = arith.constant 0 : i32
    return %c0_i32, %c0_i32_0 : i32, i32
  }
  func.func @transform_2(%arg0: i32) -> (i32, i32) {
    %c0_i32 = arith.constant 0 : i32
    %c0_i32_0 = arith.constant 0 : i32
    %c0_i32_1 = arith.constant 0 : i32
    return %c0_i32, %c0_i32_0 : i32, i32
  }
  func.func @transform_3(%arg0: i32) -> (i32, i32) {
    %c0_i32 = arith.constant 0 : i32
    %c0_i32_0 = arith.constant 0 : i32
    %c0_i32_1 = arith.constant 0 : i32
    return %c0_i32, %c0_i32_0 : i32, i32
  }
  func.func @transform_4(%arg0: i32) -> (i32, i32) {
    %c0_i32 = arith.constant 0 : i32
    %c0_i32_0 = arith.constant 0 : i32
    %c0_i32_1 = arith.constant 0 : i32
    return %c0_i32, %c0_i32_0 : i32, i32
  }
  func.func @transform_5(%arg0: i32) -> (i32, i32) {
    %c0_i32 = arith.constant 0 : i32
    %c0_i32_0 = arith.constant 0 : i32
    %c0_i32_1 = arith.constant 0 : i32
    return %c0_i32, %c0_i32_0 : i32, i32
  }
  func.func @transform_6(%arg0: i32) -> (i32, i32) {
    %c0_i32 = arith.constant 0 : i32
    %c0_i32_0 = arith.constant 0 : i32
    %c0_i32_1 = arith.constant 0 : i32
    return %c0_i32, %c0_i32_0 : i32, i32
  }
  func.func @transform_7(%arg0: i32) -> (i32, i32) {
    %c0_i32 = arith.constant 0 : i32
    %c0_i32_0 = arith.constant 0 : i32
    %c0_i32_1 = arith.constant 0 : i32
    return %c0_i32, %c0_i32_0 : i32, i32
  }
}

</mosaic_0001>

<bundles_post_ra>
// kernel: core.2
= control target key start
LH: loop header
LB: loop body
LE: loop exit
PB: predicated region body
PF: predicated region fallthrough
CT: control target
= control target key end

     0   :  { %11 = vsyncpa [#allocation4], 0  ;;  %s8771_s0 = inlined_call_operand.hbm [shape: f32[2,960,320], index: 0, kind: input, shape index: {}]   ;;  %s8772_s1 = inlined_call_operand.hbm [shape: f32[320,128], index: 1, kind: input, shape index: {}]   ;;  %s8773_s2 = inlined_call_operand.hbm [shape: f32[24,960], index: 2, kind: input, shape index: {}]   ;;  %s8774_s3 = inlined_call_operand.vmem [shape: bf16[3,128,896], index: 3, kind: input, shape index: {}]   ;;  %s8775_s4 = inlined_call_operand.vmem [shape: f32[1,896], index: 4, kind: input, shape index: {}]   ;;  %s8776_s5 = inlined_call_operand.vmem [shape: f32[1,896], index: 5, kind: input, shape index: {}]   ;;  %s8777_s6 = inlined_call_operand.vmem [shape: bf16[2,8,896], index: 6, kind: output, shape index: {}]  }
   0x1   :  { %13 = vsyncpa [#allocation4 + $0x1], 0 }
   0x2   :  { %14 = vsyncpa [#allocation6], 0  ;;  %s6862_s21 = smov 0   ;;  %s6864_s22 = smov 0  }
   0x3   :  { %s6866_s23 = smov 0   ;;  %s6868_s24 = smov 0  }
   0x4   :  { %s6870_s25 = smov 0   ;;  %s6872_s26 = smov 0  }
   0x5 LB: > { %s5172_s27 = sadd.s32 4294967295, %s6812_s26   ;;  %p54_p0 = scmp.ne.s32.totalorder %s6796_s22, %s6792_s21  ;;  %s6812_s26 = sphi %s6872_s26, %s20_s26   ;;  %s6808_s25 = sphi %s6870_s25, %s8819_s25   ;;  %s6804_s24 = sphi %s6868_s24, %s8818_s24   ;;  %s6800_s23 = sphi %s6866_s23, %s8817_s23   ;;  %s6796_s22 = sphi %s6864_s22, %s8816_s22   ;;  %s6792_s21 = sphi %s6862_s21, %s8815_s21  }
   0x6   : > { %p6892_p1 = scmp.eq.s32.totalorder %s5172_s27, 0  ;;  %p5174_p2 = scmp.ge.s32.totalorder %s6812_s26, 1 }
   0x7   : > { %p201_p3 = scmp.lt.s32.totalorder %s6812_s26, 3  ;;  %s6814_s7 = smov [#allocation5]  }
   0x8   : > { %s8784_s28 = scalar_select %p6892_p1, 1, 0 }
   0x9   : > { %p6900_p4 = por %p6892_p1, %p54_p0  ;;  %p6904_p5 = pnand %p5174_p2, %p201_p3 }
   0xa   : > { %s216_s8 = sshll.u32 %s6814_s7, 4  ;;  %s6815_s10 = smov [#allocation7]   ;;  %s217_s8 = int_to_ptr.vmem [resolvable:$true] %s216_s8 }
   0xb   : > { %s8785_s29 = scalar_select %p6900_p4, 1, 0 }
   0xc   : > { %s8786_s30 = scalar_select %p6904_p5, 1, 0 }
   0xd   : > { %p6356_p6 = pneg %p6904_p5  ;;  %s229_s11 = sshll.u32 %s6815_s10, 4  ;;  %s6916_s11 = int_to_ptr.vmem [resolvable:$true] %s229_s11 }
   0xe   : > { %s6672_s14 = scalar_lea.hbm %s8772_s1, 5120 }
   0xf   : > { %p6912_p7 = pnand %p6356_p6, %p6892_p1  ;;  %p6673_p8 = scmp.ne.s32.totalorder %s8772_s1, %s6672_s14 }
  0x10   : > { %p6679_p12 = scmp.lt.u32.totalorder %s6672_s14, %s8772_s1 }
  0x11   : > { %p6674_p9 = pneg %p6912_p7 }
  0x13   : > { %p6675_p10 = pnand %p6674_p9, %p6673_p8 }
  0x15   : > { %p6676_p11 = pneg %p6675_p10 }
  0x17   : > { %p6681_p13 = pnand %p6679_p12, %p6676_p11 }
  0x19   : > { %6684 = shalt.err (!%p6681_p13)
}
  0x1a   : > { %s6685_s19 = scalar_lea.vmem %s217_s8, 5120  ;;  %p6693_p6 = scmp.lt.s32.totalorder %s217_s8, %s217_s8 }
  0x1b   : > { %p6686_p0 = scmp.ne.s32.totalorder %s217_s8, %s6685_s19  ;;  %p6694_p1 = scmp.lt.s32.totalorder %s6685_s19, %s6685_s19 }
  0x1d   : > { %p6688_p2 = pnand %p6686_p0, %p6674_p9  ;;  %p6695_p4 = por %p6694_p1, %p6693_p6 }
  0x1f   : > { %p6689_p3 = pneg %p6688_p2 }
  0x21   : > { %p6696_p5 = pnand %p6695_p4, %p6689_p3 }
  0x23   : > { %6699 = shalt.err (!%p6696_p5)
}
  0x24   : > { %s6816_s20 = smov 128   ;;  %s6817_s21 = smov 8  }
  0x25   : > { %6359 = dma.hbm_to_vmem [thread:$0]  (!%p6912_p7), %s8772_s1, 5120, %s217_s8, [#allocation6], %s6816_s20, %s6816_s20, %s6817_s21  }
  0x26   : > { %s6700_s13 = scalar_lea.hbm %s8773_s2, 3072 }
  0x27   : > { %p6701_p8 = scmp.ne.s32.totalorder %s8773_s2, %s6700_s13  ;;  %p6707_p5 = scmp.lt.u32.totalorder %s6700_s13, %s8773_s2 }
  0x29   : > { %p6703_p1 = pnand %p6701_p8, %p6674_p9 }
  0x2b   : > { %p6704_p4 = pneg %p6703_p1 }
  0x2d   : > { %p6709_p10 = pnand %p6707_p5, %p6704_p4 }
  0x2f   : > { %6712 = shalt.err (!%p6709_p10)
}
  0x30   : > { %s6713_s8 = scalar_lea.vmem %s6916_s11, 3072  ;;  %p6721_p0 = scmp.lt.s32.totalorder %s6916_s11, %s6916_s11 }
  0x31   : > { %p6714_p11 = scmp.ne.s32.totalorder %s6916_s11, %s6713_s8  ;;  %p6722_p2 = scmp.lt.s32.totalorder %s6713_s8, %s6713_s8 }
  0x33   : > { %p6716_p12 = pnand %p6714_p11, %p6674_p9  ;;  %p6723_p3 = por %p6722_p2, %p6721_p0 }
  0x35   : > { %p6717_p13 = pneg %p6716_p12 }
  0x37   : > { %p6724_p6 = pnand %p6723_p3, %p6717_p13 }
  0x39   : > { %6727 = shalt.err (!%p6724_p6)
}
  0x3a   : > { %s6818_s18 = smov 1024   ;;  %s6819_s19 = smov 64  }
  0x3b   : > { %6362 = dma.hbm_to_vmem [thread:$0]  (!%p6912_p7), %s8773_s2, 3072, %s6916_s11, [#allocation6], %s6818_s18, %s6818_s18, %s6819_s19  }
  0x3c   : > { %s32_s27 = sadd.s32 1, %s6808_s25  ;;  %s41_s7 = sadd.s32 1, %s6800_s23 }
  0x3d   : > { %p34_p9 = scmp.ge.s32.totalorder %s32_s27, 2  ;;  %p48_p8 = scmp.ne.s32.totalorder %s6800_s23, %s6796_s22 }
  0x3e   : > { %p49_p1 = scmp.eq.s32.totalorder %s6812_s26, 0  ;;  %p6369_p4 = scmp.lt.s32.totalorder %s6812_s26, 2 }
  0x3f   : > { %s8821_s27 = smov (%p34_p9, %s32_s27), 0  ;;  %s252_s10 = sand.u32 1, %s6800_s23  }
  0x40   : > { %p50_p5 = por %p49_p1, %p48_p8  ;;  %s36_s12 = ssub.s32 %s6808_s25, %s8821_s27 }
  0x41   : > { %p39_p10 = scmp.eq.s32.totalorder %s36_s12, 0  ;;  %s6342_s13 = smul.u32 2880, %s252_s10 }
  0x42   : > { %s6343_s9 = smul.u32 46080, %s6808_s25  ;;  %p6977_p11 = pnand %p6369_p4, %p50_p5 }
  0x43   : > { %s6982_s11 = scalar_select %p39_p10, %s6800_s23, %s41_s7  }
  0x44   : > { %s6987_s17 = scalar_lea.hbm %s8771_s0, %s6343_s9  ;;  %s256_s8 = scalar_lea.vmem [#allocation3], %s6342_s13 }
  0x45   : > { %s265_s18 = sshll.u32 %s256_s8, 4  ;;  %s6991_s19 = scalar_lea.sflag [#allocation4], %s252_s10  ;;  %s6989_s18 = int_to_ptr.vmem [resolvable:$true] %s265_s18 }
  0x46   : > { %s6728_s20 = scalar_lea.hbm %s6987_s17, 46080  ;;  %p6730_p12 = pneg %p6977_p11 }
  0x47   : > { %p6729_p7 = scmp.ne.s32.totalorder %s6987_s17, %s6728_s20  ;;  %s6733_s12 = scalar_lea.hbm %s8771_s0, 92160 }
  0x48   : > { %p6734_p2 = scmp.lt.u32.totalorder %s6987_s17, %s8771_s0  ;;  %p6735_p3 = scmp.lt.u32.totalorder %s6733_s12, %s6728_s20 }
  0x49   : > { %p6731_p13 = pnand %p6730_p12, %p6729_p7  ;;  %p6737_p9 = scmp.lt.u32.totalorder %s6728_s20, %s6987_s17 }
  0x4a   : > { %p6736_p6 = por %p6735_p3, %p6734_p2 }
  0x4b   : > { %p6732_p0 = pneg %p6731_p13 }
  0x4c   : > { %p6738_p8 = por %p6737_p9, %p6736_p6 }
  0x4e   : > { %p6739_p1 = pnand %p6738_p8, %p6732_p0 }
  0x50   : > { %6742 = shalt.err (!%p6739_p1)
}
  0x51   : > { %s6743_s10 = scalar_lea.vmem %s6989_s18, 46080  ;;  %s6820_s13 = smov [#allocation3]  }
  0x52   : > { %p6744_p4 = scmp.ne.s32.totalorder %s6989_s18, %s6743_s10  ;;  %s6748_s16 = sshll.u32 %s6820_s13, 4  ;;  %s6749_s16 = int_to_ptr.vmem [resolvable:$false] %s6748_s16 }
  0x53   : > { %s6750_s8 = scalar_lea.vmem %s6749_s16, 92160  ;;  %p6751_p7 = scmp.lt.s32.totalorder %s6989_s18, %s6749_s16 }
  0x54   : > { %p6746_p5 = pnand %p6744_p4, %p6730_p12  ;;  %p6752_p13 = scmp.lt.s32.totalorder %s6750_s8, %s6743_s10 }
  0x56   : > { %p6747_p10 = pneg %p6746_p5  ;;  %p6753_p2 = por %p6752_p13, %p6751_p7 }
  0x58   : > { %p6754_p3 = pnand %p6753_p2, %p6747_p10 }
  0x5a   : > { %6757 = shalt.err (!%p6754_p3)
}
  0x5b   : > { %s6821_s20 = smov 384   ;;  %s6822_s21 = smov 24  }
  0x5c   : > { %6366 = dma.hbm_to_vmem [thread:$0]  (!%p6977_p11), %s6987_s17, 46080, %s6989_s18, %s6991_s19, %s6821_s20, %s6821_s20, %s6822_s21  }
  0x5d   : > { %p8789_p12 = scmp.ne.s32.totalorder %s8786_s30, 0 }
  0x5e   : > { %s279_s7 = sand.u32 (!%p8789_p12), 1, %s6796_s22   ;;  %p8790_p0 = scmp.ne.s32.totalorder (!%p8789_p12), %s8785_s29, 0 }
  0x5f   : > { %277 = sbr.rel (%p8789_p12) target bundleno = 1536 (0x600), region = 44  ;;  %s280_s9 = scalar_lea.sflag (!%p8789_p12), [#allocation4], %s279_s7 }
  0x60   : > { %s6344_s12 = smul.u32 (!%p8789_p12), 2880, %s279_s7 }
  0x62   : > { %s7022_s15 = scalar_lea.vmem (!%p8789_p12), [#allocation3], %s6344_s12 }
  0x66   : > { %6783 = dma.done.wait (%p8790_p0), %s280_s9, 46080  }
  0x67   : > { %6785 = vsyncadd (%p8790_p0), %s280_s9, 4294921216  ;;  %p8791_p6 = scmp.ne.s32.totalorder %s8784_s28, 0 }
  0x69   : > { %6787 = dma.done.wait (%p8791_p6), [#allocation6], 8192  }
  0x6a   : > { %6789 = vsyncadd (%p8791_p6), [#allocation6], 4294959104  ;;  %v8782_v0 = vmov 0.0|0.0   ;;  %v932_v1 = vld [vmem:[#allocation5] sm:$0xff]  ;;  %v933_v2 = vld [vmem:[#allocation5 + $0x8] sm:$0xff]  ;;  %vm972_vm0 = vcmask 523264  }
  0x6b   : > { %6146 = vmatprep.subr.bf16.mxu0 %v8782_v0  ;;  %v934_v3 = vld [vmem:[#allocation5 + $0x10] sm:$0xff]  ;;  %v6147_v4 = vpack.c.bf16 %v933_v2, %v932_v1  ;;  %v935_v5 = vld [vmem:[#allocation5 + $0x18] sm:$0xff]  ;;  %v936_v7 = vld [vmem:[#allocation5 + $0x20] sm:$0xff]  ;;  %vm6826_vm1 = vmmov 0   ;;  %p322_p11 = scmp.lt.s32.totalorder %s6804_s24, 1 }
  0x6c   : > { %v6150_v6 = vpack.c.bf16 %v935_v5, %v934_v3  ;;  %v937_v8 = vld [vmem:[#allocation5 + $0x28] sm:$0xff]  ;;  %v938_v10 = vld [vmem:[#allocation5 + $0x30] sm:$0xff]  ;;  %v939_v11 = vld [vmem:[#allocation5 + $0x38] sm:$0xff] }
  0x6d   : > { %6148 = vmatpush1.bf16.msra.mxu0 %v6147_v4  ;;  %v6153_v9 = vpack.c.bf16 %v937_v8, %v936_v7  ;;  %v964_v12 = vld [vmem:[#allocation5 + $0x100] sm:$0xff]  ;;  %v965_v13 = vld [vmem:[#allocation5 + $0x108] sm:$0xff]  ;;  %v966_v15 = vld [vmem:[#allocation5 + $0x110] sm:$0xff]  ;;  %v6156_v19 = vpack.c.bf16 %v939_v11, %v938_v10  ;;  %s8823_s24 = smov (!%p322_p11, %s6804_s24), 1 }
  0x6e   : > { %6149 = vmatprep.subr.bf16.mxu0 %v8782_v0  ;;  %v6194_v14 = vpack.c.bf16 %v965_v13, %v964_v12  ;;  %v967_v16 = vld [vmem:[#allocation5 + $0x118] sm:$0xff]  ;;  %v968_v18 = vld [vmem:[#allocation5 + $0x120] sm:$0xff]  ;;  %v969_v20 = vld [vmem:[#allocation5 + $0x128] sm:$0xff]  ;;  %s6345_s28 = smul.u32 28, %s8823_s24 }
  0x6f   : > { %v6198_v17 = vpack.c.bf16 %v967_v16, %v966_v15  ;;  %v940_v21 = vld [vmem:[#allocation5 + $0x40] sm:$0xff]  ;;  %v941_v22 = vld [vmem:[#allocation5 + $0x48] sm:$0xff]  ;;  %v6202_v23 = vpack.c.bf16 %v969_v20, %v968_v18  ;;  %v574_v24 = vld [vmem:[%s7022_s15 + $0x10] sm:$0xff] }
  0x70   : > { %6195 = vmatprep.subr.bf16.mxu1 %v6194_v14  ;;  %v573_v25 = vld [vmem:[%s7022_s15 + $0x8] sm:$0xff]  ;;  %v970_v26 = vld [vmem:[#allocation5 + $0x130] sm:$0xff]  ;;  %v971_v27 = vld [vmem:[#allocation5 + $0x138] sm:$0xff]  ;;  %5906 = vmatprep.mubr.msk.f32.mxu1 %vm972_vm0, %v574_v24  ;;  %v6159_v28 = vpack.c.bf16 %v941_v22, %v940_v21  ;;  %s8730_s14 = scalar_lea.vmem %s8777_s6, %s6345_s28 }
  0x71   : > { %6151 = vmatpush1.bf16.msra.mxu0 %v6150_v6  ;;  %6197 = vmatpush3.bf16.msra.mxu1 %v6194_v14  ;;  %v942_v29 = vld [vmem:[#allocation5 + $0x50] sm:$0xff]  ;;  %v943_v30 = vld [vmem:[#allocation5 + $0x58] sm:$0xff]  ;;  %v6206_v31 = vpack.c.bf16 %v971_v27, %v970_v26  ;;  %v944_v33 = vld [vmem:[#allocation5 + $0x60] sm:$0xff] }
  0x72   : > { %6152 = vmatprep.subr.bf16.mxu0 %v8782_v0  ;;  %6199 = vmatprep.subr.bf16.mxu1 %v6198_v17  ;;  %v6162_v32 = vpack.c.bf16 %v943_v30, %v942_v29  ;;  %v945_v34 = vld [vmem:[#allocation5 + $0x68] sm:$0xff]  ;;  %v946_v36 = vld [vmem:[#allocation5 + $0x70] sm:$0xff]  ;;  %v947_v37 = vld [vmem:[#allocation5 + $0x78] sm:$0xff] }
  0x73   : > { %1397 = vmatprep.mubr.f32.mxu0 %v573_v25  ;;  %v6165_v35 = vpack.c.bf16 %v945_v34, %v944_v33  ;;  %v577_v38 = vld [vmem:[%s7022_s15 + $0x28] sm:$0xff]  ;;  %v580_v39 = vld [vmem:[%s7022_s15 + $0x40] sm:$0xff]  ;;  %v6168_v40 = vpack.c.bf16 %v947_v37, %v946_v36  ;;  %v583_v43 = vld [vmem:[%s7022_s15 + $0x58] sm:$0xff] }
  0x74   : > { %v948_v41 = vld [vmem:[#allocation5 + $0x80] sm:$0xff]  ;;  %v949_v42 = vld [vmem:[#allocation5 + $0x88] sm:$0xff]  ;;  %v586_v44 = vld [vmem:[%s7022_s15 + $0x70] sm:$0xff] }
  0x75   : > { %6154 = vmatpush1.bf16.msra.mxu0 %v6153_v9  ;;  %6201 = vmatpush3.bf16.msra.mxu1 %v6198_v17  ;;  %v6171_v45 = vpack.c.bf16 %v949_v42, %v948_v41  ;;  %v950_v46 = vld [vmem:[#allocation5 + $0x90] sm:$0xff]  ;;  %v951_v47 = vld [vmem:[#allocation5 + $0x98] sm:$0xff]  ;;  %v589_v48 = vld [vmem:[%s7022_s15 + $0x88] sm:$0xff] }
  0x76   : > { %6155 = vmatprep.subr.bf16.mxu0 %v8782_v0  ;;  %6203 = vmatprep.subr.bf16.mxu1 %v6202_v23  ;;  %v592_v49 = vld [vmem:[%s7022_s15 + $0xa0] sm:$0xff]  ;;  %v6174_v50 = vpack.c.bf16 %v951_v47, %v950_v46  ;;  %v953_v52 = vld [vmem:[#allocation5 + $0xa8] sm:$0xff]  ;;  %v595_v53 = vld [vmem:[%s7022_s15 + $0xb8] sm:$0xff] }
  0x77   : > { %v952_v51 = vld [vmem:[#allocation5 + $0xa0] sm:$0xff]  ;;  %v598_v54 = vld [vmem:[%s7022_s15 + $0xd0] sm:$0xff]  ;;  %v955_v57 = vld [vmem:[#allocation5 + $0xb8] sm:$0xff] }
  0x78   : > { %v6177_v55 = vpack.c.bf16 %v953_v52, %v952_v51  ;;  %v954_v56 = vld [vmem:[#allocation5 + $0xb0] sm:$0xff]  ;;  %v601_v58 = vld [vmem:[%s7022_s15 + $0xe8] sm:$0xff]  ;;  %v604_v59 = vld [vmem:[%s7022_s15 + $0x100] sm:$0xff] }
  0x79   : > { %6157 = vmatpush1.bf16.msra.mxu0 %v6156_v19  ;;  %6205 = vmatpush3.bf16.msra.mxu1 %v6202_v23  ;;  %v956_v60 = vld [vmem:[#allocation5 + $0xc0] sm:$0xff]  ;;  %v957_v61 = vld [vmem:[#allocation5 + $0xc8] sm:$0xff]  ;;  %v607_v62 = vld [vmem:[%s7022_s15 + $0x118] sm:$0xff]  ;;  %v6180_v63 = vpack.c.bf16 %v955_v57, %v954_v56 }
  0x7a   : > { %6158 = vmatprep.subr.bf16.mxu0 %v8782_v0  ;;  %6207 = vmatprep.subr.bf16.mxu1 %v6206_v31  ;;  %v610_v1 = vld [vmem:[%s7022_s15 + $0x130] sm:$0xff]  ;;  %v959_v3 = vld [vmem:[#allocation5 + $0xd8] sm:$0xff]  ;;  %v6183_v4 = vpack.c.bf16 %v957_v61, %v956_v60  ;;  %v613_v5 = vld [vmem:[%s7022_s15 + $0x148] sm:$0xff] }
  0x7b   : > { %v958_v2 = vld [vmem:[#allocation5 + $0xd0] sm:$0xff]  ;;  %v616_v6 = vld [vmem:[%s7022_s15 + $0x160] sm:$0xff]  ;;  %v961_v8 = vld [vmem:[#allocation5 + $0xe8] sm:$0xff] }
  0x7c   : > { %v960_v7 = vld [vmem:[#allocation5 + $0xe0] sm:$0xff]  ;;  %v619_v9 = vld [vmem:[%s7022_s15 + $0x178] sm:$0xff]  ;;  %v6186_v10 = vpack.c.bf16 %v959_v3, %v958_v2  ;;  %v622_v11 = vld [vmem:[%s7022_s15 + $0x190] sm:$0xff] }
  0x7d   : > { %6160 = vmatpush1.bf16.msra.mxu0 %v6159_v28  ;;  %6209 = vmatpush3.bf16.msra.mxu1 %v6206_v31  ;;  %v962_v12 = vld [vmem:[#allocation5 + $0xf0] sm:$0xff]  ;;  %v963_v13 = vld [vmem:[#allocation5 + $0xf8] sm:$0xff]  ;;  %v6189_v14 = vpack.c.bf16 %v961_v8, %v960_v7  ;;  %v625_v15 = vld [vmem:[%s7022_s15 + $0x1a8] sm:$0xff] }
  0x7e   : > { %6161 = vmatprep.subr.bf16.mxu0 %v8782_v0  ;;  %v628_v16 = vld [vmem:[%s7022_s15 + $0x1c0] sm:$0xff]  ;;  %v631_v17 = vld [vmem:[%s7022_s15 + $0x1d8] sm:$0xff]  ;;  %v6192_v18 = vpack.c.bf16 %v963_v13, %v962_v12  ;;  %v634_v19 = vld [vmem:[%s7022_s15 + $0x1f0] sm:$0xff] }
  0x7f   : > { %v572_v20 = vld [vmem:[%s7022_s15] sm:$0xff]  ;;  %v637_v22 = vld [vmem:[%s7022_s15 + $0x208] sm:$0xff]  ;;  %v575_v24 = vld [vmem:[%s7022_s15 + $0x18] sm:$0xff] }
  0x80   : > { %5907 = vmatmul.mubr.msk.f32.vlgmr.msra.gmra.mrb[0].mxu1 %vm972_vm0, %v577_v38  ;;  %v576_v21 = vld [vmem:[%s7022_s15 + $0x20] sm:$0xff]  ;;  %v579_v25 = vld [vmem:[%s7022_s15 + $0x38] sm:$0xff]  ;;  %v646_v27 = vld [vmem:[%s7022_s15 + $0x250] sm:$0xff] }
  0x81   : > { %6163 = vmatpush1.bf16.msra.mxu0 %v6162_v32  ;;  %5909 = vmatprep.mubr.msk.f32.mxu1 %vm972_vm0, %v580_v39  ;;  %v640_v23 = vld [vmem:[%s7022_s15 + $0x220] sm:$0xff]  ;;  %v643_v26 = vld [vmem:[%s7022_s15 + $0x238] sm:$0xff]  ;;  %v578_v28 = vld [vmem:[%s7022_s15 + $0x30] sm:$0xff] }
  0x82   : > { %6164 = vmatprep.subr.bf16.mxu0 %v8782_v0  ;;  %v582_v29 = vld [vmem:[%s7022_s15 + $0x50] sm:$0xff]  ;;  %v649_v30 = vld [vmem:[%s7022_s15 + $0x268] sm:$0xff]  ;;  %v652_v31 = vld [vmem:[%s7022_s15 + $0x280] sm:$0xff] }
  0x83   : > { %v581_v32 = vld [vmem:[%s7022_s15 + $0x48] sm:$0xff]  ;;  %v655_v34 = vld [vmem:[%s7022_s15 + $0x298] sm:$0xff]  ;;  %v584_v36 = vld [vmem:[%s7022_s15 + $0x60] sm:$0xff] }
  0x84   : > { %5910 = vmatmul.mubr.msk.f32.gmra.mrb[2].mxu1 %vm972_vm0, %v583_v43  ;;  %v585_v33 = vld [vmem:[%s7022_s15 + $0x68] sm:$0xff]  ;;  %v588_v37 = vld [vmem:[%s7022_s15 + $0x80] sm:$0xff]  ;;  %v591_v41 = vld [vmem:[%s7022_s15 + $0x98] sm:$0xff] }
  0x85   : > { %6166 = vmatpush1.bf16.msra.mxu0 %v6165_v35  ;;  %5912 = vmatprep.mubr.msk.f32.mxu1 %vm972_vm0, %v586_v44  ;;  %v658_v35 = vld [vmem:[%s7022_s15 + $0x2b0] sm:$0xff]  ;;  %v661_v38 = vld [vmem:[%s7022_s15 + $0x2c8] sm:$0xff]  ;;  %v664_v39 = vld [vmem:[%s7022_s15 + $0x2e0] sm:$0xff] }
  0x86   : > { %6167 = vmatprep.subr.bf16.mxu0 %v8782_v0  ;;  %v667_v42 = vld [vmem:[%s7022_s15 + $0x2f8] sm:$0xff]  ;;  %v670_v43 = vld [vmem:[%s7022_s15 + $0x310] sm:$0xff]  ;;  %v673_v46 = vld [vmem:[%s7022_s15 + $0x328] sm:$0xff] }
  0x87   : > { %v590_v44 = vld [vmem:[%s7022_s15 + $0x90] sm:$0xff]  ;;  %v676_v47 = vld [vmem:[%s7022_s15 + $0x340] sm:$0xff]  ;;  %v599_v56 = vld [vmem:[%s7022_s15 + $0xd8] sm:$0xff] }
  0x88   : > { %5913 = vmatmul.mubr.msk.f32.gmra.mrb[4].mxu1 %vm972_vm0, %v589_v48  ;;  %v593_v48 = vld [vmem:[%s7022_s15 + $0xa8] sm:$0xff]  ;;  %v682_v51 = vld [vmem:[%s7022_s15 + $0x370] sm:$0xff]  ;;  %v596_v52 = vld [vmem:[%s7022_s15 + $0xc0] sm:$0xff] }
  0x89   : > { %6169 = vmatpush1.bf16.msra.mxu0 %v6168_v40  ;;  %5915 = vmatprep.mubr.msk.f32.mxu1 %vm972_vm0, %v592_v49  ;;  %v587_v40 = vld [vmem:[%s7022_s15 + $0x78] sm:$0xff]  ;;  %v597_v49 = vld [vmem:[%s7022_s15 + $0xc8] sm:$0xff]  ;;  %v602_v60 = vld [vmem:[%s7022_s15 + $0xf0] sm:$0xff] }
  0x8a   : > { %6170 = vmatprep.subr.bf16.mxu0 %v8782_v0  ;;  %v603_v57 = vld [vmem:[%s7022_s15 + $0xf8] sm:$0xff]  ;;  %v606_v61 = vld [vmem:[%s7022_s15 + $0x110] sm:$0xff]  ;;  %v609_v2 = vld [vmem:[%s7022_s15 + $0x128] sm:$0xff] }
  0x8b   : > { %v703_v3 = vld [vmem:[%s7022_s15 + $0x418] sm:$0xff]  ;;  %v709_v7 = vld [vmem:[%s7022_s15 + $0x448] sm:$0xff]  ;;  %v618_v12 = vld [vmem:[%s7022_s15 + $0x170] sm:$0xff] }
  0x8c   : > { %5916 = vmatmul.mubr.msk.f32.gmra.mrb[6].mxu1 %vm972_vm0, %v595_v53  ;;  %v600_v53 = vld [vmem:[%s7022_s15 + $0xe0] sm:$0xff]  ;;  %v611_v8 = vld [vmem:[%s7022_s15 + $0x138] sm:$0xff] }
  0x8d   : > { %6172 = vmatpush1.bf16.msra.mxu0 %v6171_v45  ;;  %5918 = vmatprep.mubr.msk.f32.mxu1 %vm972_vm0, %v598_v54  ;;  %v594_v45 = vld [vmem:[%s7022_s15 + $0xb0] sm:$0xff]  ;;  %v685_v54 = vld [vmem:[%s7022_s15 + $0x388] sm:$0xff]  ;;  %v715_v13 = vld [vmem:[%s7022_s15 + $0x478] sm:$0xff] }
  0x8e   : > { %6173 = vmatprep.subr.bf16.mxu0 %v8782_v0 }
  0x90   : > { %5919 = vmatmul.mubr.msk.f32.gmra.mrb[8].mxu1 %vm972_vm0, %v601_v58  ;;  %v691_v58 = vld [vmem:[%s7022_s15 + $0x3b8] sm:$0xff] }
  0x91   : > { %6175 = vmatpush1.bf16.msra.mxu0 %v6174_v50  ;;  %5921 = vmatprep.mubr.msk.f32.mxu1 %vm972_vm0, %v604_v59  ;;  %v679_v50 = vld [vmem:[%s7022_s15 + $0x358] sm:$0xff]  ;;  %v694_v59 = vld [vmem:[%s7022_s15 + $0x3d0] sm:$0xff] }
  0x92   : > { %6176 = vmatprep.subr.bf16.mxu0 %v8782_v0 }
  0x94   : > { %5922 = vmatmul.mubr.msk.f32.gmra.mrb[10].mxu1 %vm972_vm0, %v607_v62  ;;  %v697_v62 = vld [vmem:[%s7022_s15 + $0x3e8] sm:$0xff] }
  0x95   : > { %6178 = vmatpush1.bf16.msra.mxu0 %v6177_v55  ;;  %5924 = vmatprep.mubr.msk.f32.mxu1 %vm972_vm0, %v610_v1  ;;  %v688_v55 = vld [vmem:[%s7022_s15 + $0x3a0] sm:$0xff]  ;;  %v605_v1 = vld [vmem:[%s7022_s15 + $0x108] sm:$0xff] }
  0x96   : > { %6179 = vmatprep.subr.bf16.mxu0 %v8782_v0 }
  0x98   : > { %5925 = vmatmul.mubr.msk.f32.gmra.mrb[12].mxu1 %vm972_vm0, %v613_v5  ;;  %v706_v5 = vld [vmem:[%s7022_s15 + $0x430] sm:$0xff] }
  0x99   : > { %6181 = vmatpush1.bf16.msra.mxu0 %v6180_v63  ;;  %5927 = vmatprep.mubr.msk.f32.mxu1 %vm972_vm0, %v616_v6  ;;  %v700_v63 = vld [vmem:[%s7022_s15 + $0x400] sm:$0xff] }
  0x9a   : > { %6182 = vmatprep.subr.bf16.mxu0 %v8782_v0  ;;  %v612_v6 = vld [vmem:[%s7022_s15 + $0x140] sm:$0xff] }
  0x9c   : > { %5928 = vmatmul.mubr.msk.f32.gmra.mrb[14].mxu1 %vm972_vm0, %v619_v9  ;;  %v615_v9 = vld [vmem:[%s7022_s15 + $0x158] sm:$0xff] }
  0x9d   : > { %6184 = vmatpush1.bf16.msra.mxu0 %v6183_v4  ;;  %5930 = vmatprep.mubr.msk.f32.mxu1 %vm972_vm0, %v622_v11  ;;  %v608_v4 = vld [vmem:[%s7022_s15 + $0x120] sm:$0xff] }
  0x9e   : > { %6185 = vmatprep.subr.bf16.mxu0 %v8782_v0  ;;  %v712_v11 = vld [vmem:[%s7022_s15 + $0x460] sm:$0xff] }
  0xa0   : > { %5931 = vmatmul.mubr.msk.f32.gmra.mrb[16].mxu1 %vm972_vm0, %v625_v15  ;;  %v621_v15 = vld [vmem:[%s7022_s15 + $0x188] sm:$0xff] }
  0xa1   : > { %6187 = vmatpush1.bf16.msra.mxu0 %v6186_v10  ;;  %5933 = vmatprep.mubr.msk.f32.mxu1 %vm972_vm0, %v628_v16  ;;  %v614_v10 = vld [vmem:[%s7022_s15 + $0x150] sm:$0xff] }
  0xa2   : > { %6188 = vmatprep.subr.bf16.mxu0 %v8782_v0  ;;  %v718_v16 = vld [vmem:[%s7022_s15 + $0x490] sm:$0xff] }
  0xa4   : > { %5934 = vmatmul.mubr.msk.f32.gmra.mrb[18].mxu1 %vm972_vm0, %v631_v17  ;;  %v620_v17 = vld [vmem:[%s7022_s15 + $0x180] sm:$0xff] }
  0xa5   : > { %6190 = vmatpush1.bf16.msra.mxu0 %v6189_v14  ;;  %5936 = vmatprep.mubr.msk.f32.mxu1 %vm972_vm0, %v634_v19  ;;  %v617_v14 = vld [vmem:[%s7022_s15 + $0x168] sm:$0xff]  ;;  %v624_v19 = vld [vmem:[%s7022_s15 + $0x1a0] sm:$0xff] }
  0xa6   : > { %6191 = vmatprep.subr.bf16.mxu0 %v8782_v0  ;;  %v780_v0 = vld [vmem:[%s7022_s15 + $0x680] sm:$0xff] }
  0xa8   : > { %5937 = vmatmul.mubr.msk.f32.gmra.mrb[20].mxu1 %vm972_vm0, %v637_v22  ;;  %v724_v22 = vld [vmem:[%s7022_s15 + $0x4c0] sm:$0xff] }
  0xa9   : > { %6193 = vmatpush1.bf16.msra.mxu0 %v6192_v18  ;;  %5939 = vmatprep.mubr.msk.f32.mxu1 %vm972_vm0, %v640_v23  ;;  %v721_v18 = vld [vmem:[%s7022_s15 + $0x4a8] sm:$0xff]  ;;  %v626_v23 = vld [vmem:[%s7022_s15 + $0x1b0] sm:$0xff] }
  0xac   : > { %1398 = vmatmul.mubr.f32.vlgmr.msra.gmra.mrb[0].mxu0 %v572_v20  ;;  %5940 = vmatmul.mubr.msk.f32.gmra.mrb[22].mxu1 %vm972_vm0, %v643_v26  ;;  %v623_v20 = vld [vmem:[%s7022_s15 + $0x198] sm:$0xff]  ;;  %v629_v26 = vld [vmem:[%s7022_s15 + $0x1c8] sm:$0xff] }
  0xad   : > { %1402 = vmatprep.mubr.f32.mxu0 %v576_v21  ;;  %5942 = vmatprep.mubr.msk.f32.mxu1 %vm972_vm0, %v646_v27  ;;  %v627_v21 = vld [vmem:[%s7022_s15 + $0x1b8] sm:$0xff]  ;;  %v633_v27 = vld [vmem:[%s7022_s15 + $0x1e8] sm:$0xff] }
  0xb0   : > { %1403 = vmatmul.mubr.f32.gmra.mrb[2].mxu0 %v575_v24  ;;  %5943 = vmatmul.mubr.msk.f32.gmra.mrb[24].mxu1 %vm972_vm0, %v649_v30  ;;  %v727_v24 = vld [vmem:[%s7022_s15 + $0x4d8] sm:$0xff]  ;;  %v733_v30 = vld [vmem:[%s7022_s15 + $0x508] sm:$0xff] }
  0xb1   : > { %1407 = vmatprep.mubr.f32.mxu0 %v579_v25  ;;  %5945 = vmatprep.mubr.msk.f32.mxu1 %vm972_vm0, %v652_v31  ;;  %v630_v25 = vld [vmem:[%s7022_s15 + $0x1d0] sm:$0xff]  ;;  %v636_v31 = vld [vmem:[%s7022_s15 + $0x200] sm:$0xff] }
  0xb4   : > { %1408 = vmatmul.mubr.f32.gmra.mrb[4].mxu0 %v578_v28  ;;  %5946 = vmatmul.mubr.msk.f32.gmra.mrb[26].mxu1 %vm972_vm0, %v655_v34  ;;  %v730_v28 = vld [vmem:[%s7022_s15 + $0x4f0] sm:$0xff]  ;;  %v736_v34 = vld [vmem:[%s7022_s15 + $0x520] sm:$0xff] }
  0xb5   : > { %1412 = vmatprep.mubr.f32.mxu0 %v582_v29  ;;  %5948 = vmatprep.mubr.msk.f32.mxu1 %vm972_vm0, %v658_v35  ;;  %v632_v29 = vld [vmem:[%s7022_s15 + $0x1e0] sm:$0xff]  ;;  %v638_v35 = vld [vmem:[%s7022_s15 + $0x210] sm:$0xff] }
  0xb8   : > { %1413 = vmatmul.mubr.f32.gmra.mrb[6].mxu0 %v581_v32  ;;  %5949 = vmatmul.mubr.msk.f32.gmra.mrb[28].mxu1 %vm972_vm0, %v661_v38  ;;  %v635_v32 = vld [vmem:[%s7022_s15 + $0x1f8] sm:$0xff]  ;;  %v641_v38 = vld [vmem:[%s7022_s15 + $0x228] sm:$0xff] }
  0xb9   : > { %1417 = vmatprep.mubr.f32.mxu0 %v585_v33  ;;  %5951 = vmatprep.mubr.msk.f32.mxu1 %vm972_vm0, %v664_v39  ;;  %v639_v33 = vld [vmem:[%s7022_s15 + $0x218] sm:$0xff]  ;;  %v645_v39 = vld [vmem:[%s7022_s15 + $0x248] sm:$0xff] }
  0xbc   : > { %1418 = vmatmul.mubr.f32.gmra.mrb[8].mxu0 %v584_v36  ;;  %5952 = vmatmul.mubr.msk.f32.gmra.mrb[30].mxu1 %vm972_vm0, %v667_v42  ;;  %v642_v36 = vld [vmem:[%s7022_s15 + $0x230] sm:$0xff]  ;;  %v648_v42 = vld [vmem:[%s7022_s15 + $0x260] sm:$0xff] }
  0xbd   : > { %1422 = vmatprep.mubr.f32.mxu0 %v588_v37  ;;  %5954 = vmatprep.mubr.msk.f32.mxu1 %vm972_vm0, %v670_v43  ;;  %v739_v37 = vld [vmem:[%s7022_s15 + $0x538] sm:$0xff]  ;;  %v745_v43 = vld [vmem:[%s7022_s15 + $0x568] sm:$0xff] }
  0xc0   : > { %1423 = vmatmul.mubr.f32.gmra.mrb[10].mxu0 %v587_v40  ;;  %5955 = vmatmul.mubr.msk.f32.gmra.mrb[32].mxu1 %vm972_vm0, %v673_v46  ;;  %v742_v40 = vld [vmem:[%s7022_s15 + $0x550] sm:$0xff]  ;;  %v748_v46 = vld [vmem:[%s7022_s15 + $0x580] sm:$0xff] }
  0xc1   : > { %1427 = vmatprep.mubr.f32.mxu0 %v591_v41  ;;  %5957 = vmatprep.mubr.msk.f32.mxu1 %vm972_vm0, %v676_v47  ;;  %v644_v41 = vld [vmem:[%s7022_s15 + $0x240] sm:$0xff]  ;;  %v650_v47 = vld [vmem:[%s7022_s15 + $0x270] sm:$0xff] }
  0xc4   : > { %1428 = vmatmul.mubr.f32.gmra.mrb[12].mxu0 %v590_v44  ;;  %5958 = vmatmul.mubr.msk.f32.gmra.mrb[34].mxu1 %vm972_vm0, %v679_v50  ;;  %v647_v44 = vld [vmem:[%s7022_s15 + $0x258] sm:$0xff]  ;;  %v653_v50 = vld [vmem:[%s7022_s15 + $0x288] sm:$0xff] }
  0xc5   : > { %1432 = vmatprep.mubr.f32.mxu0 %v594_v45  ;;  %5960 = vmatprep.mubr.msk.f32.mxu1 %vm972_vm0, %v682_v51  ;;  %v651_v45 = vld [vmem:[%s7022_s15 + $0x278] sm:$0xff]  ;;  %v657_v51 = vld [vmem:[%s7022_s15 + $0x2a8] sm:$0xff] }
  0xc8   : > { %1433 = vmatmul.mubr.f32.gmra.mrb[14].mxu0 %v593_v48  ;;  %5961 = vmatmul.mubr.msk.f32.gmra.mrb[36].mxu1 %vm972_vm0, %v685_v54  ;;  %v654_v48 = vld [vmem:[%s7022_s15 + $0x290] sm:$0xff]  ;;  %v660_v54 = vld [vmem:[%s7022_s15 + $0x2c0] sm:$0xff] }
  0xc9   : > { %1437 = vmatprep.mubr.f32.mxu0 %v597_v49  ;;  %5963 = vmatprep.mubr.msk.f32.mxu1 %vm972_vm0, %v688_v55  ;;  %v751_v49 = vld [vmem:[%s7022_s15 + $0x598] sm:$0xff]  ;;  %v757_v55 = vld [vmem:[%s7022_s15 + $0x5c8] sm:$0xff] }
  0xcc   : > { %1438 = vmatmul.mubr.f32.gmra.mrb[16].mxu0 %v596_v52  ;;  %5964 = vmatmul.mubr.msk.f32.gmra.mrb[38].mxu1 %vm972_vm0, %v691_v58  ;;  %v754_v52 = vld [vmem:[%s7022_s15 + $0x5b0] sm:$0xff]  ;;  %v760_v58 = vld [vmem:[%s7022_s15 + $0x5e0] sm:$0xff] }
  0xcd   : > { %1442 = vmatprep.mubr.f32.mxu0 %v600_v53  ;;  %5966 = vmatprep.mubr.msk.f32.mxu1 %vm972_vm0, %v694_v59  ;;  %v656_v53 = vld [vmem:[%s7022_s15 + $0x2a0] sm:$0xff]  ;;  %v662_v59 = vld [vmem:[%s7022_s15 + $0x2d0] sm:$0xff] }
  0xd0   : > { %1443 = vmatmul.mubr.f32.gmra.mrb[18].mxu0 %v599_v56  ;;  %5967 = vmatmul.mubr.msk.f32.gmra.mrb[40].mxu1 %vm972_vm0, %v697_v62  ;;  %v659_v56 = vld [vmem:[%s7022_s15 + $0x2b8] sm:$0xff]  ;;  %v665_v62 = vld [vmem:[%s7022_s15 + $0x2e8] sm:$0xff] }
  0xd1   : > { %1447 = vmatprep.mubr.f32.mxu0 %v603_v57  ;;  %5969 = vmatprep.mubr.msk.f32.mxu1 %vm972_vm0, %v700_v63  ;;  %v663_v57 = vld [vmem:[%s7022_s15 + $0x2d8] sm:$0xff]  ;;  %v669_v63 = vld [vmem:[%s7022_s15 + $0x308] sm:$0xff] }
  0xd4   : > { %1448 = vmatmul.mubr.f32.gmra.mrb[20].mxu0 %v602_v60  ;;  %5970 = vmatmul.mubr.msk.f32.gmra.mrb[42].mxu1 %vm972_vm0, %v703_v3  ;;  %v666_v60 = vld [vmem:[%s7022_s15 + $0x2f0] sm:$0xff]  ;;  %v672_v3 = vld [vmem:[%s7022_s15 + $0x320] sm:$0xff] }
  0xd5   : > { %1452 = vmatprep.mubr.f32.mxu0 %v606_v61  ;;  %5972 = vmatprep.mubr.msk.f32.mxu1 %vm972_vm0, %v706_v5  ;;  %v763_v61 = vld [vmem:[%s7022_s15 + $0x5f8] sm:$0xff] }
  0xd6   : > { %v671_v5 = vld [vmem:[%s7022_s15 + $0x318] sm:$0xff] }
  0xd8   : > { %1453 = vmatmul.mubr.f32.gmra.mrb[22].mxu0 %v605_v1  ;;  %5973 = vmatmul.mubr.msk.f32.gmra.mrb[44].mxu1 %vm972_vm0, %v709_v7  ;;  %v766_v1 = vld [vmem:[%s7022_s15 + $0x610] sm:$0xff]  ;;  %v772_v7 = vld [vmem:[%s7022_s15 + $0x640] sm:$0xff] }
  0xd9   : > { %1457 = vmatprep.mubr.f32.mxu0 %v609_v2  ;;  %5975 = vmatprep.mubr.msk.f32.mxu1 %vm972_vm0, %v712_v11  ;;  %v668_v2 = vld [vmem:[%s7022_s15 + $0x300] sm:$0xff]  ;;  %v677_v11 = vld [vmem:[%s7022_s15 + $0x348] sm:$0xff] }
  0xdc   : > { %1458 = vmatmul.mubr.f32.gmra.mrb[24].mxu0 %v608_v4  ;;  %5976 = vmatmul.mubr.msk.f32.gmra.mrb[46].mxu1 %vm972_vm0, %v715_v13  ;;  %v769_v4 = vld [vmem:[%s7022_s15 + $0x628] sm:$0xff]  ;;  %v778_v13 = vld [vmem:[%s7022_s15 + $0x670] sm:$0xff] }
  0xdd   : > { %1462 = vmatprep.mubr.f32.mxu0 %v612_v6  ;;  %5978 = vmatprep.mubr.msk.f32.mxu1 %vm972_vm0, %v718_v16  ;;  %v675_v6 = vld [vmem:[%s7022_s15 + $0x338] sm:$0xff]  ;;  %v781_v16 = vld [vmem:[%s7022_s15 + $0x688] sm:$0xff] }
  0xe0   : > { %1463 = vmatmul.mubr.f32.gmra.mrb[26].mxu0 %v611_v8  ;;  %5979 = vmatmul.mubr.msk.f32.gmra.mrb[48].mxu1 %vm972_vm0, %v721_v18  ;;  %v674_v8 = vld [vmem:[%s7022_s15 + $0x330] sm:$0xff]  ;;  %v687_v18 = vld [vmem:[%s7022_s15 + $0x398] sm:$0xff] }
  0xe1   : > { %1467 = vmatprep.mubr.f32.mxu0 %v615_v9  ;;  %5981 = vmatprep.mubr.msk.f32.mxu1 %vm972_vm0, %v724_v22  ;;  %v678_v9 = vld [vmem:[%s7022_s15 + $0x350] sm:$0xff]  ;;  %v787_v22 = vld [vmem:[%s7022_s15 + $0x6b8] sm:$0xff] }
  0xe4   : > { %1468 = vmatmul.mubr.f32.gmra.mrb[28].mxu0 %v614_v10  ;;  %5982 = vmatmul.mubr.msk.f32.gmra.mrb[50].mxu1 %vm972_vm0, %v727_v24  ;;  %v775_v10 = vld [vmem:[%s7022_s15 + $0x658] sm:$0xff]  ;;  %v693_v24 = vld [vmem:[%s7022_s15 + $0x3c8] sm:$0xff] }
  0xe5   : > { %1472 = vmatprep.mubr.f32.mxu0 %v618_v12  ;;  %5984 = vmatprep.mubr.msk.f32.mxu1 %vm972_vm0, %v730_v28  ;;  %v681_v12 = vld [vmem:[%s7022_s15 + $0x368] sm:$0xff] }
  0xe6   : > { %v793_v28 = vld [vmem:[%s7022_s15 + $0x6e8] sm:$0xff] }
  0xe8   : > { %1473 = vmatmul.mubr.f32.gmra.mrb[30].mxu0 %v617_v14  ;;  %5985 = vmatmul.mubr.msk.f32.gmra.mrb[52].mxu1 %vm972_vm0, %v733_v30  ;;  %v680_v14 = vld [vmem:[%s7022_s15 + $0x360] sm:$0xff]  ;;  %v699_v30 = vld [vmem:[%s7022_s15 + $0x3f8] sm:$0xff] }
  0xe9   : > { %1477 = vmatprep.mubr.f32.mxu0 %v621_v15  ;;  %5987 = vmatprep.mubr.msk.f32.mxu1 %vm972_vm0, %v736_v34  ;;  %v684_v15 = vld [vmem:[%s7022_s15 + $0x380] sm:$0xff]  ;;  %v799_v34 = vld [vmem:[%s7022_s15 + $0x718] sm:$0xff] }
  0xec   : > { %1478 = vmatmul.mubr.f32.gmra.mrb[32].mxu0 %v620_v17  ;;  %5988 = vmatmul.mubr.msk.f32.gmra.mrb[54].mxu1 %vm972_vm0, %v739_v37  ;;  %v683_v17 = vld [vmem:[%s7022_s15 + $0x378] sm:$0xff] }
  0xed   : > { %1482 = vmatprep.mubr.f32.mxu0 %v624_v19  ;;  %5990 = vmatprep.mubr.msk.f32.mxu1 %vm972_vm0, %v742_v40  ;;  %v784_v19 = vld [vmem:[%s7022_s15 + $0x6a0] sm:$0xff]  ;;  %v802_v40 = vld [vmem:[%s7022_s15 + $0x730] sm:$0xff] }
  0xf0   : > { %1483 = vmatmul.mubr.f32.gmra.mrb[34].mxu0 %v623_v20  ;;  %5991 = vmatmul.mubr.msk.f32.gmra.mrb[56].mxu1 %vm972_vm0, %v745_v43  ;;  %v686_v20 = vld [vmem:[%s7022_s15 + $0x390] sm:$0xff] }
  0xf1   : > { %1487 = vmatprep.mubr.f32.mxu0 %v627_v21  ;;  %5993 = vmatprep.mubr.msk.f32.mxu1 %vm972_vm0, %v748_v46  ;;  %v690_v21 = vld [vmem:[%s7022_s15 + $0x3b0] sm:$0xff]  ;;  %v711_v46 = vld [vmem:[%s7022_s15 + $0x458] sm:$0xff] }
  0xf4   : > { %1488 = vmatmul.mubr.f32.gmra.mrb[36].mxu0 %v626_v23  ;;  %5994 = vmatmul.mubr.msk.f32.gmra.mrb[58].mxu1 %vm972_vm0, %v751_v49  ;;  %v689_v23 = vld [vmem:[%s7022_s15 + $0x3a8] sm:$0xff] }
  0xf5   : > { %1492 = vmatprep.mubr.f32.mxu0 %v630_v25  ;;  %5996 = vmatprep.mubr.msk.f32.mxu1 %vm972_vm0, %v754_v52  ;;  %v692_v25 = vld [vmem:[%s7022_s15 + $0x3c0] sm:$0xff]  ;;  %v811_v52 = vld [vmem:[%s7022_s15 + $0x778] sm:$0xff] }
  0xf8   : > { %1493 = vmatmul.mubr.f32.gmra.mrb[38].mxu0 %v629_v26  ;;  %5997 = vmatmul.mubr.msk.f32.gmra.mrb[60].mxu1 %vm972_vm0, %v757_v55  ;;  %v790_v26 = vld [vmem:[%s7022_s15 + $0x6d0] sm:$0xff] }
  0xf9   : > { %1497 = vmatprep.mubr.f32.mxu0 %v633_v27  ;;  %5999 = vmatprep.mubr.msk.f32.mxu1 %vm972_vm0, %v760_v58  ;;  %v696_v27 = vld [vmem:[%s7022_s15 + $0x3e0] sm:$0xff] }
  0xfa   : > { %v716_v58 = vld [vmem:[%s7022_s15 + $0x480] sm:$0xff] }
  0xfc   : > { %1498 = vmatmul.mubr.f32.gmra.mrb[40].mxu0 %v632_v29  ;;  %6000 = vmatmul.mubr.msk.f32.gmra.mrb[62].mxu1 %vm972_vm0, %v763_v61  ;;  %v695_v29 = vld [vmem:[%s7022_s15 + $0x3d8] sm:$0xff]  ;;  %v720_v61 = vld [vmem:[%s7022_s15 + $0x4a0] sm:$0xff] }
  0xfd   : > { %1502 = vmatprep.mubr.f32.mxu0 %v636_v31  ;;  %6002 = vmatprep.mubr.msk.f32.mxu1 %vm972_vm0, %v766_v1  ;;  %v698_v31 = vld [vmem:[%s7022_s15 + $0x3f0] sm:$0xff]  ;;  %v719_v1 = vld [vmem:[%s7022_s15 + $0x498] sm:$0xff] }
 0x100   : > { %1503 = vmatmul.mubr.f32.gmra.mrb[42].mxu0 %v635_v32  ;;  %6003 = vmatmul.mubr.msk.f32.gmra.mrb[64].mxu1 %vm972_vm0, %v769_v4  ;;  %v796_v32 = vld [vmem:[%s7022_s15 + $0x700] sm:$0xff] }
 0x101   : > { %1507 = vmatprep.mubr.f32.mxu0 %v639_v33  ;;  %6005 = vmatprep.mubr.msk.f32.mxu1 %vm972_vm0, %v772_v7  ;;  %v702_v33 = vld [vmem:[%s7022_s15 + $0x410] sm:$0xff]  ;;  %v820_v7 = vld [vmem:[%s7022_s15 + $0x7c0] sm:$0xff] }
 0x104   : > { %1508 = vmatmul.mubr.f32.gmra.mrb[44].mxu0 %v638_v35  ;;  %6006 = vmatmul.mubr.msk.f32.gmra.mrb[66].mxu1 %vm972_vm0, %v775_v10  ;;  %v701_v35 = vld [vmem:[%s7022_s15 + $0x408] sm:$0xff] }
 0x105   : > { %1512 = vmatprep.mubr.f32.mxu0 %v642_v36  ;;  %6008 = vmatprep.mubr.msk.f32.mxu1 %vm972_vm0, %v778_v13  ;;  %v705_v36 = vld [vmem:[%s7022_s15 + $0x428] sm:$0xff] }
 0x106   : > { %v729_v13 = vld [vmem:[%s7022_s15 + $0x4e8] sm:$0xff] }
 0x108   : > { %1513 = vmatmul.mubr.f32.gmra.mrb[46].mxu0 %v641_v38  ;;  %6009 = vmatmul.mubr.msk.f32.gmra.mrb[68].mxu1 %vm972_vm0, %v781_v16  ;;  %v704_v38 = vld [vmem:[%s7022_s15 + $0x420] sm:$0xff] }
 0x109   : > { %1517 = vmatprep.mubr.f32.mxu0 %v645_v39  ;;  %6011 = vmatprep.mubr.msk.f32.mxu1 %vm972_vm0, %v784_v19  ;;  %v829_v19 = vld [vmem:[%s7022_s15 + $0x808] sm:$0xff] }
 0x10c   : > { %1518 = vmatmul.mubr.f32.gmra.mrb[48].mxu0 %v644_v41  ;;  %6012 = vmatmul.mubr.msk.f32.gmra.mrb[70].mxu1 %vm972_vm0, %v787_v22  ;;  %v708_v41 = vld [vmem:[%s7022_s15 + $0x440] sm:$0xff] }
 0x10d   : > { %1522 = vmatprep.mubr.f32.mxu0 %v648_v42  ;;  %6014 = vmatprep.mubr.msk.f32.mxu1 %vm972_vm0, %v790_v26  ;;  %v805_v42 = vld [vmem:[%s7022_s15 + $0x748] sm:$0xff] }
 0x110   : > { %1523 = vmatmul.mubr.f32.gmra.mrb[50].mxu0 %v647_v44  ;;  %6015 = vmatmul.mubr.msk.f32.gmra.mrb[72].mxu1 %vm972_vm0, %v793_v28  ;;  %v707_v44 = vld [vmem:[%s7022_s15 + $0x438] sm:$0xff]  ;;  %v734_v28 = vld [vmem:[%s7022_s15 + $0x510] sm:$0xff] }
 0x111   : > { %1527 = vmatprep.mubr.f32.mxu0 %v651_v45  ;;  %6017 = vmatprep.mubr.msk.f32.mxu1 %vm972_vm0, %v796_v32  ;;  %v835_v32 = vld [vmem:[%s7022_s15 + $0x838] sm:$0xff] }
 0x114   : > { %1528 = vmatmul.mubr.f32.gmra.mrb[52].mxu0 %v650_v47  ;;  %6018 = vmatmul.mubr.msk.f32.gmra.mrb[74].mxu1 %vm972_vm0, %v799_v34 }
 0x115   : > { %1532 = vmatprep.mubr.f32.mxu0 %v654_v48  ;;  %6020 = vmatprep.mubr.msk.f32.mxu1 %vm972_vm0, %v802_v40  ;;  %v710_v48 = vld [vmem:[%s7022_s15 + $0x450] sm:$0xff] }
 0x118   : > { %1533 = vmatmul.mubr.f32.gmra.mrb[54].mxu0 %v653_v50  ;;  %6021 = vmatmul.mubr.msk.f32.gmra.mrb[76].mxu1 %vm972_vm0, %v805_v42  ;;  %v808_v50 = vld [vmem:[%s7022_s15 + $0x760] sm:$0xff] }
 0x119   : > { %1537 = vmatprep.mubr.f32.mxu0 %v657_v51  ;;  %v714_v51 = vld [vmem:[%s7022_s15 + $0x470] sm:$0xff]  ;;  %6023 = vmatprep.mubr.msk.f32.mxu1 %vm972_vm0, %v808_v50  ;;  %v841_v50 = vld [vmem:[%s7022_s15 + $0x868] sm:$0xff] }
 0x11c   : > { %1538 = vmatmul.mubr.f32.gmra.mrb[56].mxu0 %v656_v53  ;;  %6024 = vmatmul.mubr.msk.f32.gmra.mrb[78].mxu1 %vm972_vm0, %v811_v52 }
 0x11d   : > { %1542 = vmatprep.mubr.f32.mxu0 %v660_v54  ;;  %v713_v54 = vld [vmem:[%s7022_s15 + $0x468] sm:$0xff] }
 0x120   : > { %1543 = vmatmul.mubr.f32.gmra.mrb[58].mxu0 %v659_v56  ;;  %v717_v56 = vld [vmem:[%s7022_s15 + $0x488] sm:$0xff] }
 0x121   : > { %1547 = vmatprep.mubr.f32.mxu0 %v663_v57 }
 0x124   : > { %1548 = vmatmul.mubr.f32.gmra.mrb[60].mxu0 %v662_v59 }
 0x125   : > { %1552 = vmatprep.mubr.f32.mxu0 %v666_v60  ;;  %v814_v60 = vld [vmem:[%s7022_s15 + $0x790] sm:$0xff] }
 0x126   : > { %6026 = vmatprep.mubr.msk.f32.mxu1 %vm972_vm0, %v814_v60 }
 0x128   : > { %1553 = vmatmul.mubr.f32.gmra.mrb[62].mxu0 %v665_v62  ;;  %v817_v62 = vld [vmem:[%s7022_s15 + $0x7a8] sm:$0xff] }
 0x129   : > { %1557 = vmatprep.mubr.f32.mxu0 %v669_v63  ;;  %6027 = vmatmul.mubr.msk.f32.gmra.mrb[80].mxu1 %vm972_vm0, %v817_v62  ;;  %v847_v62 = vld [vmem:[%s7022_s15 + $0x898] sm:$0xff] }
 0x12a   : > { %6029 = vmatprep.mubr.msk.f32.mxu1 %vm972_vm0, %v820_v7 }
 0x12c   : > { %1558 = vmatmul.mubr.f32.gmra.mrb[64].mxu0 %v668_v2 }
 0x12d   : > { %1562 = vmatprep.mubr.f32.mxu0 %v672_v3  ;;  %v723_v3 = vld [vmem:[%s7022_s15 + $0x4b8] sm:$0xff] }
 0x130   : > { %1563 = vmatmul.mubr.f32.gmra.mrb[66].mxu0 %v671_v5  ;;  %v722_v5 = vld [vmem:[%s7022_s15 + $0x4b0] sm:$0xff] }
 0x131   : > { %1567 = vmatprep.mubr.f32.mxu0 %v675_v6 }
 0x134   : > { %1568 = vmatmul.mubr.f32.gmra.mrb[68].mxu0 %v674_v8  ;;  %v726_v8 = vld [vmem:[%s7022_s15 + $0x4d0] sm:$0xff] }
 0x135   : > { %1572 = vmatprep.mubr.f32.mxu0 %v678_v9  ;;  %v823_v9 = vld [vmem:[%s7022_s15 + $0x7d8] sm:$0xff] }
 0x136   : > { %6030 = vmatmul.mubr.msk.f32.gmra.mrb[82].mxu1 %vm972_vm0, %v823_v9 }
 0x138   : > { %1573 = vmatmul.mubr.f32.gmra.mrb[70].mxu0 %v677_v11  ;;  %v725_v11 = vld [vmem:[%s7022_s15 + $0x4c8] sm:$0xff] }
 0x139   : > { %1577 = vmatprep.mubr.f32.mxu0 %v681_v12 }
 0x13c   : > { %1578 = vmatmul.mubr.f32.gmra.mrb[72].mxu0 %v680_v14 }
 0x13d   : > { %1582 = vmatprep.mubr.f32.mxu0 %v684_v15  ;;  %v728_v15 = vld [vmem:[%s7022_s15 + $0x4e0] sm:$0xff] }
 0x140   : > { %1583 = vmatmul.mubr.f32.gmra.mrb[74].mxu0 %v683_v17  ;;  %v826_v17 = vld [vmem:[%s7022_s15 + $0x7f0] sm:$0xff] }
 0x141   : > { %1587 = vmatprep.mubr.f32.mxu0 %v687_v18  ;;  %v732_v18 = vld [vmem:[%s7022_s15 + $0x500] sm:$0xff]  ;;  %6032 = vmatprep.mubr.msk.f32.mxu1 %vm972_vm0, %v826_v17  ;;  %v746_v17 = vld [vmem:[%s7022_s15 + $0x570] sm:$0xff] }
 0x142   : > { %6033 = vmatmul.mubr.msk.f32.gmra.mrb[84].mxu1 %vm972_vm0, %v829_v19  ;;  %v750_v19 = vld [vmem:[%s7022_s15 + $0x590] sm:$0xff] }
 0x144   : > { %1588 = vmatmul.mubr.f32.gmra.mrb[76].mxu0 %v686_v20 }
 0x145   : > { %1592 = vmatprep.mubr.f32.mxu0 %v690_v21  ;;  %v731_v21 = vld [vmem:[%s7022_s15 + $0x4f8] sm:$0xff] }
 0x148   : > { %1593 = vmatmul.mubr.f32.gmra.mrb[78].mxu0 %v689_v23  ;;  %v735_v23 = vld [vmem:[%s7022_s15 + $0x518] sm:$0xff] }
 0x149   : > { %1597 = vmatprep.mubr.f32.mxu0 %v693_v24 }
 0x14c   : > { %1598 = vmatmul.mubr.f32.gmra.mrb[80].mxu0 %v692_v25 }
 0x14d   : > { %1602 = vmatprep.mubr.f32.mxu0 %v696_v27 }
 0x150   : > { %1603 = vmatmul.mubr.f32.gmra.mrb[82].mxu0 %v695_v29 }
 0x151   : > { %1607 = vmatprep.mubr.f32.mxu0 %v699_v30  ;;  %v832_v30 = vld [vmem:[%s7022_s15 + $0x820] sm:$0xff] }
 0x152   : > { %6035 = vmatprep.mubr.msk.f32.mxu1 %vm972_vm0, %v832_v30  ;;  %v749_v30 = vld [vmem:[%s7022_s15 + $0x588] sm:$0xff] }
 0x153   : > { %v7289_v37 = vpop.f32.mrb[0].mxu1  ;;  %6036 = vmatmul.mubr.msk.f32.gmra.mrb[86].mxu1 %vm972_vm0, %v835_v32  ;;  %v753_v32 = vld [vmem:[%s7022_s15 + $0x5a8] sm:$0xff] }
 0x154   : > { %1608 = vmatmul.mubr.f32.gmra.mrb[84].mxu0 %v698_v31  ;;  %v7292_v39 = vpop.f32.mrb[1].mxu1  ;;  %v738_v31 = vld [vmem:[%s7022_s15 + $0x530] sm:$0xff] }
 0x155   : > { %1612 = vmatprep.mubr.f32.mxu0 %v702_v33 }
 0x157   : > { %v7299_v43 = vpop.f32.mrb[2].mxu1 }
 0x158   : > { %1613 = vmatmul.mubr.f32.gmra.mrb[86].mxu0 %v701_v35  ;;  %v7302_v45 = vpop.f32.mrb[3].mxu1 }
 0x159   : > { %1617 = vmatprep.mubr.f32.mxu0 %v705_v36 }
 0x15b   : > { %v7305_v47 = vpop.f32.mrb[4].mxu1 }
 0x15c   : > { %1618 = vmatmul.mubr.f32.gmra.mrb[88].mxu0 %v704_v38  ;;  %v7308_v49 = vpop.f32.mrb[5].mxu1  ;;  %v737_v38 = vld [vmem:[%s7022_s15 + $0x528] sm:$0xff] }
 0x15d   : > { %1622 = vmatprep.mubr.f32.mxu0 %v708_v41  ;;  %v741_v41 = vld [vmem:[%s7022_s15 + $0x548] sm:$0xff] }
 0x15f   : > { %v7315_v53 = vpop.f32.mrb[6].mxu1 }
 0x160   : > { %1623 = vmatmul.mubr.f32.gmra.mrb[90].mxu0 %v707_v44  ;;  %v7318_v55 = vpop.f32.mrb[7].mxu1  ;;  %v838_v44 = vld [vmem:[%s7022_s15 + $0x850] sm:$0xff] }
 0x161   : > { %1627 = vmatprep.mubr.f32.mxu0 %v711_v46  ;;  %6038 = vmatprep.mubr.msk.f32.mxu1 %vm972_vm0, %v838_v44  ;;  %v865_v44 = vld [vmem:[%s7022_s15 + $0x928] sm:$0xff] }
 0x162   : > { %6039 = vmatmul.mubr.msk.f32.gmra.mrb[88].mxu1 %vm972_vm0, %v841_v50 }
 0x163   : > { %v7321_v57 = vpop.f32.mrb[8].mxu1 }
 0x164   : > { %1628 = vmatmul.mubr.f32.gmra.mrb[92].mxu0 %v710_v48  ;;  %v7324_v59 = vpop.f32.mrb[9].mxu1 }
 0x165   : > { %1632 = vmatprep.mubr.f32.mxu0 %v714_v51  ;;  %v740_v51 = vld [vmem:[%s7022_s15 + $0x540] sm:$0xff] }
 0x167   : > { %v7331_v63 = vpop.f32.mrb[10].mxu1 }
 0x168   : > { %1633 = vmatmul.mubr.f32.gmra.mrb[94].mxu0 %v713_v54  ;;  %v7334_v2 = vpop.f32.mrb[11].mxu1  ;;  %v744_v54 = vld [vmem:[%s7022_s15 + $0x560] sm:$0xff] }
 0x169   : > { %1637 = vmatprep.mubr.f32.mxu0 %v717_v56  ;;  %v844_v56 = vld [vmem:[%s7022_s15 + $0x880] sm:$0xff] }
 0x16a   : > { %6041 = vmatprep.mubr.msk.f32.mxu1 %vm972_vm0, %v844_v56 }
 0x16b   : > { %v7337_v4 = vpop.f32.mrb[12].mxu1  ;;  %6042 = vmatmul.mubr.msk.f32.gmra.mrb[90].mxu1 %vm972_vm0, %v847_v62  ;;  %v871_v62 = vld [vmem:[%s7022_s15 + $0x958] sm:$0xff] }
 0x16c   : > { %1638 = vmatmul.mubr.f32.gmra.mrb[96].mxu0 %v716_v58  ;;  %v7340_v6 = vpop.f32.mrb[13].mxu1 }
 0x16d   : > { %1642 = vmatprep.mubr.f32.mxu0 %v720_v61 }
 0x16f   : > { %v7347_v10 = vpop.f32.mrb[14].mxu1 }
 0x170   : > { %1643 = vmatmul.mubr.f32.gmra.mrb[98].mxu0 %v719_v1  ;;  %v7350_v12 = vpop.f32.mrb[15].mxu1  ;;  %v743_v1 = vld [vmem:[%s7022_s15 + $0x558] sm:$0xff] }
 0x171   : > { %1647 = vmatprep.mubr.f32.mxu0 %v723_v3 }
 0x173   : > { %v7353_v14 = vpop.f32.mrb[16].mxu1 }
 0x174   : > { %1648 = vmatmul.mubr.f32.gmra.mrb[100].mxu0 %v722_v5  ;;  %v7356_v16 = vpop.f32.mrb[17].mxu1  ;;  %v747_v5 = vld [vmem:[%s7022_s15 + $0x578] sm:$0xff] }
 0x175   : > { %1652 = vmatprep.mubr.f32.mxu0 %v726_v8  ;;  %v850_v8 = vld [vmem:[%s7022_s15 + $0x8b0] sm:$0xff] }
 0x176   : > { %6044 = vmatprep.mubr.msk.f32.mxu1 %vm972_vm0, %v850_v8 }
 0x177   : > { %v7363_v20 = vpop.f32.mrb[18].mxu1 }
 0x178   : > { %1653 = vmatmul.mubr.f32.gmra.mrb[102].mxu0 %v725_v11  ;;  %v7366_v22 = vpop.f32.mrb[19].mxu1 }
 0x179   : > { %1657 = vmatprep.mubr.f32.mxu0 %v729_v13 }
 0x17b   : > { %v7372_v27 = vpop.f32.mrb[20].mxu1 }
 0x17c   : > { %1658 = vmatmul.mubr.f32.gmra.mrb[104].mxu0 %v728_v15  ;;  %v7375_v29 = vpop.f32.mrb[21].mxu1  ;;  %v853_v15 = vld [vmem:[%s7022_s15 + $0x8c8] sm:$0xff] }
 0x17d   : > { %1662 = vmatprep.mubr.f32.mxu0 %v732_v18  ;;  %6045 = vmatmul.mubr.msk.f32.gmra.mrb[92].mxu1 %vm972_vm0, %v853_v15 }
 0x17f   : > { %v1399_v24 = vpop.f32.mrb[0].mxu0  ;;  %v7385_v36 = vpop.f32.mrb[22].mxu1 }
 0x180   : > { %v7370_v25 = vadd.f32 %v7292_v39, %v1399_v24  ;;  %v1401_v26 = vpop.f32.mrb[1].mxu0  ;;  %1663 = vmatmul.mubr.f32.gmra.mrb[106].mxu0 %v731_v21  ;;  %v7388_v39 = vpop.f32.mrb[23].mxu1  ;;  %v856_v21 = vld [vmem:[%s7022_s15 + $0x8e0] sm:$0xff] }
 0x181   : > { %1667 = vmatprep.mubr.f32.mxu0 %v735_v23  ;;  %6047 = vmatprep.mubr.msk.f32.mxu1 %vm972_vm0, %v856_v21  ;;  %v758_v21 = vld [vmem:[%s7022_s15 + $0x5d0] sm:$0xff] }
 0x183   : > { %v1404_v33 = vpop.f32.mrb[2].mxu0  ;;  %v7397_v48 = vpop.f32.mrb[24].mxu1 }
 0x184   : > { %v7383_v34 = vadd.f32 %v7289_v37, %v1404_v33  ;;  %v1406_v35 = vpop.f32.mrb[3].mxu0  ;;  %1668 = vmatmul.mubr.f32.gmra.mrb[108].mxu0 %v734_v28  ;;  %v7402_v52 = vpop.f32.mrb[25].mxu1  ;;  %v859_v28 = vld [vmem:[%s7022_s15 + $0x8f8] sm:$0xff] }
 0x185   : > { %1672 = vmatprep.mubr.f32.mxu0 %v738_v31  ;;  %6048 = vmatmul.mubr.msk.f32.gmra.mrb[94].mxu1 %vm972_vm0, %v859_v28  ;;  %v862_v35 = vld [vmem:[%s7022_s15 + $0x910] sm:$0xff] }
 0x186   : > { %v6212_v40 = vpack.c.bf16 %v7383_v34, %v7370_v25  ;;  %6050 = vmatprep.mubr.msk.f32.mxu1 %vm972_vm0, %v862_v35  ;;  %v762_v28 = vld [vmem:[%s7022_s15 + $0x5f0] sm:$0xff] }
 0x187   : > { %v1409_v42 = vpop.f32.mrb[4].mxu0  ;;  %v7410_v61 = vpop.f32.mrb[26].mxu1 }
 0x188   : > { %v7395_v37 = vadd.f32 %v7302_v45, %v1409_v42  ;;  %v1411_v46 = vpop.f32.mrb[5].mxu0  ;;  %1673 = vmatmul.mubr.f32.gmra.mrb[110].mxu0 %v737_v38  ;;  %v7415_v3 = vpop.f32.mrb[27].mxu1 }
 0x189   : > { %1677 = vmatprep.mubr.f32.mxu0 %v741_v41  ;;  %v752_v46 = vld [vmem:[%s7022_s15 + $0x5a0] sm:$0xff]  ;;  %6051 = vmatmul.mubr.msk.f32.gmra.mrb[96].mxu1 %vm972_vm0, %v865_v44  ;;  %v761_v44 = vld [vmem:[%s7022_s15 + $0x5e8] sm:$0xff] }
 0x18b   : > { %v1414_v45 = vpop.f32.mrb[6].mxu0  ;;  %v7425_v13 = vpop.f32.mrb[28].mxu1 }
 0x18c   : > { %v7408_v58 = vadd.f32 %v7299_v43, %v1414_v45  ;;  %v1416_v60 = vpop.f32.mrb[7].mxu0  ;;  %1678 = vmatmul.mubr.f32.gmra.mrb[112].mxu0 %v740_v51  ;;  %v7430_v18 = vpop.f32.mrb[29].mxu1  ;;  %v756_v51 = vld [vmem:[%s7022_s15 + $0x5c0] sm:$0xff] }
 0x18d   : > { %1682 = vmatprep.mubr.f32.mxu0 %v744_v54  ;;  %v868_v54 = vld [vmem:[%s7022_s15 + $0x940] sm:$0xff] }
 0x18e   : > { %6053 = vmatprep.mubr.msk.f32.mxu1 %vm972_vm0, %v868_v54  ;;  %v886_v54 = vld [vmem:[%s7022_s15 + $0x9d0] sm:$0xff] }
 0x18f   : > { %v1419_v7 = vpop.f32.mrb[8].mxu0  ;;  %v7438_v26 = vpop.f32.mrb[30].mxu1  ;;  %6054 = vmatmul.mubr.msk.f32.gmra.mrb[98].mxu1 %vm972_vm0, %v871_v62 }
 0x190   : > { %v7423_v9 = vadd.f32 %v7308_v49, %v1419_v7  ;;  %v1421_v11 = vpop.f32.mrb[9].mxu0  ;;  %1683 = vmatmul.mubr.f32.gmra.mrb[114].mxu0 %v743_v1  ;;  %v7443_v31 = vpop.f32.mrb[31].mxu1  ;;  %v755_v1 = vld [vmem:[%s7022_s15 + $0x5b8] sm:$0xff] }
 0x191   : > { %1687 = vmatprep.mubr.f32.mxu0 %v747_v5  ;;  %v759_v7 = vld [vmem:[%s7022_s15 + $0x5d8] sm:$0xff]  ;;  %v874_v11 = vld [vmem:[%s7022_s15 + $0x970] sm:$0xff] }
 0x192   : > { %6056 = vmatprep.mubr.msk.f32.mxu1 %vm972_vm0, %v874_v11 }
 0x193   : > { %v1424_v49 = vpop.f32.mrb[10].mxu0  ;;  %v7453_v42 = vpop.f32.mrb[32].mxu1 }
 0x194   : > { %v7436_v23 = vadd.f32 %v7305_v47, %v1424_v49  ;;  %v1426_v24 = vpop.f32.mrb[11].mxu0  ;;  %1688 = vmatmul.mubr.f32.gmra.mrb[116].mxu0 %v746_v17  ;;  %v7458_v50 = vpop.f32.mrb[33].mxu1  ;;  %v877_v49 = vld [vmem:[%s7022_s15 + $0x988] sm:$0xff] }
 0x195   : > { %1692 = vmatprep.mubr.f32.mxu0 %v750_v19  ;;  %6057 = vmatmul.mubr.msk.f32.gmra.mrb[100].mxu1 %vm972_vm0, %v877_v49  ;;  %v892_v49 = vld [vmem:[%s7022_s15 + $0xa00] sm:$0xff] }
 0x197   : > { %v1429_v33 = vpop.f32.mrb[12].mxu0  ;;  %v7466_v60 = vpop.f32.mrb[34].mxu1 }
 0x198   : > { %v7451_v38 = vadd.f32 %v7318_v55, %v1429_v33  ;;  %v1431_v41 = vpop.f32.mrb[13].mxu0  ;;  %1693 = vmatmul.mubr.f32.gmra.mrb[118].mxu0 %v749_v30  ;;  %v7471_v5 = vpop.f32.mrb[35].mxu1  ;;  %v880_v30 = vld [vmem:[%s7022_s15 + $0x9a0] sm:$0xff] }
 0x199   : > { %1697 = vmatprep.mubr.f32.mxu0 %v753_v32  ;;  %6059 = vmatprep.mubr.msk.f32.mxu1 %vm972_vm0, %v880_v30  ;;  %v883_v41 = vld [vmem:[%s7022_s15 + $0x9b8] sm:$0xff] }
 0x19a   : > { %6060 = vmatmul.mubr.msk.f32.gmra.mrb[102].mxu1 %vm972_vm0, %v883_v41  ;;  %v895_v30 = vld [vmem:[%s7022_s15 + $0xa18] sm:$0xff] }
 0x19b   : > { %v1434_v55 = vpop.f32.mrb[14].mxu0  ;;  %v7481_v19 = vpop.f32.mrb[36].mxu1  ;;  %6062 = vmatprep.mubr.msk.f32.mxu1 %vm972_vm0, %v886_v54 }
 0x19c   : > { %v7464_v45 = vadd.f32 %v7315_v53, %v1434_v55  ;;  %v1436_v56 = vpop.f32.mrb[15].mxu0  ;;  %1698 = vmatmul.mubr.f32.gmra.mrb[120].mxu0 %v752_v46  ;;  %v7486_v24 = vpop.f32.mrb[37].mxu1  ;;  %v928_v53 = vld [vmem:[%s7022_s15 + $0xb20] sm:$0xff] }
 0x19d   : > { %1702 = vmatprep.mubr.f32.mxu0 %v756_v51  ;;  %v765_v51 = vld [vmem:[%s7022_s15 + $0x608] sm:$0xff] }
 0x19f   : > { %v1439_v8 = vpop.f32.mrb[16].mxu0  ;;  %v7494_v35 = vpop.f32.mrb[38].mxu1 }
 0x1a0   : > { %v7479_v15 = vadd.f32 %v7324_v59, %v1439_v8  ;;  %v1441_v17 = vpop.f32.mrb[17].mxu0  ;;  %1703 = vmatmul.mubr.f32.gmra.mrb[122].mxu0 %v755_v1  ;;  %v7499_v46 = vpop.f32.mrb[39].mxu1  ;;  %v764_v8 = vld [vmem:[%s7022_s15 + $0x600] sm:$0xff] }
 0x1a1   : > { %1707 = vmatprep.mubr.f32.mxu0 %v759_v7  ;;  %v889_v7 = vld [vmem:[%s7022_s15 + $0x9e8] sm:$0xff]  ;;  %v768_v17 = vld [vmem:[%s7022_s15 + $0x620] sm:$0xff] }
 0x1a2   : > { %6063 = vmatmul.mubr.msk.f32.gmra.mrb[104].mxu1 %vm972_vm0, %v889_v7 }
 0x1a3   : > { %v1444_v59 = vpop.f32.mrb[18].mxu0  ;;  %v7509_v1 = vpop.f32.mrb[40].mxu1  ;;  %6065 = vmatprep.mubr.msk.f32.mxu1 %vm972_vm0, %v892_v49  ;;  %v774_v49 = vld [vmem:[%s7022_s15 + $0x650] sm:$0xff] }
 0x1a4   : > { %v7492_v32 = vadd.f32 %v7321_v57, %v1444_v59  ;;  %v1446_v33 = vpop.f32.mrb[19].mxu0  ;;  %1708 = vmatmul.mubr.f32.gmra.mrb[124].mxu0 %v758_v21  ;;  %v7514_v11 = vpop.f32.mrb[41].mxu1 }
 0x1a5   : > { %1712 = vmatprep.mubr.f32.mxu0 %v762_v28  ;;  %v767_v33 = vld [vmem:[%s7022_s15 + $0x618] sm:$0xff] }
 0x1a6   : > { %6066 = vmatmul.mubr.msk.f32.gmra.mrb[106].mxu1 %vm972_vm0, %v895_v30 }
 0x1a7   : > { %v1449_v55 = vpop.f32.mrb[20].mxu0  ;;  %v7522_v59 = vpop.f32.mrb[42].mxu1 }
 0x1a8   : > { %v7507_v56 = vadd.f32 %v7334_v2, %v1449_v55  ;;  %v1451_v62 = vpop.f32.mrb[21].mxu0  ;;  %1713 = vmatmul.mubr.f32.gmra.mrb[126].mxu0 %v761_v44  ;;  %v7527_v41 = vpop.f32.mrb[43].mxu1  ;;  %v771_v44 = vld [vmem:[%s7022_s15 + $0x638] sm:$0xff]  ;;  %v898_v55 = vld [vmem:[%s7022_s15 + $0xa30] sm:$0xff] }
 0x1a9   : > { %1717 = vmatprep.mubr.f32.mxu0 %v765_v51  ;;  %6068 = vmatprep.mubr.msk.f32.mxu1 %vm972_vm0, %v898_v55 }
 0x1ab   : > { %v1454_v2 = vpop.f32.mrb[22].mxu0  ;;  %v7537_v7 = vpop.f32.mrb[44].mxu1 }
 0x1ac   : > { %v7520_v21 = vadd.f32 %v7331_v63, %v1454_v2  ;;  %v1456_v28 = vpop.f32.mrb[23].mxu0  ;;  %1718 = vmatmul.mubr.f32.gmra.mrb[128].mxu0 %v764_v8  ;;  %v901_v8 = vld [vmem:[%s7022_s15 + $0xa48] sm:$0xff]  ;;  %v7542_v2 = vpop.f32.mrb[45].mxu1  ;;  %v916_v63 = vld [vmem:[%s7022_s15 + $0xac0] sm:$0xff] }
 0x1ad   : > { %1722 = vmatprep.mubr.f32.mxu0 %v768_v17  ;;  %v770_v17 = vld [vmem:[%s7022_s15 + $0x630] sm:$0xff]  ;;  %6069 = vmatmul.mubr.msk.f32.gmra.mrb[108].mxu1 %vm972_vm0, %v901_v8  ;;  %v904_v28 = vld [vmem:[%s7022_s15 + $0xa60] sm:$0xff] }
 0x1ae   : > { %6071 = vmatprep.mubr.msk.f32.mxu1 %vm972_vm0, %v904_v28 }
 0x1af   : > { %v1459_v51 = vpop.f32.mrb[24].mxu0  ;;  %v7557_v8 = vpop.f32.mrb[46].mxu1 }
 0x1b0   : > { %v7535_v54 = vadd.f32 %v7340_v6, %v1459_v51  ;;  %v1461_v62 = vpop.f32.mrb[25].mxu0  ;;  %1723 = vmatmul.mubr.f32.gmra.mrb[130].mxu0 %v767_v33  ;;  %v907_v51 = vld [vmem:[%s7022_s15 + $0xa78] sm:$0xff] }
 0x1b1   : > { %1727 = vmatprep.mubr.f32.mxu0 %v771_v44  ;;  %v773_v44 = vld [vmem:[%s7022_s15 + $0x648] sm:$0xff]  ;;  %6072 = vmatmul.mubr.msk.f32.gmra.mrb[110].mxu1 %vm972_vm0, %v907_v51  ;;  %v776_v51 = vld [vmem:[%s7022_s15 + $0x660] sm:$0xff] }
 0x1b2   : > { %v777_v62 = vld [vmem:[%s7022_s15 + $0x668] sm:$0xff] }
 0x1b3   : > { %v1464_v6 = vpop.f32.mrb[26].mxu0 }
 0x1b4   : > { %v7548_v30 = vadd.f32 %v7337_v4, %v1464_v6  ;;  %v1466_v33 = vpop.f32.mrb[27].mxu0  ;;  %1728 = vmatmul.mubr.f32.gmra.mrb[132].mxu0 %v770_v17  ;;  %v7559_v6 = vpop.f32.mrb[47].mxu1  ;;  %v910_v17 = vld [vmem:[%s7022_s15 + $0xa90] sm:$0xff] }
 0x1b5   : > { %1732 = vmatprep.mubr.f32.mxu0 %v774_v49  ;;  %6074 = vmatprep.mubr.msk.f32.mxu1 %vm972_vm0, %v910_v17  ;;  %v913_v33 = vld [vmem:[%s7022_s15 + $0xaa8] sm:$0xff]  ;;  %v783_v17 = vld [vmem:[%s7022_s15 + $0x698] sm:$0xff] }
 0x1b6   : > { %6075 = vmatmul.mubr.msk.f32.gmra.mrb[112].mxu1 %vm972_vm0, %v913_v33  ;;  %v922_v33 = vld [vmem:[%s7022_s15 + $0xaf0] sm:$0xff] }
 0x1b7   : > { %v1469_v4 = vpop.f32.mrb[28].mxu0  ;;  %6077 = vmatprep.mubr.msk.f32.mxu1 %vm972_vm0, %v916_v63 }
 0x1b8   : > { %v7563_v28 = vadd.f32 %v7350_v12, %v1469_v4  ;;  %v1471_v49 = vpop.f32.mrb[29].mxu0  ;;  %1733 = vmatmul.mubr.f32.gmra.mrb[134].mxu0 %v773_v44  ;;  %v919_v44 = vld [vmem:[%s7022_s15 + $0xad8] sm:$0xff] }
 0x1b9   : > { %1737 = vmatprep.mubr.f32.mxu0 %v777_v62  ;;  %v779_v4 = vld [vmem:[%s7022_s15 + $0x678] sm:$0xff]  ;;  %v7581_v49 = vpop.f32.mrb[48].mxu1 }
 0x1ba   : > { %6078 = vmatmul.mubr.msk.f32.gmra.mrb[114].mxu1 %vm972_vm0, %v919_v44  ;;  %v786_v44 = vld [vmem:[%s7022_s15 + $0x6b0] sm:$0xff] }
 0x1bb   : > { %v1474_v55 = vpop.f32.mrb[30].mxu0  ;;  %6080 = vmatprep.mubr.msk.f32.mxu1 %vm972_vm0, %v922_v33 }
 0x1bc   : > { %v7572_v57 = vadd.f32 %v7347_v10, %v1474_v55  ;;  %v1476_v12 = vpop.f32.mrb[31].mxu0  ;;  %1738 = vmatmul.mubr.f32.gmra.mrb[136].mxu0 %v776_v51  ;;  %v7583_v55 = vpop.f32.mrb[49].mxu1 }
 0x1bd   : > { %1742 = vmatprep.mubr.f32.mxu0 %v780_v0  ;;  %v925_v0 = vld [vmem:[%s7022_s15 + $0xb08] sm:$0xff]  ;;  %v782_v12 = vld [vmem:[%s7022_s15 + $0x690] sm:$0xff]  ;;  %v7599_v33 = vpop.f32.mrb[50].mxu1 }
 0x1be   : > { %6081 = vmatmul.mubr.msk.f32.gmra.mrb[116].mxu1 %vm972_vm0, %v925_v0  ;;  %v7601_v0 = vpop.f32.mrb[51].mxu1 }
 0x1bf   : > { %v1479_v10 = vpop.f32.mrb[32].mxu0  ;;  %6083 = vmatprep.mubr.msk.f32.mxu1 %vm972_vm0, %v928_v53 }
 0x1c0   : > { %v2145_v63 = vadd.f32 %v7356_v16, %v1479_v10  ;;  %v1481_v51 = vpop.f32.mrb[33].mxu0  ;;  %1743 = vmatmul.mubr.f32.gmra.mrb[138].mxu0 %v779_v4  ;;  %v931_v16 = vld [vmem:[%s7022_s15 + $0xb38] sm:$0xff]  ;;  %v785_v4 = vld [vmem:[%s7022_s15 + $0x6a8] sm:$0xff] }
 0x1c1   : > { %1747 = vmatprep.mubr.f32.mxu0 %v783_v17  ;;  %v789_v10 = vld [vmem:[%s7022_s15 + $0x6c8] sm:$0xff] }
 0x1c2   : > { %6084 = vmatmul.mubr.msk.f32.gmra.mrb[118].mxu1 %vm972_vm0, %v931_v16 }
 0x1c3   : > { %v1484_v62 = vpop.f32.mrb[34].mxu0 }
 0x1c4   : > { %v2150_v47 = vadd.f32 %v7353_v14, %v1484_v62  ;;  %v1486_v43 = vpop.f32.mrb[35].mxu0  ;;  %1748 = vmatmul.mubr.f32.gmra.mrb[140].mxu0 %v782_v12  ;;  %v2907_v14 = vld [vmem:[#allocation7 + $0x8] sm:$0xff]  ;;  %v792_v62 = vld [vmem:[%s7022_s15 + $0x6e0] sm:$0xff] }
 0x1c5   : > { %1752 = vmatprep.mubr.f32.mxu0 %v786_v44  ;;  %3123 = vmatprep.mubr.f32.mxu1 %v2907_v14  ;;  %v798_v14 = vld [vmem:[%s7022_s15 + $0x710] sm:$0xff] }
 0x1c6   : > { %v6210_v17 = vpack.c.bf16 %v2150_v47, %v2145_v63  ;;  %v788_v47 = vld [vmem:[%s7022_s15 + $0x6c0] sm:$0xff] }
 0x1c7   : > { %v1489_v51 = vpop.f32.mrb[36].mxu0 }
 0x1c8   : > { %v2155_v43 = vadd.f32 %v7366_v22, %v1489_v51  ;;  %v1491_v53 = vpop.f32.mrb[37].mxu0  ;;  %1753 = vmatmul.mubr.f32.gmra.mrb[142].mxu0 %v785_v4  ;;  %6211 = vmatprep.subr.bf16.mxu1 %v6210_v17  ;;  %v791_v22 = vld [vmem:[%s7022_s15 + $0x6d8] sm:$0xff]  ;;  %v7612_v17 = vpop.f32.mrb[52].mxu1  ;;  %v794_v51 = vld [vmem:[%s7022_s15 + $0x6f0] sm:$0xff] }
 0x1c9   : > { %6213 = vmatpush3.bf16.msra.mxu1 %v6212_v40  ;;  %1757 = vmatprep.mubr.f32.mxu0 %v789_v10  ;;  %v795_v4 = vld [vmem:[%s7022_s15 + $0x6f8] sm:$0xff]  ;;  %v7614_v34 = vpop.f32.mrb[53].mxu1 }
 0x1cb   : > { %v1494_v63 = vpop.f32.mrb[38].mxu0 }
 0x1cc   : > { %v2160_v12 = vadd.f32 %v7363_v20, %v1494_v63  ;;  %v1496_v44 = vpop.f32.mrb[39].mxu0  ;;  %1758 = vmatmul.mubr.f32.gmra.mrb[144].mxu0 %v788_v47  ;;  %v8792_v20 = vpack.c.bf16 %v7408_v58, %v7395_v37  ;;  %v801_v63 = vld [vmem:[%s7022_s15 + $0x728] sm:$0xff] }
 0x1cd   : > { %1762 = vmatprep.mubr.f32.mxu0 %v792_v62  ;;  %v797_v62 = vld [vmem:[%s7022_s15 + $0x708] sm:$0xff] }
 0x1ce   : > { %v6214_v16 = vpack.c.bf16 %v2160_v12, %v2155_v43  ;;  %v7625_v12 = vpop.f32.mrb[54].mxu1 }
 0x1cf   : > { %v1499_v25 = vpop.f32.mrb[40].mxu0  ;;  %v7627_v37 = vpop.f32.mrb[55].mxu1 }
 0x1d0   : > { %v2165_v40 = vadd.f32 %v7375_v29, %v1499_v25  ;;  %v1501_v10 = vpop.f32.mrb[41].mxu0  ;;  %1763 = vmatmul.mubr.f32.gmra.mrb[146].mxu0 %v791_v22  ;;  %6215 = vmatprep.subr.bf16.mxu1 %v6214_v16  ;;  %v800_v16 = vld [vmem:[%s7022_s15 + $0x720] sm:$0xff] }
 0x1d1   : > { %6217 = vmatpush3.bf16.msra.mxu1 %v8792_v20  ;;  %1767 = vmatprep.mubr.f32.mxu0 %v795_v4  ;;  %v804_v4 = vld [vmem:[%s7022_s15 + $0x740] sm:$0xff]  ;;  %v803_v20 = vld [vmem:[%s7022_s15 + $0x738] sm:$0xff] }
 0x1d3   : > { %v1504_v43 = vpop.f32.mrb[42].mxu0 }
 0x1d4   : > { %v2170_v53 = vadd.f32 %v7372_v27, %v1504_v43  ;;  %v1506_v47 = vpop.f32.mrb[43].mxu0  ;;  %1768 = vmatmul.mubr.f32.gmra.mrb[148].mxu0 %v794_v51  ;;  %v8793_v27 = vpack.c.bf16 %v7436_v23, %v7423_v9  ;;  %v807_v51 = vld [vmem:[%s7022_s15 + $0x758] sm:$0xff] }
 0x1d5   : > { %1772 = vmatprep.mubr.f32.mxu0 %v798_v14  ;;  %v7638_v14 = vpop.f32.mrb[56].mxu1  ;;  %v806_v47 = vld [vmem:[%s7022_s15 + $0x750] sm:$0xff] }
 0x1d6   : > { %v6218_v29 = vpack.c.bf16 %v2170_v53, %v2165_v40  ;;  %v7640_v9 = vpop.f32.mrb[57].mxu1 }
 0x1d7   : > { %v1509_v44 = vpop.f32.mrb[44].mxu0 }
 0x1d8   : > { %v2175_v58 = vadd.f32 %v7388_v39, %v1509_v44  ;;  %v1511_v22 = vpop.f32.mrb[45].mxu0  ;;  %1773 = vmatmul.mubr.f32.gmra.mrb[150].mxu0 %v797_v62  ;;  %6219 = vmatprep.subr.bf16.mxu1 %v6218_v29  ;;  %v810_v62 = vld [vmem:[%s7022_s15 + $0x770] sm:$0xff] }
 0x1d9   : > { %6221 = vmatpush3.bf16.msra.mxu1 %v8793_v27  ;;  %1777 = vmatprep.mubr.f32.mxu0 %v801_v63  ;;  %v813_v22 = vld [vmem:[%s7022_s15 + $0x788] sm:$0xff]  ;;  %v7651_v27 = vpop.f32.mrb[58].mxu1 }
 0x1db   : > { %v1514_v25 = vpop.f32.mrb[46].mxu0 }
 0x1dc   : > { %v2180_v40 = vadd.f32 %v7385_v36, %v1514_v25  ;;  %v1516_v10 = vpop.f32.mrb[47].mxu0  ;;  %1778 = vmatmul.mubr.f32.gmra.mrb[152].mxu0 %v800_v16  ;;  %v8794_v36 = vpack.c.bf16 %v7464_v45, %v7451_v38  ;;  %v7653_v38 = vpop.f32.mrb[59].mxu1  ;;  %v812_v25 = vld [vmem:[%s7022_s15 + $0x780] sm:$0xff] }
 0x1dd   : > { %1782 = vmatprep.mubr.f32.mxu0 %v804_v4 }
 0x1de   : > { %v6222_v39 = vpack.c.bf16 %v2180_v40, %v2175_v58  ;;  %v809_v58 = vld [vmem:[%s7022_s15 + $0x768] sm:$0xff]  ;;  %v816_v40 = vld [vmem:[%s7022_s15 + $0x7a0] sm:$0xff] }
 0x1df   : > { %v1519_v43 = vpop.f32.mrb[48].mxu0 }
 0x1e0   : > { %v2185_v23 = vadd.f32 %v7402_v52, %v1519_v43  ;;  %v1521_v53 = vpop.f32.mrb[49].mxu0  ;;  %1783 = vmatmul.mubr.f32.gmra.mrb[154].mxu0 %v803_v20  ;;  %6223 = vmatprep.subr.bf16.mxu1 %v6222_v39  ;;  %v819_v43 = vld [vmem:[%s7022_s15 + $0x7b8] sm:$0xff] }
 0x1e1   : > { %6225 = vmatpush3.bf16.msra.mxu1 %v8794_v36  ;;  %1787 = vmatprep.mubr.f32.mxu0 %v807_v51  ;;  %v815_v51 = vld [vmem:[%s7022_s15 + $0x798] sm:$0xff] }
 0x1e3   : > { %v1524_v29 = vpop.f32.mrb[50].mxu0 }
 0x1e4   : > { %v2190_v63 = vadd.f32 %v7397_v48, %v1524_v29  ;;  %v1526_v44 = vpop.f32.mrb[51].mxu0  ;;  %1788 = vmatmul.mubr.f32.gmra.mrb[156].mxu0 %v806_v47  ;;  %v8795_v48 = vpack.c.bf16 %v7492_v32, %v7479_v15  ;;  %v818_v47 = vld [vmem:[%s7022_s15 + $0x7b0] sm:$0xff] }
 0x1e5   : > { %1792 = vmatprep.mubr.f32.mxu0 %v810_v62  ;;  %v822_v62 = vld [vmem:[%s7022_s15 + $0x7d0] sm:$0xff] }
 0x1e6   : > { %v6226_v52 = vpack.c.bf16 %v2190_v63, %v2185_v23  ;;  %v7664_v23 = vpop.f32.mrb[60].mxu1 }
 0x1e7   : > { %v1529_v16 = vpop.f32.mrb[52].mxu0  ;;  %v7666_v15 = vpop.f32.mrb[61].mxu1 }
 0x1e8   : > { %v2195_v45 = vadd.f32 %v7415_v3, %v1529_v16  ;;  %v1531_v4 = vpop.f32.mrb[53].mxu0  ;;  %1793 = vmatmul.mubr.f32.gmra.mrb[158].mxu0 %v809_v58  ;;  %6227 = vmatprep.subr.bf16.mxu1 %v6226_v52  ;;  %v821_v58 = vld [vmem:[%s7022_s15 + $0x7c8] sm:$0xff] }
 0x1e9   : > { %6229 = vmatpush3.bf16.msra.mxu1 %v8795_v48  ;;  %1797 = vmatprep.mubr.f32.mxu0 %v813_v22  ;;  %v825_v52 = vld [vmem:[%s7022_s15 + $0x7e8] sm:$0xff]  ;;  %v7677_v22 = vpop.f32.mrb[62].mxu1  ;;  %v824_v4 = vld [vmem:[%s7022_s15 + $0x7e0] sm:$0xff] }
 0x1ea   : > { %v828_v48 = vld [vmem:[%s7022_s15 + $0x800] sm:$0xff] }
 0x1eb   : > { %v1534_v10 = vpop.f32.mrb[54].mxu0 }
 0x1ec   : > { %v2200_v20 = vadd.f32 %v7410_v61, %v1534_v10  ;;  %v1536_v39 = vpop.f32.mrb[55].mxu0  ;;  %1798 = vmatmul.mubr.f32.gmra.mrb[160].mxu0 %v812_v25  ;;  %v8796_v61 = vpack.c.bf16 %v7520_v21, %v7507_v56  ;;  %v7679_v56 = vpop.f32.mrb[63].mxu1 }
 0x1ed   : > { %1802 = vmatprep.mubr.f32.mxu0 %v816_v40  ;;  %v831_v39 = vld [vmem:[%s7022_s15 + $0x818] sm:$0xff] }
 0x1ee   : > { %v6230_v3 = vpack.c.bf16 %v2200_v20, %v2195_v45  ;;  %v827_v20 = vld [vmem:[%s7022_s15 + $0x7f8] sm:$0xff] }
 0x1ef   : > { %v1539_v53 = vpop.f32.mrb[56].mxu0 }
 0x1f0   : > { %v2205_v32 = vadd.f32 %v7430_v18, %v1539_v53  ;;  %v1541_v36 = vpop.f32.mrb[57].mxu0  ;;  %1803 = vmatmul.mubr.f32.gmra.mrb[162].mxu0 %v815_v51  ;;  %6231 = vmatprep.subr.bf16.mxu1 %v6230_v3  ;;  %v7690_v51 = vpop.f32.mrb[64].mxu1  ;;  %v830_v53 = vld [vmem:[%s7022_s15 + $0x810] sm:$0xff] }
 0x1f1   : > { %6233 = vmatpush3.bf16.msra.mxu1 %v8796_v61  ;;  %1807 = vmatprep.mubr.f32.mxu0 %v819_v43  ;;  %v7692_v43 = vpop.f32.mrb[65].mxu1  ;;  %v834_v36 = vld [vmem:[%s7022_s15 + $0x830] sm:$0xff] }
 0x1f3   : > { %v1544_v29 = vpop.f32.mrb[58].mxu0 }
 0x1f4   : > { %v2210_v63 = vadd.f32 %v7425_v13, %v1544_v29  ;;  %v1546_v44 = vpop.f32.mrb[59].mxu0  ;;  %1808 = vmatmul.mubr.f32.gmra.mrb[164].mxu0 %v818_v47  ;;  %v8797_v13 = vpack.c.bf16 %v7548_v30, %v7535_v54  ;;  %v2922_v29 = vld [vmem:[#allocation7 + $0x80] sm:$0xff] }
 0x1f5   : > { %1812 = vmatprep.mubr.f32.mxu0 %v822_v62  ;;  %v833_v62 = vld [vmem:[%s7022_s15 + $0x828] sm:$0xff] }
 0x1f6   : > { %v6234_v18 = vpack.c.bf16 %v2210_v63, %v2205_v32  ;;  %v2906_v32 = vld [vmem:[#allocation7] sm:$0xff] }
 0x1f7   : > { %v1549_v16 = vpop.f32.mrb[60].mxu0 }
 0x1f8   : > { %v2215_v21 = vadd.f32 %v7443_v31, %v1549_v16  ;;  %v1551_v45 = vpop.f32.mrb[61].mxu0  ;;  %1813 = vmatmul.mubr.f32.gmra.mrb[166].mxu0 %v821_v58  ;;  %6235 = vmatprep.subr.bf16.mxu1 %v6234_v18  ;;  %v836_v18 = vld [vmem:[%s7022_s15 + $0x840] sm:$0xff] }
 0x1f9   : > { %6237 = vmatpush3.bf16.msra.mxu1 %v8797_v13  ;;  %1817 = vmatprep.mubr.f32.mxu0 %v825_v52  ;;  %v840_v52 = vld [vmem:[%s7022_s15 + $0x860] sm:$0xff]  ;;  %v839_v13 = vld [vmem:[%s7022_s15 + $0x858] sm:$0xff] }
 0x1fb   : > { %v1554_v25 = vpop.f32.mrb[62].mxu0 }
 0x1fc   : > { %v2220_v40 = vadd.f32 %v7438_v26, %v1554_v25  ;;  %v1556_v10 = vpop.f32.mrb[63].mxu0  ;;  %1818 = vmatmul.mubr.f32.gmra.mrb[168].mxu0 %v824_v4  ;;  %v8798_v26 = vpack.c.bf16 %v7572_v57, %v7563_v28  ;;  %v837_v57 = vld [vmem:[%s7022_s15 + $0x848] sm:$0xff]  ;;  %v7709_v28 = vpop.f32.mrb[66].mxu1 }
 0x1fd   : > { %1822 = vmatprep.mubr.f32.mxu0 %v828_v48  ;;  %v7711_v44 = vpop.f32.mrb[67].mxu1 }
 0x1fe   : > { %v6238_v31 = vpack.c.bf16 %v2220_v40, %v2215_v21  ;;  %v7725_v48 = vpop.f32.mrb[68].mxu1 }
 0x1ff   : > { %v1559_v3 = vpop.f32.mrb[64].mxu0  ;;  %v7727_v40 = vpop.f32.mrb[69].mxu1 }
 0x200   : > { %v7695_v54 = vadd.f32 %v7458_v50, %v1559_v3  ;;  %v1561_v30 = vpop.f32.mrb[65].mxu0  ;;  %1823 = vmatmul.mubr.f32.gmra.mrb[170].mxu0 %v827_v20  ;;  %6239 = vmatprep.subr.bf16.mxu1 %v6238_v31  ;;  %v842_v20 = vld [vmem:[%s7022_s15 + $0x870] sm:$0xff] }
 0x201   : > { %6241 = vmatpush3.bf16.msra.mxu1 %v8798_v26  ;;  %1827 = vmatprep.mubr.f32.mxu0 %v831_v39  ;;  %v846_v31 = vld [vmem:[%s7022_s15 + $0x890] sm:$0xff]  ;;  %v845_v26 = vld [vmem:[%s7022_s15 + $0x888] sm:$0xff] }
 0x203   : > { %v1564_v61 = vpop.f32.mrb[66].mxu0 }
 0x204   : > { %v7703_v47 = vadd.f32 %v7453_v42, %v1564_v61  ;;  %v1566_v50 = vpop.f32.mrb[67].mxu0  ;;  %1828 = vmatmul.mubr.f32.gmra.mrb[172].mxu0 %v830_v53  ;;  %3124 = vmatmul.mubr.f32.vlgmr.msra.gmra.mrb[120].mxu1 %v2906_v32  ;;  %v7741_v32 = vpop.f32.mrb[70].mxu1 }
 0x205   : > { %1832 = vmatprep.mubr.f32.mxu0 %v834_v36  ;;  %v7743_v61 = vpop.f32.mrb[71].mxu1 }
 0x207   : > { %v1569_v63 = vpop.f32.mrb[68].mxu0 }
 0x208   : > { %v7714_v42 = vadd.f32 %v7471_v5, %v1569_v63  ;;  %v1571_v58 = vpop.f32.mrb[69].mxu0  ;;  %1833 = vmatmul.mubr.f32.gmra.mrb[174].mxu0 %v833_v62  ;;  %v843_v5 = vld [vmem:[%s7022_s15 + $0x878] sm:$0xff]  ;;  %v848_v62 = vld [vmem:[%s7022_s15 + $0x8a0] sm:$0xff] }
 0x209   : > { %1837 = vmatprep.mubr.f32.mxu0 %v837_v57  ;;  %v852_v57 = vld [vmem:[%s7022_s15 + $0x8c0] sm:$0xff] }
 0x20b   : > { %v1574_v16 = vpop.f32.mrb[70].mxu0 }
 0x20c   : > { %v7719_v21 = vadd.f32 %v7466_v60, %v1574_v16  ;;  %v1576_v45 = vpop.f32.mrb[71].mxu0  ;;  %1838 = vmatmul.mubr.f32.gmra.mrb[176].mxu0 %v836_v18 }
 0x20d   : > { %1842 = vmatprep.mubr.f32.mxu0 %v840_v52  ;;  %v851_v52 = vld [vmem:[%s7022_s15 + $0x8b8] sm:$0xff]  ;;  %v7757_v45 = vpop.f32.mrb[72].mxu1 }
 0x20f   : > { %v1579_v25 = vpop.f32.mrb[72].mxu0 }
 0x210   : > { %v7730_v10 = vadd.f32 %v7486_v24, %v1579_v25  ;;  %v1581_v60 = vpop.f32.mrb[73].mxu0  ;;  %1843 = vmatmul.mubr.f32.gmra.mrb[178].mxu0 %v839_v13  ;;  %v849_v24 = vld [vmem:[%s7022_s15 + $0x8a8] sm:$0xff] }
 0x211   : > { %1847 = vmatprep.mubr.f32.mxu0 %v843_v5  ;;  %v7759_v5 = vpop.f32.mrb[73].mxu1  ;;  %v854_v60 = vld [vmem:[%s7022_s15 + $0x8d0] sm:$0xff] }
 0x213   : > { %v1584_v39 = vpop.f32.mrb[74].mxu0 }
 0x214   : > { %v7735_v3 = vadd.f32 %v7481_v19, %v1584_v39  ;;  %v1586_v30 = vpop.f32.mrb[75].mxu0  ;;  %1848 = vmatmul.mubr.f32.gmra.mrb[180].mxu0 %v842_v20  ;;  %v858_v20 = vld [vmem:[%s7022_s15 + $0x8f0] sm:$0xff] }
 0x215   : > { %1852 = vmatprep.mubr.f32.mxu0 %v846_v31 }
 0x217   : > { %v1589_v36 = vpop.f32.mrb[76].mxu0 }
 0x218   : > { %v7746_v50 = vadd.f32 %v7499_v46, %v1589_v36  ;;  %v1591_v19 = vpop.f32.mrb[77].mxu0  ;;  %1853 = vmatmul.mubr.f32.gmra.mrb[182].mxu0 %v845_v26  ;;  %v855_v46 = vld [vmem:[%s7022_s15 + $0x8d8] sm:$0xff]  ;;  %v857_v26 = vld [vmem:[%s7022_s15 + $0x8e8] sm:$0xff]  ;;  %v7773_v36 = vpop.f32.mrb[74].mxu1 }
 0x219   : > { %1857 = vmatprep.mubr.f32.mxu0 %v849_v24  ;;  %v2923_v24 = vld [vmem:[#allocation7 + $0x88] sm:$0xff] }
 0x21b   : > { %v1594_v63 = vpop.f32.mrb[78].mxu0 }
 0x21c   : > { %v7751_v58 = vadd.f32 %v7494_v35, %v1594_v63  ;;  %v1596_v18 = vpop.f32.mrb[79].mxu0  ;;  %1858 = vmatmul.mubr.f32.gmra.mrb[184].mxu0 %v848_v62  ;;  %v7775_v62 = vpop.f32.mrb[75].mxu1  ;;  %v860_v63 = vld [vmem:[%s7022_s15 + $0x900] sm:$0xff] }
 0x21d   : > { %1862 = vmatprep.mubr.f32.mxu0 %v852_v57  ;;  %v864_v18 = vld [vmem:[%s7022_s15 + $0x920] sm:$0xff] }
 0x21f   : > { %v1599_v13 = vpop.f32.mrb[80].mxu0 }
 0x220   : > { %v7762_v25 = vadd.f32 %v7514_v11, %v1599_v13  ;;  %v1601_v35 = vpop.f32.mrb[81].mxu0  ;;  %1863 = vmatmul.mubr.f32.gmra.mrb[186].mxu0 %v851_v52  ;;  %v861_v11 = vld [vmem:[%s7022_s15 + $0x908] sm:$0xff] }
 0x221   : > { %1867 = vmatprep.mubr.f32.mxu0 %v855_v46  ;;  %v863_v35 = vld [vmem:[%s7022_s15 + $0x918] sm:$0xff] }
 0x223   : > { %v1604_v31 = vpop.f32.mrb[82].mxu0 }
 0x224   : > { %v7767_v39 = vadd.f32 %v7509_v1, %v1604_v31  ;;  %v1606_v30 = vpop.f32.mrb[83].mxu0  ;;  %1868 = vmatmul.mubr.f32.gmra.mrb[188].mxu0 %v854_v60  ;;  %v875_v60 = vld [vmem:[%s7022_s15 + $0x978] sm:$0xff] }
 0x225   : > { %1872 = vmatprep.mubr.f32.mxu0 %v858_v20  ;;  %v7789_v20 = vpop.f32.mrb[76].mxu1 }
 0x226   : > { %v7791_v30 = vpop.f32.mrb[77].mxu1 }
 0x227   : > { %v1609_v19 = vpop.f32.mrb[84].mxu0 }
 0x228   : > { %v7778_v57 = vadd.f32 %v7527_v41, %v1609_v19  ;;  %v1611_v1 = vpop.f32.mrb[85].mxu0  ;;  %1873 = vmatmul.mubr.f32.gmra.mrb[190].mxu0 %v857_v26  ;;  %v867_v41 = vld [vmem:[%s7022_s15 + $0x938] sm:$0xff]  ;;  %v870_v19 = vld [vmem:[%s7022_s15 + $0x950] sm:$0xff] }
 0x229   : > { %1877 = vmatprep.mubr.f32.mxu0 %v861_v11  ;;  %v866_v11 = vld [vmem:[%s7022_s15 + $0x930] sm:$0xff] }
 0x22b   : > { %v1614_v52 = vpop.f32.mrb[86].mxu0 }
 0x22c   : > { %v7783_v46 = vadd.f32 %v7522_v59, %v1614_v52  ;;  %v1616_v13 = vpop.f32.mrb[87].mxu0  ;;  %1878 = vmatmul.mubr.f32.gmra.mrb[192].mxu0 %v860_v63  ;;  %v869_v52 = vld [vmem:[%s7022_s15 + $0x948] sm:$0xff] }
 0x22d   : > { %1882 = vmatprep.mubr.f32.mxu0 %v864_v18 }
 0x22f   : > { %v1619_v31 = vpop.f32.mrb[88].mxu0 }
 0x230   : > { %v7794_v26 = vadd.f32 %v7542_v2, %v1619_v31  ;;  %v1621_v59 = vpop.f32.mrb[89].mxu0  ;;  %1883 = vmatmul.mubr.f32.gmra.mrb[194].mxu0 %v863_v35  ;;  %v873_v2 = vld [vmem:[%s7022_s15 + $0x968] sm:$0xff]  ;;  %v7805_v31 = vpop.f32.mrb[78].mxu1 }
 0x231   : > { %1887 = vmatprep.mubr.f32.mxu0 %v867_v41  ;;  %v7807_v41 = vpop.f32.mrb[79].mxu1 }
 0x233   : > { %v1624_v1 = vpop.f32.mrb[90].mxu0 }
 0x234   : > { %v7799_v63 = vadd.f32 %v7537_v7, %v1624_v1  ;;  %v1626_v18 = vpop.f32.mrb[91].mxu0  ;;  %1888 = vmatmul.mubr.f32.gmra.mrb[196].mxu0 %v866_v11  ;;  %v872_v11 = vld [vmem:[%s7022_s15 + $0x960] sm:$0xff] }
 0x235   : > { %1892 = vmatprep.mubr.f32.mxu0 %v870_v19  ;;  %v876_v19 = vld [vmem:[%s7022_s15 + $0x980] sm:$0xff] }
 0x237   : > { %v1629_v35 = vpop.f32.mrb[92].mxu0 }
 0x238   : > { %v7810_v59 = vadd.f32 %v7559_v6, %v1629_v35  ;;  %v1631_v7 = vpop.f32.mrb[93].mxu0  ;;  %1893 = vmatmul.mubr.f32.gmra.mrb[198].mxu0 %v869_v52  ;;  %v879_v6 = vld [vmem:[%s7022_s15 + $0x998] sm:$0xff]  ;;  %v7821_v35 = vpop.f32.mrb[80].mxu1 }
 0x239   : > { %1897 = vmatprep.mubr.f32.mxu0 %v873_v2  ;;  %v7823_v2 = vpop.f32.mrb[81].mxu1  ;;  %v2915_v7 = vld [vmem:[#allocation7 + $0x48] sm:$0xff] }
 0x23a   : > { %3128 = vmatprep.mubr.f32.mxu1 %v2915_v7  ;;  %v7831_v7 = vpop.f32.mrb[82].mxu1 }
 0x23b   : > { %v1634_v1 = vpop.f32.mrb[94].mxu0 }
 0x23c   : > { %v7815_v18 = vadd.f32 %v7557_v8, %v1634_v1  ;;  %v1636_v13 = vpop.f32.mrb[95].mxu0  ;;  %1898 = vmatmul.mubr.f32.gmra.mrb[200].mxu0 %v872_v11  ;;  %v878_v11 = vld [vmem:[%s7022_s15 + $0x990] sm:$0xff] }
 0x23d   : > { %1902 = vmatprep.mubr.f32.mxu0 %v876_v19  ;;  %v2914_v13 = vld [vmem:[#allocation7 + $0x40] sm:$0xff]  ;;  %v882_v19 = vld [vmem:[%s7022_s15 + $0x9b0] sm:$0xff] }
 0x23e   : > { %3129 = vmatmul.mubr.f32.gmra.mrb[122].mxu1 %v2914_v13  ;;  %v2909_v13 = vld [vmem:[#allocation7 + $0x18] sm:$0xff] }
 0x23f   : > { %v1639_v52 = vpop.f32.mrb[96].mxu0  ;;  %3133 = vmatprep.mubr.f32.mxu1 %v2923_v24  ;;  %v8799_v24 = vpack.c.bf16 %v7703_v47, %v7695_v54 }
 0x240   : > { %v2305_v16 = vadd.f32 %v7583_v55, %v1639_v52  ;;  %v1641_v8 = vpop.f32.mrb[97].mxu0  ;;  %1903 = vmatmul.mubr.f32.gmra.mrb[202].mxu0 %v875_v60  ;;  %v881_v55 = vld [vmem:[%s7022_s15 + $0x9a8] sm:$0xff] }
 0x241   : > { %1907 = vmatprep.mubr.f32.mxu0 %v879_v6  ;;  %v885_v52 = vld [vmem:[%s7022_s15 + $0x9c8] sm:$0xff]  ;;  %v7833_v8 = vpop.f32.mrb[83].mxu1 }
 0x242   : > { %3134 = vmatmul.mubr.f32.gmra.mrb[124].mxu1 %v2922_v29  ;;  %v884_v29 = vld [vmem:[%s7022_s15 + $0x9c0] sm:$0xff] }
 0x243   : > { %v1644_v1 = vpop.f32.mrb[98].mxu0  ;;  %3203 = vmatprep.mubr.f32.mxu1 %v2909_v13  ;;  %v890_v13 = vld [vmem:[%s7022_s15 + $0x9f0] sm:$0xff] }
 0x244   : > { %v2310_v53 = vadd.f32 %v7581_v49, %v1644_v1  ;;  %v1646_v4 = vpop.f32.mrb[99].mxu0  ;;  %1908 = vmatmul.mubr.f32.gmra.mrb[204].mxu0 %v878_v11 }
 0x245   : > { %1912 = vmatprep.mubr.f32.mxu0 %v882_v19 }
 0x246   : > { %v6242_v60 = vpack.c.bf16 %v2310_v53, %v2305_v16  ;;  %v888_v53 = vld [vmem:[%s7022_s15 + $0x9e0] sm:$0xff] }
 0x247   : > { %v1649_v6 = vpop.f32.mrb[100].mxu0 }
 0x248   : > { %v2315_v49 = vadd.f32 %v7601_v0, %v1649_v6  ;;  %v1651_v4 = vpop.f32.mrb[101].mxu0  ;;  %1913 = vmatmul.mubr.f32.gmra.mrb[206].mxu0 %v881_v55  ;;  %6243 = vmatprep.subr.bf16.mxu1 %v6242_v60  ;;  %v887_v0 = vld [vmem:[%s7022_s15 + $0x9d8] sm:$0xff]  ;;  %v7844_v60 = vpop.f32.mrb[84].mxu1 }
 0x249   : > { %6245 = vmatpush3.bf16.msra.mxu1 %v8799_v24  ;;  %1917 = vmatprep.mubr.f32.mxu0 %v885_v52  ;;  %v891_v55 = vld [vmem:[%s7022_s15 + $0x9f8] sm:$0xff]  ;;  %v7846_v47 = vpop.f32.mrb[85].mxu1 }
 0x24b   : > { %v1654_v16 = vpop.f32.mrb[102].mxu0 }
 0x24c   : > { %v2320_v11 = vadd.f32 %v7599_v33, %v1654_v16  ;;  %v1656_v19 = vpop.f32.mrb[103].mxu0  ;;  %1918 = vmatmul.mubr.f32.gmra.mrb[208].mxu0 %v884_v29  ;;  %v8800_v33 = vpack.c.bf16 %v7719_v21, %v7714_v42  ;;  %v897_v16 = vld [vmem:[%s7022_s15 + $0xa28] sm:$0xff] }
 0x24d   : > { %1922 = vmatprep.mubr.f32.mxu0 %v888_v53  ;;  %v893_v53 = vld [vmem:[%s7022_s15 + $0xa08] sm:$0xff] }
 0x24e   : > { %v6246_v1 = vpack.c.bf16 %v2320_v11, %v2315_v49  ;;  %v894_v49 = vld [vmem:[%s7022_s15 + $0xa10] sm:$0xff]  ;;  %v7857_v11 = vpop.f32.mrb[86].mxu1 }
 0x24f   : > { %v1659_v54 = vpop.f32.mrb[104].mxu0  ;;  %v7859_v42 = vpop.f32.mrb[87].mxu1 }
 0x250   : > { %v2325_v52 = vadd.f32 %v7614_v34, %v1659_v54  ;;  %v1661_v6 = vpop.f32.mrb[105].mxu0  ;;  %1923 = vmatmul.mubr.f32.gmra.mrb[210].mxu0 %v887_v0  ;;  %6247 = vmatprep.subr.bf16.mxu1 %v6246_v1  ;;  %v896_v1 = vld [vmem:[%s7022_s15 + $0xa20] sm:$0xff] }
 0x251   : > { %6249 = vmatpush3.bf16.msra.mxu1 %v8800_v33  ;;  %1927 = vmatprep.mubr.f32.mxu0 %v891_v55  ;;  %v900_v55 = vld [vmem:[%s7022_s15 + $0xa40] sm:$0xff]  ;;  %v899_v33 = vld [vmem:[%s7022_s15 + $0xa38] sm:$0xff] }
 0x253   : > { %v1664_v4 = vpop.f32.mrb[106].mxu0 }
 0x254   : > { %v2330_v24 = vadd.f32 %v7612_v17, %v1664_v4  ;;  %v1666_v29 = vpop.f32.mrb[107].mxu0  ;;  %1928 = vmatmul.mubr.f32.gmra.mrb[212].mxu0 %v890_v13  ;;  %v8801_v17 = vpack.c.bf16 %v7735_v3, %v7730_v10  ;;  %v903_v13 = vld [vmem:[%s7022_s15 + $0xa58] sm:$0xff] }
 0x255   : > { %1932 = vmatprep.mubr.f32.mxu0 %v894_v49  ;;  %v7870_v49 = vpop.f32.mrb[88].mxu1  ;;  %v902_v29 = vld [vmem:[%s7022_s15 + $0xa50] sm:$0xff] }
 0x256   : > { %v6250_v34 = vpack.c.bf16 %v2330_v24, %v2325_v52  ;;  %v7872_v24 = vpop.f32.mrb[89].mxu1 }
 0x257   : > { %v1669_v19 = vpop.f32.mrb[108].mxu0 }
 0x258   : > { %v2335_v21 = vadd.f32 %v7627_v37, %v1669_v19  ;;  %v1671_v0 = vpop.f32.mrb[109].mxu0  ;;  %1933 = vmatmul.mubr.f32.gmra.mrb[214].mxu0 %v893_v53  ;;  %6251 = vmatprep.subr.bf16.mxu1 %v6250_v34  ;;  %v6432_v53 = vld [vmem:[%s8774_s3 + $0x8] ss:$28 sps:$4 sm:$0xff]  }
 0x259   : > { %6253 = vmatpush3.bf16.msra.mxu1 %v8801_v17  ;;  %1937 = vmatprep.mubr.f32.mxu0 %v897_v16  ;;  %v6434_v34 = vld [vmem:[%s8774_s3 + $0xc] ss:$28 sps:$4 sm:$0xff]   ;;  %v7889_v17 = vpop.f32.mrb[90].mxu1 }
 0x25a   : > { %4293 = vmatprep.subr.bf16.mxu0 %v6434_v34  ;;  %v909_v0 = vld [vmem:[%s7022_s15 + $0xa88] sm:$0xff]  ;;  %v914_v34 = vld [vmem:[%s7022_s15 + $0xab0] sm:$0xff] }
 0x25b   : > { %v1674_v54 = vpop.f32.mrb[110].mxu0  ;;  %4294 = vmatpush1.bf16.msra.mxu0 %v6432_v53 }
 0x25c   : > { %v2340_v52 = vadd.f32 %v7625_v12, %v1674_v54  ;;  %v1676_v6 = vpop.f32.mrb[111].mxu0  ;;  %1938 = vmatmul.mubr.f32.gmra.mrb[216].mxu0 %v896_v1  ;;  %v8802_v12 = vpack.c.bf16 %v7751_v58, %v7746_v50  ;;  %v905_v50 = vld [vmem:[%s7022_s15 + $0xa68] sm:$0xff] }
 0x25d   : > { %1942 = vmatprep.mubr.f32.mxu0 %v900_v55  ;;  %v7891_v55 = vpop.f32.mrb[91].mxu1  ;;  %v908_v6 = vld [vmem:[%s7022_s15 + $0xa80] sm:$0xff] }
 0x25e   : > { %v6254_v37 = vpack.c.bf16 %v2340_v52, %v2335_v21 }
 0x25f   : > { %v1679_v4 = vpop.f32.mrb[112].mxu0 }
 0x260   : > { %v2345_v10 = vadd.f32 %v7640_v9, %v1679_v4  ;;  %v1681_v3 = vpop.f32.mrb[113].mxu0  ;;  %1943 = vmatmul.mubr.f32.gmra.mrb[218].mxu0 %v899_v33  ;;  %6255 = vmatprep.subr.bf16.mxu1 %v6254_v37  ;;  %v906_v9 = vld [vmem:[%s7022_s15 + $0xa70] sm:$0xff]  ;;  %v912_v33 = vld [vmem:[%s7022_s15 + $0xaa0] sm:$0xff] }
 0x261   : > { %6257 = vmatpush3.bf16.msra.mxu1 %v8802_v12  ;;  %1947 = vmatprep.mubr.f32.mxu0 %v903_v13  ;;  %v915_v3 = vld [vmem:[%s7022_s15 + $0xab8] sm:$0xff]  ;;  %v7902_v12 = vpop.f32.mrb[92].mxu1 }
 0x263   : > { %v1684_v16 = vpop.f32.mrb[114].mxu0 }
 0x264   : > { %v2350_v19 = vadd.f32 %v7638_v14, %v1684_v16  ;;  %v1686_v21 = vpop.f32.mrb[115].mxu0  ;;  %1948 = vmatmul.mubr.f32.gmra.mrb[220].mxu0 %v902_v29  ;;  %v8803_v14 = vpack.c.bf16 %v7767_v39, %v7762_v25  ;;  %v7904_v25 = vpop.f32.mrb[93].mxu1 }
 0x265   : > { %1952 = vmatprep.mubr.f32.mxu0 %v906_v9  ;;  %v918_v9 = vld [vmem:[%s7022_s15 + $0xad0] sm:$0xff] }
 0x266   : > { %v6258_v58 = vpack.c.bf16 %v2350_v19, %v2345_v10  ;;  %v911_v10 = vld [vmem:[%s7022_s15 + $0xa98] sm:$0xff] }
 0x267   : > { %v1689_v1 = vpop.f32.mrb[116].mxu0 }
 0x268   : > { %v2355_v54 = vadd.f32 %v7653_v38, %v1689_v1  ;;  %v1691_v52 = vpop.f32.mrb[117].mxu0  ;;  %1953 = vmatmul.mubr.f32.gmra.mrb[222].mxu0 %v905_v50  ;;  %6259 = vmatprep.subr.bf16.mxu1 %v6258_v58  ;;  %v917_v50 = vld [vmem:[%s7022_s15 + $0xac8] sm:$0xff] }
 0x269   : > { %6261 = vmatpush3.bf16.msra.mxu1 %v8803_v14  ;;  %1957 = vmatprep.mubr.f32.mxu0 %v909_v0  ;;  %v921_v58 = vld [vmem:[%s7022_s15 + $0xae8] sm:$0xff]  ;;  %v7915_v0 = vpop.f32.mrb[94].mxu1  ;;  %v920_v52 = vld [vmem:[%s7022_s15 + $0xae0] sm:$0xff] }
 0x26a   : > { %v924_v14 = vld [vmem:[%s7022_s15 + $0xb00] sm:$0xff] }
 0x26b   : > { %v1694_v37 = vpop.f32.mrb[118].mxu0 }
 0x26c   : > { %v2360_v13 = vadd.f32 %v7651_v27, %v1694_v37  ;;  %v1696_v4 = vpop.f32.mrb[119].mxu0  ;;  %1958 = vmatmul.mubr.f32.gmra.mrb[224].mxu0 %v908_v6  ;;  %v8804_v27 = vpack.c.bf16 %v7783_v46, %v7778_v57  ;;  %v7917_v57 = vpop.f32.mrb[95].mxu1 }
 0x26d   : > { %1962 = vmatprep.mubr.f32.mxu0 %v912_v33  ;;  %v927_v4 = vld [vmem:[%s7022_s15 + $0xb18] sm:$0xff] }
 0x26e   : > { %v6262_v38 = vpack.c.bf16 %v2360_v13, %v2355_v54  ;;  %v923_v13 = vld [vmem:[%s7022_s15 + $0xaf8] sm:$0xff] }
 0x26f   : > { %v1699_v29 = vpop.f32.mrb[120].mxu0 }
 0x270   : > { %v2365_v39 = vadd.f32 %v7666_v15, %v1699_v29  ;;  %v1701_v53 = vpop.f32.mrb[121].mxu0  ;;  %1963 = vmatmul.mubr.f32.gmra.mrb[226].mxu0 %v911_v10  ;;  %6263 = vmatprep.subr.bf16.mxu1 %v6262_v38  ;;  %v7928_v10 = vpop.f32.mrb[96].mxu1  ;;  %v926_v29 = vld [vmem:[%s7022_s15 + $0xb10] sm:$0xff] }
 0x271   : > { %6265 = vmatpush3.bf16.msra.mxu1 %v8804_v27  ;;  %1967 = vmatprep.mubr.f32.mxu0 %v915_v3  ;;  %v7930_v3 = vpop.f32.mrb[97].mxu1  ;;  %v930_v53 = vld [vmem:[%s7022_s15 + $0xb30] sm:$0xff]  ;;  %v2917_v27 = vld [vmem:[#allocation7 + $0x58] sm:$0xff] }
 0x273   : > { %v1704_v16 = vpop.f32.mrb[122].mxu0 }
 0x274   : > { %v2370_v19 = vadd.f32 %v7664_v23, %v1704_v16  ;;  %v1706_v21 = vpop.f32.mrb[123].mxu0  ;;  %1968 = vmatmul.mubr.f32.gmra.mrb[228].mxu0 %v914_v34  ;;  %v8805_v23 = vpack.c.bf16 %v7799_v63, %v7794_v26 }
 0x275   : > { %1972 = vmatprep.mubr.f32.mxu0 %v918_v9  ;;  %v7946_v21 = vpop.f32.mrb[98].mxu1 }
 0x276   : > { %v6266_v15 = vpack.c.bf16 %v2370_v19, %v2365_v39  ;;  %v2908_v39 = vld [vmem:[#allocation7 + $0x10] sm:$0xff] }
 0x277   : > { %v1709_v1 = vpop.f32.mrb[124].mxu0  ;;  %v2916_v19 = vld [vmem:[#allocation7 + $0x50] sm:$0xff] }
 0x278   : > { %v2375_v46 = vadd.f32 %v7679_v56, %v1709_v1  ;;  %v1711_v54 = vpop.f32.mrb[125].mxu0  ;;  %1973 = vmatmul.mubr.f32.gmra.mrb[230].mxu0 %v917_v50  ;;  %6267 = vmatprep.subr.bf16.mxu1 %v6266_v15  ;;  %v7948_v15 = vpop.f32.mrb[99].mxu1  ;;  %v2924_v1 = vld [vmem:[#allocation7 + $0x90] sm:$0xff] }
 0x279   : > { %6269 = vmatpush3.bf16.msra.mxu1 %v8805_v23  ;;  %1977 = vmatprep.mubr.f32.mxu0 %v921_v58 }
 0x27b   : > { %v1714_v6 = vpop.f32.mrb[126].mxu0 }
 0x27c   : > { %v2380_v33 = vadd.f32 %v7677_v22, %v1714_v6  ;;  %v1716_v37 = vpop.f32.mrb[127].mxu0  ;;  %1978 = vmatmul.mubr.f32.gmra.mrb[232].mxu0 %v920_v52  ;;  %v8806_v22 = vpack.c.bf16 %v7815_v18, %v7810_v59  ;;  %v2925_v18 = vld [vmem:[#allocation7 + $0x98] sm:$0xff]  ;;  %v7958_v6 = vpop.f32.mrb[100].mxu1 }
 0x27d   : > { %1982 = vmatprep.mubr.f32.mxu0 %v924_v14 }
 0x27e   : > { %v6270_v56 = vpack.c.bf16 %v2380_v33, %v2375_v46  ;;  %v2911_v46 = vld [vmem:[#allocation7 + $0x28] sm:$0xff]  ;;  %v7960_v33 = vpop.f32.mrb[101].mxu1 }
 0x27f   : > { %v1719_v38 = vpop.f32.mrb[128].mxu0 }
 0x280   : > { %v7933_v26 = vadd.f32 %v7692_v43, %v1719_v38  ;;  %v1721_v63 = vpop.f32.mrb[129].mxu0  ;;  %1983 = vmatmul.mubr.f32.gmra.mrb[234].mxu0 %v923_v13  ;;  %6271 = vmatprep.subr.bf16.mxu1 %v6270_v56  ;;  %v929_v43 = vld [vmem:[%s7022_s15 + $0xb28] sm:$0xff] }
 0x281   : > { %6273 = vmatpush3.bf16.msra.mxu1 %v8806_v22  ;;  %1987 = vmatprep.mubr.f32.mxu0 %v927_v4  ;;  %v7970_v63 = vpop.f32.mrb[102].mxu1 }
 0x283   : > { %v1724_v34 = vpop.f32.mrb[130].mxu0 }
 0x284   : > { %v7941_v9 = vadd.f32 %v7690_v51, %v1724_v34  ;;  %v1726_v16 = vpop.f32.mrb[131].mxu0  ;;  %1988 = vmatmul.mubr.f32.gmra.mrb[236].mxu0 %v926_v29  ;;  %3204 = vmatmul.mubr.f32.vlgmr.msra.gmra.mrb[126].mxu1 %v2908_v39  ;;  %v7972_v29 = vpop.f32.mrb[103].mxu1 }
 0x285   : > { %1992 = vmatprep.mubr.f32.mxu0 %v930_v53  ;;  %3208 = vmatprep.mubr.f32.mxu1 %v2917_v27  ;;  %v6435_v16 = vld [vmem:[%s8774_s3 + $0x40] ss:$28 sps:$4 sm:$0xff]  }
 0x286   : > { %v6276_v59 = vpack.c.bf16 %v7941_v9, %v7933_v26 }
 0x287   : > { %v1729_v50 = vpop.f32.mrb[132].mxu0 }
 0x288   : > { %v7951_v58 = vadd.f32 %v7711_v44, %v1729_v50  ;;  %v1731_v51 = vpop.f32.mrb[133].mxu0  ;;  %1993 = vmatmul.mubr.f32.gmra.mrb[238].mxu0 %v929_v43  ;;  %3209 = vmatmul.mubr.f32.gmra.mrb[128].mxu1 %v2916_v19  ;;  %v6437_v43 = vld [vmem:[%s8774_s3 + $0x44] ss:$28 sps:$4 sm:$0xff]   ;;  %v7988_v19 = vpop.f32.mrb[104].mxu1 }
 0x289   : > { %3213 = vmatprep.mubr.f32.mxu1 %v2925_v18  ;;  %v7990_v18 = vpop.f32.mrb[105].mxu1  ;;  %4295 = vmatprep.subr.bf16.mxu0 %v6437_v43 }
 0x28a   : > { %4296 = vmatpush1.bf16.msra.mxu0 %v6435_v16 }
 0x28b   : > { %v1734_v54 = vpop.f32.mrb[134].mxu0 }
 0x28c   : > { %v7954_v23 = vadd.f32 %v7709_v28, %v1734_v54  ;;  %v1736_v52 = vpop.f32.mrb[135].mxu0  ;;  %3214 = vmatmul.mubr.f32.gmra.mrb[130].mxu1 %v2924_v1 }
 0x28d   : > { %3283 = vmatprep.mubr.f32.mxu1 %v2911_v46  ;;  %v8000_v52 = vpop.f32.mrb[106].mxu1 }
 0x28f   : > { %v1739_v44 = vpop.f32.mrb[136].mxu0 }
 0x290   : > { %v7963_v37 = vadd.f32 %v7727_v40, %v1739_v44  ;;  %v1741_v13 = vpop.f32.mrb[137].mxu0 }
 0x291   : > { %v8002_v13 = vpop.f32.mrb[107].mxu1 }
 0x293   : > { %v1744_v56 = vpop.f32.mrb[138].mxu0 }
 0x294   : > { %v7966_v4 = vadd.f32 %v7725_v48, %v1744_v56  ;;  %v1746_v28 = vpop.f32.mrb[139].mxu0 }
 0x297   : > { %v1749_v22 = vpop.f32.mrb[140].mxu0 }
 0x298   : > { %v7975_v39 = vadd.f32 %v7743_v61, %v1749_v22  ;;  %v1751_v53 = vpop.f32.mrb[141].mxu0 }
 0x29b   : > { %v1754_v40 = vpop.f32.mrb[142].mxu0 }
 0x29c   : > { %v7978_v27 = vadd.f32 %v7741_v32, %v1754_v40  ;;  %v1756_v34 = vpop.f32.mrb[143].mxu0  ;;  %v8012_v40 = vpop.f32.mrb[108].mxu1 }
 0x29d   : > { %v8014_v16 = vpop.f32.mrb[109].mxu1 }
 0x29f   : > { %v1759_v61 = vpop.f32.mrb[144].mxu0 }
 0x2a0   : > { %v7993_v32 = vadd.f32 %v7759_v5, %v1759_v61  ;;  %v1761_v50 = vpop.f32.mrb[145].mxu0 }
 0x2a3   : > { %v1764_v51 = vpop.f32.mrb[146].mxu0 }
 0x2a4   : > { %v7996_v1 = vadd.f32 %v7757_v45, %v1764_v51  ;;  %v1766_v46 = vpop.f32.mrb[147].mxu0 }
 0x2a5   : > { %v8024_v46 = vpop.f32.mrb[110].mxu1 }
 0x2a7   : > { %v1769_v44 = vpop.f32.mrb[148].mxu0 }
 0x2a8   : > { %v8005_v56 = vadd.f32 %v7775_v62, %v1769_v44  ;;  %v1771_v5 = vpop.f32.mrb[149].mxu0 }
 0x2a9   : > { %v8026_v5 = vpop.f32.mrb[111].mxu1 }
 0x2ab   : > { %v1774_v28 = vpop.f32.mrb[150].mxu0 }
 0x2ac   : > { %v8008_v22 = vadd.f32 %v7773_v36, %v1774_v28  ;;  %v1776_v53 = vpop.f32.mrb[151].mxu0 }
 0x2af   : > { %v1779_v34 = vpop.f32.mrb[152].mxu0 }
 0x2b0   : > { %v8017_v43 = vadd.f32 %v7791_v30, %v1779_v34  ;;  %v1781_v61 = vpop.f32.mrb[153].mxu0 }
 0x2b3   : > { %v1784_v62 = vpop.f32.mrb[154].mxu0 }
 0x2b4   : > { %v8020_v50 = vadd.f32 %v7789_v20, %v1784_v62  ;;  %v1786_v51 = vpop.f32.mrb[155].mxu0  ;;  %v8036_v62 = vpop.f32.mrb[112].mxu1 }
 0x2b5   : > { %v8038_v36 = vpop.f32.mrb[113].mxu1 }
 0x2b6   : > { %v8042_v38 = vpop.f32.mrb[114].mxu1 }
 0x2b7   : > { %v1789_v44 = vpop.f32.mrb[156].mxu0 }
 0x2b8   : > { %v8029_v28 = vadd.f32 %v7807_v41, %v1789_v44  ;;  %v1791_v53 = vpop.f32.mrb[157].mxu0 }
 0x2bb   : > { %v1794_v30 = vpop.f32.mrb[158].mxu0 }
 0x2bc   : > { %v8032_v34 = vadd.f32 %v7805_v31, %v1794_v30  ;;  %v1796_v61 = vpop.f32.mrb[159].mxu0  ;;  %v8044_v30 = vpop.f32.mrb[115].mxu1 }
 0x2bf   : > { %v1799_v51 = vpop.f32.mrb[160].mxu0 }
 0x2c0   : > { %v2465_v45 = vadd.f32 %v7823_v2, %v1799_v51  ;;  %v1801_v54 = vpop.f32.mrb[161].mxu0 }
 0x2c3   : > { %v1804_v48 = vpop.f32.mrb[162].mxu0 }
 0x2c4   : > { %v2470_v41 = vadd.f32 %v7821_v35, %v1804_v48  ;;  %v1806_v44 = vpop.f32.mrb[163].mxu0  ;;  %v8051_v48 = vpop.f32.mrb[116].mxu1 }
 0x2c6   : > { %v6274_v53 = vpack.c.bf16 %v2470_v41, %v2465_v45  ;;  %v8053_v41 = vpop.f32.mrb[117].mxu1 }
 0x2c7   : > { %v1809_v31 = vpop.f32.mrb[164].mxu0 }
 0x2c8   : > { %v2475_v61 = vadd.f32 %v7833_v8, %v1809_v31  ;;  %v1811_v20 = vpop.f32.mrb[165].mxu0  ;;  %6275 = vmatprep.subr.bf16.mxu1 %v6274_v53  ;;  %v8807_v8 = vpack.c.bf16 %v7954_v23, %v7951_v58  ;;  %v6440_v58 = vld [vmem:[%s8774_s3 + $0x7c] ss:$28 sps:$4 sm:$0xff]  }
 0x2c9   : > { %6277 = vmatpush3.bf16.msra.mxu1 %v6276_v59  ;;  %v8060_v20 = vpop.f32.mrb[118].mxu1  ;;  %4297 = vmatprep.subr.bf16.mxu0 %v6440_v58 }
 0x2ca   : > { %v8062_v31 = vpop.f32.mrb[119].mxu1 }
 0x2cb   : > { %v1814_v2 = vpop.f32.mrb[166].mxu0 }
 0x2cc   : > { %v2480_v54 = vadd.f32 %v7831_v7, %v1814_v2  ;;  %v1816_v51 = vpop.f32.mrb[167].mxu0 }
 0x2ce   : > { %v6278_v35 = vpack.c.bf16 %v2480_v54, %v2475_v61 }
 0x2cf   : > { %v1819_v45 = vpop.f32.mrb[168].mxu0 }
 0x2d0   : > { %v2485_v44 = vadd.f32 %v7846_v47, %v1819_v45  ;;  %v1821_v14 = vpop.f32.mrb[169].mxu0  ;;  %6279 = vmatprep.subr.bf16.mxu1 %v6278_v35  ;;  %v6438_v47 = vld [vmem:[%s8774_s3 + $0x78] ss:$28 sps:$4 sm:$0xff]  }
 0x2d1   : > { %6281 = vmatpush3.bf16.msra.mxu1 %v8807_v8  ;;  %4298 = vmatpush1.bf16.msra.mxu0 %v6438_v47  ;;  %v6444_v47 = vld [vmem:[%s8774_s3 + $0xe8] ss:$28 sps:$4 sm:$0xff]  }
 0x2d3   : > { %v1824_v26 = vpop.f32.mrb[170].mxu0 }
 0x2d4   : > { %v2490_v9 = vadd.f32 %v7844_v60, %v1824_v26  ;;  %v1826_v59 = vpop.f32.mrb[171].mxu0  ;;  %v8808_v60 = vpack.c.bf16 %v7966_v4, %v7963_v37 }
 0x2d6   : > { %v6282_v7 = vpack.c.bf16 %v2490_v9, %v2485_v44  ;;  %v8809_v44 = vpack.c.bf16 %v7978_v27, %v7975_v39  ;;  %v6441_v39 = vld [vmem:[%s8774_s3 + $0xb0] ss:$28 sps:$4 sm:$0xff]  }
 0x2d7   : > { %v1829_v53 = vpop.f32.mrb[172].mxu0  ;;  %v5772_v27 = vpop.f32.mrb[120].mxu1 }
 0x2d8   : > { %v2495_v61 = vadd.f32 %v7859_v42, %v1829_v53  ;;  %v1831_v2 = vpop.f32.mrb[173].mxu0  ;;  %6283 = vmatprep.subr.bf16.mxu1 %v6282_v7  ;;  %v8810_v7 = vpack.c.bf16 %v7996_v1, %v7993_v32 }
 0x2d9   : > { %6285 = vmatpush3.bf16.msra.mxu1 %v8808_v60  ;;  %v6446_v2 = vld [vmem:[%s8774_s3 + $0xec] ss:$28 sps:$4 sm:$0xff]  }
 0x2db   : > { %v1834_v23 = vpop.f32.mrb[174].mxu0 }
 0x2dc   : > { %v2500_v14 = vadd.f32 %v7857_v11, %v1834_v23  ;;  %v1836_v42 = vpop.f32.mrb[175].mxu0  ;;  %v8811_v23 = vpack.c.bf16 %v8008_v22, %v8005_v56 }
 0x2de   : > { %v6286_v54 = vpack.c.bf16 %v2500_v14, %v2495_v61 }
 0x2df   : > { %v1839_v51 = vpop.f32.mrb[176].mxu0 }
 0x2e0   : > { %v2505_v35 = vadd.f32 %v7872_v24, %v1839_v51  ;;  %v1841_v45 = vpop.f32.mrb[177].mxu0  ;;  %6287 = vmatprep.subr.bf16.mxu1 %v6286_v54 }
 0x2e1   : > { %6289 = vmatpush3.bf16.msra.mxu1 %v8809_v44 }
 0x2e3   : > { %v1844_v8 = vpop.f32.mrb[178].mxu0 }
 0x2e4   : > { %v2510_v37 = vadd.f32 %v7870_v49, %v1844_v8  ;;  %v1846_v4 = vpop.f32.mrb[179].mxu0  ;;  %v6443_v49 = vld [vmem:[%s8774_s3 + $0xb4] ss:$28 sps:$4 sm:$0xff]  }
 0x2e5   : > { %4299 = vmatprep.subr.bf16.mxu0 %v6443_v49 }
 0x2e6   : > { %v6290_v26 = vpack.c.bf16 %v2510_v37, %v2505_v35  ;;  %4300 = vmatpush1.bf16.msra.mxu0 %v6441_v39 }
 0x2e7   : > { %v1849_v9 = vpop.f32.mrb[180].mxu0  ;;  %4301 = vmatprep.subr.bf16.mxu0 %v6446_v2 }
 0x2e8   : > { %v2515_v59 = vadd.f32 %v7891_v55, %v1849_v9  ;;  %v1851_v11 = vpop.f32.mrb[181].mxu0  ;;  %6291 = vmatprep.subr.bf16.mxu1 %v6290_v26  ;;  %v5773_v55 = vpop.f32.mrb[121].mxu1  ;;  %v8813_v9 = vpack.c.bf16 %v8032_v34, %v8029_v28  ;;  %v2926_v28 = vld [vmem:[#allocation7 + $0xa0] sm:$0xff] }
 0x2e9   : > { %6293 = vmatpush3.bf16.msra.mxu1 %v8810_v7  ;;  %v8094_v32 = vadd.f32 %v5773_v55, %v5772_v27  ;;  %v2919_v11 = vld [vmem:[#allocation7 + $0x68] sm:$0xff] }
 0x2ea   : > { %4302 = vmatpush1.bf16.msra.mxu0 %v6444_v47 }
 0x2eb   : > { %v1854_v24 = vpop.f32.mrb[182].mxu0 }
 0x2ec   : > { %v2520_v53 = vadd.f32 %v7889_v17, %v1854_v24  ;;  %v1856_v61 = vpop.f32.mrb[183].mxu0  ;;  %v2918_v24 = vld [vmem:[#allocation7 + $0x60] sm:$0xff] }
 0x2ee   : > { %v6294_v1 = vpack.c.bf16 %v2520_v53, %v2515_v59  ;;  %v8814_v59 = vmov 0.0|0.0   ;;  %v2913_v53 = vld [vmem:[#allocation7 + $0x38] sm:$0xff] }
 0x2ef   : > { %v1859_v58 = vpop.f32.mrb[184].mxu0 }
 0x2f0   : > { %v2525_v60 = vadd.f32 %v7904_v25, %v1859_v58  ;;  %v1861_v17 = vpop.f32.mrb[185].mxu0  ;;  %6295 = vmatprep.subr.bf16.mxu1 %v6294_v1  ;;  %v8812_v25 = vpack.c.bf16 %v8020_v50, %v8017_v43 }
 0x2f1   : > { %6297 = vmatpush3.bf16.msra.mxu1 %v8811_v23 }
 0x2f3   : > { %v1864_v14 = vpop.f32.mrb[186].mxu0 }
 0x2f4   : > { %v2530_v42 = vadd.f32 %v7902_v12, %v1864_v14  ;;  %v1866_v54 = vpop.f32.mrb[187].mxu0 }
 0x2f6   : > { %v6298_v51 = vpack.c.bf16 %v2530_v42, %v2525_v60 }
 0x2f7   : > { %v1869_v35 = vpop.f32.mrb[188].mxu0 }
 0x2f8   : > { %v2535_v45 = vadd.f32 %v7917_v57, %v1869_v35  ;;  %v1871_v44 = vpop.f32.mrb[189].mxu0  ;;  %6299 = vmatprep.subr.bf16.mxu1 %v6298_v51  ;;  %v2910_v57 = vld [vmem:[#allocation7 + $0x20] sm:$0xff] }
 0x2f9   : > { %6301 = vmatpush3.bf16.msra.mxu1 %v8812_v25 }
 0x2fb   : > { %v1874_v8 = vpop.f32.mrb[190].mxu0 }
 0x2fc   : > { %v2540_v37 = vadd.f32 %v7915_v0, %v1874_v8  ;;  %v1876_v56 = vpop.f32.mrb[191].mxu0 }
 0x2fe   : > { %v6302_v22 = vpack.c.bf16 %v2540_v37, %v2535_v45 }
 0x2ff   : > { %v1879_v4 = vpop.f32.mrb[192].mxu0 }
 0x300   : > { %v2545_v26 = vadd.f32 %v7930_v3, %v1879_v4  ;;  %v1881_v12 = vpop.f32.mrb[193].mxu0  ;;  %6303 = vmatprep.subr.bf16.mxu1 %v6302_v22  ;;  %v2927_v3 = vld [vmem:[#allocation7 + $0xa8] sm:$0xff] }
 0x301   : > { %6305 = vmatpush3.bf16.msra.mxu1 %v8813_v9 }
 0x302   : > { %6306 = vmatprep.subr.bf16.mxu1 %v8814_v59 }
 0x303   : > { %v1884_v43 = vpop.f32.mrb[194].mxu0 }
 0x304   : > { %v2550_v50 = vadd.f32 %v7928_v10, %v1884_v43  ;;  %v1886_v7 = vpop.f32.mrb[195].mxu0  ;;  %3284 = vmatmul.mubr.f32.vlgmr.msra.gmra.mrb[132].mxu1 %v2910_v57 }
 0x305   : > { %3288 = vmatprep.mubr.f32.mxu1 %v2919_v11 }
 0x306   : > { %v6307_v0 = vpack.c.bf16 %v2550_v50, %v2545_v26 }
 0x307   : > { %v1889_v39 = vpop.f32.mrb[196].mxu0 }
 0x308   : > { %v2555_v49 = vadd.f32 %v7948_v15, %v1889_v39  ;;  %v1891_v27 = vpop.f32.mrb[197].mxu0  ;;  %6308 = vmatpush1.bf16.msra.mxu1 %v6307_v0 }
 0x309   : > { %3289 = vmatmul.mubr.f32.gmra.mrb[134].mxu1 %v2918_v24  ;;  %6309 = vmatprep.subr.bf16.mxu1 %v8814_v59 }
 0x30a   : > { %3293 = vmatprep.mubr.f32.mxu1 %v2927_v3 }
 0x30b   : > { %v1894_v34 = vpop.f32.mrb[198].mxu0 }
 0x30c   : > { %v2560_v10 = vadd.f32 %v7946_v21, %v1894_v34  ;;  %v1896_v61 = vpop.f32.mrb[199].mxu0 }
 0x30d   : > { %3294 = vmatmul.mubr.f32.gmra.mrb[136].mxu1 %v2926_v28 }
 0x30e   : > { %v6310_v55 = vpack.c.bf16 %v2560_v10, %v2555_v49  ;;  %5303 = vmatprep.mubr.msk.f32.mxu1 %vm972_vm0, %v2913_v53 }
 0x30f   : > { %v1899_v2 = vpop.f32.mrb[200].mxu0 }
 0x310   : > { %v2565_v1 = vadd.f32 %v7960_v33, %v1899_v2  ;;  %v1901_v15 = vpop.f32.mrb[201].mxu0  ;;  %6311 = vmatpush1.bf16.msra.mxu1 %v6310_v55 }
 0x311   : > { %6312 = vmatprep.subr.bf16.mxu1 %v8814_v59  ;;  %v5775_v17 = vpop.f32.mrb[122].mxu1 }
 0x312   : > { %v5776_v23 = vpop.f32.mrb[123].mxu1 }
 0x313   : > { %v1904_v47 = vpop.f32.mrb[202].mxu0  ;;  %v8122_v21 = vadd.f32 %v5776_v23, %v5775_v17 }
 0x314   : > { %v2570_v58 = vadd.f32 %v7958_v6, %v1904_v47  ;;  %v1906_v60 = vpop.f32.mrb[203].mxu0 }
 0x315   : > { %v5778_v35 = vpop.f32.mrb[124].mxu1 }
 0x316   : > { %v6313_v14 = vpack.c.bf16 %v2570_v58, %v2565_v1  ;;  %v5779_v33 = vpop.f32.mrb[125].mxu1 }
 0x317   : > { %v1909_v42 = vpop.f32.mrb[204].mxu0  ;;  %v8126_v45 = vadd.f32 %v5779_v33, %v5778_v35 }
 0x318   : > { %v2575_v54 = vadd.f32 %v7972_v29, %v1909_v42  ;;  %v1911_v51 = vpop.f32.mrb[205].mxu0  ;;  %6314 = vmatpush1.bf16.msra.mxu1 %v6313_v14 }
 0x319   : > { %6315 = vmatprep.subr.bf16.mxu1 %v8814_v59 }
 0x31b   : > { %v1914_v44 = vpop.f32.mrb[206].mxu0 }
 0x31c   : > { %v2580_v6 = vadd.f32 %v7970_v63, %v1914_v44  ;;  %v1916_v25 = vpop.f32.mrb[207].mxu0 }
 0x31e   : > { %v6316_v8 = vpack.c.bf16 %v2580_v6, %v2575_v54 }
 0x31f   : > { %v1919_v37 = vpop.f32.mrb[208].mxu0 }
 0x320   : > { %v2585_v56 = vadd.f32 %v7990_v18, %v1919_v37  ;;  %v1921_v22 = vpop.f32.mrb[209].mxu0  ;;  %6317 = vmatpush1.bf16.msra.mxu1 %v6316_v8 }
 0x321   : > { %6318 = vmatprep.subr.bf16.mxu1 %v8814_v59 }
 0x323   : > { %v1924_v29 = vpop.f32.mrb[210].mxu0 }
 0x324   : > { %v2590_v4 = vadd.f32 %v7988_v19, %v1924_v29  ;;  %v1926_v26 = vpop.f32.mrb[211].mxu0 }
 0x326   : > { %v6319_v12 = vpack.c.bf16 %v2590_v4, %v2585_v56 }
 0x327   : > { %v1929_v9 = vpop.f32.mrb[212].mxu0 }
 0x328   : > { %v2595_v57 = vadd.f32 %v8002_v13, %v1929_v9  ;;  %v1931_v11 = vpop.f32.mrb[213].mxu0  ;;  %6320 = vmatpush1.bf16.msra.mxu1 %v6319_v12  ;;  %v2912_v12 = vld [vmem:[#allocation7 + $0x30] sm:$0xff] }
 0x329   : > { %6321 = vmatprep.subr.bf16.mxu1 %v8814_v59  ;;  %v6450_v11 = vld [vmem:[%s8774_s3 + $0x1c0] ss:$28 sps:$4 sm:$0xff]  }
 0x32b   : > { %v1934_v63 = vpop.f32.mrb[214].mxu0 }
 0x32c   : > { %v2600_v43 = vadd.f32 %v8000_v52, %v1934_v63  ;;  %v1936_v18 = vpop.f32.mrb[215].mxu0  ;;  %v6452_v63 = vld [vmem:[%s8774_s3 + $0x1c4] ss:$28 sps:$4 sm:$0xff]  }
 0x32d   : > { %v2920_v18 = vld [vmem:[#allocation7 + $0x70] sm:$0xff] }
 0x32e   : > { %v6322_v50 = vpack.c.bf16 %v2600_v43, %v2595_v57  ;;  %v6455_v43 = vld [vmem:[%s8774_s3 + $0x1fc] ss:$28 sps:$4 sm:$0xff]  }
 0x32f   : > { %v1939_v7 = vpop.f32.mrb[216].mxu0 }
 0x330   : > { %v2605_v0 = vadd.f32 %v8014_v16, %v1939_v7  ;;  %v1941_v24 = vpop.f32.mrb[217].mxu0  ;;  %6323 = vmatpush1.bf16.msra.mxu1 %v6322_v50  ;;  %v2929_v50 = vld [vmem:[#allocation7 + $0xb8] sm:$0xff]  ;;  %v6458_v7 = vld [vmem:[%s8774_s3 + $0x234] ss:$28 sps:$4 sm:$0xff]  }
 0x331   : > { %6324 = vmatprep.subr.bf16.mxu1 %v8814_v59  ;;  %v6456_v24 = vld [vmem:[%s8774_s3 + $0x230] ss:$28 sps:$4 sm:$0xff]  }
 0x333   : > { %v1944_v19 = vpop.f32.mrb[218].mxu0 }
 0x334   : > { %v2610_v39 = vadd.f32 %v8012_v40, %v1944_v19  ;;  %v1946_v13 = vpop.f32.mrb[219].mxu0  ;;  %v6461_v19 = vld [vmem:[%s8774_s3 + $0x26c] ss:$28 sps:$4 sm:$0xff]  }
 0x335   : > { %v6464_v13 = vld [vmem:[%s8774_s3 + $0x2a4] ss:$28 sps:$4 sm:$0xff]  }
 0x336   : > { %v6325_v3 = vpack.c.bf16 %v2610_v39, %v2605_v0  ;;  %v2928_v0 = vld [vmem:[#allocation7 + $0xb0] sm:$0xff]  ;;  %v6459_v39 = vld [vmem:[%s8774_s3 + $0x268] ss:$28 sps:$4 sm:$0xff]  }
 0x337   : > { %v1949_v49 = vpop.f32.mrb[220].mxu0 }
 0x338   : > { %v2615_v27 = vadd.f32 %v8026_v5, %v1949_v49  ;;  %v1951_v28 = vpop.f32.mrb[221].mxu0  ;;  %6326 = vmatpush1.bf16.msra.mxu1 %v6325_v3  ;;  %v6462_v3 = vld [vmem:[%s8774_s3 + $0x2a0] ss:$28 sps:$4 sm:$0xff]  }
 0x339   : > { %6327 = vmatprep.subr.bf16.mxu1 %v8814_v59  ;;  %v6467_v49 = vld [vmem:[%s8774_s3 + $0x2dc] ss:$28 sps:$4 sm:$0xff]  }
 0x33a   : > { %v6470_v28 = vld [vmem:[%s8774_s3 + $0x15c] ss:$28 sps:$4 sm:$0xff]  }
 0x33b   : > { %v1954_v52 = vpop.f32.mrb[222].mxu0 }
 0x33c   : > { %v2620_v34 = vadd.f32 %v8024_v46, %v1954_v52  ;;  %v1956_v16 = vpop.f32.mrb[223].mxu0  ;;  %v6468_v52 = vld [vmem:[%s8774_s3 + $0x158] ss:$28 sps:$4 sm:$0xff]  }
 0x33d   : > { %v6471_v16 = vld [vmem:[%s8774_s3 + $0x310] ss:$28 sps:$4 sm:$0xff]  }
 0x33e   : > { %v6328_v53 = vpack.c.bf16 %v2620_v34, %v2615_v27  ;;  %v6465_v27 = vld [vmem:[%s8774_s3 + $0x2d8] ss:$28 sps:$4 sm:$0xff]  }
 0x33f   : > { %v1959_v10 = vpop.f32.mrb[224].mxu0  ;;  %v6473_v34 = vld [vmem:[%s8774_s3 + $0x314] ss:$28 sps:$4 sm:$0xff]  }
 0x340   : > { %v2625_v61 = vadd.f32 %v8038_v36, %v1959_v10  ;;  %v1961_v55 = vpop.f32.mrb[225].mxu0  ;;  %6329 = vmatpush1.bf16.msra.mxu1 %v6328_v53  ;;  %v6476_v53 = vld [vmem:[%s8774_s3 + $0x194] ss:$28 sps:$4 sm:$0xff]  }
 0x341   : > { %6330 = vmatprep.subr.bf16.mxu1 %v8814_v59  ;;  %v6474_v10 = vld [vmem:[%s8774_s3 + $0x190] ss:$28 sps:$4 sm:$0xff]   ;;  %v6477_v55 = vld [vmem:[%s8774_s3 + $0x348] ss:$28 sps:$4 sm:$0xff]  }
 0x343   : > { %v1964_v40 = vpop.f32.mrb[226].mxu0 }
 0x344   : > { %v2630_v2 = vadd.f32 %v8036_v62, %v1964_v40  ;;  %v1966_v5 = vpop.f32.mrb[227].mxu0  ;;  %v6824_v40 = vmov 0  }
 0x345   : > { %4325 = vmatprep.mubr.bf16.mxu0 %v6824_v40  ;;  %v6483_v5 = vld [vmem:[%s8774_s3 + $0x1cc] ss:$28 sps:$4 sm:$0xff]  }
 0x346   : > { %v6331_v1 = vpack.c.bf16 %v2630_v2, %v2625_v61  ;;  %v6479_v61 = vld [vmem:[%s8774_s3 + $0x34c] ss:$28 sps:$4 sm:$0xff]   ;;  %v6825_v2 = vmov 0.0  }
 0x347   : > { %v1969_v15 = vpop.f32.mrb[228].mxu0 }
 0x348   : > { %v2635_v47 = vadd.f32 %v8044_v30, %v1969_v15  ;;  %v1971_v58 = vpop.f32.mrb[229].mxu0  ;;  %6332 = vmatpush1.bf16.msra.mxu1 %v6331_v1 }
 0x349   : > { %6333 = vmatprep.subr.bf16.mxu1 %v8814_v59 }
 0x34b   : > { %v1974_v46 = vpop.f32.mrb[230].mxu0 }
 0x34c   : > { %v2640_v60 = vadd.f32 %v8042_v38, %v1974_v46  ;;  %v1976_v36 = vpop.f32.mrb[231].mxu0 }
 0x34e   : > { %v6334_v17 = vpack.c.bf16 %v2640_v60, %v2635_v47 }
 0x34f   : > { %v1979_v23 = vpop.f32.mrb[232].mxu0 }
 0x350   : > { %v2645_v14 = vadd.f32 %v8053_v41, %v1979_v23  ;;  %v1981_v42 = vpop.f32.mrb[233].mxu0  ;;  %6335 = vmatpush1.bf16.msra.mxu1 %v6334_v17 }
 0x351   : > { %6336 = vmatprep.subr.bf16.mxu1 %v8814_v59 }
 0x353   : > { %v1984_v62 = vpop.f32.mrb[234].mxu0 }
 0x354   : > { %v2650_v54 = vadd.f32 %v8051_v48, %v1984_v62  ;;  %v1986_v30 = vpop.f32.mrb[235].mxu0 }
 0x356   : > { %v6337_v51 = vpack.c.bf16 %v2650_v54, %v2645_v14 }
 0x357   : > { %v1989_v35 = vpop.f32.mrb[236].mxu0  ;;  %v5813_v33 = vpop.f32.mrb[126].mxu1 }
 0x358   : > { %v2655_v44 = vadd.f32 %v8062_v31, %v1989_v35  ;;  %v1991_v6 = vpop.f32.mrb[237].mxu0  ;;  %6338 = vmatpush1.bf16.msra.mxu1 %v6337_v51  ;;  %v5814_v38 = vpop.f32.mrb[127].mxu1 }
 0x359   : > { %6339 = vmatprep.subr.bf16.mxu1 %v8814_v59  ;;  %v5815_v25 = vadd.f32 %v5814_v38, %v5813_v33  ;;  %v2921_v59 = vld [vmem:[#allocation7 + $0x78] sm:$0xff] }
 0x35a   : > { %v6480_v6 = vld [vmem:[%s8774_s3 + $0x18] ss:$28 sps:$4 sm:$0xff]  }
 0x35b   : > { %v1994_v41 = vpop.f32.mrb[238].mxu0  ;;  %v8153_v8 = vadd.f32 %v5815_v25, %v8094_v32  ;;  %v5816_v37 = vpop.f32.mrb[128].mxu1  ;;  %v6447_v32 = vld [vmem:[%s8774_s3 + $0x120] ss:$28 sps:$4 sm:$0xff]  }
 0x35c   : > { %v2660_v56 = vadd.f32 %v8060_v20, %v1994_v41  ;;  %v1996_v48 = vpop.f32.mrb[239].mxu0  ;;  %v5817_v22 = vpop.f32.mrb[129].mxu1  ;;  %v6449_v20 = vld [vmem:[%s8774_s3 + $0x124] ss:$28 sps:$4 sm:$0xff]  }
 0x35d   : > { %v5818_v29 = vadd.f32 %v5817_v22, %v5816_v37  ;;  %4303 = vmatprep.subr.bf16.mxu0 %v6449_v20  ;;  %v6481_v41 = vld [vmem:[%s8774_s3 + $0x1c8] ss:$28 sps:$4 sm:$0xff]   ;;  %v6484_v22 = vld [vmem:[%s8774_s3 + $0x50] ss:$28 sps:$4 sm:$0xff]  }
 0x35e   : > { %v6340_v4 = vpack.c.bf16 %v2660_v56, %v2655_v44  ;;  %4304 = vmatpush1.bf16.msra.mxu0 %v6447_v32  ;;  %v6487_v56 = vld [vmem:[%s8774_s3 + $0x204] ss:$28 sps:$4 sm:$0xff]   ;;  %v6496_v32 = vld [vmem:[%s8774_s3 + $0xf8] ss:$28 sps:$4 sm:$0xff]  }
 0x35f   : > { %v8157_v26 = vadd.f32 %v5818_v29, %v8122_v21  ;;  %v5819_v31 = vpop.f32.mrb[130].mxu1  ;;  %4305 = vmatprep.subr.bf16.mxu0 %v6470_v28  ;;  %v6485_v29 = vld [vmem:[%s8774_s3 + $0x200] ss:$28 sps:$4 sm:$0xff]   ;;  %v6497_v20 = vld [vmem:[%s8774_s3 + $0x2a8] ss:$28 sps:$4 sm:$0xff]  }
 0x360   : > { %6341 = vmatpush1.bf16.msra.mxu1 %v6340_v4  ;;  %v5820_v9 = vpop.f32.mrb[131].mxu1  ;;  %v6491_v4 = vld [vmem:[%s8774_s3 + $0x23c] ss:$28 sps:$4 sm:$0xff]  }
 0x361   : > { %v5821_v57 = vadd.f32 %v5820_v9, %v5819_v31  ;;  %3801 = vmatprep.subr.bf16.mxu1 %v6452_v63  ;;  %v6489_v31 = vld [vmem:[%s8774_s3 + $0x238] ss:$28 sps:$4 sm:$0xff]   ;;  %v6492_v9 = vld [vmem:[%s8774_s3 + $0xc0] ss:$28 sps:$4 sm:$0xff]  }
 0x362   : > { %4306 = vmatpush1.bf16.msra.mxu0 %v6468_v52  ;;  %v6501_v63 = vld [vmem:[%s8774_s3 + $0x2e0] ss:$28 sps:$4 sm:$0xff]   ;;  %v6521_v52 = vld [vmem:[%s8774_s3 + $0x208] ss:$28 sps:$4 sm:$0xff]  }
 0x363   : > { %3364 = vmatmul.mubr.f32.vlgmr.msra.gmra.mrb[138].mxu1 %v2912_v12  ;;  %v8169_v21 = vadd.f32 %v5821_v57, %v8126_v45  ;;  %v6453_v45 = vld [vmem:[%s8774_s3 + $0x1f8] ss:$28 sps:$4 sm:$0xff]   ;;  %4307 = vmatprep.subr.bf16.mxu0 %v6476_v53  ;;  %v6499_v57 = vld [vmem:[%s8774_s3 + $0x2ac] ss:$28 sps:$4 sm:$0xff]  }
 0x364   : > { %5304 = vmatprep.mubr.msk.f32.mxu1 %vm972_vm0, %v2921_v59  ;;  %3802 = vmatpush1.bf16.msra.mxu1 %v6450_v11  ;;  %v6495_v12 = vld [vmem:[%s8774_s3 + $0x274] ss:$28 sps:$4 sm:$0xff]   ;;  %v6503_v11 = vld [vmem:[%s8774_s3 + $0x2e4] ss:$28 sps:$4 sm:$0xff]   ;;  %v6526_v28 = vld [vmem:[%s8774_s3 + $0x3fc] ss:$28 sps:$4 sm:$0xff]  }
 0x365   : > { %3803 = vmatprep.subr.bf16.mxu1 %v6455_v43  ;;  %v6493_v59 = vld [vmem:[%s8774_s3 + $0x270] ss:$28 sps:$4 sm:$0xff]   ;;  %v6507_v43 = vld [vmem:[%s8774_s3 + $0x31c] ss:$28 sps:$4 sm:$0xff]  }
 0x366   : > { %4308 = vmatpush1.bf16.msra.mxu0 %v6474_v10  ;;  %v6532_v53 = vld [vmem:[%s8774_s3 + $0x434] ss:$28 sps:$4 sm:$0xff]   ;;  %v6527_v10 = vld [vmem:[%s8774_s3 + $0x240] ss:$28 sps:$4 sm:$0xff]  }
 0x367   : > { %3369 = vmatmul.mubr.f32.gmra.mrb[140].mxu1 %v2920_v18  ;;  %6106 = vmatprep.subr.bf16.mxu0 %v6825_v2  ;;  %v6504_v18 = vld [vmem:[%s8774_s3 + $0x168] ss:$28 sps:$4 sm:$0xff]  }
 0x368   : > { %5305 = vmatprep.mubr.msk.f32.mxu1 %vm972_vm0, %v2929_v50  ;;  %3804 = vmatpush1.bf16.msra.mxu1 %v6453_v45  ;;  %v6505_v50 = vld [vmem:[%s8774_s3 + $0x318] ss:$28 sps:$4 sm:$0xff]  }
 0x369   : > { %3805 = vmatprep.subr.bf16.mxu1 %v6458_v7  ;;  %v6511_v45 = vld [vmem:[%s8774_s3 + $0x354] ss:$28 sps:$4 sm:$0xff]   ;;  %v6508_v7 = vld [vmem:[%s8774_s3 + $0x1a0] ss:$28 sps:$4 sm:$0xff]  }
 0x36b   : > { %3374 = vmatmul.mubr.f32.gmra.mrb[142].mxu1 %v2928_v0  ;;  %v6514_v0 = vld [vmem:[%s8774_s3 + $0x38c] ss:$28 sps:$4 sm:$0xff]  }
 0x36c   : > { %3806 = vmatpush1.bf16.msra.mxu1 %v6456_v24  ;;  %3833 = vmatprep.mubr.bf16.mxu1 %v6824_v40  ;;  %v6509_v24 = vld [vmem:[%s8774_s3 + $0x350] ss:$28 sps:$4 sm:$0xff]  }
 0x36d   : > { %3807 = vmatprep.subr.bf16.mxu1 %v6461_v19  ;;  %v6517_v19 = vld [vmem:[%s8774_s3 + $0x1d4] ss:$28 sps:$4 sm:$0xff]  }
 0x370   : > { %3808 = vmatpush1.bf16.msra.mxu1 %v6459_v39  ;;  %v6512_v39 = vld [vmem:[%s8774_s3 + $0x388] ss:$28 sps:$4 sm:$0xff]  }
 0x371   : > { %3809 = vmatprep.subr.bf16.mxu1 %v6464_v13  ;;  %v6520_v13 = vld [vmem:[%s8774_s3 + $0x3c4] ss:$28 sps:$4 sm:$0xff]  }
 0x374   : > { %3810 = vmatpush1.bf16.msra.mxu1 %v6462_v3  ;;  %v6515_v3 = vld [vmem:[%s8774_s3 + $0x1d0] ss:$28 sps:$4 sm:$0xff]  }
 0x375   : > { %3811 = vmatprep.subr.bf16.mxu1 %v6467_v49  ;;  %v6523_v49 = vld [vmem:[%s8774_s3 + $0x20c] ss:$28 sps:$4 sm:$0xff]  }
 0x378   : > { %3812 = vmatpush1.bf16.msra.mxu1 %v6465_v27  ;;  %v6518_v27 = vld [vmem:[%s8774_s3 + $0x3c0] ss:$28 sps:$4 sm:$0xff]  }
 0x379   : > { %3813 = vmatprep.subr.bf16.mxu1 %v6473_v34  ;;  %v6529_v34 = vld [vmem:[%s8774_s3 + $0x244] ss:$28 sps:$4 sm:$0xff]  }
 0x37c   : > { %3814 = vmatpush1.bf16.msra.mxu1 %v6471_v16  ;;  %v6524_v16 = vld [vmem:[%s8774_s3 + $0x3f8] ss:$28 sps:$4 sm:$0xff]  }
 0x37d   : > { %3815 = vmatprep.subr.bf16.mxu1 %v6479_v61  ;;  %v6535_v61 = vld [vmem:[%s8774_s3 + $0x27c] ss:$28 sps:$4 sm:$0xff]  }
 0x380   : > { %3816 = vmatpush1.bf16.msra.mxu1 %v6477_v55  ;;  %v6530_v55 = vld [vmem:[%s8774_s3 + $0x430] ss:$28 sps:$4 sm:$0xff]  }
 0x381   : > { %3842 = vmatprep.subr.bf16.mxu1 %v6483_v5  ;;  %v6538_v5 = vld [vmem:[%s8774_s3 + $0x46c] ss:$28 sps:$4 sm:$0xff]  }
 0x3d7   : > { %v5854_v1 = vpop.f32.mrb[132].mxu1 }
 0x3d8   : > { %v5855_v15 = vpop.f32.mrb[133].mxu1 }
 0x3d9   : > { %v5856_v47 = vadd.f32 %v5855_v15, %v5854_v1  ;;  %v6533_v1 = vld [vmem:[%s8774_s3 + $0x278] ss:$28 sps:$4 sm:$0xff]  }
 0x3da   : > { %v6541_v15 = vld [vmem:[%s8774_s3 + $0x2b4] ss:$28 sps:$4 sm:$0xff]  }
 0x3db   : > { %v3286_v58 = vadd.f32 %v5856_v47, %v8153_v8  ;;  %v6536_v47 = vld [vmem:[%s8774_s3 + $0x468] ss:$28 sps:$4 sm:$0xff]  }
 0x3dc   : > { %v5857_v46 = vpop.f32.mrb[134].mxu1 }
 0x3dd   : > { %v5858_v60 = vpop.f32.mrb[135].mxu1 }
 0x3de   : > { %v5859_v36 = vadd.f32 %v5858_v60, %v5857_v46  ;;  %v6539_v46 = vld [vmem:[%s8774_s3 + $0x2b0] ss:$28 sps:$4 sm:$0xff]  }
 0x3df   : > { %v6547_v60 = vld [vmem:[%s8774_s3 + $0x2ec] ss:$28 sps:$4 sm:$0xff]  }
 0x3e0   : > { %v5860_v17 = vpop.f32.mrb[136].mxu1  ;;  %v3291_v23 = vadd.f32 %v5859_v36, %v8157_v26  ;;  %v6488_v26 = vld [vmem:[%s8774_s3 + $0x88] ss:$28 sps:$4 sm:$0xff]   ;;  %v6542_v36 = vld [vmem:[%s8774_s3 + $0x4a0] ss:$28 sps:$4 sm:$0xff]  }
 0x3e1   : > { %v5861_v14 = vpop.f32.mrb[137].mxu1 }
 0x3e2   : > { %v5862_v42 = vadd.f32 %v5861_v14, %v5860_v17  ;;  %v6550_v17 = vld [vmem:[%s8774_s3 + $0x4dc] ss:$28 sps:$4 sm:$0xff]   ;;  %v6553_v14 = vld [vmem:[%s8774_s3 + $0x324] ss:$28 sps:$4 sm:$0xff]  }
 0x3e4   : > { %v3296_v62 = vadd.f32 %v5862_v42, %v8169_v21  ;;  %v6500_v21 = vld [vmem:[%s8774_s3 + $0x130] ss:$28 sps:$4 sm:$0xff]   ;;  %v6548_v42 = vld [vmem:[%s8774_s3 + $0x4d8] ss:$28 sps:$4 sm:$0xff]  }
 0x436   : > { %v3365_v54 = vpop.f32.mrb[138].mxu1 }
 0x437   : > { %v3366_v30 = vadd.f32 %v3365_v54, %v3286_v58  ;;  %v3367_v51 = vpop.f32.mrb[139].mxu1  ;;  %v6544_v58 = vld [vmem:[%s8774_s3 + $0x4a4] ss:$28 sps:$4 sm:$0xff]  }
 0x438   : > { %v6551_v54 = vld [vmem:[%s8774_s3 + $0x320] ss:$28 sps:$4 sm:$0xff]   ;;  %v6554_v51 = vld [vmem:[%s8774_s3 + $0x510] ss:$28 sps:$4 sm:$0xff]  }
 0x43a   : > { %v3370_v35 = vpop.f32.mrb[140].mxu1 }
 0x43b   : > { %v3371_v33 = vadd.f32 %v3370_v35, %v3291_v23  ;;  %v3372_v44 = vpop.f32.mrb[141].mxu1  ;;  %v6545_v23 = vld [vmem:[%s8774_s3 + $0x2e8] ss:$28 sps:$4 sm:$0xff]   ;;  %v6557_v35 = vld [vmem:[%s8774_s3 + $0x358] ss:$28 sps:$4 sm:$0xff]  }
 0x43d   : > { %v8242_v38 = vpack.c.bf16 %v3371_v33, %v3366_v30  ;;  %v6559_v30 = vld [vmem:[%s8774_s3 + $0x35c] ss:$28 sps:$4 sm:$0xff]  }
 0x43e   : > { %v3375_v25 = vpop.f32.mrb[142].mxu1  ;;  %v6560_v33 = vld [vmem:[%s8774_s3 + $0x398] ss:$28 sps:$4 sm:$0xff]  }
 0x43f   : > { %v8247_v8 = vadd.f32 %v3375_v25, %v3296_v62  ;;  %4326 = vmatmul.mubr.bf16.vlgmr.msra.gmra.mrb[240].mxu0 %v8242_v38  ;;  %v8251_v37 = vrot.slane %v8242_v38, 4  ;;  %v3377_v48 = vpop.f32.mrb[143].mxu1  ;;  %v6556_v62 = vld [vmem:[%s8774_s3 + $0x514] ss:$28 sps:$4 sm:$0xff]  }
 0x440   : > { %6107 = vmatpush3.bf16.msra.mxu0 %v6480_v6  ;;  %6122 = vmatprep.mubr.msk.bf16.mxu0 %vm6826_vm1, %v6825_v2  ;;  %v6561_v6 = vld [vmem:[%s8774_s3 + $0x1d8] ss:$28 sps:$4 sm:$0xff]   ;;  %v6562_v25 = vld [vmem:[%s8774_s3 + $0x3d0] ss:$28 sps:$4 sm:$0xff]   ;;  %v6566_v48 = vld [vmem:[%s8774_s3 + $0x440] ss:$28 sps:$4 sm:$0xff]  }
 0x441   : > { %3834 = vmatmul.mubr.bf16.vlgmr.msra.gmra.mrb[144].mxu1 %v8251_v37  ;;  %6108 = vmatprep.subr.bf16.mxu0 %v6825_v2  ;;  %v8432_v44 = vpack.c.bf16 %v8247_v8, %v8247_v8  ;;  %v6564_v8 = vld [vmem:[%s8774_s3 + $0x408] ss:$28 sps:$4 sm:$0xff]  }
 0x442   : > { %3843 = vmatpush1.bf16.msra.mxu1 %v6481_v41  ;;  %3874 = vmatprep.mubr.bf16.mxu1 %v6824_v40  ;;  %v6563_v41 = vld [vmem:[%s8774_s3 + $0x210] ss:$28 sps:$4 sm:$0xff]  }
 0x443   : > { %3844 = vmatprep.subr.bf16.mxu1 %v6487_v56  ;;  %v6565_v56 = vld [vmem:[%s8774_s3 + $0x248] ss:$28 sps:$4 sm:$0xff]  }
 0x444   : > { %6109 = vmatpush3.bf16.msra.mxu0 %v6484_v22  ;;  %v6567_v22 = vld [vmem:[%s8774_s3 + $0x280] ss:$28 sps:$4 sm:$0xff]  }
 0x445   : > { %6110 = vmatprep.subr.bf16.mxu0 %v6825_v2 }
 0x446   : > { %3845 = vmatpush1.bf16.msra.mxu1 %v6485_v29  ;;  %v6568_v29 = vld [vmem:[%s8774_s3 + $0x478] ss:$28 sps:$4 sm:$0xff]  }
 0x447   : > { %3846 = vmatprep.subr.bf16.mxu1 %v6491_v4  ;;  %v6569_v4 = vld [vmem:[%s8774_s3 + $0x2b8] ss:$28 sps:$4 sm:$0xff]  }
 0x448   : > { %6111 = vmatpush3.bf16.msra.mxu0 %v6488_v26  ;;  %v6570_v26 = vld [vmem:[%s8774_s3 + $0x4b0] ss:$28 sps:$4 sm:$0xff]  }
 0x449   : > { %6112 = vmatprep.subr.bf16.mxu0 %v6825_v2 }
 0x44a   : > { %3847 = vmatpush1.bf16.msra.mxu1 %v6489_v31  ;;  %v6571_v31 = vld [vmem:[%s8774_s3 + $0x2f0] ss:$28 sps:$4 sm:$0xff]  }
 0x44b   : > { %3848 = vmatprep.subr.bf16.mxu1 %v6495_v12  ;;  %v6572_v12 = vld [vmem:[%s8774_s3 + $0x4e8] ss:$28 sps:$4 sm:$0xff]  }
 0x44c   : > { %6113 = vmatpush3.bf16.msra.mxu0 %v6492_v9  ;;  %v6573_v9 = vld [vmem:[%s8774_s3 + $0x328] ss:$28 sps:$4 sm:$0xff]  }
 0x44d   : > { %6114 = vmatprep.subr.bf16.mxu0 %v6825_v2 }
 0x44e   : > { %3849 = vmatpush1.bf16.msra.mxu1 %v6493_v59  ;;  %v6574_v59 = vld [vmem:[%s8774_s3 + $0x520] ss:$28 sps:$4 sm:$0xff]  }
 0x44f   : > { %3850 = vmatprep.subr.bf16.mxu1 %v6499_v57  ;;  %v6575_v57 = vld [vmem:[%s8774_s3 + $0x360] ss:$28 sps:$4 sm:$0xff]  }
 0x450   : > { %6115 = vmatpush3.bf16.msra.mxu0 %v6496_v32  ;;  %v6578_v32 = vld [vmem:[%s8774_s3 + $0x4] ss:$28 sps:$4 sm:$0xff]  }
 0x451   : > { %6116 = vmatprep.subr.bf16.mxu0 %v6825_v2 }
 0x452   : > { %3851 = vmatpush1.bf16.msra.mxu1 %v6497_v20  ;;  %v6576_v20 = vld [vmem:[%s8774_s3] ss:$28 sps:$4 sm:$0xff]  }
 0x453   : > { %3852 = vmatprep.subr.bf16.mxu1 %v6503_v11  ;;  %v6581_v11 = vld [vmem:[%s8774_s3 + $0x3c] ss:$28 sps:$4 sm:$0xff]  }
 0x454   : > { %6117 = vmatpush3.bf16.msra.mxu0 %v6500_v21  ;;  %v6584_v21 = vld [vmem:[%s8774_s3 + $0x74] ss:$28 sps:$4 sm:$0xff]  }
 0x455   : > { %6118 = vmatprep.subr.bf16.mxu0 %v6825_v2 }
 0x456   : > { %3853 = vmatpush1.bf16.msra.mxu1 %v6501_v63  ;;  %v6582_v63 = vld [vmem:[%s8774_s3 + $0x70] ss:$28 sps:$4 sm:$0xff]  }
 0x457   : > { %3854 = vmatprep.subr.bf16.mxu1 %v6507_v43  ;;  %v6585_v43 = vld [vmem:[%s8774_s3 + $0xa8] ss:$28 sps:$4 sm:$0xff]  }
 0x458   : > { %6119 = vmatpush3.bf16.msra.mxu0 %v6504_v18  ;;  %v6590_v18 = vld [vmem:[%s8774_s3 + $0xe4] ss:$28 sps:$4 sm:$0xff]  }
 0x459   : > { %6120 = vmatprep.subr.bf16.mxu0 %v6825_v2 }
 0x45a   : > { %3855 = vmatpush1.bf16.msra.mxu1 %v6505_v50  ;;  %v6588_v50 = vld [vmem:[%s8774_s3 + $0xe0] ss:$28 sps:$4 sm:$0xff]  }
 0x45b   : > { %3856 = vmatprep.subr.bf16.mxu1 %v6511_v45  ;;  %v6593_v45 = vld [vmem:[%s8774_s3 + $0x11c] ss:$28 sps:$4 sm:$0xff]  }
 0x45c   : > { %6121 = vmatpush3.bf16.msra.mxu0 %v6508_v7  ;;  %v6591_v7 = vld [vmem:[%s8774_s3 + $0x118] ss:$28 sps:$4 sm:$0xff]  }
 0x45d   : > { %4809 = vmatprep.subr.bf16.mxu0 %v6514_v0  ;;  %v6596_v0 = vld [vmem:[%s8774_s3 + $0x154] ss:$28 sps:$4 sm:$0xff]  }
 0x45e   : > { %3857 = vmatpush1.bf16.msra.mxu1 %v6509_v24  ;;  %v6594_v24 = vld [vmem:[%s8774_s3 + $0x150] ss:$28 sps:$4 sm:$0xff]  }
 0x45f   : > { %6123 = vmatmul.mubr.bf16.vlgmr.msra.gmra.mrb[244].mxu0 %v8242_v38  ;;  %3883 = vmatprep.subr.bf16.mxu1 %v6517_v19  ;;  %v6599_v19 = vld [vmem:[%s8774_s3 + $0x18c] ss:$28 sps:$4 sm:$0xff]  }
 0x460   : > { %4810 = vmatpush1.bf16.msra.mxu0 %v6512_v39  ;;  %4841 = vmatprep.mubr.bf16.mxu0 %v6824_v40  ;;  %v6597_v39 = vld [vmem:[%s8774_s3 + $0x188] ss:$28 sps:$4 sm:$0xff]  }
 0x461   : > { %3875 = vmatmul.mubr.bf16.vlgmr.msra.gmra.mrb[148].mxu1 %v8251_v37  ;;  %4811 = vmatprep.subr.bf16.mxu0 %v6520_v13  ;;  %v6602_v13 = vld [vmem:[%s8774_s3 + $0x14] ss:$28 sps:$4 sm:$0xff]  }
 0x462   : > { %3884 = vmatpush1.bf16.msra.mxu1 %v6515_v3  ;;  %3915 = vmatprep.mubr.bf16.mxu1 %v6824_v40  ;;  %v6600_v3 = vld [vmem:[%s8774_s3 + $0x10] ss:$28 sps:$4 sm:$0xff]  }
 0x463   : > { %3885 = vmatprep.subr.bf16.mxu1 %v6523_v49  ;;  %v6605_v49 = vld [vmem:[%s8774_s3 + $0x4c] ss:$28 sps:$4 sm:$0xff]  }
 0x464   : > { %4812 = vmatpush1.bf16.msra.mxu0 %v6518_v27  ;;  %v6603_v27 = vld [vmem:[%s8774_s3 + $0x48] ss:$28 sps:$4 sm:$0xff]  }
 0x465   : > { %4813 = vmatprep.subr.bf16.mxu0 %v6526_v28  ;;  %v6608_v28 = vld [vmem:[%s8774_s3 + $0x84] ss:$28 sps:$4 sm:$0xff]  }
 0x466   : > { %3886 = vmatpush1.bf16.msra.mxu1 %v6521_v52  ;;  %v6606_v52 = vld [vmem:[%s8774_s3 + $0x80] ss:$28 sps:$4 sm:$0xff]  }
 0x467   : > { %3887 = vmatprep.subr.bf16.mxu1 %v6529_v34  ;;  %v6611_v34 = vld [vmem:[%s8774_s3 + $0xbc] ss:$28 sps:$4 sm:$0xff]  }
 0x468   : > { %4814 = vmatpush1.bf16.msra.mxu0 %v6524_v16  ;;  %v6609_v16 = vld [vmem:[%s8774_s3 + $0xb8] ss:$28 sps:$4 sm:$0xff]  }
 0x469   : > { %4815 = vmatprep.subr.bf16.mxu0 %v6532_v53  ;;  %v6614_v53 = vld [vmem:[%s8774_s3 + $0xf4] ss:$28 sps:$4 sm:$0xff]  }
 0x46a   : > { %3888 = vmatpush1.bf16.msra.mxu1 %v6527_v10  ;;  %v6612_v10 = vld [vmem:[%s8774_s3 + $0xf0] ss:$28 sps:$4 sm:$0xff]  }
 0x46b   : > { %3889 = vmatprep.subr.bf16.mxu1 %v6535_v61  ;;  %v6617_v61 = vld [vmem:[%s8774_s3 + $0x12c] ss:$28 sps:$4 sm:$0xff]  }
 0x46c   : > { %4816 = vmatpush1.bf16.msra.mxu0 %v6530_v55  ;;  %v6615_v55 = vld [vmem:[%s8774_s3 + $0x128] ss:$28 sps:$4 sm:$0xff]  }
 0x46d   : > { %4817 = vmatprep.subr.bf16.mxu0 %v6538_v5  ;;  %v6620_v5 = vld [vmem:[%s8774_s3 + $0x164] ss:$28 sps:$4 sm:$0xff]  }
 0x46e   : > { %3890 = vmatpush1.bf16.msra.mxu1 %v6533_v1  ;;  %v6618_v1 = vld [vmem:[%s8774_s3 + $0x160] ss:$28 sps:$4 sm:$0xff]  }
 0x46f   : > { %3891 = vmatprep.subr.bf16.mxu1 %v6541_v15  ;;  %v6623_v15 = vld [vmem:[%s8774_s3 + $0x19c] ss:$28 sps:$4 sm:$0xff]  }
 0x470   : > { %4818 = vmatpush1.bf16.msra.mxu0 %v6536_v47  ;;  %v6621_v47 = vld [vmem:[%s8774_s3 + $0x198] ss:$28 sps:$4 sm:$0xff]  }
 0x471   : > { %4819 = vmatprep.subr.bf16.mxu0 %v6544_v58  ;;  %v6626_v58 = vld [vmem:[%s8774_s3 + $0x384] ss:$28 sps:$4 sm:$0xff]  }
 0x472   : > { %3892 = vmatpush1.bf16.msra.mxu1 %v6539_v46  ;;  %v6624_v46 = vld [vmem:[%s8774_s3 + $0x380] ss:$28 sps:$4 sm:$0xff]  }
 0x473   : > { %3893 = vmatprep.subr.bf16.mxu1 %v6547_v60  ;;  %v6629_v60 = vld [vmem:[%s8774_s3 + $0x3bc] ss:$28 sps:$4 sm:$0xff]  }
 0x474   : > { %4820 = vmatpush1.bf16.msra.mxu0 %v6542_v36  ;;  %v6627_v36 = vld [vmem:[%s8774_s3 + $0x3b8] ss:$28 sps:$4 sm:$0xff]  }
 0x475   : > { %4821 = vmatprep.subr.bf16.mxu0 %v6550_v17  ;;  %v6632_v17 = vld [vmem:[%s8774_s3 + $0x3f4] ss:$28 sps:$4 sm:$0xff]  }
 0x476   : > { %3894 = vmatpush1.bf16.msra.mxu1 %v6545_v23  ;;  %v6630_v23 = vld [vmem:[%s8774_s3 + $0x3f0] ss:$28 sps:$4 sm:$0xff]  }
 0x477   : > { %3895 = vmatprep.subr.bf16.mxu1 %v6553_v14  ;;  %v6633_v14 = vld [vmem:[%s8774_s3 + $0x428] ss:$28 sps:$4 sm:$0xff]  }
 0x478   : > { %4822 = vmatpush1.bf16.msra.mxu0 %v6548_v42  ;;  %v6638_v42 = vld [vmem:[%s8774_s3 + $0x464] ss:$28 sps:$4 sm:$0xff]  }
 0x479   : > { %4823 = vmatprep.subr.bf16.mxu0 %v6556_v62  ;;  %v6636_v62 = vld [vmem:[%s8774_s3 + $0x460] ss:$28 sps:$4 sm:$0xff]  }
 0x47a   : > { %3896 = vmatpush1.bf16.msra.mxu1 %v6551_v54  ;;  %v6641_v54 = vld [vmem:[%s8774_s3 + $0x49c] ss:$28 sps:$4 sm:$0xff]  }
 0x47b   : > { %3897 = vmatprep.subr.bf16.mxu1 %v6559_v30  ;;  %v6639_v30 = vld [vmem:[%s8774_s3 + $0x498] ss:$28 sps:$4 sm:$0xff]  }
 0x47c   : > { %4824 = vmatpush1.bf16.msra.mxu0 %v6554_v51  ;;  %v6644_v51 = vld [vmem:[%s8774_s3 + $0x4d4] ss:$28 sps:$4 sm:$0xff]  }
 0x47d   : > { %6126 = vmatprep.subr.bf16.mxu0 %v6825_v2 }
 0x47e   : > { %3898 = vmatpush1.bf16.msra.mxu1 %v6557_v35  ;;  %v6642_v35 = vld [vmem:[%s8774_s3 + $0x4d0] ss:$28 sps:$4 sm:$0xff]  }
 0x47f   : > { %4842 = vmatmul.mubr.bf16.vlgmr.msra.gmra.mrb[248].mxu0 %v8432_v44  ;;  %6086 = vmatprep.subr.bf16.mxu1 %v6825_v2 }
 0x480   : > { %6127 = vmatpush3.bf16.msra.mxu0 %v6560_v33  ;;  %6142 = vmatprep.mubr.msk.bf16.mxu0 %vm6826_vm1, %v6825_v2  ;;  %v6647_v33 = vld [vmem:[%s8774_s3 + $0x50c] ss:$28 sps:$4 sm:$0xff]  }
 0x481   : > { %3916 = vmatmul.mubr.bf16.vlgmr.msra.gmra.mrb[152].mxu1 %v8251_v37  ;;  %6128 = vmatprep.subr.bf16.mxu0 %v6825_v2 }
 0x482   : > { %6087 = vmatpush3.bf16.msra.mxu1 %v6561_v6  ;;  %6102 = vmatprep.mubr.msk.bf16.mxu1 %vm6826_vm1, %v6825_v2  ;;  %v6645_v6 = vld [vmem:[%s8774_s3 + $0x508] ss:$28 sps:$4 sm:$0xff]  }
 0x483   : > { %6088 = vmatprep.subr.bf16.mxu1 %v6825_v2 }
 0x484   : > { %6129 = vmatpush3.bf16.msra.mxu0 %v6562_v25  ;;  %v6650_v25 = vld [vmem:[%s8774_s3 + $0x394] ss:$28 sps:$4 sm:$0xff]  }
 0x485   : > { %6130 = vmatprep.subr.bf16.mxu0 %v6825_v2 }
 0x486   : > { %6089 = vmatpush3.bf16.msra.mxu1 %v6563_v41  ;;  %v6648_v41 = vld [vmem:[%s8774_s3 + $0x390] ss:$28 sps:$4 sm:$0xff]  }
 0x487   : > { %6090 = vmatprep.subr.bf16.mxu1 %v6825_v2 }
 0x488   : > { %6131 = vmatpush3.bf16.msra.mxu0 %v6564_v8  ;;  %v6653_v8 = vld [vmem:[%s8774_s3 + $0x3cc] ss:$28 sps:$4 sm:$0xff]  }
 0x489   : > { %6132 = vmatprep.subr.bf16.mxu0 %v6825_v2 }
 0x48a   : > { %6091 = vmatpush3.bf16.msra.mxu1 %v6565_v56  ;;  %v6651_v56 = vld [vmem:[%s8774_s3 + $0x3c8] ss:$28 sps:$4 sm:$0xff]  }
 0x48b   : > { %6092 = vmatprep.subr.bf16.mxu1 %v6825_v2 }
 0x48c   : > { %6133 = vmatpush3.bf16.msra.mxu0 %v6566_v48  ;;  %v6656_v48 = vld [vmem:[%s8774_s3 + $0x404] ss:$28 sps:$4 sm:$0xff]  }
 0x48d   : > { %6134 = vmatprep.subr.bf16.mxu0 %v6825_v2 }
 0x48e   : > { %6093 = vmatpush3.bf16.msra.mxu1 %v6567_v22  ;;  %v6654_v22 = vld [vmem:[%s8774_s3 + $0x400] ss:$28 sps:$4 sm:$0xff]  }
 0x48f   : > { %6094 = vmatprep.subr.bf16.mxu1 %v6825_v2 }
 0x490   : > { %6135 = vmatpush3.bf16.msra.mxu0 %v6568_v29  ;;  %v6659_v29 = vld [vmem:[%s8774_s3 + $0x43c] ss:$28 sps:$4 sm:$0xff]  }
 0x491   : > { %6136 = vmatprep.subr.bf16.mxu0 %v6825_v2 }
 0x492   : > { %6095 = vmatpush3.bf16.msra.mxu1 %v6569_v4  ;;  %v6662_v4 = vld [vmem:[%s8774_s3 + $0x474] ss:$28 sps:$4 sm:$0xff]  }
 0x493   : > { %6096 = vmatprep.subr.bf16.mxu1 %v6825_v2 }
 0x494   : > { %6137 = vmatpush3.bf16.msra.mxu0 %v6570_v26  ;;  %v6660_v26 = vld [vmem:[%s8774_s3 + $0x470] ss:$28 sps:$4 sm:$0xff]  }
 0x495   : > { %6138 = vmatprep.subr.bf16.mxu0 %v6825_v2 }
 0x496   : > { %6097 = vmatpush3.bf16.msra.mxu1 %v6571_v31  ;;  %v6665_v31 = vld [vmem:[%s8774_s3 + $0x4ac] ss:$28 sps:$4 sm:$0xff]  }
 0x497   : > { %6098 = vmatprep.subr.bf16.mxu1 %v6825_v2 }
 0x498   : > { %6139 = vmatpush3.bf16.msra.mxu0 %v6572_v12 }
 0x499   : > { %6140 = vmatprep.subr.bf16.mxu0 %v6825_v2 }
 0x49a   : > { %6099 = vmatpush3.bf16.msra.mxu1 %v6573_v9  ;;  %v6663_v9 = vld [vmem:[%s8774_s3 + $0x4a8] ss:$28 sps:$4 sm:$0xff]  }
 0x49b   : > { %6100 = vmatprep.subr.bf16.mxu1 %v6825_v2  ;;  %v6579_v2 = vld [vmem:[%s8774_s3 + $0x38] ss:$28 sps:$4 sm:$0xff]  }
 0x49c   : > { %6141 = vmatpush3.bf16.msra.mxu0 %v6574_v59 }
 0x49e   : > { %6101 = vmatpush3.bf16.msra.mxu1 %v6575_v57  ;;  %v6668_v57 = vld [vmem:[%s8774_s3 + $0x4e4] ss:$28 sps:$4 sm:$0xff]  }
 0x49f   : > { %6143 = vmatmul.mubr.bf16.vlgmr.msra.gmra.mrb[252].mxu0 %v8432_v44  ;;  %4252 = vmatprep.subr.bf16.mxu1 %v6578_v32 }
 0x4a1   : > { %6103 = vmatmul.mubr.bf16.vlgmr.msra.gmra.mrb[156].mxu1 %v8251_v37  ;;  %v6587_v37 = vld [vmem:[%s8774_s3 + $0xac] ss:$28 sps:$4 sm:$0xff]  }
 0x4a2   : > { %4253 = vmatpush1.bf16.msra.mxu1 %v6576_v20  ;;  %4284 = vmatprep.mubr.bf16.mxu1 %v6824_v40 }
 0x4a3   : > { %4254 = vmatprep.subr.bf16.mxu1 %v6581_v11 }
 0x4a6   : > { %4255 = vmatpush1.bf16.msra.mxu1 %v6579_v2 }
 0x4a7   : > { %4256 = vmatprep.subr.bf16.mxu1 %v6584_v21 }
 0x4aa   : > { %4257 = vmatpush1.bf16.msra.mxu1 %v6582_v63  ;;  %v6666_v63 = vld [vmem:[%s8774_s3 + $0x4e0] ss:$28 sps:$4 sm:$0xff]  }
 0x4ab   : > { %4258 = vmatprep.subr.bf16.mxu1 %v6587_v37 }
 0x4ae   : > { %4259 = vmatpush1.bf16.msra.mxu1 %v6585_v43  ;;  %v6671_v43 = vld [vmem:[%s8774_s3 + $0x51c] ss:$28 sps:$4 sm:$0xff]  }
 0x4af   : > { %4260 = vmatprep.subr.bf16.mxu1 %v6590_v18  ;;  %v6669_v18 = vld [vmem:[%s8774_s3 + $0x518] ss:$28 sps:$4 sm:$0xff]  }
 0x4b2   : > { %4261 = vmatpush1.bf16.msra.mxu1 %v6588_v50 }
 0x4b3   : > { %4262 = vmatprep.subr.bf16.mxu1 %v6593_v45 }
 0x4b6   : > { %4263 = vmatpush1.bf16.msra.mxu1 %v6591_v7 }
 0x4b7   : > { %4264 = vmatprep.subr.bf16.mxu1 %v6596_v0 }
 0x4ba   : > { %4265 = vmatpush1.bf16.msra.mxu1 %v6594_v24 }
 0x4bb   : > { %4266 = vmatprep.subr.bf16.mxu1 %v6599_v19 }
 0x4be   : > { %4267 = vmatpush1.bf16.msra.mxu1 %v6597_v39 }
 0x4bf   : > { %4334 = vmatprep.subr.bf16.mxu1 %v6602_v13 }
 0x4c1   : > { %4285 = vmatmul.mubr.bf16.vlgmr.msra.gmra.mrb[160].mxu1 %v8242_v38 }
 0x4c2   : > { %4335 = vmatpush1.bf16.msra.mxu1 %v6600_v3  ;;  %4366 = vmatprep.mubr.bf16.mxu1 %v6824_v40 }
 0x4c3   : > { %4336 = vmatprep.subr.bf16.mxu1 %v6605_v49 }
 0x4c6   : > { %4337 = vmatpush1.bf16.msra.mxu1 %v6603_v27  ;;  %v4940_v27 = vlaneseq }
 0x4c7   : > { %4338 = vmatprep.subr.bf16.mxu1 %v6608_v28 }
 0x4c8   : > { %v8707_v28 = vshrl.u32 %v4940_v27, 7 }
 0x4ca   : > { %4339 = vmatpush1.bf16.msra.mxu1 %v6606_v52  ;;  %v4950_v52 = vsub.s32 2, %v8707_v28 }
 0x4cb   : > { %4340 = vmatprep.subr.bf16.mxu1 %v6611_v34  ;;  %v4954_v34 = vsub.s32 3, %v8707_v28 }
 0x4ce   : > { %4341 = vmatpush1.bf16.msra.mxu1 %v6609_v16  ;;  %v8720_v16 = vld [vmem:[%s8776_s5] sm:$0xff] }
 0x4cf   : > { %4342 = vmatprep.subr.bf16.mxu1 %v6614_v53 }
 0x4d2   : > { %4343 = vmatpush1.bf16.msra.mxu1 %v6612_v10 }
 0x4d3   : > { %4344 = vmatprep.subr.bf16.mxu1 %v6617_v61 }
 0x4d6   : > { %4345 = vmatpush1.bf16.msra.mxu1 %v6615_v55 }
 0x4d7   : > { %4346 = vmatprep.subr.bf16.mxu1 %v6620_v5  ;;  %v5002_v5 = vrot.slane %v8720_v16, %v4950_v52 }
 0x4da   : > { %4347 = vmatpush1.bf16.msra.mxu1 %v6618_v1 }
 0x4db   : > { %4348 = vmatprep.subr.bf16.mxu1 %v6623_v15 }
 0x4de   : > { %4349 = vmatpush1.bf16.msra.mxu1 %v6621_v47  ;;  %v5006_v47 = vrot.slane %v8720_v16, %v4954_v34 }
 0x4df   : > { %4768 = vmatprep.subr.bf16.mxu1 %v6626_v58 }
 0x4e1   : > { %4367 = vmatmul.mubr.bf16.vlgmr.msra.gmra.mrb[164].mxu1 %v8242_v38  ;;  %v6635_v38 = vld [vmem:[%s8774_s3 + $0x42c] ss:$28 sps:$4 sm:$0xff]  }
 0x4e2   : > { %4769 = vmatpush1.bf16.msra.mxu1 %v6624_v46  ;;  %4800 = vmatprep.mubr.bf16.mxu1 %v6824_v40 }
 0x4e3   : > { %4770 = vmatprep.subr.bf16.mxu1 %v6629_v60 }
 0x4e6   : > { %4771 = vmatpush1.bf16.msra.mxu1 %v6627_v36 }
 0x4e7   : > { %4772 = vmatprep.subr.bf16.mxu1 %v6632_v17 }
 0x4ea   : > { %4773 = vmatpush1.bf16.msra.mxu1 %v6630_v23 }
 0x4eb   : > { %4774 = vmatprep.subr.bf16.mxu1 %v6635_v38 }
 0x4ee   : > { %4775 = vmatpush1.bf16.msra.mxu1 %v6633_v14 }
 0x4ef   : > { %4776 = vmatprep.subr.bf16.mxu1 %v6638_v42 }
 0x4f2   : > { %4777 = vmatpush1.bf16.msra.mxu1 %v6636_v62 }
 0x4f3   : > { %4778 = vmatprep.subr.bf16.mxu1 %v6641_v54 }
 0x4f6   : > { %4779 = vmatpush1.bf16.msra.mxu1 %v6639_v30 }
 0x4f7   : > { %4780 = vmatprep.subr.bf16.mxu1 %v6644_v51 }
 0x4fa   : > { %4781 = vmatpush1.bf16.msra.mxu1 %v6642_v35  ;;  %v4966_v35 = vsub.s32 6, %v8707_v28 }
 0x4fb   : > { %4782 = vmatprep.subr.bf16.mxu1 %v6647_v33 }
 0x4fe   : > { %4783 = vmatpush1.bf16.msra.mxu1 %v6645_v6 }
 0x4ff   : > { %4850 = vmatprep.subr.bf16.mxu1 %v6650_v25 }
 0x501   : > { %4801 = vmatmul.mubr.bf16.vlgmr.msra.gmra.mrb[168].mxu1 %v8432_v44 }
 0x502   : > { %4851 = vmatpush1.bf16.msra.mxu1 %v6648_v41  ;;  %4882 = vmatprep.mubr.bf16.mxu1 %v6824_v40  ;;  %v6657_v40 = vld [vmem:[%s8774_s3 + $0x438] ss:$28 sps:$4 sm:$0xff]  }
 0x503   : > { %4852 = vmatprep.subr.bf16.mxu1 %v6653_v8 }
 0x506   : > { %4853 = vmatpush1.bf16.msra.mxu1 %v6651_v56 }
 0x507   : > { %4854 = vmatprep.subr.bf16.mxu1 %v6656_v48 }
 0x50a   : > { %4855 = vmatpush1.bf16.msra.mxu1 %v6654_v22 }
 0x50b   : > { %4856 = vmatprep.subr.bf16.mxu1 %v6659_v29 }
 0x50e   : > { %4857 = vmatpush1.bf16.msra.mxu1 %v6657_v40 }
 0x50f   : > { %4858 = vmatprep.subr.bf16.mxu1 %v6662_v4  ;;  %v5018_v4 = vrot.slane %v8720_v16, %v4966_v35 }
 0x512   : > { %4859 = vmatpush1.bf16.msra.mxu1 %v6660_v26  ;;  %v4327_v12 = vpop.f32.mrb[240].mxu0 }
 0x513   : > { %v4329_v59 = vpop.f32.mrb[241].mxu0  ;;  %4860 = vmatprep.subr.bf16.mxu1 %v6665_v31 }
 0x514   : > { %v8693_v32 = vpop.f32.mrb[144].mxu1  ;;  %v4331_v20 = vpop.f32.mrb[242].mxu0 }
 0x515   : > { %v8695_v11 = vpop.f32.mrb[145].mxu1  ;;  %v4332_v2 = vpop.f32.mrb[243].mxu0 }
 0x516   : > { %4861 = vmatpush1.bf16.msra.mxu1 %v6663_v9  ;;  %v3839_v21 = vpop.f32.mrb[146].mxu1 }
 0x517   : > { %v3840_v37 = vpop.f32.mrb[147].mxu1  ;;  %4862 = vmatprep.subr.bf16.mxu1 %v6668_v57 }
 0x51a   : > { %4863 = vmatpush1.bf16.msra.mxu1 %v6666_v63 }
 0x51b   : > { %4864 = vmatprep.subr.bf16.mxu1 %v6671_v43 }
 0x51e   : > { %4865 = vmatpush1.bf16.msra.mxu1 %v6669_v18 }
 0x521   : > { %4883 = vmatmul.mubr.bf16.vlgmr.msra.gmra.mrb[172].mxu1 %v8432_v44  ;;  %v8713_v44 = vld [vmem:[%s8775_s4] sm:$0xff] }
 0x522   : > { %v4951_v53 = vrot.slane %v8713_v44, %v4950_v52  ;;  %v4955_v61 = vrot.slane %v8713_v44, %v4954_v34  ;;  %v4967_v56 = vrot.slane %v8713_v44, %v4966_v35 }
 0x532   : > { %v4409_v50 = vpop.f32.mrb[244].mxu0 }
 0x533   : > { %v6124_v45 = vpop.f32.mrb[245].mxu0 }
 0x534   : > { %v3876_v7 = vpop.f32.mrb[148].mxu1  ;;  %v4412_v0 = vpop.f32.mrb[246].mxu0 }
 0x535   : > { %v4328_v24 = vadd.f32 %v4327_v12, %v3876_v7  ;;  %v3878_v19 = vpop.f32.mrb[149].mxu1  ;;  %v6125_v39 = vpop.f32.mrb[247].mxu0 }
 0x536   : > { %v4330_v13 = vadd.f32 %v4329_v59, %v3878_v19  ;;  %v3880_v3 = vpop.f32.mrb[150].mxu1  ;;  %v4946_v19 = vsub.s32 1, %v8707_v28 }
 0x537   : > { %v3881_v49 = vpop.f32.mrb[151].mxu1 }
 0x538   : > { %v4998_v52 = vrot.slane %v8720_v16, %v4946_v19 }
 0x552   : > { %v4843_v10 = vpop.f32.mrb[248].mxu0 }
 0x553   : > { %v4933_v55 = vadd.f32 %v4843_v10, %v4328_v24  ;;  %v4845_v1 = vpop.f32.mrb[249].mxu0  ;;  %v4942_v24 = vsub.s32 0, %v8707_v28 }
 0x554   : > { %v4934_v15 = vadd.f32 %v4845_v1, %v4330_v13  ;;  %v3917_v58 = vpop.f32.mrb[152].mxu1  ;;  %v4847_v46 = vpop.f32.mrb[250].mxu0 }
 0x555   : > { %v4977_v60 = vadd.f32 %v4951_v53, %v4933_v55  ;;  %v3919_v36 = vpop.f32.mrb[153].mxu1  ;;  %v4848_v17 = vpop.f32.mrb[251].mxu0  ;;  %v4943_v39 = vrot.slane %v8713_v44, %v4942_v24  ;;  %v4962_v46 = vsub.s32 5, %v8707_v28 }
 0x556   : > { %v4978_v23 = vadd.f32 %v4955_v61, %v4934_v15  ;;  %v3921_v38 = vpop.f32.mrb[154].mxu1 }
 0x557   : > { %vm4985_vm2 = vcmp.gt.f32.partialorder %v4977_v60, 0.0  ;;  %v5028_v14 = vmul.f32 %v5002_v5, %v4977_v60  ;;  %v3922_v42 = vpop.f32.mrb[155].mxu1  ;;  %v4963_v17 = vrot.slane %v8713_v44, %v4962_v46 }
 0x558   : > { %vm4986_vm3 = vcmp.gt.f32.partialorder %v4978_v23, 0.0  ;;  %v5029_v62 = vmul.f32 %v5006_v47, %v4978_v23 }
 0x559   : > { %v5035_v54 = vsel %vm4985_vm2, %v4977_v60, %v5028_v14 }
 0x55a   : > { %v5036_v30 = vsel %vm4986_vm3, %v4978_v23, %v5029_v62  ;;  %v5014_v62 = vrot.slane %v8720_v16, %v4962_v46 }
 0x55b   : > { %v5609_v51 = vpack.c.bf16 %v5036_v30, %v5035_v54 }
 0x55d   : > { %5070 = vst [vmem:[%s8730_s14 + $0x8] sm:$0xff] %v5609_v51 }
 0x572   : > { %v4925_v33 = vpop.f32.mrb[252].mxu0 }
 0x573   : > { %v6144_v6 = vpop.f32.mrb[253].mxu0 }
 0x574   : > { %v3958_v25 = vpop.f32.mrb[156].mxu1  ;;  %v4928_v41 = vpop.f32.mrb[254].mxu0 }
 0x575   : > { %v4410_v8 = vadd.f32 %v4409_v50, %v3958_v25  ;;  %v6104_v48 = vpop.f32.mrb[157].mxu1  ;;  %v6145_v22 = vpop.f32.mrb[255].mxu0 }
 0x576   : > { %v3961_v29 = vpop.f32.mrb[158].mxu1 }
 0x577   : > { %v4937_v40 = vadd.f32 %v4925_v33, %v4410_v8  ;;  %v6105_v26 = vpop.f32.mrb[159].mxu1 }
 0x579   : > { %v4981_v31 = vadd.f32 %v4967_v56, %v4937_v40 }
 0x57b   : > { %vm4989_vm4 = vcmp.gt.f32.partialorder %v4981_v31, 0.0  ;;  %v5032_v12 = vmul.f32 %v5018_v4, %v4981_v31 }
 0x57d   : > { %v5039_v9 = vsel %vm4989_vm4, %v4981_v31, %v5032_v12 }
 0x57e   : > { %v5611_v59 = vpack.c.bf16 %v5039_v9, %v5039_v9 }
 0x580   : > { %5072 = vst [vmem:[%s8730_s14 + $0x18] sm:$0xf] %v5611_v59 }
 0x594   : > { %v4286_v57 = vpop.f32.mrb[160].mxu1 }
 0x595   : > { %v4287_v20 = vadd.f32 %v4286_v57, %v8693_v32  ;;  %v4288_v2 = vpop.f32.mrb[161].mxu1  ;;  %v4947_v32 = vrot.slane %v8713_v44, %v4946_v19 }
 0x596   : > { %v4289_v21 = vadd.f32 %v4288_v2, %v8695_v11  ;;  %v4290_v63 = vpop.f32.mrb[162].mxu1  ;;  %v4994_v11 = vrot.slane %v8720_v16, %v4942_v24 }
 0x597   : > { %v4291_v37 = vpop.f32.mrb[163].mxu1 }
 0x5b4   : > { %v4368_v43 = vpop.f32.mrb[164].mxu1 }
 0x5b5   : > { %v4369_v18 = vadd.f32 %v4368_v43, %v3917_v58  ;;  %v4370_v50 = vpop.f32.mrb[165].mxu1  ;;  %v4958_v58 = vsub.s32 4, %v8707_v28 }
 0x5b6   : > { %v4371_v45 = vadd.f32 %v4370_v50, %v3919_v36  ;;  %v4372_v7 = vpop.f32.mrb[166].mxu1 }
 0x5b7   : > { %v4373_v0 = vpop.f32.mrb[167].mxu1  ;;  %v4959_v60 = vrot.slane %v8713_v44, %v4958_v58  ;;  %v5010_v38 = vrot.slane %v8720_v16, %v4958_v58 }
 0x5d4   : > { %v4802_v13 = vpop.f32.mrb[168].mxu1 }
 0x5d5   : > { %v4931_v3 = vadd.f32 %v4802_v13, %v4287_v20  ;;  %v4804_v49 = vpop.f32.mrb[169].mxu1 }
 0x5d6   : > { %v4932_v27 = vadd.f32 %v4804_v49, %v4289_v21  ;;  %v4806_v34 = vpop.f32.mrb[170].mxu1 }
 0x5d7   : > { %v4975_v53 = vadd.f32 %v4943_v39, %v4931_v3  ;;  %v4807_v10 = vpop.f32.mrb[171].mxu1 }
 0x5d8   : > { %v4976_v61 = vadd.f32 %v4947_v32, %v4932_v27 }
 0x5d9   : > { %vm4983_vm5 = vcmp.gt.f32.partialorder %v4975_v53, 0.0  ;;  %v5026_v55 = vmul.f32 %v4994_v11, %v4975_v53 }
 0x5da   : > { %vm4984_vm6 = vcmp.gt.f32.partialorder %v4976_v61, 0.0  ;;  %v5027_v5 = vmul.f32 %v4998_v52, %v4976_v61 }
 0x5db   : > { %v5033_v1 = vsel %vm4983_vm5, %v4975_v53, %v5026_v55 }
 0x5dc   : > { %v5034_v15 = vsel %vm4984_vm6, %v4976_v61, %v5027_v5 }
 0x5dd   : > { %v5608_v47 = vpack.c.bf16 %v5034_v15, %v5033_v1 }
 0x5df   : > { %5069 = vst [vmem:[%s8730_s14] sm:$0xff] %v5608_v47 }
 0x5f4   : > { %v4884_v36 = vpop.f32.mrb[172].mxu1 }
 0x5f5   : > { %v4935_v23 = vadd.f32 %v4884_v36, %v4369_v18  ;;  %v4886_v14 = vpop.f32.mrb[173].mxu1 }
 0x5f6   : > { %v4936_v42 = vadd.f32 %v4886_v14, %v4371_v45  ;;  %v4888_v54 = vpop.f32.mrb[174].mxu1 }
 0x5f7   : > { %v4979_v30 = vadd.f32 %v4959_v60, %v4935_v23  ;;  %v4889_v51 = vpop.f32.mrb[175].mxu1 }
 0x5f8   : > { %v4980_v35 = vadd.f32 %v4963_v17, %v4936_v42 }
 0x5f9   : > { %vm4987_vm7 = vcmp.gt.f32.partialorder %v4979_v30, 0.0  ;;  %v5030_v33 = vmul.f32 %v5010_v38, %v4979_v30 }
 0x5fa   : > { %vm4988_vm8 = vcmp.gt.f32.partialorder %v4980_v35, 0.0  ;;  %v5031_v28 = vmul.f32 %v5014_v62, %v4980_v35 }
 0x5fb   : > { %v5037_v6 = vsel %vm4987_vm7, %v4979_v30, %v5030_v33 }
 0x5fc   : > { %v5038_v25 = vsel %vm4988_vm8, %v4980_v35, %v5031_v28 }
 0x5fd   : > { %v5610_v41 = vpack.c.bf16 %v5038_v25, %v5037_v6 }
 0x5ff   : > { %5071 = vst [vmem:[%s8730_s14 + $0x10] sm:$0xff] %v5610_v41 }
 0x600 PF: > { %s20_s26 = sadd.s32 1, %s6812_s26   ;;  %s8815_s21 = smov %s6796_s22 }
 0x601   : > { %p17_p9 = scmp.ge.s32.totalorder %s20_s26, 4   ;;  %s8816_s22 = smov %s6800_s23 }
 0x602   : > { %s8817_s23 = smov %s6982_s11  ;;  %s8818_s24 = smov %s6808_s25 }
 0x603   : > { %s8819_s25 = smov %s8821_s27  ;;  %19 = sbr.rel (!%p17_p9) target bundleno = 5 (0x5), region = 103 }
 0x60a   :  { %5094 = vsyncpa [#allocation4], 1 }
 0x60b   :  { %5096 = vsyncpa [#allocation4 + $0x1], 1 }
 0x60c   :  { %5097 = vsyncpa [#allocation6], 1 }

// kernel: core.3
= control target key start
LH: loop header
LB: loop body
LE: loop exit
PB: predicated region body
PF: predicated region fallthrough
CT: control target
= control target key end

     0   :  { %v1827_v36 = vlaneseq  ;;  %v18404_v37 = vmov 1966171168   ;;  %s24184_s0 = inlined_call_operand.vmem [shape: bf16[2,7168], index: 0, kind: input, shape index: {}]   ;;  %s24185_s1 = inlined_call_operand.vmem [shape: bf16[7168,512], index: 1, kind: input, shape index: {}]   ;;  %s24186_s2 = inlined_call_operand.vmem [shape: f32[1,512], index: 2, kind: input, shape index: {}, may-alias: {2,4}]   ;;  %s24187_s3 = inlined_call_operand.vmem [shape: f32[1,512], index: 3, kind: input, shape index: {}]   ;;  %s24188_s4 = inlined_call_operand.vmem [shape: f32[1,512], index: 4, kind: input, shape index: {}, may-alias: {2,4}]   ;;  %s24189_s5 = inlined_call_operand.vmem [shape: f32[2,512], index: 5, kind: input, shape index: {}]   ;;  %s24190_s6 = inlined_call_operand.hbm [shape: f32[2,512], index: 6, kind: output, shape index: {0}]   ;;  %s24191_s7 = inlined_call_operand.vmem [shape: f32[2,1], index: 7, kind: output, shape index: {1}]  }
   0x1   :  { %v15676_v0 = vld [vmem:[%s24185_s1 + $0x4] ss:$16 sps:$4 sm:$0xff]   ;;  %v15678_v1 = vld [vmem:[%s24185_s1 + $0xc] ss:$16 sps:$4 sm:$0xff]   ;;  %v15680_v2 = vld [vmem:[%s24185_s1] ss:$16 sps:$4 sm:$0xff]   ;;  %v1856_v38 = vunpack.c.l.s4 %v18404_v37 }
   0x2   :  { %11213 = vmatprep.subr.bf16.mxu0 %v15676_v0  ;;  %v15681_v3 = vld [vmem:[%s24185_s1 + $0x8] ss:$16 sps:$4 sm:$0xff]   ;;  %12361 = vmatprep.subr.bf16.mxu1 %v15678_v1  ;;  %v15682_v4 = vld [vmem:[%s24185_s1 + $0x24] ss:$16 sps:$4 sm:$0xff]   ;;  %v15684_v5 = vld [vmem:[%s24185_s1 + $0x2c] ss:$16 sps:$4 sm:$0xff]  }
   0x3   :  { %11214 = vmatpush1.bf16.msra.mxu0 %v15680_v2  ;;  %12362 = vmatpush1.bf16.msra.mxu1 %v15681_v3  ;;  %v15686_v6 = vld [vmem:[%s24185_s1 + $0x20] ss:$16 sps:$4 sm:$0xff]   ;;  %v15687_v7 = vld [vmem:[%s24185_s1 + $0x28] ss:$16 sps:$4 sm:$0xff]   ;;  %v15688_v8 = vld [vmem:[%s24185_s1 + $0x44] ss:$16 sps:$4 sm:$0xff]   ;;  %v1857_v43 = vunpack.c.0.s8 %v1856_v38 }
   0x4   :  { %11215 = vmatprep.subr.bf16.mxu0 %v15682_v4  ;;  %12363 = vmatprep.subr.bf16.mxu1 %v15684_v5  ;;  %v15690_v9 = vld [vmem:[%s24185_s1 + $0x4c] ss:$16 sps:$4 sm:$0xff]   ;;  %v15692_v10 = vld [vmem:[%s24185_s1 + $0x40] ss:$16 sps:$4 sm:$0xff]   ;;  %v15693_v11 = vld [vmem:[%s24185_s1 + $0x48] ss:$16 sps:$4 sm:$0xff]  }
   0x5   :  { %v15694_v12 = vld [vmem:[%s24185_s1 + $0x64] ss:$16 sps:$4 sm:$0xff]   ;;  %v15696_v13 = vld [vmem:[%s24185_s1 + $0x6c] ss:$16 sps:$4 sm:$0xff]   ;;  %v15698_v14 = vld [vmem:[%s24185_s1 + $0x60] ss:$16 sps:$4 sm:$0xff]  }
   0x6   :  { %v15699_v15 = vld [vmem:[%s24185_s1 + $0x68] ss:$16 sps:$4 sm:$0xff]   ;;  %v15700_v16 = vld [vmem:[%s24185_s1 + $0x84] ss:$16 sps:$4 sm:$0xff]   ;;  %v15702_v17 = vld [vmem:[%s24185_s1 + $0x8c] ss:$16 sps:$4 sm:$0xff]  }
   0x7   :  { %11216 = vmatpush1.bf16.msra.mxu0 %v15686_v6  ;;  %12364 = vmatpush1.bf16.msra.mxu1 %v15687_v7  ;;  %v15704_v18 = vld [vmem:[%s24185_s1 + $0x80] ss:$16 sps:$4 sm:$0xff]   ;;  %v15705_v19 = vld [vmem:[%s24185_s1 + $0x88] ss:$16 sps:$4 sm:$0xff]   ;;  %v15706_v20 = vld [vmem:[%s24185_s1 + $0xa4] ss:$16 sps:$4 sm:$0xff]  }
   0x8   :  { %11217 = vmatprep.subr.bf16.mxu0 %v15688_v8  ;;  %12365 = vmatprep.subr.bf16.mxu1 %v15690_v9  ;;  %v15708_v21 = vld [vmem:[%s24185_s1 + $0xac] ss:$16 sps:$4 sm:$0xff]   ;;  %v15710_v22 = vld [vmem:[%s24185_s1 + $0xa0] ss:$16 sps:$4 sm:$0xff]   ;;  %v15711_v23 = vld [vmem:[%s24185_s1 + $0xa8] ss:$16 sps:$4 sm:$0xff]  }
   0x9   :  { %v15712_v24 = vld [vmem:[%s24185_s1 + $0xc4] ss:$16 sps:$4 sm:$0xff]   ;;  %v15714_v25 = vld [vmem:[%s24185_s1 + $0xcc] ss:$16 sps:$4 sm:$0xff]   ;;  %v15716_v26 = vld [vmem:[%s24185_s1 + $0xc0] ss:$16 sps:$4 sm:$0xff]  }
   0xa   :  { %v15717_v27 = vld [vmem:[%s24185_s1 + $0xc8] ss:$16 sps:$4 sm:$0xff]   ;;  %v15718_v28 = vld [vmem:[%s24185_s1 + $0xe4] ss:$16 sps:$4 sm:$0xff]   ;;  %v15720_v29 = vld [vmem:[%s24185_s1 + $0xec] ss:$16 sps:$4 sm:$0xff]  }
   0xb   :  { %11218 = vmatpush1.bf16.msra.mxu0 %v15692_v10  ;;  %12366 = vmatpush1.bf16.msra.mxu1 %v15693_v11  ;;  %v15722_v30 = vld [vmem:[%s24185_s1 + $0xe0] ss:$16 sps:$4 sm:$0xff]   ;;  %v15723_v31 = vld [vmem:[%s24185_s1 + $0xe8] ss:$16 sps:$4 sm:$0xff]   ;;  %v15724_v32 = vld [vmem:[%s24185_s1 + $0x104] ss:$16 sps:$4 sm:$0xff]  }
   0xc   :  { %11219 = vmatprep.subr.bf16.mxu0 %v15694_v12  ;;  %12367 = vmatprep.subr.bf16.mxu1 %v15696_v13  ;;  %v15726_v33 = vld [vmem:[%s24185_s1 + $0x10c] ss:$16 sps:$4 sm:$0xff]   ;;  %v15728_v34 = vld [vmem:[%s24185_s1 + $0x100] ss:$16 sps:$4 sm:$0xff]   ;;  %v15729_v35 = vld [vmem:[%s24185_s1 + $0x108] ss:$16 sps:$4 sm:$0xff]  }
   0xd   :  { %v15730_v39 = vld [vmem:[%s24185_s1 + $0x124] ss:$16 sps:$4 sm:$0xff]   ;;  %v15732_v40 = vld [vmem:[%s24185_s1 + $0x12c] ss:$16 sps:$4 sm:$0xff]   ;;  %v15734_v41 = vld [vmem:[%s24185_s1 + $0x120] ss:$16 sps:$4 sm:$0xff]  }
   0xe   :  { %v18564_v42 = vshrl.u32 %v1827_v36, 7  ;;  %v15735_v44 = vld [vmem:[%s24185_s1 + $0x128] ss:$16 sps:$4 sm:$0xff]   ;;  %v15736_v45 = vld [vmem:[%s24185_s1 + $0x144] ss:$16 sps:$4 sm:$0xff]  }
   0xf   :  { %11220 = vmatpush1.bf16.msra.mxu0 %v15698_v14  ;;  %12368 = vmatpush1.bf16.msra.mxu1 %v15699_v15  ;;  %v15738_v46 = vld [vmem:[%s24185_s1 + $0x14c] ss:$16 sps:$4 sm:$0xff]   ;;  %v15740_v47 = vld [vmem:[%s24185_s1 + $0x140] ss:$16 sps:$4 sm:$0xff]   ;;  %v15741_v48 = vld [vmem:[%s24185_s1 + $0x148] ss:$16 sps:$4 sm:$0xff]  }
  0x10   :  { %11221 = vmatprep.subr.bf16.mxu0 %v15700_v16  ;;  %12369 = vmatprep.subr.bf16.mxu1 %v15702_v17  ;;  %v18582_v49 = vsub.s32 %v1857_v43, %v18564_v42  ;;  %v15742_v50 = vld [vmem:[%s24185_s1 + $0x164] ss:$16 sps:$4 sm:$0xff]   ;;  %v15744_v51 = vld [vmem:[%s24185_s1 + $0x16c] ss:$16 sps:$4 sm:$0xff]   ;;  %v15746_v53 = vld [vmem:[%s24185_s1 + $0x160] ss:$16 sps:$4 sm:$0xff]  }
  0x11   :  { %v18593_v52 = vld [vmem:[%s24184_s0] sm:$0xff]  ;;  %v15747_v55 = vld [vmem:[%s24185_s1 + $0x168] ss:$16 sps:$4 sm:$0xff]   ;;  %v15750_v57 = vld [vmem:[%s24185_s1 + $0x18c] ss:$16 sps:$4 sm:$0xff]  }
  0x12   :  { %v1861_v54 = vrot.slane %v18593_v52, %v18582_v49  ;;  %v15748_v56 = vld [vmem:[%s24185_s1 + $0x184] ss:$16 sps:$4 sm:$0xff]   ;;  %v15752_v59 = vld [vmem:[%s24185_s1 + $0x180] ss:$16 sps:$4 sm:$0xff]   ;;  %v15753_v61 = vld [vmem:[%s24185_s1 + $0x188] ss:$16 sps:$4 sm:$0xff]  }
  0x13   :  { %11222 = vmatpush1.bf16.msra.mxu0 %v15704_v18  ;;  %12370 = vmatpush1.bf16.msra.mxu1 %v15705_v19  ;;  %v15754_v62 = vld [vmem:[%s24185_s1 + $0x1a4] ss:$16 sps:$4 sm:$0xff]   ;;  %v15756_v63 = vld [vmem:[%s24185_s1 + $0x1ac] ss:$16 sps:$4 sm:$0xff]   ;;  %v15758_v0 = vld [vmem:[%s24185_s1 + $0x1a0] ss:$16 sps:$4 sm:$0xff]  }
  0x14   :  { %11223 = vmatprep.subr.bf16.mxu0 %v15706_v20  ;;  %12371 = vmatprep.subr.bf16.mxu1 %v15708_v21  ;;  %v1869_v58 = vcombine.high %v1861_v54, %v1861_v54  ;;  %v15759_v1 = vld [vmem:[%s24185_s1 + $0x1a8] ss:$16 sps:$4 sm:$0xff]   ;;  %v15760_v2 = vld [vmem:[%s24185_s1 + $0x1c4] ss:$16 sps:$4 sm:$0xff]   ;;  %v15762_v3 = vld [vmem:[%s24185_s1 + $0x1cc] ss:$16 sps:$4 sm:$0xff]   ;;  %v18662_v13 = vrot.slane %v1861_v54, %v18582_v49 }
  0x15   :  { %v15764_v4 = vld [vmem:[%s24185_s1 + $0x1c0] ss:$16 sps:$4 sm:$0xff]   ;;  %v15765_v5 = vld [vmem:[%s24185_s1 + $0x1c8] ss:$16 sps:$4 sm:$0xff]   ;;  %v15766_v6 = vld [vmem:[%s24185_s1 + $0x1e4] ss:$16 sps:$4 sm:$0xff]  }
  0x16   :  { %v1891_v60 = vrot.slane %v1869_v58, %v18582_v49  ;;  %v15768_v7 = vld [vmem:[%s24185_s1 + $0x1ec] ss:$16 sps:$4 sm:$0xff]   ;;  %v15770_v8 = vld [vmem:[%s24185_s1 + $0x1e0] ss:$16 sps:$4 sm:$0xff]   ;;  %v15771_v9 = vld [vmem:[%s24185_s1 + $0x1e8] ss:$16 sps:$4 sm:$0xff]  }
  0x17   :  { %11224 = vmatpush1.bf16.msra.mxu0 %v15710_v22  ;;  %12372 = vmatpush1.bf16.msra.mxu1 %v15711_v23  ;;  %v15774_v10 = vld [vmem:[%s24185_s1 + $0x204] ss:$16 sps:$4 sm:$0xff]   ;;  %v15777_v11 = vld [vmem:[%s24185_s1 + $0x20c] ss:$16 sps:$4 sm:$0xff]   ;;  %v15772_v12 = vld [vmem:[%s24185_s1 + $0x200] ss:$16 sps:$4 sm:$0xff]  }
  0x18   :  { %11225 = vmatprep.subr.bf16.mxu0 %v15712_v24  ;;  %12373 = vmatprep.subr.bf16.mxu1 %v15714_v25  ;;  %v15775_v14 = vld [vmem:[%s24185_s1 + $0x208] ss:$16 sps:$4 sm:$0xff]   ;;  %v15780_v15 = vld [vmem:[%s24185_s1 + $0x224] ss:$16 sps:$4 sm:$0xff]   ;;  %v15783_v16 = vld [vmem:[%s24185_s1 + $0x22c] ss:$16 sps:$4 sm:$0xff]   ;;  %v1901_v17 = vcombine.high %v1891_v60, %v1891_v60 }
  0x19   :  { %11245 = vmatprep.mubr.bf16.mxu0 %v1891_v60  ;;  %12393 = vmatprep.mubr.bf16.mxu1 %v1891_v60  ;;  %v15778_v18 = vld [vmem:[%s24185_s1 + $0x220] ss:$16 sps:$4 sm:$0xff]   ;;  %v15781_v19 = vld [vmem:[%s24185_s1 + $0x228] ss:$16 sps:$4 sm:$0xff]   ;;  %v15786_v20 = vld [vmem:[%s24185_s1 + $0x244] ss:$16 sps:$4 sm:$0xff]  }
  0x1a   :  { %v15789_v21 = vld [vmem:[%s24185_s1 + $0x24c] ss:$16 sps:$4 sm:$0xff]   ;;  %v15784_v22 = vld [vmem:[%s24185_s1 + $0x240] ss:$16 sps:$4 sm:$0xff]   ;;  %v15787_v23 = vld [vmem:[%s24185_s1 + $0x248] ss:$16 sps:$4 sm:$0xff]  }
  0x1b   :  { %11226 = vmatpush1.bf16.msra.mxu0 %v15716_v26  ;;  %12374 = vmatpush1.bf16.msra.mxu1 %v15717_v27  ;;  %v15792_v24 = vld [vmem:[%s24185_s1 + $0x264] ss:$16 sps:$4 sm:$0xff]   ;;  %v15795_v25 = vld [vmem:[%s24185_s1 + $0x26c] ss:$16 sps:$4 sm:$0xff]   ;;  %v15790_v26 = vld [vmem:[%s24185_s1 + $0x260] ss:$16 sps:$4 sm:$0xff]  }
  0x1c   :  { %11227 = vmatprep.subr.bf16.mxu0 %v15718_v28  ;;  %12375 = vmatprep.subr.bf16.mxu1 %v15720_v29  ;;  %v15793_v27 = vld [vmem:[%s24185_s1 + $0x268] ss:$16 sps:$4 sm:$0xff]   ;;  %v15798_v28 = vld [vmem:[%s24185_s1 + $0x284] ss:$16 sps:$4 sm:$0xff]   ;;  %v15801_v29 = vld [vmem:[%s24185_s1 + $0x28c] ss:$16 sps:$4 sm:$0xff]  }
  0x1d   :  { %v15810_v36 = vld [vmem:[%s24185_s1 + $0x2c4] ss:$16 sps:$4 sm:$0xff]   ;;  %v15813_v37 = vld [vmem:[%s24185_s1 + $0x2cc] ss:$16 sps:$4 sm:$0xff]   ;;  %v15808_v38 = vld [vmem:[%s24185_s1 + $0x2c0] ss:$16 sps:$4 sm:$0xff]  }
  0x1e   :  { %v15814_v43 = vld [vmem:[%s24185_s1 + $0x2e0] ss:$16 sps:$4 sm:$0xff]   ;;  %v15829_v54 = vld [vmem:[%s24185_s1 + $0x328] ss:$16 sps:$4 sm:$0xff]   ;;  %v15843_v60 = vld [vmem:[%s24185_s1 + $0x36c] ss:$16 sps:$4 sm:$0xff]  }
  0x1f   :  { %11228 = vmatpush1.bf16.msra.mxu0 %v15722_v30  ;;  %12376 = vmatpush1.bf16.msra.mxu1 %v15723_v31  ;;  %v15796_v30 = vld [vmem:[%s24185_s1 + $0x280] ss:$16 sps:$4 sm:$0xff]   ;;  %v15799_v31 = vld [vmem:[%s24185_s1 + $0x288] ss:$16 sps:$4 sm:$0xff]  }
  0x20   :  { %11229 = vmatprep.subr.bf16.mxu0 %v15724_v32  ;;  %12377 = vmatprep.subr.bf16.mxu1 %v15726_v33  ;;  %v15804_v32 = vld [vmem:[%s24185_s1 + $0x2a4] ss:$16 sps:$4 sm:$0xff]   ;;  %v15807_v33 = vld [vmem:[%s24185_s1 + $0x2ac] ss:$16 sps:$4 sm:$0xff]   ;;  %v15835_v58 = vld [vmem:[%s24185_s1 + $0x348] ss:$16 sps:$4 sm:$0xff]  }
  0x23   :  { %11230 = vmatpush1.bf16.msra.mxu0 %v15728_v34  ;;  %12378 = vmatpush1.bf16.msra.mxu1 %v15729_v35  ;;  %v15802_v34 = vld [vmem:[%s24185_s1 + $0x2a0] ss:$16 sps:$4 sm:$0xff]   ;;  %v15805_v35 = vld [vmem:[%s24185_s1 + $0x2a8] ss:$16 sps:$4 sm:$0xff]  }
  0x24   :  { %11231 = vmatprep.subr.bf16.mxu0 %v15730_v39  ;;  %12379 = vmatprep.subr.bf16.mxu1 %v15732_v40  ;;  %v15811_v39 = vld [vmem:[%s24185_s1 + $0x2c8] ss:$16 sps:$4 sm:$0xff]   ;;  %v15816_v40 = vld [vmem:[%s24185_s1 + $0x2e4] ss:$16 sps:$4 sm:$0xff]  }
  0x27   :  { %11232 = vmatpush1.bf16.msra.mxu0 %v15734_v41  ;;  %12380 = vmatpush1.bf16.msra.mxu1 %v15735_v44  ;;  %v15819_v41 = vld [vmem:[%s24185_s1 + $0x2ec] ss:$16 sps:$4 sm:$0xff]   ;;  %v15817_v44 = vld [vmem:[%s24185_s1 + $0x2e8] ss:$16 sps:$4 sm:$0xff]  }
  0x28   :  { %11233 = vmatprep.subr.bf16.mxu0 %v15736_v45  ;;  %12381 = vmatprep.subr.bf16.mxu1 %v15738_v46  ;;  %v15822_v45 = vld [vmem:[%s24185_s1 + $0x304] ss:$16 sps:$4 sm:$0xff]   ;;  %v15825_v46 = vld [vmem:[%s24185_s1 + $0x30c] ss:$16 sps:$4 sm:$0xff]  }
  0x2b   :  { %11234 = vmatpush1.bf16.msra.mxu0 %v15740_v47  ;;  %12382 = vmatpush1.bf16.msra.mxu1 %v15741_v48  ;;  %v15820_v47 = vld [vmem:[%s24185_s1 + $0x300] ss:$16 sps:$4 sm:$0xff]   ;;  %v15823_v48 = vld [vmem:[%s24185_s1 + $0x308] ss:$16 sps:$4 sm:$0xff]  }
  0x2c   :  { %11235 = vmatprep.subr.bf16.mxu0 %v15742_v50  ;;  %12383 = vmatprep.subr.bf16.mxu1 %v15744_v51  ;;  %v15828_v50 = vld [vmem:[%s24185_s1 + $0x324] ss:$16 sps:$4 sm:$0xff]   ;;  %v15831_v51 = vld [vmem:[%s24185_s1 + $0x32c] ss:$16 sps:$4 sm:$0xff]  }
  0x2f   :  { %11236 = vmatpush1.bf16.msra.mxu0 %v15746_v53  ;;  %12384 = vmatpush1.bf16.msra.mxu1 %v15747_v55  ;;  %v15826_v53 = vld [vmem:[%s24185_s1 + $0x320] ss:$16 sps:$4 sm:$0xff]   ;;  %v15834_v55 = vld [vmem:[%s24185_s1 + $0x344] ss:$16 sps:$4 sm:$0xff]  }
  0x30   :  { %11237 = vmatprep.subr.bf16.mxu0 %v15748_v56  ;;  %12385 = vmatprep.subr.bf16.mxu1 %v15750_v57  ;;  %v15837_v56 = vld [vmem:[%s24185_s1 + $0x34c] ss:$16 sps:$4 sm:$0xff]   ;;  %v15832_v57 = vld [vmem:[%s24185_s1 + $0x340] ss:$16 sps:$4 sm:$0xff]  }
  0x33   :  { %11238 = vmatpush1.bf16.msra.mxu0 %v15752_v59  ;;  %12386 = vmatpush1.bf16.msra.mxu1 %v15753_v61  ;;  %v15840_v59 = vld [vmem:[%s24185_s1 + $0x364] ss:$16 sps:$4 sm:$0xff]   ;;  %v15838_v61 = vld [vmem:[%s24185_s1 + $0x360] ss:$16 sps:$4 sm:$0xff]  }
  0x34   :  { %11239 = vmatprep.subr.bf16.mxu0 %v15754_v62  ;;  %12387 = vmatprep.subr.bf16.mxu1 %v15756_v63  ;;  %v15841_v62 = vld [vmem:[%s24185_s1 + $0x368] ss:$16 sps:$4 sm:$0xff]   ;;  %v15846_v63 = vld [vmem:[%s24185_s1 + $0x384] ss:$16 sps:$4 sm:$0xff]  }
  0x37   :  { %11240 = vmatpush1.bf16.msra.mxu0 %v15758_v0  ;;  %12388 = vmatpush1.bf16.msra.mxu1 %v15759_v1  ;;  %v15849_v0 = vld [vmem:[%s24185_s1 + $0x38c] ss:$16 sps:$4 sm:$0xff]   ;;  %v15844_v1 = vld [vmem:[%s24185_s1 + $0x380] ss:$16 sps:$4 sm:$0xff]  }
  0x38   :  { %11241 = vmatprep.subr.bf16.mxu0 %v15760_v2  ;;  %12389 = vmatprep.subr.bf16.mxu1 %v15762_v3  ;;  %v15847_v2 = vld [vmem:[%s24185_s1 + $0x388] ss:$16 sps:$4 sm:$0xff]   ;;  %v15852_v3 = vld [vmem:[%s24185_s1 + $0x3a4] ss:$16 sps:$4 sm:$0xff]  }
  0x3b   :  { %11242 = vmatpush1.bf16.msra.mxu0 %v15764_v4  ;;  %12390 = vmatpush1.bf16.msra.mxu1 %v15765_v5  ;;  %v15855_v4 = vld [vmem:[%s24185_s1 + $0x3ac] ss:$16 sps:$4 sm:$0xff]   ;;  %v15850_v5 = vld [vmem:[%s24185_s1 + $0x3a0] ss:$16 sps:$4 sm:$0xff]  }
  0x3c   :  { %11243 = vmatprep.subr.bf16.mxu0 %v15766_v6  ;;  %12391 = vmatprep.subr.bf16.mxu1 %v15768_v7  ;;  %v15853_v6 = vld [vmem:[%s24185_s1 + $0x3a8] ss:$16 sps:$4 sm:$0xff]   ;;  %v15858_v7 = vld [vmem:[%s24185_s1 + $0x3c4] ss:$16 sps:$4 sm:$0xff]  }
  0x3f   :  { %11244 = vmatpush1.bf16.msra.mxu0 %v15770_v8  ;;  %12392 = vmatpush1.bf16.msra.mxu1 %v15771_v9  ;;  %v15861_v8 = vld [vmem:[%s24185_s1 + $0x3cc] ss:$16 sps:$4 sm:$0xff]   ;;  %v1854_v9 = vcombine.high %v18593_v52, %v18593_v52 }
  0x40   :  { %11254 = vmatprep.subr.bf16.mxu0 %v15774_v10  ;;  %12402 = vmatprep.subr.bf16.mxu1 %v15777_v11  ;;  %v15856_v10 = vld [vmem:[%s24185_s1 + $0x3c0] ss:$16 sps:$4 sm:$0xff]   ;;  %v15859_v11 = vld [vmem:[%s24185_s1 + $0x3c8] ss:$16 sps:$4 sm:$0xff]   ;;  %v15867_v52 = vld [vmem:[%s24185_s1 + $0x3ec] ss:$16 sps:$4 sm:$0xff]  }
  0x42   :  { %11246 = vmatmul.mubr.bf16.vlgmr.msra.gmra.mrb[0].mxu0 %v18662_v13  ;;  %12394 = vmatmul.mubr.bf16.vlgmr.msra.gmra.mrb[0].mxu1 %v18662_v13 }
  0x43   :  { %11255 = vmatpush1.bf16.msra.mxu0 %v15772_v12  ;;  %12403 = vmatpush1.bf16.msra.mxu1 %v15775_v14  ;;  %v15864_v12 = vld [vmem:[%s24185_s1 + $0x3e4] ss:$16 sps:$4 sm:$0xff]   ;;  %v18846_v14 = vrot.slane %v1854_v9, %v18582_v49  ;;  %v15943_v9 = vld [vmem:[%s24185_s1 + $0x588] ss:$16 sps:$4 sm:$0xff]  }
  0x44   :  { %11256 = vmatprep.subr.bf16.mxu0 %v15780_v15  ;;  %12404 = vmatprep.subr.bf16.mxu1 %v15783_v16  ;;  %v15862_v15 = vld [vmem:[%s24185_s1 + $0x3e0] ss:$16 sps:$4 sm:$0xff]   ;;  %v15865_v16 = vld [vmem:[%s24185_s1 + $0x3e8] ss:$16 sps:$4 sm:$0xff]  }
  0x45   :  { %11286 = vmatprep.mubr.bf16.mxu0 %v1901_v17  ;;  %12434 = vmatprep.mubr.bf16.mxu1 %v1901_v17  ;;  %v15870_v17 = vld [vmem:[%s24185_s1 + $0x404] ss:$16 sps:$4 sm:$0xff]  }
  0x47   :  { %11257 = vmatpush1.bf16.msra.mxu0 %v15778_v18  ;;  %12405 = vmatpush1.bf16.msra.mxu1 %v15781_v19  ;;  %v15873_v18 = vld [vmem:[%s24185_s1 + $0x40c] ss:$16 sps:$4 sm:$0xff]   ;;  %v1870_v19 = vcombine.high %v18846_v14, %v18846_v14 }
  0x48   :  { %11258 = vmatprep.subr.bf16.mxu0 %v15786_v20  ;;  %12406 = vmatprep.subr.bf16.mxu1 %v15789_v21  ;;  %v15868_v20 = vld [vmem:[%s24185_s1 + $0x400] ss:$16 sps:$4 sm:$0xff]   ;;  %v1899_v21 = vcombine.high %v18662_v13, %v18662_v13 }
  0x49   :  { %v15874_v13 = vld [vmem:[%s24185_s1 + $0x420] ss:$16 sps:$4 sm:$0xff]  }
  0x4b   :  { %11259 = vmatpush1.bf16.msra.mxu0 %v15784_v22  ;;  %12407 = vmatpush1.bf16.msra.mxu1 %v15787_v23  ;;  %v15871_v22 = vld [vmem:[%s24185_s1 + $0x408] ss:$16 sps:$4 sm:$0xff]   ;;  %v15876_v23 = vld [vmem:[%s24185_s1 + $0x424] ss:$16 sps:$4 sm:$0xff]  }
  0x4c   :  { %11260 = vmatprep.subr.bf16.mxu0 %v15792_v24  ;;  %12408 = vmatprep.subr.bf16.mxu1 %v15795_v25  ;;  %v15879_v24 = vld [vmem:[%s24185_s1 + $0x42c] ss:$16 sps:$4 sm:$0xff]   ;;  %v18877_v25 = vrot.slane %v1870_v19, %v18582_v49  ;;  %v15960_v19 = vld [vmem:[%s24185_s1 + $0x5e4] ss:$16 sps:$4 sm:$0xff]  }
  0x4f   :  { %11261 = vmatpush1.bf16.msra.mxu0 %v15790_v26  ;;  %12409 = vmatpush1.bf16.msra.mxu1 %v15793_v27  ;;  %v15877_v26 = vld [vmem:[%s24185_s1 + $0x428] ss:$16 sps:$4 sm:$0xff]   ;;  %v15882_v27 = vld [vmem:[%s24185_s1 + $0x444] ss:$16 sps:$4 sm:$0xff]  }
  0x50   :  { %11262 = vmatprep.subr.bf16.mxu0 %v15798_v28  ;;  %12410 = vmatprep.subr.bf16.mxu1 %v15801_v29  ;;  %v15885_v28 = vld [vmem:[%s24185_s1 + $0x44c] ss:$16 sps:$4 sm:$0xff]   ;;  %v15880_v29 = vld [vmem:[%s24185_s1 + $0x440] ss:$16 sps:$4 sm:$0xff]  }
  0x53   :  { %11263 = vmatpush1.bf16.msra.mxu0 %v15796_v30  ;;  %12411 = vmatpush1.bf16.msra.mxu1 %v15799_v31  ;;  %v15883_v30 = vld [vmem:[%s24185_s1 + $0x448] ss:$16 sps:$4 sm:$0xff]   ;;  %v15888_v31 = vld [vmem:[%s24185_s1 + $0x464] ss:$16 sps:$4 sm:$0xff]  }
  0x54   :  { %11264 = vmatprep.subr.bf16.mxu0 %v15804_v32  ;;  %12412 = vmatprep.subr.bf16.mxu1 %v15807_v33  ;;  %v15891_v32 = vld [vmem:[%s24185_s1 + $0x46c] ss:$16 sps:$4 sm:$0xff]   ;;  %v15886_v33 = vld [vmem:[%s24185_s1 + $0x460] ss:$16 sps:$4 sm:$0xff]  }
  0x57   :  { %11265 = vmatpush1.bf16.msra.mxu0 %v15802_v34  ;;  %12413 = vmatpush1.bf16.msra.mxu1 %v15805_v35  ;;  %v15889_v34 = vld [vmem:[%s24185_s1 + $0x468] ss:$16 sps:$4 sm:$0xff]   ;;  %v15894_v35 = vld [vmem:[%s24185_s1 + $0x484] ss:$16 sps:$4 sm:$0xff]  }
  0x58   :  { %11266 = vmatprep.subr.bf16.mxu0 %v15810_v36  ;;  %12414 = vmatprep.subr.bf16.mxu1 %v15813_v37  ;;  %v15897_v36 = vld [vmem:[%s24185_s1 + $0x48c] ss:$16 sps:$4 sm:$0xff]   ;;  %v15892_v37 = vld [vmem:[%s24185_s1 + $0x480] ss:$16 sps:$4 sm:$0xff]  }
  0x5b   :  { %11267 = vmatpush1.bf16.msra.mxu0 %v15808_v38  ;;  %12415 = vmatpush1.bf16.msra.mxu1 %v15811_v39  ;;  %v15895_v38 = vld [vmem:[%s24185_s1 + $0x488] ss:$16 sps:$4 sm:$0xff]   ;;  %v15900_v39 = vld [vmem:[%s24185_s1 + $0x4a4] ss:$16 sps:$4 sm:$0xff]  }
  0x5c   :  { %11268 = vmatprep.subr.bf16.mxu0 %v15816_v40  ;;  %12416 = vmatprep.subr.bf16.mxu1 %v15819_v41  ;;  %v15903_v40 = vld [vmem:[%s24185_s1 + $0x4ac] ss:$16 sps:$4 sm:$0xff]   ;;  %v15898_v41 = vld [vmem:[%s24185_s1 + $0x4a0] ss:$16 sps:$4 sm:$0xff]  }
  0x5f   :  { %11269 = vmatpush1.bf16.msra.mxu0 %v15814_v43  ;;  %12417 = vmatpush1.bf16.msra.mxu1 %v15817_v44  ;;  %v15901_v43 = vld [vmem:[%s24185_s1 + $0x4a8] ss:$16 sps:$4 sm:$0xff]   ;;  %v15906_v44 = vld [vmem:[%s24185_s1 + $0x4c4] ss:$16 sps:$4 sm:$0xff]  }
  0x60   :  { %11270 = vmatprep.subr.bf16.mxu0 %v15822_v45  ;;  %12418 = vmatprep.subr.bf16.mxu1 %v15825_v46  ;;  %v15909_v45 = vld [vmem:[%s24185_s1 + $0x4cc] ss:$16 sps:$4 sm:$0xff]   ;;  %v15904_v46 = vld [vmem:[%s24185_s1 + $0x4c0] ss:$16 sps:$4 sm:$0xff]  }
  0x63   :  { %11271 = vmatpush1.bf16.msra.mxu0 %v15820_v47  ;;  %12419 = vmatpush1.bf16.msra.mxu1 %v15823_v48  ;;  %v15907_v47 = vld [vmem:[%s24185_s1 + $0x4c8] ss:$16 sps:$4 sm:$0xff]   ;;  %v15912_v48 = vld [vmem:[%s24185_s1 + $0x4e4] ss:$16 sps:$4 sm:$0xff]  }
  0x64   :  { %11272 = vmatprep.subr.bf16.mxu0 %v15828_v50  ;;  %12420 = vmatprep.subr.bf16.mxu1 %v15831_v51  ;;  %v15915_v50 = vld [vmem:[%s24185_s1 + $0x4ec] ss:$16 sps:$4 sm:$0xff]   ;;  %v15910_v51 = vld [vmem:[%s24185_s1 + $0x4e0] ss:$16 sps:$4 sm:$0xff]  }
  0x67   :  { %11273 = vmatpush1.bf16.msra.mxu0 %v15826_v53  ;;  %12421 = vmatpush1.bf16.msra.mxu1 %v15829_v54  ;;  %v15913_v53 = vld [vmem:[%s24185_s1 + $0x4e8] ss:$16 sps:$4 sm:$0xff]   ;;  %v15918_v54 = vld [vmem:[%s24185_s1 + $0x504] ss:$16 sps:$4 sm:$0xff]  }
  0x68   :  { %11274 = vmatprep.subr.bf16.mxu0 %v15834_v55  ;;  %12422 = vmatprep.subr.bf16.mxu1 %v15837_v56  ;;  %v15921_v55 = vld [vmem:[%s24185_s1 + $0x50c] ss:$16 sps:$4 sm:$0xff]   ;;  %v15916_v56 = vld [vmem:[%s24185_s1 + $0x500] ss:$16 sps:$4 sm:$0xff]  }
  0x6b   :  { %11275 = vmatpush1.bf16.msra.mxu0 %v15832_v57  ;;  %12423 = vmatpush1.bf16.msra.mxu1 %v15835_v58  ;;  %v15919_v57 = vld [vmem:[%s24185_s1 + $0x508] ss:$16 sps:$4 sm:$0xff]   ;;  %v15924_v58 = vld [vmem:[%s24185_s1 + $0x524] ss:$16 sps:$4 sm:$0xff]  }
  0x6c   :  { %11276 = vmatprep.subr.bf16.mxu0 %v15840_v59  ;;  %12424 = vmatprep.subr.bf16.mxu1 %v15843_v60  ;;  %v15927_v59 = vld [vmem:[%s24185_s1 + $0x52c] ss:$16 sps:$4 sm:$0xff]   ;;  %v15922_v60 = vld [vmem:[%s24185_s1 + $0x520] ss:$16 sps:$4 sm:$0xff]  }
  0x6f   :  { %11277 = vmatpush1.bf16.msra.mxu0 %v15838_v61  ;;  %12425 = vmatpush1.bf16.msra.mxu1 %v15841_v62  ;;  %v15925_v61 = vld [vmem:[%s24185_s1 + $0x528] ss:$16 sps:$4 sm:$0xff]   ;;  %v15930_v62 = vld [vmem:[%s24185_s1 + $0x544] ss:$16 sps:$4 sm:$0xff]  }
  0x70   :  { %11278 = vmatprep.subr.bf16.mxu0 %v15846_v63  ;;  %12426 = vmatprep.subr.bf16.mxu1 %v15849_v0  ;;  %v15933_v63 = vld [vmem:[%s24185_s1 + $0x54c] ss:$16 sps:$4 sm:$0xff]   ;;  %v15928_v0 = vld [vmem:[%s24185_s1 + $0x540] ss:$16 sps:$4 sm:$0xff]  }
  0x73   :  { %11279 = vmatpush1.bf16.msra.mxu0 %v15844_v1  ;;  %12427 = vmatpush1.bf16.msra.mxu1 %v15847_v2  ;;  %v15931_v1 = vld [vmem:[%s24185_s1 + $0x548] ss:$16 sps:$4 sm:$0xff]   ;;  %v15936_v2 = vld [vmem:[%s24185_s1 + $0x564] ss:$16 sps:$4 sm:$0xff]  }
  0x74   :  { %11280 = vmatprep.subr.bf16.mxu0 %v15852_v3  ;;  %12428 = vmatprep.subr.bf16.mxu1 %v15855_v4  ;;  %v15939_v3 = vld [vmem:[%s24185_s1 + $0x56c] ss:$16 sps:$4 sm:$0xff]   ;;  %v15934_v4 = vld [vmem:[%s24185_s1 + $0x560] ss:$16 sps:$4 sm:$0xff]  }
  0x77   :  { %11281 = vmatpush1.bf16.msra.mxu0 %v15850_v5  ;;  %12429 = vmatpush1.bf16.msra.mxu1 %v15853_v6  ;;  %v15937_v5 = vld [vmem:[%s24185_s1 + $0x568] ss:$16 sps:$4 sm:$0xff]   ;;  %v15942_v6 = vld [vmem:[%s24185_s1 + $0x584] ss:$16 sps:$4 sm:$0xff]  }
  0x78   :  { %11282 = vmatprep.subr.bf16.mxu0 %v15858_v7  ;;  %12430 = vmatprep.subr.bf16.mxu1 %v15861_v8  ;;  %v15945_v7 = vld [vmem:[%s24185_s1 + $0x58c] ss:$16 sps:$4 sm:$0xff]   ;;  %v15940_v8 = vld [vmem:[%s24185_s1 + $0x580] ss:$16 sps:$4 sm:$0xff]  }
  0x7b   :  { %11283 = vmatpush1.bf16.msra.mxu0 %v15856_v10  ;;  %12431 = vmatpush1.bf16.msra.mxu1 %v15859_v11  ;;  %v15948_v10 = vld [vmem:[%s24185_s1 + $0x5a4] ss:$16 sps:$4 sm:$0xff]   ;;  %v15951_v11 = vld [vmem:[%s24185_s1 + $0x5ac] ss:$16 sps:$4 sm:$0xff]  }
  0x7c   :  { %11284 = vmatprep.subr.bf16.mxu0 %v15864_v12  ;;  %12432 = vmatprep.subr.bf16.mxu1 %v15867_v52  ;;  %v15946_v12 = vld [vmem:[%s24185_s1 + $0x5a0] ss:$16 sps:$4 sm:$0xff]   ;;  %v15949_v52 = vld [vmem:[%s24185_s1 + $0x5a8] ss:$16 sps:$4 sm:$0xff]  }
  0x7f   :  { %11285 = vmatpush1.bf16.msra.mxu0 %v15862_v15  ;;  %12433 = vmatpush1.bf16.msra.mxu1 %v15865_v16  ;;  %v15954_v15 = vld [vmem:[%s24185_s1 + $0x5c4] ss:$16 sps:$4 sm:$0xff]   ;;  %v15957_v16 = vld [vmem:[%s24185_s1 + $0x5cc] ss:$16 sps:$4 sm:$0xff]  }
  0x80   :  { %11295 = vmatprep.subr.bf16.mxu0 %v15870_v17  ;;  %12443 = vmatprep.subr.bf16.mxu1 %v15873_v18  ;;  %v15952_v17 = vld [vmem:[%s24185_s1 + $0x5c0] ss:$16 sps:$4 sm:$0xff]   ;;  %v15955_v18 = vld [vmem:[%s24185_s1 + $0x5c8] ss:$16 sps:$4 sm:$0xff]  }
  0x82   :  { %11287 = vmatmul.mubr.bf16.vlgmr.msra.gmra.mrb[0].mxu0 %v1899_v21  ;;  %12435 = vmatmul.mubr.bf16.vlgmr.msra.gmra.mrb[0].mxu1 %v1899_v21  ;;  %v15958_v21 = vld [vmem:[%s24185_s1 + $0x5e0] ss:$16 sps:$4 sm:$0xff]  }
  0x83   :  { %11296 = vmatpush1.bf16.msra.mxu0 %v15868_v20  ;;  %12444 = vmatpush1.bf16.msra.mxu1 %v15871_v22  ;;  %v15963_v20 = vld [vmem:[%s24185_s1 + $0x5ec] ss:$16 sps:$4 sm:$0xff]   ;;  %v15961_v22 = vld [vmem:[%s24185_s1 + $0x5e8] ss:$16 sps:$4 sm:$0xff]  }
  0x84   :  { %11297 = vmatprep.subr.bf16.mxu0 %v15876_v23  ;;  %12445 = vmatprep.subr.bf16.mxu1 %v15879_v24  ;;  %v15967_v23 = vld [vmem:[%s24185_s1 + $0x604] ss:$16 sps:$4 sm:$0xff]   ;;  %v15970_v24 = vld [vmem:[%s24185_s1 + $0x60c] ss:$16 sps:$4 sm:$0xff]  }
  0x85   :  { %11327 = vmatprep.mubr.bf16.mxu0 %v18877_v25  ;;  %12475 = vmatprep.mubr.bf16.mxu1 %v18877_v25 }
  0x87   :  { %11298 = vmatpush1.bf16.msra.mxu0 %v15874_v13  ;;  %12446 = vmatpush1.bf16.msra.mxu1 %v15877_v26  ;;  %v15965_v13 = vld [vmem:[%s24185_s1 + $0x600] ss:$16 sps:$4 sm:$0xff]   ;;  %v19066_v26 = vrot.slane %v18846_v14, %v18582_v49  ;;  %v1902_v14 = vcombine.high %v18877_v25, %v18877_v25  ;;  %v15979_v25 = vld [vmem:[%s24185_s1 + $0x644] ss:$16 sps:$4 sm:$0xff]  }
  0x88   :  { %11299 = vmatprep.subr.bf16.mxu0 %v15882_v27  ;;  %12447 = vmatprep.subr.bf16.mxu1 %v15885_v28  ;;  %v15968_v27 = vld [vmem:[%s24185_s1 + $0x608] ss:$16 sps:$4 sm:$0xff]   ;;  %v15973_v28 = vld [vmem:[%s24185_s1 + $0x624] ss:$16 sps:$4 sm:$0xff]  }
  0x8b   :  { %11300 = vmatpush1.bf16.msra.mxu0 %v15880_v29  ;;  %12448 = vmatpush1.bf16.msra.mxu1 %v15883_v30  ;;  %v15976_v29 = vld [vmem:[%s24185_s1 + $0x62c] ss:$16 sps:$4 sm:$0xff]   ;;  %v15971_v30 = vld [vmem:[%s24185_s1 + $0x620] ss:$16 sps:$4 sm:$0xff]  }
  0x8c   :  { %11301 = vmatprep.subr.bf16.mxu0 %v15888_v31  ;;  %12449 = vmatprep.subr.bf16.mxu1 %v15891_v32  ;;  %v15974_v31 = vld [vmem:[%s24185_s1 + $0x628] ss:$16 sps:$4 sm:$0xff]   ;;  %v15982_v32 = vld [vmem:[%s24185_s1 + $0x64c] ss:$16 sps:$4 sm:$0xff]  }
  0x8f   :  { %11302 = vmatpush1.bf16.msra.mxu0 %v15886_v33  ;;  %12450 = vmatpush1.bf16.msra.mxu1 %v15889_v34  ;;  %v15977_v33 = vld [vmem:[%s24185_s1 + $0x640] ss:$16 sps:$4 sm:$0xff]   ;;  %v15980_v34 = vld [vmem:[%s24185_s1 + $0x648] ss:$16 sps:$4 sm:$0xff]  }
  0x90   :  { %11303 = vmatprep.subr.bf16.mxu0 %v15894_v35  ;;  %12451 = vmatprep.subr.bf16.mxu1 %v15897_v36  ;;  %v15985_v35 = vld [vmem:[%s24185_s1 + $0x664] ss:$16 sps:$4 sm:$0xff]   ;;  %v15988_v36 = vld [vmem:[%s24185_s1 + $0x66c] ss:$16 sps:$4 sm:$0xff]  }
  0x93   :  { %11304 = vmatpush1.bf16.msra.mxu0 %v15892_v37  ;;  %12452 = vmatpush1.bf16.msra.mxu1 %v15895_v38  ;;  %v15983_v37 = vld [vmem:[%s24185_s1 + $0x660] ss:$16 sps:$4 sm:$0xff]   ;;  %v15986_v38 = vld [vmem:[%s24185_s1 + $0x668] ss:$16 sps:$4 sm:$0xff]  }
  0x94   :  { %11305 = vmatprep.subr.bf16.mxu0 %v15900_v39  ;;  %12453 = vmatprep.subr.bf16.mxu1 %v15903_v40  ;;  %v15991_v39 = vld [vmem:[%s24185_s1 + $0x684] ss:$16 sps:$4 sm:$0xff]   ;;  %v15994_v40 = vld [vmem:[%s24185_s1 + $0x68c] ss:$16 sps:$4 sm:$0xff]  }
  0x97   :  { %11306 = vmatpush1.bf16.msra.mxu0 %v15898_v41  ;;  %12454 = vmatpush1.bf16.msra.mxu1 %v15901_v43  ;;  %v15989_v41 = vld [vmem:[%s24185_s1 + $0x680] ss:$16 sps:$4 sm:$0xff]   ;;  %v15992_v43 = vld [vmem:[%s24185_s1 + $0x688] ss:$16 sps:$4 sm:$0xff]  }
  0x98   :  { %11307 = vmatprep.subr.bf16.mxu0 %v15906_v44  ;;  %12455 = vmatprep.subr.bf16.mxu1 %v15909_v45  ;;  %v15997_v44 = vld [vmem:[%s24185_s1 + $0x6a4] ss:$16 sps:$4 sm:$0xff]   ;;  %v16000_v45 = vld [vmem:[%s24185_s1 + $0x6ac] ss:$16 sps:$4 sm:$0xff]  }
  0x9b   :  { %11308 = vmatpush1.bf16.msra.mxu0 %v15904_v46  ;;  %12456 = vmatpush1.bf16.msra.mxu1 %v15907_v47  ;;  %v15995_v46 = vld [vmem:[%s24185_s1 + $0x6a0] ss:$16 sps:$4 sm:$0xff]   ;;  %v15998_v47 = vld [vmem:[%s24185_s1 + $0x6a8] ss:$16 sps:$4 sm:$0xff]  }
  0x9c   :  { %11309 = vmatprep.subr.bf16.mxu0 %v15912_v48  ;;  %12457 = vmatprep.subr.bf16.mxu1 %v15915_v50  ;;  %v16003_v48 = vld [vmem:[%s24185_s1 + $0x6c4] ss:$16 sps:$4 sm:$0xff]   ;;  %v16006_v50 = vld [vmem:[%s24185_s1 + $0x6cc] ss:$16 sps:$4 sm:$0xff]  }
  0x9f   :  { %11310 = vmatpush1.bf16.msra.mxu0 %v15910_v51  ;;  %12458 = vmatpush1.bf16.msra.mxu1 %v15913_v53  ;;  %v16001_v51 = vld [vmem:[%s24185_s1 + $0x6c0] ss:$16 sps:$4 sm:$0xff]   ;;  %v16004_v53 = vld [vmem:[%s24185_s1 + $0x6c8] ss:$16 sps:$4 sm:$0xff]  }
  0xa0   :  { %11311 = vmatprep.subr.bf16.mxu0 %v15918_v54  ;;  %12459 = vmatprep.subr.bf16.mxu1 %v15921_v55  ;;  %v16009_v54 = vld [vmem:[%s24185_s1 + $0x6e4] ss:$16 sps:$4 sm:$0xff]   ;;  %v16012_v55 = vld [vmem:[%s24185_s1 + $0x6ec] ss:$16 sps:$4 sm:$0xff]  }
  0xa3   :  { %11312 = vmatpush1.bf16.msra.mxu0 %v15916_v56  ;;  %12460 = vmatpush1.bf16.msra.mxu1 %v15919_v57  ;;  %v16007_v56 = vld [vmem:[%s24185_s1 + $0x6e0] ss:$16 sps:$4 sm:$0xff]   ;;  %v16010_v57 = vld [vmem:[%s24185_s1 + $0x6e8] ss:$16 sps:$4 sm:$0xff]  }
  0xa4   :  { %11313 = vmatprep.subr.bf16.mxu0 %v15924_v58  ;;  %12461 = vmatprep.subr.bf16.mxu1 %v15927_v59  ;;  %v16015_v58 = vld [vmem:[%s24185_s1 + $0x704] ss:$16 sps:$4 sm:$0xff]   ;;  %v16018_v59 = vld [vmem:[%s24185_s1 + $0x70c] ss:$16 sps:$4 sm:$0xff]  }
  0xa7   :  { %11314 = vmatpush1.bf16.msra.mxu0 %v15922_v60  ;;  %12462 = vmatpush1.bf16.msra.mxu1 %v15925_v61  ;;  %v16013_v60 = vld [vmem:[%s24185_s1 + $0x700] ss:$16 sps:$4 sm:$0xff]   ;;  %v16016_v61 = vld [vmem:[%s24185_s1 + $0x708] ss:$16 sps:$4 sm:$0xff]  }
  0xa8   :  { %11315 = vmatprep.subr.bf16.mxu0 %v15930_v62  ;;  %12463 = vmatprep.subr.bf16.mxu1 %v15933_v63  ;;  %v16021_v62 = vld [vmem:[%s24185_s1 + $0x724] ss:$16 sps:$4 sm:$0xff]   ;;  %v16024_v63 = vld [vmem:[%s24185_s1 + $0x72c] ss:$16 sps:$4 sm:$0xff]  }
  0xab   :  { %11316 = vmatpush1.bf16.msra.mxu0 %v15928_v0  ;;  %12464 = vmatpush1.bf16.msra.mxu1 %v15931_v1  ;;  %v16019_v0 = vld [vmem:[%s24185_s1 + $0x720] ss:$16 sps:$4 sm:$0xff]   ;;  %v16022_v1 = vld [vmem:[%s24185_s1 + $0x728] ss:$16 sps:$4 sm:$0xff]  }
  0xac   :  { %11317 = vmatprep.subr.bf16.mxu0 %v15936_v2  ;;  %12465 = vmatprep.subr.bf16.mxu1 %v15939_v3  ;;  %v16027_v2 = vld [vmem:[%s24185_s1 + $0x744] ss:$16 sps:$4 sm:$0xff]   ;;  %v16030_v3 = vld [vmem:[%s24185_s1 + $0x74c] ss:$16 sps:$4 sm:$0xff]  }
  0xaf   :  { %11318 = vmatpush1.bf16.msra.mxu0 %v15934_v4  ;;  %12466 = vmatpush1.bf16.msra.mxu1 %v15937_v5  ;;  %v16025_v4 = vld [vmem:[%s24185_s1 + $0x740] ss:$16 sps:$4 sm:$0xff]   ;;  %v16028_v5 = vld [vmem:[%s24185_s1 + $0x748] ss:$16 sps:$4 sm:$0xff]  }
  0xb0   :  { %11319 = vmatprep.subr.bf16.mxu0 %v15942_v6  ;;  %12467 = vmatprep.subr.bf16.mxu1 %v15945_v7  ;;  %v16033_v6 = vld [vmem:[%s24185_s1 + $0x764] ss:$16 sps:$4 sm:$0xff]   ;;  %v16036_v7 = vld [vmem:[%s24185_s1 + $0x76c] ss:$16 sps:$4 sm:$0xff]  }
  0xb3   :  { %11320 = vmatpush1.bf16.msra.mxu0 %v15940_v8  ;;  %12468 = vmatpush1.bf16.msra.mxu1 %v15943_v9  ;;  %v16031_v8 = vld [vmem:[%s24185_s1 + $0x760] ss:$16 sps:$4 sm:$0xff]   ;;  %v16034_v9 = vld [vmem:[%s24185_s1 + $0x768] ss:$16 sps:$4 sm:$0xff]  }
  0xb4   :  { %11321 = vmatprep.subr.bf16.mxu0 %v15948_v10  ;;  %12469 = vmatprep.subr.bf16.mxu1 %v15951_v11  ;;  %v16039_v10 = vld [vmem:[%s24185_s1 + $0x784] ss:$16 sps:$4 sm:$0xff]   ;;  %v16042_v11 = vld [vmem:[%s24185_s1 + $0x78c] ss:$16 sps:$4 sm:$0xff]  }
  0xb7   :  { %11322 = vmatpush1.bf16.msra.mxu0 %v15946_v12  ;;  %12470 = vmatpush1.bf16.msra.mxu1 %v15949_v52  ;;  %v16037_v12 = vld [vmem:[%s24185_s1 + $0x780] ss:$16 sps:$4 sm:$0xff]   ;;  %v16040_v52 = vld [vmem:[%s24185_s1 + $0x788] ss:$16 sps:$4 sm:$0xff]  }
  0xb8   :  { %11323 = vmatprep.subr.bf16.mxu0 %v15954_v15  ;;  %12471 = vmatprep.subr.bf16.mxu1 %v15957_v16  ;;  %v16045_v15 = vld [vmem:[%s24185_s1 + $0x7a4] ss:$16 sps:$4 sm:$0xff]   ;;  %v16048_v16 = vld [vmem:[%s24185_s1 + $0x7ac] ss:$16 sps:$4 sm:$0xff]  }
  0xbb   :  { %11324 = vmatpush1.bf16.msra.mxu0 %v15952_v17  ;;  %12472 = vmatpush1.bf16.msra.mxu1 %v15955_v18  ;;  %v16043_v17 = vld [vmem:[%s24185_s1 + $0x7a0] ss:$16 sps:$4 sm:$0xff]   ;;  %v16046_v18 = vld [vmem:[%s24185_s1 + $0x7a8] ss:$16 sps:$4 sm:$0xff]  }
  0xbc   :  { %11325 = vmatprep.subr.bf16.mxu0 %v15960_v19  ;;  %12473 = vmatprep.subr.bf16.mxu1 %v15963_v20  ;;  %v16051_v19 = vld [vmem:[%s24185_s1 + $0x7c4] ss:$16 sps:$4 sm:$0xff]   ;;  %v16054_v20 = vld [vmem:[%s24185_s1 + $0x7cc] ss:$16 sps:$4 sm:$0xff]  }
  0xbf   :  { %11326 = vmatpush1.bf16.msra.mxu0 %v15958_v21  ;;  %12474 = vmatpush1.bf16.msra.mxu1 %v15961_v22  ;;  %v19240_v21 = vld.sshfl [vmem:[%s24184_s0 + $0x8] sm:$0xff pattern:$0x75316420]  ;;  %v16049_v22 = vld [vmem:[%s24185_s1 + $0x7c0] ss:$16 sps:$4 sm:$0xff]  }
  0xc0   :  { %11336 = vmatprep.subr.bf16.mxu0 %v15967_v23  ;;  %12484 = vmatprep.subr.bf16.mxu1 %v15970_v24  ;;  %v16052_v23 = vld [vmem:[%s24185_s1 + $0x7c8] ss:$16 sps:$4 sm:$0xff]   ;;  %v16057_v24 = vld [vmem:[%s24185_s1 + $0x7e4] ss:$16 sps:$4 sm:$0xff]  }
  0xc2   :  { %11328 = vmatmul.mubr.bf16.vlgmr.msra.gmra.mrb[0].mxu0 %v19066_v26  ;;  %12476 = vmatmul.mubr.bf16.vlgmr.msra.gmra.mrb[0].mxu1 %v19066_v26 }
  0xc3   :  { %11337 = vmatpush1.bf16.msra.mxu0 %v15965_v13  ;;  %12485 = vmatpush1.bf16.msra.mxu1 %v15968_v27  ;;  %v16060_v13 = vld [vmem:[%s24185_s1 + $0x7ec] ss:$16 sps:$4 sm:$0xff]   ;;  %v16055_v27 = vld [vmem:[%s24185_s1 + $0x7e0] ss:$16 sps:$4 sm:$0xff]  }
  0xc4   :  { %11338 = vmatprep.subr.bf16.mxu0 %v15973_v28  ;;  %12486 = vmatprep.subr.bf16.mxu1 %v15976_v29  ;;  %v16058_v28 = vld [vmem:[%s24185_s1 + $0x7e8] ss:$16 sps:$4 sm:$0xff]   ;;  %v16063_v29 = vld [vmem:[%s24185_s1 + $0x804] ss:$16 sps:$4 sm:$0xff]  }
  0xc5   :  { %11368 = vmatprep.mubr.bf16.mxu0 %v1902_v14  ;;  %12516 = vmatprep.mubr.bf16.mxu1 %v1902_v14  ;;  %v16066_v14 = vld [vmem:[%s24185_s1 + $0x80c] ss:$16 sps:$4 sm:$0xff]  }
  0xc7   :  { %11339 = vmatpush1.bf16.msra.mxu0 %v15971_v30  ;;  %12487 = vmatpush1.bf16.msra.mxu1 %v15974_v31  ;;  %v1918_v30 = vcombine.high %v19240_v21, %v19240_v21  ;;  %v1900_v31 = vcombine.high %v19066_v26, %v19066_v26  ;;  %v16072_v26 = vld [vmem:[%s24185_s1 + $0x82c] ss:$16 sps:$4 sm:$0xff]  }
  0xc8   :  { %11340 = vmatprep.subr.bf16.mxu0 %v15979_v25  ;;  %12488 = vmatprep.subr.bf16.mxu1 %v15982_v32  ;;  %v16061_v25 = vld [vmem:[%s24185_s1 + $0x800] ss:$16 sps:$4 sm:$0xff]   ;;  %v16064_v32 = vld [vmem:[%s24185_s1 + $0x808] ss:$16 sps:$4 sm:$0xff]  }
  0xcb   :  { %11341 = vmatpush1.bf16.msra.mxu0 %v15977_v33  ;;  %12489 = vmatpush1.bf16.msra.mxu1 %v15980_v34  ;;  %v16069_v33 = vld [vmem:[%s24185_s1 + $0x824] ss:$16 sps:$4 sm:$0xff]   ;;  %v19283_v34 = vrot.slane %v1918_v30, %v18582_v49 }
  0xcc   :  { %11342 = vmatprep.subr.bf16.mxu0 %v15985_v35  ;;  %12490 = vmatprep.subr.bf16.mxu1 %v15988_v36  ;;  %v16067_v35 = vld [vmem:[%s24185_s1 + $0x820] ss:$16 sps:$4 sm:$0xff]   ;;  %v16070_v36 = vld [vmem:[%s24185_s1 + $0x828] ss:$16 sps:$4 sm:$0xff]   ;;  %v16153_v30 = vld [vmem:[%s24185_s1 + $0x9e4] ss:$16 sps:$4 sm:$0xff]  }
  0xcf   :  { %11343 = vmatpush1.bf16.msra.mxu0 %v15983_v37  ;;  %12491 = vmatpush1.bf16.msra.mxu1 %v15986_v38  ;;  %v16075_v37 = vld [vmem:[%s24185_s1 + $0x844] ss:$16 sps:$4 sm:$0xff]   ;;  %v16078_v38 = vld [vmem:[%s24185_s1 + $0x84c] ss:$16 sps:$4 sm:$0xff]  }
  0xd0   :  { %11344 = vmatprep.subr.bf16.mxu0 %v15991_v39  ;;  %12492 = vmatprep.subr.bf16.mxu1 %v15994_v40  ;;  %v16073_v39 = vld [vmem:[%s24185_s1 + $0x840] ss:$16 sps:$4 sm:$0xff]   ;;  %v16076_v40 = vld [vmem:[%s24185_s1 + $0x848] ss:$16 sps:$4 sm:$0xff]  }
  0xd3   :  { %11345 = vmatpush1.bf16.msra.mxu0 %v15989_v41  ;;  %12493 = vmatpush1.bf16.msra.mxu1 %v15992_v43  ;;  %v16081_v41 = vld [vmem:[%s24185_s1 + $0x864] ss:$16 sps:$4 sm:$0xff]   ;;  %v16084_v43 = vld [vmem:[%s24185_s1 + $0x86c] ss:$16 sps:$4 sm:$0xff]  }
  0xd4   :  { %11346 = vmatprep.subr.bf16.mxu0 %v15997_v44  ;;  %12494 = vmatprep.subr.bf16.mxu1 %v16000_v45  ;;  %v16079_v44 = vld [vmem:[%s24185_s1 + $0x860] ss:$16 sps:$4 sm:$0xff]   ;;  %v16082_v45 = vld [vmem:[%s24185_s1 + $0x868] ss:$16 sps:$4 sm:$0xff]  }
  0xd7   :  { %11347 = vmatpush1.bf16.msra.mxu0 %v15995_v46  ;;  %12495 = vmatpush1.bf16.msra.mxu1 %v15998_v47  ;;  %v16087_v46 = vld [vmem:[%s24185_s1 + $0x884] ss:$16 sps:$4 sm:$0xff]   ;;  %v16090_v47 = vld [vmem:[%s24185_s1 + $0x88c] ss:$16 sps:$4 sm:$0xff]  }
  0xd8   :  { %11348 = vmatprep.subr.bf16.mxu0 %v16003_v48  ;;  %12496 = vmatprep.subr.bf16.mxu1 %v16006_v50  ;;  %v16085_v48 = vld [vmem:[%s24185_s1 + $0x880] ss:$16 sps:$4 sm:$0xff]   ;;  %v16088_v50 = vld [vmem:[%s24185_s1 + $0x888] ss:$16 sps:$4 sm:$0xff]  }
  0xdb   :  { %11349 = vmatpush1.bf16.msra.mxu0 %v16001_v51  ;;  %12497 = vmatpush1.bf16.msra.mxu1 %v16004_v53  ;;  %v16093_v51 = vld [vmem:[%s24185_s1 + $0x8a4] ss:$16 sps:$4 sm:$0xff]   ;;  %v16096_v53 = vld [vmem:[%s24185_s1 + $0x8ac] ss:$16 sps:$4 sm:$0xff]  }
  0xdc   :  { %11350 = vmatprep.subr.bf16.mxu0 %v16009_v54  ;;  %12498 = vmatprep.subr.bf16.mxu1 %v16012_v55  ;;  %v16091_v54 = vld [vmem:[%s24185_s1 + $0x8a0] ss:$16 sps:$4 sm:$0xff]   ;;  %v16094_v55 = vld [vmem:[%s24185_s1 + $0x8a8] ss:$16 sps:$4 sm:$0xff]  }
  0xdf   :  { %11351 = vmatpush1.bf16.msra.mxu0 %v16007_v56  ;;  %12499 = vmatpush1.bf16.msra.mxu1 %v16010_v57  ;;  %v16099_v56 = vld [vmem:[%s24185_s1 + $0x8c4] ss:$16 sps:$4 sm:$0xff]   ;;  %v16102_v57 = vld [vmem:[%s24185_s1 + $0x8cc] ss:$16 sps:$4 sm:$0xff]  }
  0xe0   :  { %11352 = vmatprep.subr.bf16.mxu0 %v16015_v58  ;;  %12500 = vmatprep.subr.bf16.mxu1 %v16018_v59  ;;  %v16097_v58 = vld [vmem:[%s24185_s1 + $0x8c0] ss:$16 sps:$4 sm:$0xff]   ;;  %v16100_v59 = vld [vmem:[%s24185_s1 + $0x8c8] ss:$16 sps:$4 sm:$0xff]  }
  0xe3   :  { %11353 = vmatpush1.bf16.msra.mxu0 %v16013_v60  ;;  %12501 = vmatpush1.bf16.msra.mxu1 %v16016_v61  ;;  %v16105_v60 = vld [vmem:[%s24185_s1 + $0x8e4] ss:$16 sps:$4 sm:$0xff]   ;;  %v16108_v61 = vld [vmem:[%s24185_s1 + $0x8ec] ss:$16 sps:$4 sm:$0xff]  }
  0xe4   :  { %11354 = vmatprep.subr.bf16.mxu0 %v16021_v62  ;;  %12502 = vmatprep.subr.bf16.mxu1 %v16024_v63  ;;  %v16103_v62 = vld [vmem:[%s24185_s1 + $0x8e0] ss:$16 sps:$4 sm:$0xff]   ;;  %v16106_v63 = vld [vmem:[%s24185_s1 + $0x8e8] ss:$16 sps:$4 sm:$0xff]  }
  0xe7   :  { %11355 = vmatpush1.bf16.msra.mxu0 %v16019_v0  ;;  %12503 = vmatpush1.bf16.msra.mxu1 %v16022_v1  ;;  %v16111_v0 = vld [vmem:[%s24185_s1 + $0x904] ss:$16 sps:$4 sm:$0xff]   ;;  %v16114_v1 = vld [vmem:[%s24185_s1 + $0x90c] ss:$16 sps:$4 sm:$0xff]  }
  0xe8   :  { %11356 = vmatprep.subr.bf16.mxu0 %v16027_v2  ;;  %12504 = vmatprep.subr.bf16.mxu1 %v16030_v3  ;;  %v16109_v2 = vld [vmem:[%s24185_s1 + $0x900] ss:$16 sps:$4 sm:$0xff]   ;;  %v16112_v3 = vld [vmem:[%s24185_s1 + $0x908] ss:$16 sps:$4 sm:$0xff]  }
  0xeb   :  { %11357 = vmatpush1.bf16.msra.mxu0 %v16025_v4  ;;  %12505 = vmatpush1.bf16.msra.mxu1 %v16028_v5  ;;  %v16117_v4 = vld [vmem:[%s24185_s1 + $0x924] ss:$16 sps:$4 sm:$0xff]   ;;  %v16120_v5 = vld [vmem:[%s24185_s1 + $0x92c] ss:$16 sps:$4 sm:$0xff]  }
  0xec   :  { %11358 = vmatprep.subr.bf16.mxu0 %v16033_v6  ;;  %12506 = vmatprep.subr.bf16.mxu1 %v16036_v7  ;;  %v16115_v6 = vld [vmem:[%s24185_s1 + $0x920] ss:$16 sps:$4 sm:$0xff]   ;;  %v16118_v7 = vld [vmem:[%s24185_s1 + $0x928] ss:$16 sps:$4 sm:$0xff]  }
  0xef   :  { %11359 = vmatpush1.bf16.msra.mxu0 %v16031_v8  ;;  %12507 = vmatpush1.bf16.msra.mxu1 %v16034_v9  ;;  %v16123_v8 = vld [vmem:[%s24185_s1 + $0x944] ss:$16 sps:$4 sm:$0xff]   ;;  %v16126_v9 = vld [vmem:[%s24185_s1 + $0x94c] ss:$16 sps:$4 sm:$0xff]  }
  0xf0   :  { %11360 = vmatprep.subr.bf16.mxu0 %v16039_v10  ;;  %12508 = vmatprep.subr.bf16.mxu1 %v16042_v11  ;;  %v16121_v10 = vld [vmem:[%s24185_s1 + $0x940] ss:$16 sps:$4 sm:$0xff]   ;;  %v16124_v11 = vld [vmem:[%s24185_s1 + $0x948] ss:$16 sps:$4 sm:$0xff]  }
  0xf3   :  { %11361 = vmatpush1.bf16.msra.mxu0 %v16037_v12  ;;  %12509 = vmatpush1.bf16.msra.mxu1 %v16040_v52  ;;  %v16129_v12 = vld [vmem:[%s24185_s1 + $0x964] ss:$16 sps:$4 sm:$0xff]   ;;  %v16132_v52 = vld [vmem:[%s24185_s1 + $0x96c] ss:$16 sps:$4 sm:$0xff]  }
  0xf4   :  { %11362 = vmatprep.subr.bf16.mxu0 %v16045_v15  ;;  %12510 = vmatprep.subr.bf16.mxu1 %v16048_v16  ;;  %v16127_v15 = vld [vmem:[%s24185_s1 + $0x960] ss:$16 sps:$4 sm:$0xff]   ;;  %v16130_v16 = vld [vmem:[%s24185_s1 + $0x968] ss:$16 sps:$4 sm:$0xff]  }
  0xf7   :  { %11363 = vmatpush1.bf16.msra.mxu0 %v16043_v17  ;;  %12511 = vmatpush1.bf16.msra.mxu1 %v16046_v18  ;;  %v16135_v17 = vld [vmem:[%s24185_s1 + $0x984] ss:$16 sps:$4 sm:$0xff]   ;;  %v16138_v18 = vld [vmem:[%s24185_s1 + $0x98c] ss:$16 sps:$4 sm:$0xff]  }
  0xf8   :  { %11364 = vmatprep.subr.bf16.mxu0 %v16051_v19  ;;  %12512 = vmatprep.subr.bf16.mxu1 %v16054_v20  ;;  %v16133_v19 = vld [vmem:[%s24185_s1 + $0x980] ss:$16 sps:$4 sm:$0xff]   ;;  %v16136_v20 = vld [vmem:[%s24185_s1 + $0x988] ss:$16 sps:$4 sm:$0xff]  }
  0xfb   :  { %11365 = vmatpush1.bf16.msra.mxu0 %v16049_v22  ;;  %12513 = vmatpush1.bf16.msra.mxu1 %v16052_v23  ;;  %v16141_v22 = vld [vmem:[%s24185_s1 + $0x9a4] ss:$16 sps:$4 sm:$0xff]   ;;  %v16144_v23 = vld [vmem:[%s24185_s1 + $0x9ac] ss:$16 sps:$4 sm:$0xff]  }
  0xfc   :  { %11366 = vmatprep.subr.bf16.mxu0 %v16057_v24  ;;  %12514 = vmatprep.subr.bf16.mxu1 %v16060_v13  ;;  %v16139_v24 = vld [vmem:[%s24185_s1 + $0x9a0] ss:$16 sps:$4 sm:$0xff]   ;;  %v16142_v13 = vld [vmem:[%s24185_s1 + $0x9a8] ss:$16 sps:$4 sm:$0xff]  }
  0xff   :  { %11367 = vmatpush1.bf16.msra.mxu0 %v16055_v27  ;;  %12515 = vmatpush1.bf16.msra.mxu1 %v16058_v28  ;;  %v16147_v27 = vld [vmem:[%s24185_s1 + $0x9c4] ss:$16 sps:$4 sm:$0xff]   ;;  %v16150_v28 = vld [vmem:[%s24185_s1 + $0x9cc] ss:$16 sps:$4 sm:$0xff]  }
 0x100   :  { %11377 = vmatprep.subr.bf16.mxu0 %v16063_v29  ;;  %12525 = vmatprep.subr.bf16.mxu1 %v16066_v14  ;;  %v16145_v29 = vld [vmem:[%s24185_s1 + $0x9c0] ss:$16 sps:$4 sm:$0xff]   ;;  %v16148_v14 = vld [vmem:[%s24185_s1 + $0x9c8] ss:$16 sps:$4 sm:$0xff]  }
 0x102   :  { %11369 = vmatmul.mubr.bf16.vlgmr.msra.gmra.mrb[0].mxu0 %v1900_v31  ;;  %12517 = vmatmul.mubr.bf16.vlgmr.msra.gmra.mrb[0].mxu1 %v1900_v31  ;;  %v16156_v31 = vld [vmem:[%s24185_s1 + $0x9ec] ss:$16 sps:$4 sm:$0xff]  }
 0x103   :  { %11378 = vmatpush1.bf16.msra.mxu0 %v16061_v25  ;;  %12526 = vmatpush1.bf16.msra.mxu1 %v16064_v32  ;;  %v16151_v25 = vld [vmem:[%s24185_s1 + $0x9e0] ss:$16 sps:$4 sm:$0xff]   ;;  %v16154_v32 = vld [vmem:[%s24185_s1 + $0x9e8] ss:$16 sps:$4 sm:$0xff]  }
 0x104   :  { %11379 = vmatprep.subr.bf16.mxu0 %v16069_v33  ;;  %12527 = vmatprep.subr.bf16.mxu1 %v16072_v26  ;;  %v16159_v33 = vld [vmem:[%s24185_s1 + $0xa04] ss:$16 sps:$4 sm:$0xff]   ;;  %v16162_v26 = vld [vmem:[%s24185_s1 + $0xa0c] ss:$16 sps:$4 sm:$0xff]  }
 0x105   :  { %11409 = vmatprep.mubr.bf16.mxu0 %v19283_v34  ;;  %12557 = vmatprep.mubr.bf16.mxu1 %v19283_v34 }
 0x107   :  { %11380 = vmatpush1.bf16.msra.mxu0 %v16067_v35  ;;  %12528 = vmatpush1.bf16.msra.mxu1 %v16070_v36  ;;  %v19469_v35 = vrot.slane %v19240_v21, %v18582_v49  ;;  %v16157_v36 = vld [vmem:[%s24185_s1 + $0xa00] ss:$16 sps:$4 sm:$0xff]   ;;  %v16168_v21 = vld [vmem:[%s24185_s1 + $0xa2c] ss:$16 sps:$4 sm:$0xff]  }
 0x108   :  { %11381 = vmatprep.subr.bf16.mxu0 %v16075_v37  ;;  %12529 = vmatprep.subr.bf16.mxu1 %v16078_v38  ;;  %v16160_v37 = vld [vmem:[%s24185_s1 + $0xa08] ss:$16 sps:$4 sm:$0xff]   ;;  %v16165_v38 = vld [vmem:[%s24185_s1 + $0xa24] ss:$16 sps:$4 sm:$0xff]  }
 0x10b   :  { %11382 = vmatpush1.bf16.msra.mxu0 %v16073_v39  ;;  %12530 = vmatpush1.bf16.msra.mxu1 %v16076_v40  ;;  %v1950_v39 = vcombine.high %v19283_v34, %v19283_v34  ;;  %v16163_v40 = vld [vmem:[%s24185_s1 + $0xa20] ss:$16 sps:$4 sm:$0xff]   ;;  %v16171_v34 = vld [vmem:[%s24185_s1 + $0xa44] ss:$16 sps:$4 sm:$0xff]  }
 0x10c   :  { %11383 = vmatprep.subr.bf16.mxu0 %v16081_v41  ;;  %12531 = vmatprep.subr.bf16.mxu1 %v16084_v43  ;;  %v16166_v41 = vld [vmem:[%s24185_s1 + $0xa28] ss:$16 sps:$4 sm:$0xff]   ;;  %v16174_v43 = vld [vmem:[%s24185_s1 + $0xa4c] ss:$16 sps:$4 sm:$0xff]  }
 0x10f   :  { %11384 = vmatpush1.bf16.msra.mxu0 %v16079_v44  ;;  %12532 = vmatpush1.bf16.msra.mxu1 %v16082_v45  ;;  %v16169_v44 = vld [vmem:[%s24185_s1 + $0xa40] ss:$16 sps:$4 sm:$0xff]   ;;  %v16172_v45 = vld [vmem:[%s24185_s1 + $0xa48] ss:$16 sps:$4 sm:$0xff]  }
 0x110   :  { %11385 = vmatprep.subr.bf16.mxu0 %v16087_v46  ;;  %12533 = vmatprep.subr.bf16.mxu1 %v16090_v47  ;;  %v16177_v46 = vld [vmem:[%s24185_s1 + $0xa64] ss:$16 sps:$4 sm:$0xff]   ;;  %v16180_v47 = vld [vmem:[%s24185_s1 + $0xa6c] ss:$16 sps:$4 sm:$0xff]  }
 0x113   :  { %11386 = vmatpush1.bf16.msra.mxu0 %v16085_v48  ;;  %12534 = vmatpush1.bf16.msra.mxu1 %v16088_v50  ;;  %v16175_v48 = vld [vmem:[%s24185_s1 + $0xa60] ss:$16 sps:$4 sm:$0xff]   ;;  %v16178_v50 = vld [vmem:[%s24185_s1 + $0xa68] ss:$16 sps:$4 sm:$0xff]  }
 0x114   :  { %11387 = vmatprep.subr.bf16.mxu0 %v16093_v51  ;;  %12535 = vmatprep.subr.bf16.mxu1 %v16096_v53  ;;  %v16183_v51 = vld [vmem:[%s24185_s1 + $0xa84] ss:$16 sps:$4 sm:$0xff]   ;;  %v16186_v53 = vld [vmem:[%s24185_s1 + $0xa8c] ss:$16 sps:$4 sm:$0xff]  }
 0x117   :  { %11388 = vmatpush1.bf16.msra.mxu0 %v16091_v54  ;;  %12536 = vmatpush1.bf16.msra.mxu1 %v16094_v55  ;;  %v16181_v54 = vld [vmem:[%s24185_s1 + $0xa80] ss:$16 sps:$4 sm:$0xff]   ;;  %v16184_v55 = vld [vmem:[%s24185_s1 + $0xa88] ss:$16 sps:$4 sm:$0xff]  }
 0x118   :  { %11389 = vmatprep.subr.bf16.mxu0 %v16099_v56  ;;  %12537 = vmatprep.subr.bf16.mxu1 %v16102_v57  ;;  %v16189_v56 = vld [vmem:[%s24185_s1 + $0xaa4] ss:$16 sps:$4 sm:$0xff]   ;;  %v16192_v57 = vld [vmem:[%s24185_s1 + $0xaac] ss:$16 sps:$4 sm:$0xff]  }
 0x11b   :  { %11390 = vmatpush1.bf16.msra.mxu0 %v16097_v58  ;;  %12538 = vmatpush1.bf16.msra.mxu1 %v16100_v59  ;;  %v16187_v58 = vld [vmem:[%s24185_s1 + $0xaa0] ss:$16 sps:$4 sm:$0xff]   ;;  %v16190_v59 = vld [vmem:[%s24185_s1 + $0xaa8] ss:$16 sps:$4 sm:$0xff]  }
 0x11c   :  { %11391 = vmatprep.subr.bf16.mxu0 %v16105_v60  ;;  %12539 = vmatprep.subr.bf16.mxu1 %v16108_v61  ;;  %v16195_v60 = vld [vmem:[%s24185_s1 + $0xac4] ss:$16 sps:$4 sm:$0xff]   ;;  %v16198_v61 = vld [vmem:[%s24185_s1 + $0xacc] ss:$16 sps:$4 sm:$0xff]  }
 0x11f   :  { %11392 = vmatpush1.bf16.msra.mxu0 %v16103_v62  ;;  %12540 = vmatpush1.bf16.msra.mxu1 %v16106_v63  ;;  %v16193_v62 = vld [vmem:[%s24185_s1 + $0xac0] ss:$16 sps:$4 sm:$0xff]   ;;  %v16196_v63 = vld [vmem:[%s24185_s1 + $0xac8] ss:$16 sps:$4 sm:$0xff]  }
 0x120   :  { %11393 = vmatprep.subr.bf16.mxu0 %v16111_v0  ;;  %12541 = vmatprep.subr.bf16.mxu1 %v16114_v1  ;;  %v16201_v0 = vld [vmem:[%s24185_s1 + $0xae4] ss:$16 sps:$4 sm:$0xff]   ;;  %v16204_v1 = vld [vmem:[%s24185_s1 + $0xaec] ss:$16 sps:$4 sm:$0xff]  }
 0x123   :  { %11394 = vmatpush1.bf16.msra.mxu0 %v16109_v2  ;;  %12542 = vmatpush1.bf16.msra.mxu1 %v16112_v3  ;;  %v16199_v2 = vld [vmem:[%s24185_s1 + $0xae0] ss:$16 sps:$4 sm:$0xff]   ;;  %v16202_v3 = vld [vmem:[%s24185_s1 + $0xae8] ss:$16 sps:$4 sm:$0xff]  }
 0x124   :  { %11395 = vmatprep.subr.bf16.mxu0 %v16117_v4  ;;  %12543 = vmatprep.subr.bf16.mxu1 %v16120_v5  ;;  %v16207_v4 = vld [vmem:[%s24185_s1 + $0xb04] ss:$16 sps:$4 sm:$0xff]   ;;  %v16210_v5 = vld [vmem:[%s24185_s1 + $0xb0c] ss:$16 sps:$4 sm:$0xff]  }
 0x127   :  { %11396 = vmatpush1.bf16.msra.mxu0 %v16115_v6  ;;  %12544 = vmatpush1.bf16.msra.mxu1 %v16118_v7  ;;  %v16205_v6 = vld [vmem:[%s24185_s1 + $0xb00] ss:$16 sps:$4 sm:$0xff]   ;;  %v16208_v7 = vld [vmem:[%s24185_s1 + $0xb08] ss:$16 sps:$4 sm:$0xff]  }
 0x128   :  { %11397 = vmatprep.subr.bf16.mxu0 %v16123_v8  ;;  %12545 = vmatprep.subr.bf16.mxu1 %v16126_v9  ;;  %v16213_v8 = vld [vmem:[%s24185_s1 + $0xb24] ss:$16 sps:$4 sm:$0xff]   ;;  %v16216_v9 = vld [vmem:[%s24185_s1 + $0xb2c] ss:$16 sps:$4 sm:$0xff]  }
 0x12b   :  { %11398 = vmatpush1.bf16.msra.mxu0 %v16121_v10  ;;  %12546 = vmatpush1.bf16.msra.mxu1 %v16124_v11  ;;  %v16211_v10 = vld [vmem:[%s24185_s1 + $0xb20] ss:$16 sps:$4 sm:$0xff]   ;;  %v16214_v11 = vld [vmem:[%s24185_s1 + $0xb28] ss:$16 sps:$4 sm:$0xff]  }
 0x12c   :  { %11399 = vmatprep.subr.bf16.mxu0 %v16129_v12  ;;  %12547 = vmatprep.subr.bf16.mxu1 %v16132_v52  ;;  %v16219_v12 = vld [vmem:[%s24185_s1 + $0xb44] ss:$16 sps:$4 sm:$0xff]   ;;  %v16222_v52 = vld [vmem:[%s24185_s1 + $0xb4c] ss:$16 sps:$4 sm:$0xff]  }
 0x12f   :  { %11400 = vmatpush1.bf16.msra.mxu0 %v16127_v15  ;;  %12548 = vmatpush1.bf16.msra.mxu1 %v16130_v16  ;;  %v16217_v15 = vld [vmem:[%s24185_s1 + $0xb40] ss:$16 sps:$4 sm:$0xff]   ;;  %v16220_v16 = vld [vmem:[%s24185_s1 + $0xb48] ss:$16 sps:$4 sm:$0xff]  }
 0x130   :  { %11401 = vmatprep.subr.bf16.mxu0 %v16135_v17  ;;  %12549 = vmatprep.subr.bf16.mxu1 %v16138_v18  ;;  %v16225_v17 = vld [vmem:[%s24185_s1 + $0xb64] ss:$16 sps:$4 sm:$0xff]   ;;  %v16228_v18 = vld [vmem:[%s24185_s1 + $0xb6c] ss:$16 sps:$4 sm:$0xff]  }
 0x133   :  { %11402 = vmatpush1.bf16.msra.mxu0 %v16133_v19  ;;  %12550 = vmatpush1.bf16.msra.mxu1 %v16136_v20  ;;  %v16223_v19 = vld [vmem:[%s24185_s1 + $0xb60] ss:$16 sps:$4 sm:$0xff]   ;;  %v16226_v20 = vld [vmem:[%s24185_s1 + $0xb68] ss:$16 sps:$4 sm:$0xff]  }
 0x134   :  { %11403 = vmatprep.subr.bf16.mxu0 %v16141_v22  ;;  %12551 = vmatprep.subr.bf16.mxu1 %v16144_v23  ;;  %v16231_v22 = vld [vmem:[%s24185_s1 + $0xb84] ss:$16 sps:$4 sm:$0xff]   ;;  %v16234_v23 = vld [vmem:[%s24185_s1 + $0xb8c] ss:$16 sps:$4 sm:$0xff]  }
 0x137   :  { %11404 = vmatpush1.bf16.msra.mxu0 %v16139_v24  ;;  %12552 = vmatpush1.bf16.msra.mxu1 %v16142_v13  ;;  %v16229_v24 = vld [vmem:[%s24185_s1 + $0xb80] ss:$16 sps:$4 sm:$0xff]   ;;  %v16232_v13 = vld [vmem:[%s24185_s1 + $0xb88] ss:$16 sps:$4 sm:$0xff]  }
 0x138   :  { %11405 = vmatprep.subr.bf16.mxu0 %v16147_v27  ;;  %12553 = vmatprep.subr.bf16.mxu1 %v16150_v28  ;;  %v16237_v27 = vld [vmem:[%s24185_s1 + $0xba4] ss:$16 sps:$4 sm:$0xff]   ;;  %v16240_v28 = vld [vmem:[%s24185_s1 + $0xbac] ss:$16 sps:$4 sm:$0xff]  }
 0x13b   :  { %11406 = vmatpush1.bf16.msra.mxu0 %v16145_v29  ;;  %12554 = vmatpush1.bf16.msra.mxu1 %v16148_v14  ;;  %v16235_v29 = vld [vmem:[%s24185_s1 + $0xba0] ss:$16 sps:$4 sm:$0xff]   ;;  %v16238_v14 = vld [vmem:[%s24185_s1 + $0xba8] ss:$16 sps:$4 sm:$0xff]  }
 0x13c   :  { %11407 = vmatprep.subr.bf16.mxu0 %v16153_v30  ;;  %12555 = vmatprep.subr.bf16.mxu1 %v16156_v31  ;;  %v16243_v30 = vld [vmem:[%s24185_s1 + $0xbc4] ss:$16 sps:$4 sm:$0xff]   ;;  %v16246_v31 = vld [vmem:[%s24185_s1 + $0xbcc] ss:$16 sps:$4 sm:$0xff]  }
 0x13f   :  { %11408 = vmatpush1.bf16.msra.mxu0 %v16151_v25  ;;  %12556 = vmatpush1.bf16.msra.mxu1 %v16154_v32  ;;  %v18374_v25 = vld [vmem:[%s24184_s0 + $0x8] sm:$0xff] }
 0x140   :  { %11418 = vmatprep.subr.bf16.mxu0 %v16159_v33  ;;  %12566 = vmatprep.subr.bf16.mxu1 %v16162_v26  ;;  %v1903_v32 = vcombine.high %v18374_v25, %v18374_v25  ;;  %v16241_v33 = vld [vmem:[%s24185_s1 + $0xbc0] ss:$16 sps:$4 sm:$0xff]   ;;  %v16244_v26 = vld [vmem:[%s24185_s1 + $0xbc8] ss:$16 sps:$4 sm:$0xff]  }
 0x141   :  { %v16325_v25 = vld [vmem:[%s24185_s1 + $0xd80] ss:$16 sps:$4 sm:$0xff]  }
 0x142   :  { %11410 = vmatmul.mubr.bf16.vlgmr.msra.gmra.mrb[0].mxu0 %v19469_v35  ;;  %12558 = vmatmul.mubr.bf16.vlgmr.msra.gmra.mrb[0].mxu1 %v19469_v35 }
 0x143   :  { %11419 = vmatpush1.bf16.msra.mxu0 %v16157_v36  ;;  %12567 = vmatpush1.bf16.msra.mxu1 %v16160_v37  ;;  %v16249_v36 = vld [vmem:[%s24185_s1 + $0xbe4] ss:$16 sps:$4 sm:$0xff]   ;;  %v16252_v37 = vld [vmem:[%s24185_s1 + $0xbec] ss:$16 sps:$4 sm:$0xff]  }
 0x144   :  { %11420 = vmatprep.subr.bf16.mxu0 %v16165_v38  ;;  %12568 = vmatprep.subr.bf16.mxu1 %v16168_v21  ;;  %v19659_v38 = vrot.slane %v1903_v32, %v18582_v49  ;;  %v16247_v21 = vld [vmem:[%s24185_s1 + $0xbe0] ss:$16 sps:$4 sm:$0xff]   ;;  %v16328_v32 = vld [vmem:[%s24185_s1 + $0xd88] ss:$16 sps:$4 sm:$0xff]  }
 0x145   :  { %11450 = vmatprep.mubr.bf16.mxu0 %v1950_v39  ;;  %12598 = vmatprep.mubr.bf16.mxu1 %v1950_v39  ;;  %v16250_v39 = vld [vmem:[%s24185_s1 + $0xbe8] ss:$16 sps:$4 sm:$0xff]  }
 0x147   :  { %11421 = vmatpush1.bf16.msra.mxu0 %v16163_v40  ;;  %12569 = vmatpush1.bf16.msra.mxu1 %v16166_v41  ;;  %v16255_v40 = vld [vmem:[%s24185_s1 + $0xc04] ss:$16 sps:$4 sm:$0xff]   ;;  %v16258_v41 = vld [vmem:[%s24185_s1 + $0xc0c] ss:$16 sps:$4 sm:$0xff]  }
 0x148   :  { %11422 = vmatprep.subr.bf16.mxu0 %v16171_v34  ;;  %12570 = vmatprep.subr.bf16.mxu1 %v16174_v43  ;;  %v1919_v34 = vcombine.high %v19659_v38, %v19659_v38  ;;  %v1948_v43 = vcombine.high %v19469_v35, %v19469_v35  ;;  %v16264_v35 = vld [vmem:[%s24185_s1 + $0xc2c] ss:$16 sps:$4 sm:$0xff]  }
 0x14b   :  { %11423 = vmatpush1.bf16.msra.mxu0 %v16169_v44  ;;  %12571 = vmatpush1.bf16.msra.mxu1 %v16172_v45  ;;  %v16253_v44 = vld [vmem:[%s24185_s1 + $0xc00] ss:$16 sps:$4 sm:$0xff]   ;;  %v16256_v45 = vld [vmem:[%s24185_s1 + $0xc08] ss:$16 sps:$4 sm:$0xff]  }
 0x14c   :  { %11424 = vmatprep.subr.bf16.mxu0 %v16177_v46  ;;  %12572 = vmatprep.subr.bf16.mxu1 %v16180_v47  ;;  %v16261_v46 = vld [vmem:[%s24185_s1 + $0xc24] ss:$16 sps:$4 sm:$0xff]   ;;  %v19690_v47 = vrot.slane %v1919_v34, %v18582_v49 }
 0x14d   :  { %v16345_v34 = vld [vmem:[%s24185_s1 + $0xde4] ss:$16 sps:$4 sm:$0xff]  }
 0x14f   :  { %11425 = vmatpush1.bf16.msra.mxu0 %v16175_v48  ;;  %12573 = vmatpush1.bf16.msra.mxu1 %v16178_v50  ;;  %v16259_v48 = vld [vmem:[%s24185_s1 + $0xc20] ss:$16 sps:$4 sm:$0xff]   ;;  %v16262_v50 = vld [vmem:[%s24185_s1 + $0xc28] ss:$16 sps:$4 sm:$0xff]  }
 0x150   :  { %11426 = vmatprep.subr.bf16.mxu0 %v16183_v51  ;;  %12574 = vmatprep.subr.bf16.mxu1 %v16186_v53  ;;  %v16267_v51 = vld [vmem:[%s24185_s1 + $0xc44] ss:$16 sps:$4 sm:$0xff]   ;;  %v16270_v53 = vld [vmem:[%s24185_s1 + $0xc4c] ss:$16 sps:$4 sm:$0xff]  }
 0x153   :  { %11427 = vmatpush1.bf16.msra.mxu0 %v16181_v54  ;;  %12575 = vmatpush1.bf16.msra.mxu1 %v16184_v55  ;;  %v16265_v54 = vld [vmem:[%s24185_s1 + $0xc40] ss:$16 sps:$4 sm:$0xff]   ;;  %v16268_v55 = vld [vmem:[%s24185_s1 + $0xc48] ss:$16 sps:$4 sm:$0xff]  }
 0x154   :  { %11428 = vmatprep.subr.bf16.mxu0 %v16189_v56  ;;  %12576 = vmatprep.subr.bf16.mxu1 %v16192_v57  ;;  %v16273_v56 = vld [vmem:[%s24185_s1 + $0xc64] ss:$16 sps:$4 sm:$0xff]   ;;  %v16276_v57 = vld [vmem:[%s24185_s1 + $0xc6c] ss:$16 sps:$4 sm:$0xff]  }
 0x157   :  { %11429 = vmatpush1.bf16.msra.mxu0 %v16187_v58  ;;  %12577 = vmatpush1.bf16.msra.mxu1 %v16190_v59  ;;  %v16271_v58 = vld [vmem:[%s24185_s1 + $0xc60] ss:$16 sps:$4 sm:$0xff]   ;;  %v16274_v59 = vld [vmem:[%s24185_s1 + $0xc68] ss:$16 sps:$4 sm:$0xff]  }
 0x158   :  { %11430 = vmatprep.subr.bf16.mxu0 %v16195_v60  ;;  %12578 = vmatprep.subr.bf16.mxu1 %v16198_v61  ;;  %v16279_v60 = vld [vmem:[%s24185_s1 + $0xc84] ss:$16 sps:$4 sm:$0xff]   ;;  %v16282_v61 = vld [vmem:[%s24185_s1 + $0xc8c] ss:$16 sps:$4 sm:$0xff]  }
 0x15b   :  { %11431 = vmatpush1.bf16.msra.mxu0 %v16193_v62  ;;  %12579 = vmatpush1.bf16.msra.mxu1 %v16196_v63  ;;  %v16277_v62 = vld [vmem:[%s24185_s1 + $0xc80] ss:$16 sps:$4 sm:$0xff]   ;;  %v16280_v63 = vld [vmem:[%s24185_s1 + $0xc88] ss:$16 sps:$4 sm:$0xff]  }
 0x15c   :  { %11432 = vmatprep.subr.bf16.mxu0 %v16201_v0  ;;  %12580 = vmatprep.subr.bf16.mxu1 %v16204_v1  ;;  %v16285_v0 = vld [vmem:[%s24185_s1 + $0xca4] ss:$16 sps:$4 sm:$0xff]   ;;  %v16288_v1 = vld [vmem:[%s24185_s1 + $0xcac] ss:$16 sps:$4 sm:$0xff]  }
 0x15f   :  { %11433 = vmatpush1.bf16.msra.mxu0 %v16199_v2  ;;  %12581 = vmatpush1.bf16.msra.mxu1 %v16202_v3  ;;  %v16283_v2 = vld [vmem:[%s24185_s1 + $0xca0] ss:$16 sps:$4 sm:$0xff]   ;;  %v16286_v3 = vld [vmem:[%s24185_s1 + $0xca8] ss:$16 sps:$4 sm:$0xff]  }
 0x160   :  { %11434 = vmatprep.subr.bf16.mxu0 %v16207_v4  ;;  %12582 = vmatprep.subr.bf16.mxu1 %v16210_v5  ;;  %v16291_v4 = vld [vmem:[%s24185_s1 + $0xcc4] ss:$16 sps:$4 sm:$0xff]   ;;  %v16294_v5 = vld [vmem:[%s24185_s1 + $0xccc] ss:$16 sps:$4 sm:$0xff]  }
 0x163   :  { %11435 = vmatpush1.bf16.msra.mxu0 %v16205_v6  ;;  %12583 = vmatpush1.bf16.msra.mxu1 %v16208_v7  ;;  %v16289_v6 = vld [vmem:[%s24185_s1 + $0xcc0] ss:$16 sps:$4 sm:$0xff]   ;;  %v16292_v7 = vld [vmem:[%s24185_s1 + $0xcc8] ss:$16 sps:$4 sm:$0xff]  }
 0x164   :  { %11436 = vmatprep.subr.bf16.mxu0 %v16213_v8  ;;  %12584 = vmatprep.subr.bf16.mxu1 %v16216_v9  ;;  %v16297_v8 = vld [vmem:[%s24185_s1 + $0xce4] ss:$16 sps:$4 sm:$0xff]   ;;  %v16300_v9 = vld [vmem:[%s24185_s1 + $0xcec] ss:$16 sps:$4 sm:$0xff]  }
 0x167   :  { %11437 = vmatpush1.bf16.msra.mxu0 %v16211_v10  ;;  %12585 = vmatpush1.bf16.msra.mxu1 %v16214_v11  ;;  %v16295_v10 = vld [vmem:[%s24185_s1 + $0xce0] ss:$16 sps:$4 sm:$0xff]   ;;  %v16298_v11 = vld [vmem:[%s24185_s1 + $0xce8] ss:$16 sps:$4 sm:$0xff]  }
 0x168   :  { %11438 = vmatprep.subr.bf16.mxu0 %v16219_v12  ;;  %12586 = vmatprep.subr.bf16.mxu1 %v16222_v52  ;;  %v16303_v12 = vld [vmem:[%s24185_s1 + $0xd04] ss:$16 sps:$4 sm:$0xff]   ;;  %v16306_v52 = vld [vmem:[%s24185_s1 + $0xd0c] ss:$16 sps:$4 sm:$0xff]  }
 0x16b   :  { %11439 = vmatpush1.bf16.msra.mxu0 %v16217_v15  ;;  %12587 = vmatpush1.bf16.msra.mxu1 %v16220_v16  ;;  %v16301_v15 = vld [vmem:[%s24185_s1 + $0xd00] ss:$16 sps:$4 sm:$0xff]   ;;  %v16304_v16 = vld [vmem:[%s24185_s1 + $0xd08] ss:$16 sps:$4 sm:$0xff]  }
 0x16c   :  { %11440 = vmatprep.subr.bf16.mxu0 %v16225_v17  ;;  %12588 = vmatprep.subr.bf16.mxu1 %v16228_v18  ;;  %v16309_v17 = vld [vmem:[%s24185_s1 + $0xd24] ss:$16 sps:$4 sm:$0xff]   ;;  %v16312_v18 = vld [vmem:[%s24185_s1 + $0xd2c] ss:$16 sps:$4 sm:$0xff]  }
 0x16f   :  { %11441 = vmatpush1.bf16.msra.mxu0 %v16223_v19  ;;  %12589 = vmatpush1.bf16.msra.mxu1 %v16226_v20  ;;  %v16307_v19 = vld [vmem:[%s24185_s1 + $0xd20] ss:$16 sps:$4 sm:$0xff]   ;;  %v16310_v20 = vld [vmem:[%s24185_s1 + $0xd28] ss:$16 sps:$4 sm:$0xff]  }
 0x170   :  { %11442 = vmatprep.subr.bf16.mxu0 %v16231_v22  ;;  %12590 = vmatprep.subr.bf16.mxu1 %v16234_v23  ;;  %v16315_v22 = vld [vmem:[%s24185_s1 + $0xd44] ss:$16 sps:$4 sm:$0xff]   ;;  %v16318_v23 = vld [vmem:[%s24185_s1 + $0xd4c] ss:$16 sps:$4 sm:$0xff]  }
 0x173   :  { %11443 = vmatpush1.bf16.msra.mxu0 %v16229_v24  ;;  %12591 = vmatpush1.bf16.msra.mxu1 %v16232_v13  ;;  %v16313_v24 = vld [vmem:[%s24185_s1 + $0xd40] ss:$16 sps:$4 sm:$0xff]   ;;  %v16316_v13 = vld [vmem:[%s24185_s1 + $0xd48] ss:$16 sps:$4 sm:$0xff]  }
 0x174   :  { %11444 = vmatprep.subr.bf16.mxu0 %v16237_v27  ;;  %12592 = vmatprep.subr.bf16.mxu1 %v16240_v28  ;;  %v16321_v27 = vld [vmem:[%s24185_s1 + $0xd64] ss:$16 sps:$4 sm:$0xff]   ;;  %v16324_v28 = vld [vmem:[%s24185_s1 + $0xd6c] ss:$16 sps:$4 sm:$0xff]  }
 0x177   :  { %11445 = vmatpush1.bf16.msra.mxu0 %v16235_v29  ;;  %12593 = vmatpush1.bf16.msra.mxu1 %v16238_v14  ;;  %v16319_v29 = vld [vmem:[%s24185_s1 + $0xd60] ss:$16 sps:$4 sm:$0xff]   ;;  %v16322_v14 = vld [vmem:[%s24185_s1 + $0xd68] ss:$16 sps:$4 sm:$0xff]  }
 0x178   :  { %11446 = vmatprep.subr.bf16.mxu0 %v16243_v30  ;;  %12594 = vmatprep.subr.bf16.mxu1 %v16246_v31  ;;  %v16327_v30 = vld [vmem:[%s24185_s1 + $0xd84] ss:$16 sps:$4 sm:$0xff]   ;;  %v16330_v31 = vld [vmem:[%s24185_s1 + $0xd8c] ss:$16 sps:$4 sm:$0xff]  }
 0x17b   :  { %11447 = vmatpush1.bf16.msra.mxu0 %v16241_v33  ;;  %12595 = vmatpush1.bf16.msra.mxu1 %v16244_v26  ;;  %v16333_v33 = vld [vmem:[%s24185_s1 + $0xda4] ss:$16 sps:$4 sm:$0xff]   ;;  %v16336_v26 = vld [vmem:[%s24185_s1 + $0xdac] ss:$16 sps:$4 sm:$0xff]  }
 0x17c   :  { %11448 = vmatprep.subr.bf16.mxu0 %v16249_v36  ;;  %12596 = vmatprep.subr.bf16.mxu1 %v16252_v37  ;;  %v16331_v36 = vld [vmem:[%s24185_s1 + $0xda0] ss:$16 sps:$4 sm:$0xff]   ;;  %v16334_v37 = vld [vmem:[%s24185_s1 + $0xda8] ss:$16 sps:$4 sm:$0xff]  }
 0x17f   :  { %11449 = vmatpush1.bf16.msra.mxu0 %v16247_v21  ;;  %12597 = vmatpush1.bf16.msra.mxu1 %v16250_v39  ;;  %v16339_v21 = vld [vmem:[%s24185_s1 + $0xdc4] ss:$16 sps:$4 sm:$0xff]   ;;  %v16342_v39 = vld [vmem:[%s24185_s1 + $0xdcc] ss:$16 sps:$4 sm:$0xff]  }
 0x180   :  { %11459 = vmatprep.subr.bf16.mxu0 %v16255_v40  ;;  %12607 = vmatprep.subr.bf16.mxu1 %v16258_v41  ;;  %v16337_v40 = vld [vmem:[%s24185_s1 + $0xdc0] ss:$16 sps:$4 sm:$0xff]   ;;  %v16340_v41 = vld [vmem:[%s24185_s1 + $0xdc8] ss:$16 sps:$4 sm:$0xff]  }
 0x182   :  { %11451 = vmatmul.mubr.bf16.vlgmr.msra.gmra.mrb[0].mxu0 %v1948_v43  ;;  %12599 = vmatmul.mubr.bf16.vlgmr.msra.gmra.mrb[0].mxu1 %v1948_v43  ;;  %v16348_v43 = vld [vmem:[%s24185_s1 + $0xdec] ss:$16 sps:$4 sm:$0xff]  }
 0x183   :  { %11460 = vmatpush1.bf16.msra.mxu0 %v16253_v44  ;;  %12608 = vmatpush1.bf16.msra.mxu1 %v16256_v45  ;;  %v16343_v44 = vld [vmem:[%s24185_s1 + $0xde0] ss:$16 sps:$4 sm:$0xff]   ;;  %v16346_v45 = vld [vmem:[%s24185_s1 + $0xde8] ss:$16 sps:$4 sm:$0xff]  }
 0x184   :  { %11461 = vmatprep.subr.bf16.mxu0 %v16261_v46  ;;  %12609 = vmatprep.subr.bf16.mxu1 %v16264_v35  ;;  %v16352_v46 = vld [vmem:[%s24185_s1 + $0xe04] ss:$16 sps:$4 sm:$0xff]   ;;  %v16355_v35 = vld [vmem:[%s24185_s1 + $0xe0c] ss:$16 sps:$4 sm:$0xff]  }
 0x185   :  { %11491 = vmatprep.mubr.bf16.mxu0 %v19690_v47  ;;  %12639 = vmatprep.mubr.bf16.mxu1 %v19690_v47 }
 0x187   :  { %11462 = vmatpush1.bf16.msra.mxu0 %v16259_v48  ;;  %12610 = vmatpush1.bf16.msra.mxu1 %v16262_v50  ;;  %v19876_v48 = vrot.slane %v19659_v38, %v18582_v49  ;;  %v16350_v50 = vld [vmem:[%s24185_s1 + $0xe00] ss:$16 sps:$4 sm:$0xff]   ;;  %v16361_v38 = vld [vmem:[%s24185_s1 + $0xe2c] ss:$16 sps:$4 sm:$0xff]  }
 0x188   :  { %11463 = vmatprep.subr.bf16.mxu0 %v16267_v51  ;;  %12611 = vmatprep.subr.bf16.mxu1 %v16270_v53  ;;  %v16353_v51 = vld [vmem:[%s24185_s1 + $0xe08] ss:$16 sps:$4 sm:$0xff]   ;;  %v16358_v53 = vld [vmem:[%s24185_s1 + $0xe24] ss:$16 sps:$4 sm:$0xff]  }
 0x18b   :  { %11464 = vmatpush1.bf16.msra.mxu0 %v16265_v54  ;;  %12612 = vmatpush1.bf16.msra.mxu1 %v16268_v55  ;;  %v1951_v54 = vcombine.high %v19690_v47, %v19690_v47  ;;  %v16356_v55 = vld [vmem:[%s24185_s1 + $0xe20] ss:$16 sps:$4 sm:$0xff]   ;;  %v16364_v47 = vld [vmem:[%s24185_s1 + $0xe44] ss:$16 sps:$4 sm:$0xff]  }
 0x18c   :  { %11465 = vmatprep.subr.bf16.mxu0 %v16273_v56  ;;  %12613 = vmatprep.subr.bf16.mxu1 %v16276_v57  ;;  %v16359_v56 = vld [vmem:[%s24185_s1 + $0xe28] ss:$16 sps:$4 sm:$0xff]   ;;  %v16367_v57 = vld [vmem:[%s24185_s1 + $0xe4c] ss:$16 sps:$4 sm:$0xff]  }
 0x18f   :  { %11466 = vmatpush1.bf16.msra.mxu0 %v16271_v58  ;;  %12614 = vmatpush1.bf16.msra.mxu1 %v16274_v59  ;;  %v16362_v58 = vld [vmem:[%s24185_s1 + $0xe40] ss:$16 sps:$4 sm:$0xff]   ;;  %v16365_v59 = vld [vmem:[%s24185_s1 + $0xe48] ss:$16 sps:$4 sm:$0xff]  }
 0x190   :  { %11467 = vmatprep.subr.bf16.mxu0 %v16279_v60  ;;  %12615 = vmatprep.subr.bf16.mxu1 %v16282_v61  ;;  %v16370_v60 = vld [vmem:[%s24185_s1 + $0xe64] ss:$16 sps:$4 sm:$0xff]   ;;  %v16373_v61 = vld [vmem:[%s24185_s1 + $0xe6c] ss:$16 sps:$4 sm:$0xff]  }
 0x193   :  { %11468 = vmatpush1.bf16.msra.mxu0 %v16277_v62  ;;  %12616 = vmatpush1.bf16.msra.mxu1 %v16280_v63  ;;  %v16368_v62 = vld [vmem:[%s24185_s1 + $0xe60] ss:$16 sps:$4 sm:$0xff]   ;;  %v16371_v63 = vld [vmem:[%s24185_s1 + $0xe68] ss:$16 sps:$4 sm:$0xff]  }
 0x194   :  { %11469 = vmatprep.subr.bf16.mxu0 %v16285_v0  ;;  %12617 = vmatprep.subr.bf16.mxu1 %v16288_v1  ;;  %v16376_v0 = vld [vmem:[%s24185_s1 + $0xe84] ss:$16 sps:$4 sm:$0xff]   ;;  %v16379_v1 = vld [vmem:[%s24185_s1 + $0xe8c] ss:$16 sps:$4 sm:$0xff]  }
 0x197   :  { %11470 = vmatpush1.bf16.msra.mxu0 %v16283_v2  ;;  %12618 = vmatpush1.bf16.msra.mxu1 %v16286_v3  ;;  %v16374_v2 = vld [vmem:[%s24185_s1 + $0xe80] ss:$16 sps:$4 sm:$0xff]   ;;  %v16377_v3 = vld [vmem:[%s24185_s1 + $0xe88] ss:$16 sps:$4 sm:$0xff]  }
 0x198   :  { %11471 = vmatprep.subr.bf16.mxu0 %v16291_v4  ;;  %12619 = vmatprep.subr.bf16.mxu1 %v16294_v5  ;;  %v16382_v4 = vld [vmem:[%s24185_s1 + $0xea4] ss:$16 sps:$4 sm:$0xff]   ;;  %v16385_v5 = vld [vmem:[%s24185_s1 + $0xeac] ss:$16 sps:$4 sm:$0xff]  }
 0x19b   :  { %11472 = vmatpush1.bf16.msra.mxu0 %v16289_v6  ;;  %12620 = vmatpush1.bf16.msra.mxu1 %v16292_v7  ;;  %v16380_v6 = vld [vmem:[%s24185_s1 + $0xea0] ss:$16 sps:$4 sm:$0xff]   ;;  %v16383_v7 = vld [vmem:[%s24185_s1 + $0xea8] ss:$16 sps:$4 sm:$0xff]  }
 0x19c   :  { %11473 = vmatprep.subr.bf16.mxu0 %v16297_v8  ;;  %12621 = vmatprep.subr.bf16.mxu1 %v16300_v9  ;;  %v16388_v8 = vld [vmem:[%s24185_s1 + $0xec4] ss:$16 sps:$4 sm:$0xff]   ;;  %v16391_v9 = vld [vmem:[%s24185_s1 + $0xecc] ss:$16 sps:$4 sm:$0xff]  }
 0x19f   :  { %11474 = vmatpush1.bf16.msra.mxu0 %v16295_v10  ;;  %12622 = vmatpush1.bf16.msra.mxu1 %v16298_v11  ;;  %v16386_v10 = vld [vmem:[%s24185_s1 + $0xec0] ss:$16 sps:$4 sm:$0xff]   ;;  %v16389_v11 = vld [vmem:[%s24185_s1 + $0xec8] ss:$16 sps:$4 sm:$0xff]  }
 0x1a0   :  { %11475 = vmatprep.subr.bf16.mxu0 %v16303_v12  ;;  %12623 = vmatprep.subr.bf16.mxu1 %v16306_v52  ;;  %v16394_v12 = vld [vmem:[%s24185_s1 + $0xee4] ss:$16 sps:$4 sm:$0xff]   ;;  %v16397_v52 = vld [vmem:[%s24185_s1 + $0xeec] ss:$16 sps:$4 sm:$0xff]  }
 0x1a3   :  { %11476 = vmatpush1.bf16.msra.mxu0 %v16301_v15  ;;  %12624 = vmatpush1.bf16.msra.mxu1 %v16304_v16  ;;  %v16392_v15 = vld [vmem:[%s24185_s1 + $0xee0] ss:$16 sps:$4 sm:$0xff]   ;;  %v16395_v16 = vld [vmem:[%s24185_s1 + $0xee8] ss:$16 sps:$4 sm:$0xff]  }
 0x1a4   :  { %11477 = vmatprep.subr.bf16.mxu0 %v16309_v17  ;;  %12625 = vmatprep.subr.bf16.mxu1 %v16312_v18  ;;  %v16400_v17 = vld [vmem:[%s24185_s1 + $0xf04] ss:$16 sps:$4 sm:$0xff]   ;;  %v16403_v18 = vld [vmem:[%s24185_s1 + $0xf0c] ss:$16 sps:$4 sm:$0xff]  }
 0x1a7   :  { %11478 = vmatpush1.bf16.msra.mxu0 %v16307_v19  ;;  %12626 = vmatpush1.bf16.msra.mxu1 %v16310_v20  ;;  %v16398_v19 = vld [vmem:[%s24185_s1 + $0xf00] ss:$16 sps:$4 sm:$0xff]   ;;  %v16401_v20 = vld [vmem:[%s24185_s1 + $0xf08] ss:$16 sps:$4 sm:$0xff]  }
 0x1a8   :  { %11479 = vmatprep.subr.bf16.mxu0 %v16315_v22  ;;  %12627 = vmatprep.subr.bf16.mxu1 %v16318_v23  ;;  %v16406_v22 = vld [vmem:[%s24185_s1 + $0xf24] ss:$16 sps:$4 sm:$0xff]   ;;  %v16409_v23 = vld [vmem:[%s24185_s1 + $0xf2c] ss:$16 sps:$4 sm:$0xff]  }
 0x1ab   :  { %11480 = vmatpush1.bf16.msra.mxu0 %v16313_v24  ;;  %12628 = vmatpush1.bf16.msra.mxu1 %v16316_v13  ;;  %v16404_v24 = vld [vmem:[%s24185_s1 + $0xf20] ss:$16 sps:$4 sm:$0xff]   ;;  %v16407_v13 = vld [vmem:[%s24185_s1 + $0xf28] ss:$16 sps:$4 sm:$0xff]  }
 0x1ac   :  { %11481 = vmatprep.subr.bf16.mxu0 %v16321_v27  ;;  %12629 = vmatprep.subr.bf16.mxu1 %v16324_v28  ;;  %v16412_v27 = vld [vmem:[%s24185_s1 + $0xf44] ss:$16 sps:$4 sm:$0xff]   ;;  %v16415_v28 = vld [vmem:[%s24185_s1 + $0xf4c] ss:$16 sps:$4 sm:$0xff]  }
 0x1af   :  { %11482 = vmatpush1.bf16.msra.mxu0 %v16319_v29  ;;  %12630 = vmatpush1.bf16.msra.mxu1 %v16322_v14  ;;  %v16410_v29 = vld [vmem:[%s24185_s1 + $0xf40] ss:$16 sps:$4 sm:$0xff]   ;;  %v16413_v14 = vld [vmem:[%s24185_s1 + $0xf48] ss:$16 sps:$4 sm:$0xff]  }
 0x1b0   :  { %11483 = vmatprep.subr.bf16.mxu0 %v16327_v30  ;;  %12631 = vmatprep.subr.bf16.mxu1 %v16330_v31  ;;  %v16418_v30 = vld [vmem:[%s24185_s1 + $0xf64] ss:$16 sps:$4 sm:$0xff]   ;;  %v16421_v31 = vld [vmem:[%s24185_s1 + $0xf6c] ss:$16 sps:$4 sm:$0xff]  }
 0x1b3   :  { %11484 = vmatpush1.bf16.msra.mxu0 %v16325_v25  ;;  %12632 = vmatpush1.bf16.msra.mxu1 %v16328_v32  ;;  %v16416_v25 = vld [vmem:[%s24185_s1 + $0xf60] ss:$16 sps:$4 sm:$0xff]   ;;  %v16419_v32 = vld [vmem:[%s24185_s1 + $0xf68] ss:$16 sps:$4 sm:$0xff]  }
 0x1b4   :  { %11485 = vmatprep.subr.bf16.mxu0 %v16333_v33  ;;  %12633 = vmatprep.subr.bf16.mxu1 %v16336_v26  ;;  %v16424_v33 = vld [vmem:[%s24185_s1 + $0xf84] ss:$16 sps:$4 sm:$0xff]   ;;  %v16427_v26 = vld [vmem:[%s24185_s1 + $0xf8c] ss:$16 sps:$4 sm:$0xff]  }
 0x1b7   :  { %11486 = vmatpush1.bf16.msra.mxu0 %v16331_v36  ;;  %12634 = vmatpush1.bf16.msra.mxu1 %v16334_v37  ;;  %v16422_v36 = vld [vmem:[%s24185_s1 + $0xf80] ss:$16 sps:$4 sm:$0xff]   ;;  %v16425_v37 = vld [vmem:[%s24185_s1 + $0xf88] ss:$16 sps:$4 sm:$0xff]  }
 0x1b8   :  { %11487 = vmatprep.subr.bf16.mxu0 %v16339_v21  ;;  %12635 = vmatprep.subr.bf16.mxu1 %v16342_v39  ;;  %v16430_v21 = vld [vmem:[%s24185_s1 + $0xfa4] ss:$16 sps:$4 sm:$0xff]   ;;  %v16433_v39 = vld [vmem:[%s24185_s1 + $0xfac] ss:$16 sps:$4 sm:$0xff]  }
 0x1bb   :  { %11488 = vmatpush1.bf16.msra.mxu0 %v16337_v40  ;;  %12636 = vmatpush1.bf16.msra.mxu1 %v16340_v41  ;;  %v16428_v40 = vld [vmem:[%s24185_s1 + $0xfa0] ss:$16 sps:$4 sm:$0xff]   ;;  %v16431_v41 = vld [vmem:[%s24185_s1 + $0xfa8] ss:$16 sps:$4 sm:$0xff]  }
 0x1bc   :  { %11489 = vmatprep.subr.bf16.mxu0 %v16345_v34  ;;  %12637 = vmatprep.subr.bf16.mxu1 %v16348_v43  ;;  %v16436_v34 = vld [vmem:[%s24185_s1 + $0xfc4] ss:$16 sps:$4 sm:$0xff]   ;;  %v16439_v43 = vld [vmem:[%s24185_s1 + $0xfcc] ss:$16 sps:$4 sm:$0xff]  }
 0x1bf   :  { %11490 = vmatpush1.bf16.msra.mxu0 %v16343_v44  ;;  %12638 = vmatpush1.bf16.msra.mxu1 %v16346_v45  ;;  %v20053_v44 = vld.sshfl [vmem:[%s24184_s0 + $0x10] sm:$0xff pattern:$0x75316420] }
 0x1c0   :  { %11500 = vmatprep.subr.bf16.mxu0 %v16352_v46  ;;  %12648 = vmatprep.subr.bf16.mxu1 %v16355_v35  ;;  %v16434_v45 = vld [vmem:[%s24185_s1 + $0xfc0] ss:$16 sps:$4 sm:$0xff]   ;;  %v16437_v46 = vld [vmem:[%s24185_s1 + $0xfc8] ss:$16 sps:$4 sm:$0xff]   ;;  %v16442_v35 = vld [vmem:[%s24185_s1 + $0xfe4] ss:$16 sps:$4 sm:$0xff]  }
 0x1c2   :  { %11492 = vmatmul.mubr.bf16.vlgmr.msra.gmra.mrb[0].mxu0 %v19876_v48  ;;  %12640 = vmatmul.mubr.bf16.vlgmr.msra.gmra.mrb[0].mxu1 %v19876_v48 }
 0x1c3   :  { %11501 = vmatpush1.bf16.msra.mxu0 %v16350_v50  ;;  %12649 = vmatpush1.bf16.msra.mxu1 %v16353_v51  ;;  %v16445_v50 = vld [vmem:[%s24185_s1 + $0xfec] ss:$16 sps:$4 sm:$0xff]   ;;  %v16440_v51 = vld [vmem:[%s24185_s1 + $0xfe0] ss:$16 sps:$4 sm:$0xff]  }
 0x1c4   :  { %11502 = vmatprep.subr.bf16.mxu0 %v16358_v53  ;;  %12650 = vmatprep.subr.bf16.mxu1 %v16361_v38  ;;  %v16443_v53 = vld [vmem:[%s24185_s1 + $0xfe8] ss:$16 sps:$4 sm:$0xff]   ;;  %v16448_v38 = vld [vmem:[%s24185_s1 + $0x1004] ss:$16 sps:$4 sm:$0xff]  }
 0x1c5   :  { %11532 = vmatprep.mubr.bf16.mxu0 %v1951_v54  ;;  %12680 = vmatprep.mubr.bf16.mxu1 %v1951_v54  ;;  %v16451_v54 = vld [vmem:[%s24185_s1 + $0x100c] ss:$16 sps:$4 sm:$0xff]  }
 0x1c7   :  { %11503 = vmatpush1.bf16.msra.mxu0 %v16356_v55  ;;  %12651 = vmatpush1.bf16.msra.mxu1 %v16359_v56  ;;  %v1967_v55 = vcombine.high %v20053_v44, %v20053_v44  ;;  %v1949_v56 = vcombine.high %v19876_v48, %v19876_v48  ;;  %v16457_v48 = vld [vmem:[%s24185_s1 + $0x102c] ss:$16 sps:$4 sm:$0xff]  }
 0x1c8   :  { %11504 = vmatprep.subr.bf16.mxu0 %v16364_v47  ;;  %12652 = vmatprep.subr.bf16.mxu1 %v16367_v57  ;;  %v16446_v47 = vld [vmem:[%s24185_s1 + $0x1000] ss:$16 sps:$4 sm:$0xff]   ;;  %v16449_v57 = vld [vmem:[%s24185_s1 + $0x1008] ss:$16 sps:$4 sm:$0xff]  }
 0x1cb   :  { %11505 = vmatpush1.bf16.msra.mxu0 %v16362_v58  ;;  %12653 = vmatpush1.bf16.msra.mxu1 %v16365_v59  ;;  %v16454_v58 = vld [vmem:[%s24185_s1 + $0x1024] ss:$16 sps:$4 sm:$0xff]   ;;  %v20096_v59 = vrot.slane %v1967_v55, %v18582_v49 }
 0x1cc   :  { %11506 = vmatprep.subr.bf16.mxu0 %v16370_v60  ;;  %12654 = vmatprep.subr.bf16.mxu1 %v16373_v61  ;;  %v16452_v60 = vld [vmem:[%s24185_s1 + $0x1020] ss:$16 sps:$4 sm:$0xff]   ;;  %v16455_v61 = vld [vmem:[%s24185_s1 + $0x1028] ss:$16 sps:$4 sm:$0xff]   ;;  %v16538_v55 = vld [vmem:[%s24185_s1 + $0x11e4] ss:$16 sps:$4 sm:$0xff]  }
 0x1cf   :  { %11507 = vmatpush1.bf16.msra.mxu0 %v16368_v62  ;;  %12655 = vmatpush1.bf16.msra.mxu1 %v16371_v63  ;;  %v16460_v62 = vld [vmem:[%s24185_s1 + $0x1044] ss:$16 sps:$4 sm:$0xff]   ;;  %v16463_v63 = vld [vmem:[%s24185_s1 + $0x104c] ss:$16 sps:$4 sm:$0xff]  }
 0x1d0   :  { %11508 = vmatprep.subr.bf16.mxu0 %v16376_v0  ;;  %12656 = vmatprep.subr.bf16.mxu1 %v16379_v1  ;;  %v16458_v0 = vld [vmem:[%s24185_s1 + $0x1040] ss:$16 sps:$4 sm:$0xff]   ;;  %v16461_v1 = vld [vmem:[%s24185_s1 + $0x1048] ss:$16 sps:$4 sm:$0xff]  }
 0x1d3   :  { %11509 = vmatpush1.bf16.msra.mxu0 %v16374_v2  ;;  %12657 = vmatpush1.bf16.msra.mxu1 %v16377_v3  ;;  %v16466_v2 = vld [vmem:[%s24185_s1 + $0x1064] ss:$16 sps:$4 sm:$0xff]   ;;  %v16469_v3 = vld [vmem:[%s24185_s1 + $0x106c] ss:$16 sps:$4 sm:$0xff]  }
 0x1d4   :  { %11510 = vmatprep.subr.bf16.mxu0 %v16382_v4  ;;  %12658 = vmatprep.subr.bf16.mxu1 %v16385_v5  ;;  %v16464_v4 = vld [vmem:[%s24185_s1 + $0x1060] ss:$16 sps:$4 sm:$0xff]   ;;  %v16467_v5 = vld [vmem:[%s24185_s1 + $0x1068] ss:$16 sps:$4 sm:$0xff]  }
 0x1d7   :  { %11511 = vmatpush1.bf16.msra.mxu0 %v16380_v6  ;;  %12659 = vmatpush1.bf16.msra.mxu1 %v16383_v7  ;;  %v16472_v6 = vld [vmem:[%s24185_s1 + $0x1084] ss:$16 sps:$4 sm:$0xff]   ;;  %v16475_v7 = vld [vmem:[%s24185_s1 + $0x108c] ss:$16 sps:$4 sm:$0xff]  }
 0x1d8   :  { %11512 = vmatprep.subr.bf16.mxu0 %v16388_v8  ;;  %12660 = vmatprep.subr.bf16.mxu1 %v16391_v9  ;;  %v16470_v8 = vld [vmem:[%s24185_s1 + $0x1080] ss:$16 sps:$4 sm:$0xff]   ;;  %v16473_v9 = vld [vmem:[%s24185_s1 + $0x1088] ss:$16 sps:$4 sm:$0xff]  }
 0x1db   :  { %11513 = vmatpush1.bf16.msra.mxu0 %v16386_v10  ;;  %12661 = vmatpush1.bf16.msra.mxu1 %v16389_v11  ;;  %v16478_v10 = vld [vmem:[%s24185_s1 + $0x10a4] ss:$16 sps:$4 sm:$0xff]   ;;  %v16481_v11 = vld [vmem:[%s24185_s1 + $0x10ac] ss:$16 sps:$4 sm:$0xff]  }
 0x1dc   :  { %11514 = vmatprep.subr.bf16.mxu0 %v16394_v12  ;;  %12662 = vmatprep.subr.bf16.mxu1 %v16397_v52  ;;  %v16476_v12 = vld [vmem:[%s24185_s1 + $0x10a0] ss:$16 sps:$4 sm:$0xff]   ;;  %v16479_v52 = vld [vmem:[%s24185_s1 + $0x10a8] ss:$16 sps:$4 sm:$0xff]  }
 0x1df   :  { %11515 = vmatpush1.bf16.msra.mxu0 %v16392_v15  ;;  %12663 = vmatpush1.bf16.msra.mxu1 %v16395_v16  ;;  %v16484_v15 = vld [vmem:[%s24185_s1 + $0x10c4] ss:$16 sps:$4 sm:$0xff]   ;;  %v16487_v16 = vld [vmem:[%s24185_s1 + $0x10cc] ss:$16 sps:$4 sm:$0xff]  }
 0x1e0   :  { %11516 = vmatprep.subr.bf16.mxu0 %v16400_v17  ;;  %12664 = vmatprep.subr.bf16.mxu1 %v16403_v18  ;;  %v16482_v17 = vld [vmem:[%s24185_s1 + $0x10c0] ss:$16 sps:$4 sm:$0xff]   ;;  %v16485_v18 = vld [vmem:[%s24185_s1 + $0x10c8] ss:$16 sps:$4 sm:$0xff]  }
 0x1e3   :  { %11517 = vmatpush1.bf16.msra.mxu0 %v16398_v19  ;;  %12665 = vmatpush1.bf16.msra.mxu1 %v16401_v20  ;;  %v16490_v19 = vld [vmem:[%s24185_s1 + $0x10e4] ss:$16 sps:$4 sm:$0xff]   ;;  %v16493_v20 = vld [vmem:[%s24185_s1 + $0x10ec] ss:$16 sps:$4 sm:$0xff]  }
 0x1e4   :  { %11518 = vmatprep.subr.bf16.mxu0 %v16406_v22  ;;  %12666 = vmatprep.subr.bf16.mxu1 %v16409_v23  ;;  %v16488_v22 = vld [vmem:[%s24185_s1 + $0x10e0] ss:$16 sps:$4 sm:$0xff]   ;;  %v16491_v23 = vld [vmem:[%s24185_s1 + $0x10e8] ss:$16 sps:$4 sm:$0xff]  }
 0x1e7   :  { %11519 = vmatpush1.bf16.msra.mxu0 %v16404_v24  ;;  %12667 = vmatpush1.bf16.msra.mxu1 %v16407_v13  ;;  %v16496_v24 = vld [vmem:[%s24185_s1 + $0x1104] ss:$16 sps:$4 sm:$0xff]   ;;  %v16499_v13 = vld [vmem:[%s24185_s1 + $0x110c] ss:$16 sps:$4 sm:$0xff]  }
 0x1e8   :  { %11520 = vmatprep.subr.bf16.mxu0 %v16412_v27  ;;  %12668 = vmatprep.subr.bf16.mxu1 %v16415_v28  ;;  %v16494_v27 = vld [vmem:[%s24185_s1 + $0x1100] ss:$16 sps:$4 sm:$0xff]   ;;  %v16497_v28 = vld [vmem:[%s24185_s1 + $0x1108] ss:$16 sps:$4 sm:$0xff]  }
 0x1eb   :  { %11521 = vmatpush1.bf16.msra.mxu0 %v16410_v29  ;;  %12669 = vmatpush1.bf16.msra.mxu1 %v16413_v14  ;;  %v16502_v29 = vld [vmem:[%s24185_s1 + $0x1124] ss:$16 sps:$4 sm:$0xff]   ;;  %v16505_v14 = vld [vmem:[%s24185_s1 + $0x112c] ss:$16 sps:$4 sm:$0xff]  }
 0x1ec   :  { %11522 = vmatprep.subr.bf16.mxu0 %v16418_v30  ;;  %12670 = vmatprep.subr.bf16.mxu1 %v16421_v31  ;;  %v16500_v30 = vld [vmem:[%s24185_s1 + $0x1120] ss:$16 sps:$4 sm:$0xff]   ;;  %v16503_v31 = vld [vmem:[%s24185_s1 + $0x1128] ss:$16 sps:$4 sm:$0xff]  }
 0x1ef   :  { %11523 = vmatpush1.bf16.msra.mxu0 %v16416_v25  ;;  %12671 = vmatpush1.bf16.msra.mxu1 %v16419_v32  ;;  %v16508_v25 = vld [vmem:[%s24185_s1 + $0x1144] ss:$16 sps:$4 sm:$0xff]   ;;  %v16511_v32 = vld [vmem:[%s24185_s1 + $0x114c] ss:$16 sps:$4 sm:$0xff]  }
 0x1f0   :  { %11524 = vmatprep.subr.bf16.mxu0 %v16424_v33  ;;  %12672 = vmatprep.subr.bf16.mxu1 %v16427_v26  ;;  %v16506_v33 = vld [vmem:[%s24185_s1 + $0x1140] ss:$16 sps:$4 sm:$0xff]   ;;  %v16509_v26 = vld [vmem:[%s24185_s1 + $0x1148] ss:$16 sps:$4 sm:$0xff]  }
 0x1f3   :  { %11525 = vmatpush1.bf16.msra.mxu0 %v16422_v36  ;;  %12673 = vmatpush1.bf16.msra.mxu1 %v16425_v37  ;;  %v16514_v36 = vld [vmem:[%s24185_s1 + $0x1164] ss:$16 sps:$4 sm:$0xff]   ;;  %v16517_v37 = vld [vmem:[%s24185_s1 + $0x116c] ss:$16 sps:$4 sm:$0xff]  }
 0x1f4   :  { %11526 = vmatprep.subr.bf16.mxu0 %v16430_v21  ;;  %12674 = vmatprep.subr.bf16.mxu1 %v16433_v39  ;;  %v16512_v21 = vld [vmem:[%s24185_s1 + $0x1160] ss:$16 sps:$4 sm:$0xff]   ;;  %v16515_v39 = vld [vmem:[%s24185_s1 + $0x1168] ss:$16 sps:$4 sm:$0xff]  }
 0x1f7   :  { %11527 = vmatpush1.bf16.msra.mxu0 %v16428_v40  ;;  %12675 = vmatpush1.bf16.msra.mxu1 %v16431_v41  ;;  %v16520_v40 = vld [vmem:[%s24185_s1 + $0x1184] ss:$16 sps:$4 sm:$0xff]   ;;  %v16523_v41 = vld [vmem:[%s24185_s1 + $0x118c] ss:$16 sps:$4 sm:$0xff]  }
 0x1f8   :  { %11528 = vmatprep.subr.bf16.mxu0 %v16436_v34  ;;  %12676 = vmatprep.subr.bf16.mxu1 %v16439_v43  ;;  %v16518_v34 = vld [vmem:[%s24185_s1 + $0x1180] ss:$16 sps:$4 sm:$0xff]   ;;  %v16521_v43 = vld [vmem:[%s24185_s1 + $0x1188] ss:$16 sps:$4 sm:$0xff]  }
 0x1fb   :  { %11529 = vmatpush1.bf16.msra.mxu0 %v16434_v45  ;;  %12677 = vmatpush1.bf16.msra.mxu1 %v16437_v46  ;;  %v16526_v45 = vld [vmem:[%s24185_s1 + $0x11a4] ss:$16 sps:$4 sm:$0xff]   ;;  %v16529_v46 = vld [vmem:[%s24185_s1 + $0x11ac] ss:$16 sps:$4 sm:$0xff]  }
 0x1fc   :  { %11530 = vmatprep.subr.bf16.mxu0 %v16442_v35  ;;  %12678 = vmatprep.subr.bf16.mxu1 %v16445_v50  ;;  %v16524_v35 = vld [vmem:[%s24185_s1 + $0x11a0] ss:$16 sps:$4 sm:$0xff]   ;;  %v16527_v50 = vld [vmem:[%s24185_s1 + $0x11a8] ss:$16 sps:$4 sm:$0xff]  }
 0x1ff   :  { %11531 = vmatpush1.bf16.msra.mxu0 %v16440_v51  ;;  %12679 = vmatpush1.bf16.msra.mxu1 %v16443_v53  ;;  %v16532_v51 = vld [vmem:[%s24185_s1 + $0x11c4] ss:$16 sps:$4 sm:$0xff]   ;;  %v16535_v53 = vld [vmem:[%s24185_s1 + $0x11cc] ss:$16 sps:$4 sm:$0xff]  }
 0x200   :  { %11541 = vmatprep.subr.bf16.mxu0 %v16448_v38  ;;  %12689 = vmatprep.subr.bf16.mxu1 %v16451_v54  ;;  %v16530_v38 = vld [vmem:[%s24185_s1 + $0x11c0] ss:$16 sps:$4 sm:$0xff]   ;;  %v16533_v54 = vld [vmem:[%s24185_s1 + $0x11c8] ss:$16 sps:$4 sm:$0xff]  }
 0x202   :  { %11533 = vmatmul.mubr.bf16.vlgmr.msra.gmra.mrb[0].mxu0 %v1949_v56  ;;  %12681 = vmatmul.mubr.bf16.vlgmr.msra.gmra.mrb[0].mxu1 %v1949_v56  ;;  %v16541_v56 = vld [vmem:[%s24185_s1 + $0x11ec] ss:$16 sps:$4 sm:$0xff]  }
 0x203   :  { %11542 = vmatpush1.bf16.msra.mxu0 %v16446_v47  ;;  %12690 = vmatpush1.bf16.msra.mxu1 %v16449_v57  ;;  %v16536_v47 = vld [vmem:[%s24185_s1 + $0x11e0] ss:$16 sps:$4 sm:$0xff]   ;;  %v16539_v57 = vld [vmem:[%s24185_s1 + $0x11e8] ss:$16 sps:$4 sm:$0xff]  }
 0x204   :  { %11543 = vmatprep.subr.bf16.mxu0 %v16454_v58  ;;  %12691 = vmatprep.subr.bf16.mxu1 %v16457_v48  ;;  %v16544_v58 = vld [vmem:[%s24185_s1 + $0x1204] ss:$16 sps:$4 sm:$0xff]   ;;  %v16547_v48 = vld [vmem:[%s24185_s1 + $0x120c] ss:$16 sps:$4 sm:$0xff]  }
 0x205   :  { %11573 = vmatprep.mubr.bf16.mxu0 %v20096_v59  ;;  %12721 = vmatprep.mubr.bf16.mxu1 %v20096_v59 }
 0x207   :  { %11544 = vmatpush1.bf16.msra.mxu0 %v16452_v60  ;;  %12692 = vmatpush1.bf16.msra.mxu1 %v16455_v61  ;;  %v20282_v60 = vrot.slane %v20053_v44, %v18582_v49  ;;  %v16542_v61 = vld [vmem:[%s24185_s1 + $0x1200] ss:$16 sps:$4 sm:$0xff]   ;;  %v16553_v44 = vld [vmem:[%s24185_s1 + $0x122c] ss:$16 sps:$4 sm:$0xff]  }
 0x208   :  { %11545 = vmatprep.subr.bf16.mxu0 %v16460_v62  ;;  %12693 = vmatprep.subr.bf16.mxu1 %v16463_v63  ;;  %v16545_v62 = vld [vmem:[%s24185_s1 + $0x1208] ss:$16 sps:$4 sm:$0xff]   ;;  %v16550_v63 = vld [vmem:[%s24185_s1 + $0x1224] ss:$16 sps:$4 sm:$0xff]  }
 0x20b   :  { %11546 = vmatpush1.bf16.msra.mxu0 %v16458_v0  ;;  %12694 = vmatpush1.bf16.msra.mxu1 %v16461_v1  ;;  %v1999_v0 = vcombine.high %v20096_v59, %v20096_v59  ;;  %v16548_v1 = vld [vmem:[%s24185_s1 + $0x1220] ss:$16 sps:$4 sm:$0xff]   ;;  %v16556_v59 = vld [vmem:[%s24185_s1 + $0x1244] ss:$16 sps:$4 sm:$0xff]  }
 0x20c   :  { %11547 = vmatprep.subr.bf16.mxu0 %v16466_v2  ;;  %12695 = vmatprep.subr.bf16.mxu1 %v16469_v3  ;;  %v16551_v2 = vld [vmem:[%s24185_s1 + $0x1228] ss:$16 sps:$4 sm:$0xff]   ;;  %v16559_v3 = vld [vmem:[%s24185_s1 + $0x124c] ss:$16 sps:$4 sm:$0xff]  }
 0x20f   :  { %11548 = vmatpush1.bf16.msra.mxu0 %v16464_v4  ;;  %12696 = vmatpush1.bf16.msra.mxu1 %v16467_v5  ;;  %v16554_v4 = vld [vmem:[%s24185_s1 + $0x1240] ss:$16 sps:$4 sm:$0xff]   ;;  %v16557_v5 = vld [vmem:[%s24185_s1 + $0x1248] ss:$16 sps:$4 sm:$0xff]  }
 0x210   :  { %11549 = vmatprep.subr.bf16.mxu0 %v16472_v6  ;;  %12697 = vmatprep.subr.bf16.mxu1 %v16475_v7  ;;  %v16562_v6 = vld [vmem:[%s24185_s1 + $0x1264] ss:$16 sps:$4 sm:$0xff]   ;;  %v16565_v7 = vld [vmem:[%s24185_s1 + $0x126c] ss:$16 sps:$4 sm:$0xff]  }
 0x213   :  { %11550 = vmatpush1.bf16.msra.mxu0 %v16470_v8  ;;  %12698 = vmatpush1.bf16.msra.mxu1 %v16473_v9  ;;  %v16560_v8 = vld [vmem:[%s24185_s1 + $0x1260] ss:$16 sps:$4 sm:$0xff]   ;;  %v16563_v9 = vld [vmem:[%s24185_s1 + $0x1268] ss:$16 sps:$4 sm:$0xff]  }
 0x214   :  { %11551 = vmatprep.subr.bf16.mxu0 %v16478_v10  ;;  %12699 = vmatprep.subr.bf16.mxu1 %v16481_v11  ;;  %v16568_v10 = vld [vmem:[%s24185_s1 + $0x1284] ss:$16 sps:$4 sm:$0xff]   ;;  %v16571_v11 = vld [vmem:[%s24185_s1 + $0x128c] ss:$16 sps:$4 sm:$0xff]  }
 0x217   :  { %11552 = vmatpush1.bf16.msra.mxu0 %v16476_v12  ;;  %12700 = vmatpush1.bf16.msra.mxu1 %v16479_v52  ;;  %v16566_v12 = vld [vmem:[%s24185_s1 + $0x1280] ss:$16 sps:$4 sm:$0xff]   ;;  %v16569_v52 = vld [vmem:[%s24185_s1 + $0x1288] ss:$16 sps:$4 sm:$0xff]  }
 0x218   :  { %11553 = vmatprep.subr.bf16.mxu0 %v16484_v15  ;;  %12701 = vmatprep.subr.bf16.mxu1 %v16487_v16  ;;  %v16574_v15 = vld [vmem:[%s24185_s1 + $0x12a4] ss:$16 sps:$4 sm:$0xff]   ;;  %v16577_v16 = vld [vmem:[%s24185_s1 + $0x12ac] ss:$16 sps:$4 sm:$0xff]  }
 0x21b   :  { %11554 = vmatpush1.bf16.msra.mxu0 %v16482_v17  ;;  %12702 = vmatpush1.bf16.msra.mxu1 %v16485_v18  ;;  %v16572_v17 = vld [vmem:[%s24185_s1 + $0x12a0] ss:$16 sps:$4 sm:$0xff]   ;;  %v16575_v18 = vld [vmem:[%s24185_s1 + $0x12a8] ss:$16 sps:$4 sm:$0xff]  }
 0x21c   :  { %11555 = vmatprep.subr.bf16.mxu0 %v16490_v19  ;;  %12703 = vmatprep.subr.bf16.mxu1 %v16493_v20  ;;  %v16580_v19 = vld [vmem:[%s24185_s1 + $0x12c4] ss:$16 sps:$4 sm:$0xff]   ;;  %v16583_v20 = vld [vmem:[%s24185_s1 + $0x12cc] ss:$16 sps:$4 sm:$0xff]  }
 0x21f   :  { %11556 = vmatpush1.bf16.msra.mxu0 %v16488_v22  ;;  %12704 = vmatpush1.bf16.msra.mxu1 %v16491_v23  ;;  %v16578_v22 = vld [vmem:[%s24185_s1 + $0x12c0] ss:$16 sps:$4 sm:$0xff]   ;;  %v16581_v23 = vld [vmem:[%s24185_s1 + $0x12c8] ss:$16 sps:$4 sm:$0xff]  }
 0x220   :  { %11557 = vmatprep.subr.bf16.mxu0 %v16496_v24  ;;  %12705 = vmatprep.subr.bf16.mxu1 %v16499_v13  ;;  %v16586_v24 = vld [vmem:[%s24185_s1 + $0x12e4] ss:$16 sps:$4 sm:$0xff]   ;;  %v16589_v13 = vld [vmem:[%s24185_s1 + $0x12ec] ss:$16 sps:$4 sm:$0xff]  }
 0x223   :  { %11558 = vmatpush1.bf16.msra.mxu0 %v16494_v27  ;;  %12706 = vmatpush1.bf16.msra.mxu1 %v16497_v28  ;;  %v16584_v27 = vld [vmem:[%s24185_s1 + $0x12e0] ss:$16 sps:$4 sm:$0xff]   ;;  %v16587_v28 = vld [vmem:[%s24185_s1 + $0x12e8] ss:$16 sps:$4 sm:$0xff]  }
 0x224   :  { %11559 = vmatprep.subr.bf16.mxu0 %v16502_v29  ;;  %12707 = vmatprep.subr.bf16.mxu1 %v16505_v14  ;;  %v16592_v29 = vld [vmem:[%s24185_s1 + $0x1304] ss:$16 sps:$4 sm:$0xff]   ;;  %v16595_v14 = vld [vmem:[%s24185_s1 + $0x130c] ss:$16 sps:$4 sm:$0xff]  }
 0x227   :  { %11560 = vmatpush1.bf16.msra.mxu0 %v16500_v30  ;;  %12708 = vmatpush1.bf16.msra.mxu1 %v16503_v31  ;;  %v16590_v30 = vld [vmem:[%s24185_s1 + $0x1300] ss:$16 sps:$4 sm:$0xff]   ;;  %v16593_v31 = vld [vmem:[%s24185_s1 + $0x1308] ss:$16 sps:$4 sm:$0xff]  }
 0x228   :  { %11561 = vmatprep.subr.bf16.mxu0 %v16508_v25  ;;  %12709 = vmatprep.subr.bf16.mxu1 %v16511_v32  ;;  %v16598_v25 = vld [vmem:[%s24185_s1 + $0x1324] ss:$16 sps:$4 sm:$0xff]   ;;  %v16601_v32 = vld [vmem:[%s24185_s1 + $0x132c] ss:$16 sps:$4 sm:$0xff]  }
 0x22b   :  { %11562 = vmatpush1.bf16.msra.mxu0 %v16506_v33  ;;  %12710 = vmatpush1.bf16.msra.mxu1 %v16509_v26  ;;  %v16596_v33 = vld [vmem:[%s24185_s1 + $0x1320] ss:$16 sps:$4 sm:$0xff]   ;;  %v16599_v26 = vld [vmem:[%s24185_s1 + $0x1328] ss:$16 sps:$4 sm:$0xff]  }
 0x22c   :  { %11563 = vmatprep.subr.bf16.mxu0 %v16514_v36  ;;  %12711 = vmatprep.subr.bf16.mxu1 %v16517_v37  ;;  %v16604_v36 = vld [vmem:[%s24185_s1 + $0x1344] ss:$16 sps:$4 sm:$0xff]   ;;  %v16607_v37 = vld [vmem:[%s24185_s1 + $0x134c] ss:$16 sps:$4 sm:$0xff]  }
 0x22f   :  { %11564 = vmatpush1.bf16.msra.mxu0 %v16512_v21  ;;  %12712 = vmatpush1.bf16.msra.mxu1 %v16515_v39  ;;  %v16602_v21 = vld [vmem:[%s24185_s1 + $0x1340] ss:$16 sps:$4 sm:$0xff]   ;;  %v16605_v39 = vld [vmem:[%s24185_s1 + $0x1348] ss:$16 sps:$4 sm:$0xff]  }
 0x230   :  { %11565 = vmatprep.subr.bf16.mxu0 %v16520_v40  ;;  %12713 = vmatprep.subr.bf16.mxu1 %v16523_v41  ;;  %v16610_v40 = vld [vmem:[%s24185_s1 + $0x1364] ss:$16 sps:$4 sm:$0xff]   ;;  %v16613_v41 = vld [vmem:[%s24185_s1 + $0x136c] ss:$16 sps:$4 sm:$0xff]  }
 0x233   :  { %11566 = vmatpush1.bf16.msra.mxu0 %v16518_v34  ;;  %12714 = vmatpush1.bf16.msra.mxu1 %v16521_v43  ;;  %v16608_v34 = vld [vmem:[%s24185_s1 + $0x1360] ss:$16 sps:$4 sm:$0xff]   ;;  %v16611_v43 = vld [vmem:[%s24185_s1 + $0x1368] ss:$16 sps:$4 sm:$0xff]  }
 0x234   :  { %11567 = vmatprep.subr.bf16.mxu0 %v16526_v45  ;;  %12715 = vmatprep.subr.bf16.mxu1 %v16529_v46  ;;  %v16616_v45 = vld [vmem:[%s24185_s1 + $0x1384] ss:$16 sps:$4 sm:$0xff]   ;;  %v16619_v46 = vld [vmem:[%s24185_s1 + $0x138c] ss:$16 sps:$4 sm:$0xff]  }
 0x237   :  { %11568 = vmatpush1.bf16.msra.mxu0 %v16524_v35  ;;  %12716 = vmatpush1.bf16.msra.mxu1 %v16527_v50  ;;  %v16614_v35 = vld [vmem:[%s24185_s1 + $0x1380] ss:$16 sps:$4 sm:$0xff]   ;;  %v16617_v50 = vld [vmem:[%s24185_s1 + $0x1388] ss:$16 sps:$4 sm:$0xff]  }
 0x238   :  { %11569 = vmatprep.subr.bf16.mxu0 %v16532_v51  ;;  %12717 = vmatprep.subr.bf16.mxu1 %v16535_v53  ;;  %v16622_v51 = vld [vmem:[%s24185_s1 + $0x13a4] ss:$16 sps:$4 sm:$0xff]   ;;  %v16625_v53 = vld [vmem:[%s24185_s1 + $0x13ac] ss:$16 sps:$4 sm:$0xff]  }
 0x23b   :  { %11570 = vmatpush1.bf16.msra.mxu0 %v16530_v38  ;;  %12718 = vmatpush1.bf16.msra.mxu1 %v16533_v54  ;;  %v16620_v38 = vld [vmem:[%s24185_s1 + $0x13a0] ss:$16 sps:$4 sm:$0xff]   ;;  %v16623_v54 = vld [vmem:[%s24185_s1 + $0x13a8] ss:$16 sps:$4 sm:$0xff]  }
 0x23c   :  { %11571 = vmatprep.subr.bf16.mxu0 %v16538_v55  ;;  %12719 = vmatprep.subr.bf16.mxu1 %v16541_v56  ;;  %v16628_v55 = vld [vmem:[%s24185_s1 + $0x13c4] ss:$16 sps:$4 sm:$0xff]   ;;  %v16631_v56 = vld [vmem:[%s24185_s1 + $0x13cc] ss:$16 sps:$4 sm:$0xff]  }
 0x23f   :  { %11572 = vmatpush1.bf16.msra.mxu0 %v16536_v47  ;;  %12720 = vmatpush1.bf16.msra.mxu1 %v16539_v57  ;;  %v18375_v47 = vld [vmem:[%s24184_s0 + $0x10] sm:$0xff] }
 0x240   :  { %11582 = vmatprep.subr.bf16.mxu0 %v16544_v58  ;;  %12730 = vmatprep.subr.bf16.mxu1 %v16547_v48  ;;  %v1952_v57 = vcombine.high %v18375_v47, %v18375_v47  ;;  %v16626_v58 = vld [vmem:[%s24185_s1 + $0x13c0] ss:$16 sps:$4 sm:$0xff]   ;;  %v16629_v48 = vld [vmem:[%s24185_s1 + $0x13c8] ss:$16 sps:$4 sm:$0xff]  }
 0x241   :  { %v16710_v47 = vld [vmem:[%s24185_s1 + $0x1580] ss:$16 sps:$4 sm:$0xff]  }
 0x242   :  { %11574 = vmatmul.mubr.bf16.vlgmr.msra.gmra.mrb[0].mxu0 %v20282_v60  ;;  %12722 = vmatmul.mubr.bf16.vlgmr.msra.gmra.mrb[0].mxu1 %v20282_v60 }
 0x243   :  { %11583 = vmatpush1.bf16.msra.mxu0 %v16542_v61  ;;  %12731 = vmatpush1.bf16.msra.mxu1 %v16545_v62  ;;  %v16634_v61 = vld [vmem:[%s24185_s1 + $0x13e4] ss:$16 sps:$4 sm:$0xff]   ;;  %v16637_v62 = vld [vmem:[%s24185_s1 + $0x13ec] ss:$16 sps:$4 sm:$0xff]  }
 0x244   :  { %11584 = vmatprep.subr.bf16.mxu0 %v16550_v63  ;;  %12732 = vmatprep.subr.bf16.mxu1 %v16553_v44  ;;  %v20472_v63 = vrot.slane %v1952_v57, %v18582_v49  ;;  %v16632_v44 = vld [vmem:[%s24185_s1 + $0x13e0] ss:$16 sps:$4 sm:$0xff]   ;;  %v16713_v57 = vld [vmem:[%s24185_s1 + $0x1588] ss:$16 sps:$4 sm:$0xff]  }
 0x245   :  { %11614 = vmatprep.mubr.bf16.mxu0 %v1999_v0  ;;  %12762 = vmatprep.mubr.bf16.mxu1 %v1999_v0  ;;  %v16635_v0 = vld [vmem:[%s24185_s1 + $0x13e8] ss:$16 sps:$4 sm:$0xff]  }
 0x247   :  { %11585 = vmatpush1.bf16.msra.mxu0 %v16548_v1  ;;  %12733 = vmatpush1.bf16.msra.mxu1 %v16551_v2  ;;  %v16640_v1 = vld [vmem:[%s24185_s1 + $0x1404] ss:$16 sps:$4 sm:$0xff]   ;;  %v16643_v2 = vld [vmem:[%s24185_s1 + $0x140c] ss:$16 sps:$4 sm:$0xff]  }
 0x248   :  { %11586 = vmatprep.subr.bf16.mxu0 %v16556_v59  ;;  %12734 = vmatprep.subr.bf16.mxu1 %v16559_v3  ;;  %v1968_v59 = vcombine.high %v20472_v63, %v20472_v63  ;;  %v1997_v3 = vcombine.high %v20282_v60, %v20282_v60  ;;  %v16649_v60 = vld [vmem:[%s24185_s1 + $0x142c] ss:$16 sps:$4 sm:$0xff]  }
 0x24b   :  { %11587 = vmatpush1.bf16.msra.mxu0 %v16554_v4  ;;  %12735 = vmatpush1.bf16.msra.mxu1 %v16557_v5  ;;  %v16638_v4 = vld [vmem:[%s24185_s1 + $0x1400] ss:$16 sps:$4 sm:$0xff]   ;;  %v16641_v5 = vld [vmem:[%s24185_s1 + $0x1408] ss:$16 sps:$4 sm:$0xff]  }
 0x24c   :  { %11588 = vmatprep.subr.bf16.mxu0 %v16562_v6  ;;  %12736 = vmatprep.subr.bf16.mxu1 %v16565_v7  ;;  %v16646_v6 = vld [vmem:[%s24185_s1 + $0x1424] ss:$16 sps:$4 sm:$0xff]   ;;  %v20503_v7 = vrot.slane %v1968_v59, %v18582_v49 }
 0x24d   :  { %v16730_v59 = vld [vmem:[%s24185_s1 + $0x15e4] ss:$16 sps:$4 sm:$0xff]  }
 0x24f   :  { %11589 = vmatpush1.bf16.msra.mxu0 %v16560_v8  ;;  %12737 = vmatpush1.bf16.msra.mxu1 %v16563_v9  ;;  %v16644_v8 = vld [vmem:[%s24185_s1 + $0x1420] ss:$16 sps:$4 sm:$0xff]   ;;  %v16647_v9 = vld [vmem:[%s24185_s1 + $0x1428] ss:$16 sps:$4 sm:$0xff]  }
 0x250   :  { %11590 = vmatprep.subr.bf16.mxu0 %v16568_v10  ;;  %12738 = vmatprep.subr.bf16.mxu1 %v16571_v11  ;;  %v16652_v10 = vld [vmem:[%s24185_s1 + $0x1444] ss:$16 sps:$4 sm:$0xff]   ;;  %v16655_v11 = vld [vmem:[%s24185_s1 + $0x144c] ss:$16 sps:$4 sm:$0xff]  }
 0x253   :  { %11591 = vmatpush1.bf16.msra.mxu0 %v16566_v12  ;;  %12739 = vmatpush1.bf16.msra.mxu1 %v16569_v52  ;;  %v16650_v12 = vld [vmem:[%s24185_s1 + $0x1440] ss:$16 sps:$4 sm:$0xff]   ;;  %v16653_v52 = vld [vmem:[%s24185_s1 + $0x1448] ss:$16 sps:$4 sm:$0xff]  }
 0x254   :  { %11592 = vmatprep.subr.bf16.mxu0 %v16574_v15  ;;  %12740 = vmatprep.subr.bf16.mxu1 %v16577_v16  ;;  %v16658_v15 = vld [vmem:[%s24185_s1 + $0x1464] ss:$16 sps:$4 sm:$0xff]   ;;  %v16661_v16 = vld [vmem:[%s24185_s1 + $0x146c] ss:$16 sps:$4 sm:$0xff]  }
 0x257   :  { %11593 = vmatpush1.bf16.msra.mxu0 %v16572_v17  ;;  %12741 = vmatpush1.bf16.msra.mxu1 %v16575_v18  ;;  %v16656_v17 = vld [vmem:[%s24185_s1 + $0x1460] ss:$16 sps:$4 sm:$0xff]   ;;  %v16659_v18 = vld [vmem:[%s24185_s1 + $0x1468] ss:$16 sps:$4 sm:$0xff]  }
 0x258   :  { %11594 = vmatprep.subr.bf16.mxu0 %v16580_v19  ;;  %12742 = vmatprep.subr.bf16.mxu1 %v16583_v20  ;;  %v16664_v19 = vld [vmem:[%s24185_s1 + $0x1484] ss:$16 sps:$4 sm:$0xff]   ;;  %v16667_v20 = vld [vmem:[%s24185_s1 + $0x148c] ss:$16 sps:$4 sm:$0xff]  }
 0x25b   :  { %11595 = vmatpush1.bf16.msra.mxu0 %v16578_v22  ;;  %12743 = vmatpush1.bf16.msra.mxu1 %v16581_v23  ;;  %v16662_v22 = vld [vmem:[%s24185_s1 + $0x1480] ss:$16 sps:$4 sm:$0xff]   ;;  %v16665_v23 = vld [vmem:[%s24185_s1 + $0x1488] ss:$16 sps:$4 sm:$0xff]  }
 0x25c   :  { %11596 = vmatprep.subr.bf16.mxu0 %v16586_v24  ;;  %12744 = vmatprep.subr.bf16.mxu1 %v16589_v13  ;;  %v16670_v24 = vld [vmem:[%s24185_s1 + $0x14a4] ss:$16 sps:$4 sm:$0xff]   ;;  %v16673_v13 = vld [vmem:[%s24185_s1 + $0x14ac] ss:$16 sps:$4 sm:$0xff]  }
 0x25f   :  { %11597 = vmatpush1.bf16.msra.mxu0 %v16584_v27  ;;  %12745 = vmatpush1.bf16.msra.mxu1 %v16587_v28  ;;  %v16668_v27 = vld [vmem:[%s24185_s1 + $0x14a0] ss:$16 sps:$4 sm:$0xff]   ;;  %v16671_v28 = vld [vmem:[%s24185_s1 + $0x14a8] ss:$16 sps:$4 sm:$0xff]  }
 0x260   :  { %11598 = vmatprep.subr.bf16.mxu0 %v16592_v29  ;;  %12746 = vmatprep.subr.bf16.mxu1 %v16595_v14  ;;  %v16676_v29 = vld [vmem:[%s24185_s1 + $0x14c4] ss:$16 sps:$4 sm:$0xff]   ;;  %v16679_v14 = vld [vmem:[%s24185_s1 + $0x14cc] ss:$16 sps:$4 sm:$0xff]  }
 0x263   :  { %11599 = vmatpush1.bf16.msra.mxu0 %v16590_v30  ;;  %12747 = vmatpush1.bf16.msra.mxu1 %v16593_v31  ;;  %v16674_v30 = vld [vmem:[%s24185_s1 + $0x14c0] ss:$16 sps:$4 sm:$0xff]   ;;  %v16677_v31 = vld [vmem:[%s24185_s1 + $0x14c8] ss:$16 sps:$4 sm:$0xff]  }
 0x264   :  { %11600 = vmatprep.subr.bf16.mxu0 %v16598_v25  ;;  %12748 = vmatprep.subr.bf16.mxu1 %v16601_v32  ;;  %v16682_v25 = vld [vmem:[%s24185_s1 + $0x14e4] ss:$16 sps:$4 sm:$0xff]   ;;  %v16685_v32 = vld [vmem:[%s24185_s1 + $0x14ec] ss:$16 sps:$4 sm:$0xff]  }
 0x267   :  { %11601 = vmatpush1.bf16.msra.mxu0 %v16596_v33  ;;  %12749 = vmatpush1.bf16.msra.mxu1 %v16599_v26  ;;  %v16680_v33 = vld [vmem:[%s24185_s1 + $0x14e0] ss:$16 sps:$4 sm:$0xff]   ;;  %v16683_v26 = vld [vmem:[%s24185_s1 + $0x14e8] ss:$16 sps:$4 sm:$0xff]  }
 0x268   :  { %11602 = vmatprep.subr.bf16.mxu0 %v16604_v36  ;;  %12750 = vmatprep.subr.bf16.mxu1 %v16607_v37  ;;  %v16688_v36 = vld [vmem:[%s24185_s1 + $0x1504] ss:$16 sps:$4 sm:$0xff]   ;;  %v16691_v37 = vld [vmem:[%s24185_s1 + $0x150c] ss:$16 sps:$4 sm:$0xff]  }
 0x26b   :  { %11603 = vmatpush1.bf16.msra.mxu0 %v16602_v21  ;;  %12751 = vmatpush1.bf16.msra.mxu1 %v16605_v39  ;;  %v16686_v21 = vld [vmem:[%s24185_s1 + $0x1500] ss:$16 sps:$4 sm:$0xff]   ;;  %v16689_v39 = vld [vmem:[%s24185_s1 + $0x1508] ss:$16 sps:$4 sm:$0xff]  }
 0x26c   :  { %11604 = vmatprep.subr.bf16.mxu0 %v16610_v40  ;;  %12752 = vmatprep.subr.bf16.mxu1 %v16613_v41  ;;  %v16694_v40 = vld [vmem:[%s24185_s1 + $0x1524] ss:$16 sps:$4 sm:$0xff]   ;;  %v16697_v41 = vld [vmem:[%s24185_s1 + $0x152c] ss:$16 sps:$4 sm:$0xff]  }
 0x26f   :  { %11605 = vmatpush1.bf16.msra.mxu0 %v16608_v34  ;;  %12753 = vmatpush1.bf16.msra.mxu1 %v16611_v43  ;;  %v16692_v34 = vld [vmem:[%s24185_s1 + $0x1520] ss:$16 sps:$4 sm:$0xff]   ;;  %v16695_v43 = vld [vmem:[%s24185_s1 + $0x1528] ss:$16 sps:$4 sm:$0xff]  }
 0x270   :  { %11606 = vmatprep.subr.bf16.mxu0 %v16616_v45  ;;  %12754 = vmatprep.subr.bf16.mxu1 %v16619_v46  ;;  %v16700_v45 = vld [vmem:[%s24185_s1 + $0x1544] ss:$16 sps:$4 sm:$0xff]   ;;  %v16703_v46 = vld [vmem:[%s24185_s1 + $0x154c] ss:$16 sps:$4 sm:$0xff]  }
 0x273   :  { %11607 = vmatpush1.bf16.msra.mxu0 %v16614_v35  ;;  %12755 = vmatpush1.bf16.msra.mxu1 %v16617_v50  ;;  %v16698_v35 = vld [vmem:[%s24185_s1 + $0x1540] ss:$16 sps:$4 sm:$0xff]   ;;  %v16701_v50 = vld [vmem:[%s24185_s1 + $0x1548] ss:$16 sps:$4 sm:$0xff]  }
 0x274   :  { %11608 = vmatprep.subr.bf16.mxu0 %v16622_v51  ;;  %12756 = vmatprep.subr.bf16.mxu1 %v16625_v53  ;;  %v16706_v51 = vld [vmem:[%s24185_s1 + $0x1564] ss:$16 sps:$4 sm:$0xff]   ;;  %v16709_v53 = vld [vmem:[%s24185_s1 + $0x156c] ss:$16 sps:$4 sm:$0xff]  }
 0x277   :  { %11609 = vmatpush1.bf16.msra.mxu0 %v16620_v38  ;;  %12757 = vmatpush1.bf16.msra.mxu1 %v16623_v54  ;;  %v16704_v38 = vld [vmem:[%s24185_s1 + $0x1560] ss:$16 sps:$4 sm:$0xff]   ;;  %v16707_v54 = vld [vmem:[%s24185_s1 + $0x1568] ss:$16 sps:$4 sm:$0xff]  }
 0x278   :  { %11610 = vmatprep.subr.bf16.mxu0 %v16628_v55  ;;  %12758 = vmatprep.subr.bf16.mxu1 %v16631_v56  ;;  %v16712_v55 = vld [vmem:[%s24185_s1 + $0x1584] ss:$16 sps:$4 sm:$0xff]   ;;  %v16715_v56 = vld [vmem:[%s24185_s1 + $0x158c] ss:$16 sps:$4 sm:$0xff]  }
 0x27b   :  { %11611 = vmatpush1.bf16.msra.mxu0 %v16626_v58  ;;  %12759 = vmatpush1.bf16.msra.mxu1 %v16629_v48  ;;  %v16718_v58 = vld [vmem:[%s24185_s1 + $0x15a4] ss:$16 sps:$4 sm:$0xff]   ;;  %v16721_v48 = vld [vmem:[%s24185_s1 + $0x15ac] ss:$16 sps:$4 sm:$0xff]  }
 0x27c   :  { %11612 = vmatprep.subr.bf16.mxu0 %v16634_v61  ;;  %12760 = vmatprep.subr.bf16.mxu1 %v16637_v62  ;;  %v16716_v61 = vld [vmem:[%s24185_s1 + $0x15a0] ss:$16 sps:$4 sm:$0xff]   ;;  %v16719_v62 = vld [vmem:[%s24185_s1 + $0x15a8] ss:$16 sps:$4 sm:$0xff]  }
 0x27f   :  { %11613 = vmatpush1.bf16.msra.mxu0 %v16632_v44  ;;  %12761 = vmatpush1.bf16.msra.mxu1 %v16635_v0  ;;  %v16724_v44 = vld [vmem:[%s24185_s1 + $0x15c4] ss:$16 sps:$4 sm:$0xff]   ;;  %v16727_v0 = vld [vmem:[%s24185_s1 + $0x15cc] ss:$16 sps:$4 sm:$0xff]  }
 0x280   :  { %11623 = vmatprep.subr.bf16.mxu0 %v16640_v1  ;;  %12771 = vmatprep.subr.bf16.mxu1 %v16643_v2  ;;  %v16722_v1 = vld [vmem:[%s24185_s1 + $0x15c0] ss:$16 sps:$4 sm:$0xff]   ;;  %v16725_v2 = vld [vmem:[%s24185_s1 + $0x15c8] ss:$16 sps:$4 sm:$0xff]  }
 0x282   :  { %11615 = vmatmul.mubr.bf16.vlgmr.msra.gmra.mrb[0].mxu0 %v1997_v3  ;;  %12763 = vmatmul.mubr.bf16.vlgmr.msra.gmra.mrb[0].mxu1 %v1997_v3  ;;  %v16733_v3 = vld [vmem:[%s24185_s1 + $0x15ec] ss:$16 sps:$4 sm:$0xff]  }
 0x283   :  { %11624 = vmatpush1.bf16.msra.mxu0 %v16638_v4  ;;  %12772 = vmatpush1.bf16.msra.mxu1 %v16641_v5  ;;  %v16728_v4 = vld [vmem:[%s24185_s1 + $0x15e0] ss:$16 sps:$4 sm:$0xff]   ;;  %v16731_v5 = vld [vmem:[%s24185_s1 + $0x15e8] ss:$16 sps:$4 sm:$0xff]  }
 0x284   :  { %11625 = vmatprep.subr.bf16.mxu0 %v16646_v6  ;;  %12773 = vmatprep.subr.bf16.mxu1 %v16649_v60  ;;  %v16737_v6 = vld [vmem:[%s24185_s1 + $0x1604] ss:$16 sps:$4 sm:$0xff]   ;;  %v16740_v60 = vld [vmem:[%s24185_s1 + $0x160c] ss:$16 sps:$4 sm:$0xff]  }
 0x285   :  { %11655 = vmatprep.mubr.bf16.mxu0 %v20503_v7  ;;  %12803 = vmatprep.mubr.bf16.mxu1 %v20503_v7 }
 0x287   :  { %11626 = vmatpush1.bf16.msra.mxu0 %v16644_v8  ;;  %12774 = vmatpush1.bf16.msra.mxu1 %v16647_v9  ;;  %v20689_v8 = vrot.slane %v20472_v63, %v18582_v49  ;;  %v16735_v9 = vld [vmem:[%s24185_s1 + $0x1600] ss:$16 sps:$4 sm:$0xff]   ;;  %v16746_v63 = vld [vmem:[%s24185_s1 + $0x162c] ss:$16 sps:$4 sm:$0xff]  }
 0x288   :  { %11627 = vmatprep.subr.bf16.mxu0 %v16652_v10  ;;  %12775 = vmatprep.subr.bf16.mxu1 %v16655_v11  ;;  %v16738_v10 = vld [vmem:[%s24185_s1 + $0x1608] ss:$16 sps:$4 sm:$0xff]   ;;  %v16743_v11 = vld [vmem:[%s24185_s1 + $0x1624] ss:$16 sps:$4 sm:$0xff]  }
 0x28b   :  { %11628 = vmatpush1.bf16.msra.mxu0 %v16650_v12  ;;  %12776 = vmatpush1.bf16.msra.mxu1 %v16653_v52  ;;  %v2000_v12 = vcombine.high %v20503_v7, %v20503_v7  ;;  %v16741_v52 = vld [vmem:[%s24185_s1 + $0x1620] ss:$16 sps:$4 sm:$0xff]   ;;  %v16749_v7 = vld [vmem:[%s24185_s1 + $0x1644] ss:$16 sps:$4 sm:$0xff]  }
 0x28c   :  { %11629 = vmatprep.subr.bf16.mxu0 %v16658_v15  ;;  %12777 = vmatprep.subr.bf16.mxu1 %v16661_v16  ;;  %v16744_v15 = vld [vmem:[%s24185_s1 + $0x1628] ss:$16 sps:$4 sm:$0xff]   ;;  %v16752_v16 = vld [vmem:[%s24185_s1 + $0x164c] ss:$16 sps:$4 sm:$0xff]  }
 0x28f   :  { %11630 = vmatpush1.bf16.msra.mxu0 %v16656_v17  ;;  %12778 = vmatpush1.bf16.msra.mxu1 %v16659_v18  ;;  %v16747_v17 = vld [vmem:[%s24185_s1 + $0x1640] ss:$16 sps:$4 sm:$0xff]   ;;  %v16750_v18 = vld [vmem:[%s24185_s1 + $0x1648] ss:$16 sps:$4 sm:$0xff]  }
 0x290   :  { %11631 = vmatprep.subr.bf16.mxu0 %v16664_v19  ;;  %12779 = vmatprep.subr.bf16.mxu1 %v16667_v20  ;;  %v16755_v19 = vld [vmem:[%s24185_s1 + $0x1664] ss:$16 sps:$4 sm:$0xff]   ;;  %v16758_v20 = vld [vmem:[%s24185_s1 + $0x166c] ss:$16 sps:$4 sm:$0xff]  }
 0x293   :  { %11632 = vmatpush1.bf16.msra.mxu0 %v16662_v22  ;;  %12780 = vmatpush1.bf16.msra.mxu1 %v16665_v23  ;;  %v16753_v22 = vld [vmem:[%s24185_s1 + $0x1660] ss:$16 sps:$4 sm:$0xff]   ;;  %v16756_v23 = vld [vmem:[%s24185_s1 + $0x1668] ss:$16 sps:$4 sm:$0xff]  }
 0x294   :  { %11633 = vmatprep.subr.bf16.mxu0 %v16670_v24  ;;  %12781 = vmatprep.subr.bf16.mxu1 %v16673_v13  ;;  %v16761_v24 = vld [vmem:[%s24185_s1 + $0x1684] ss:$16 sps:$4 sm:$0xff]   ;;  %v16764_v13 = vld [vmem:[%s24185_s1 + $0x168c] ss:$16 sps:$4 sm:$0xff]  }
 0x297   :  { %11634 = vmatpush1.bf16.msra.mxu0 %v16668_v27  ;;  %12782 = vmatpush1.bf16.msra.mxu1 %v16671_v28  ;;  %v16759_v27 = vld [vmem:[%s24185_s1 + $0x1680] ss:$16 sps:$4 sm:$0xff]   ;;  %v16762_v28 = vld [vmem:[%s24185_s1 + $0x1688] ss:$16 sps:$4 sm:$0xff]  }
 0x298   :  { %11635 = vmatprep.subr.bf16.mxu0 %v16676_v29  ;;  %12783 = vmatprep.subr.bf16.mxu1 %v16679_v14  ;;  %v16767_v29 = vld [vmem:[%s24185_s1 + $0x16a4] ss:$16 sps:$4 sm:$0xff]   ;;  %v16770_v14 = vld [vmem:[%s24185_s1 + $0x16ac] ss:$16 sps:$4 sm:$0xff]  }
 0x29b   :  { %11636 = vmatpush1.bf16.msra.mxu0 %v16674_v30  ;;  %12784 = vmatpush1.bf16.msra.mxu1 %v16677_v31  ;;  %v16765_v30 = vld [vmem:[%s24185_s1 + $0x16a0] ss:$16 sps:$4 sm:$0xff]   ;;  %v16768_v31 = vld [vmem:[%s24185_s1 + $0x16a8] ss:$16 sps:$4 sm:$0xff]  }
 0x29c   :  { %11637 = vmatprep.subr.bf16.mxu0 %v16682_v25  ;;  %12785 = vmatprep.subr.bf16.mxu1 %v16685_v32  ;;  %v16773_v25 = vld [vmem:[%s24185_s1 + $0x16c4] ss:$16 sps:$4 sm:$0xff]   ;;  %v16776_v32 = vld [vmem:[%s24185_s1 + $0x16cc] ss:$16 sps:$4 sm:$0xff]  }
 0x29f   :  { %11638 = vmatpush1.bf16.msra.mxu0 %v16680_v33  ;;  %12786 = vmatpush1.bf16.msra.mxu1 %v16683_v26  ;;  %v16771_v33 = vld [vmem:[%s24185_s1 + $0x16c0] ss:$16 sps:$4 sm:$0xff]   ;;  %v16774_v26 = vld [vmem:[%s24185_s1 + $0x16c8] ss:$16 sps:$4 sm:$0xff]  }
 0x2a0   :  { %11639 = vmatprep.subr.bf16.mxu0 %v16688_v36  ;;  %12787 = vmatprep.subr.bf16.mxu1 %v16691_v37  ;;  %v16779_v36 = vld [vmem:[%s24185_s1 + $0x16e4] ss:$16 sps:$4 sm:$0xff]   ;;  %v16782_v37 = vld [vmem:[%s24185_s1 + $0x16ec] ss:$16 sps:$4 sm:$0xff]  }
 0x2a3   :  { %11640 = vmatpush1.bf16.msra.mxu0 %v16686_v21  ;;  %12788 = vmatpush1.bf16.msra.mxu1 %v16689_v39  ;;  %v16777_v21 = vld [vmem:[%s24185_s1 + $0x16e0] ss:$16 sps:$4 sm:$0xff]   ;;  %v16780_v39 = vld [vmem:[%s24185_s1 + $0x16e8] ss:$16 sps:$4 sm:$0xff]  }
 0x2a4   :  { %11641 = vmatprep.subr.bf16.mxu0 %v16694_v40  ;;  %12789 = vmatprep.subr.bf16.mxu1 %v16697_v41  ;;  %v16785_v40 = vld [vmem:[%s24185_s1 + $0x1704] ss:$16 sps:$4 sm:$0xff]   ;;  %v16788_v41 = vld [vmem:[%s24185_s1 + $0x170c] ss:$16 sps:$4 sm:$0xff]  }
 0x2a7   :  { %11642 = vmatpush1.bf16.msra.mxu0 %v16692_v34  ;;  %12790 = vmatpush1.bf16.msra.mxu1 %v16695_v43  ;;  %v16783_v34 = vld [vmem:[%s24185_s1 + $0x1700] ss:$16 sps:$4 sm:$0xff]   ;;  %v16786_v43 = vld [vmem:[%s24185_s1 + $0x1708] ss:$16 sps:$4 sm:$0xff]  }
 0x2a8   :  { %11643 = vmatprep.subr.bf16.mxu0 %v16700_v45  ;;  %12791 = vmatprep.subr.bf16.mxu1 %v16703_v46  ;;  %v16791_v45 = vld [vmem:[%s24185_s1 + $0x1724] ss:$16 sps:$4 sm:$0xff]   ;;  %v16794_v46 = vld [vmem:[%s24185_s1 + $0x172c] ss:$16 sps:$4 sm:$0xff]  }
 0x2ab   :  { %11644 = vmatpush1.bf16.msra.mxu0 %v16698_v35  ;;  %12792 = vmatpush1.bf16.msra.mxu1 %v16701_v50  ;;  %v16789_v35 = vld [vmem:[%s24185_s1 + $0x1720] ss:$16 sps:$4 sm:$0xff]   ;;  %v16792_v50 = vld [vmem:[%s24185_s1 + $0x1728] ss:$16 sps:$4 sm:$0xff]  }
 0x2ac   :  { %11645 = vmatprep.subr.bf16.mxu0 %v16706_v51  ;;  %12793 = vmatprep.subr.bf16.mxu1 %v16709_v53  ;;  %v16797_v51 = vld [vmem:[%s24185_s1 + $0x1744] ss:$16 sps:$4 sm:$0xff]   ;;  %v16800_v53 = vld [vmem:[%s24185_s1 + $0x174c] ss:$16 sps:$4 sm:$0xff]  }
 0x2af   :  { %11646 = vmatpush1.bf16.msra.mxu0 %v16704_v38  ;;  %12794 = vmatpush1.bf16.msra.mxu1 %v16707_v54  ;;  %v16795_v38 = vld [vmem:[%s24185_s1 + $0x1740] ss:$16 sps:$4 sm:$0xff]   ;;  %v16798_v54 = vld [vmem:[%s24185_s1 + $0x1748] ss:$16 sps:$4 sm:$0xff]  }
 0x2b0   :  { %11647 = vmatprep.subr.bf16.mxu0 %v16712_v55  ;;  %12795 = vmatprep.subr.bf16.mxu1 %v16715_v56  ;;  %v16803_v55 = vld [vmem:[%s24185_s1 + $0x1764] ss:$16 sps:$4 sm:$0xff]   ;;  %v16806_v56 = vld [vmem:[%s24185_s1 + $0x176c] ss:$16 sps:$4 sm:$0xff]  }
 0x2b3   :  { %11648 = vmatpush1.bf16.msra.mxu0 %v16710_v47  ;;  %12796 = vmatpush1.bf16.msra.mxu1 %v16713_v57  ;;  %v16801_v47 = vld [vmem:[%s24185_s1 + $0x1760] ss:$16 sps:$4 sm:$0xff]   ;;  %v16804_v57 = vld [vmem:[%s24185_s1 + $0x1768] ss:$16 sps:$4 sm:$0xff]  }
 0x2b4   :  { %11649 = vmatprep.subr.bf16.mxu0 %v16718_v58  ;;  %12797 = vmatprep.subr.bf16.mxu1 %v16721_v48  ;;  %v16809_v58 = vld [vmem:[%s24185_s1 + $0x1784] ss:$16 sps:$4 sm:$0xff]   ;;  %v16812_v48 = vld [vmem:[%s24185_s1 + $0x178c] ss:$16 sps:$4 sm:$0xff]  }
 0x2b7   :  { %11650 = vmatpush1.bf16.msra.mxu0 %v16716_v61  ;;  %12798 = vmatpush1.bf16.msra.mxu1 %v16719_v62  ;;  %v16807_v61 = vld [vmem:[%s24185_s1 + $0x1780] ss:$16 sps:$4 sm:$0xff]   ;;  %v16810_v62 = vld [vmem:[%s24185_s1 + $0x1788] ss:$16 sps:$4 sm:$0xff]  }
 0x2b8   :  { %11651 = vmatprep.subr.bf16.mxu0 %v16724_v44  ;;  %12799 = vmatprep.subr.bf16.mxu1 %v16727_v0  ;;  %v16815_v44 = vld [vmem:[%s24185_s1 + $0x17a4] ss:$16 sps:$4 sm:$0xff]   ;;  %v16818_v0 = vld [vmem:[%s24185_s1 + $0x17ac] ss:$16 sps:$4 sm:$0xff]  }
 0x2bb   :  { %11652 = vmatpush1.bf16.msra.mxu0 %v16722_v1  ;;  %12800 = vmatpush1.bf16.msra.mxu1 %v16725_v2  ;;  %v16813_v1 = vld [vmem:[%s24185_s1 + $0x17a0] ss:$16 sps:$4 sm:$0xff]   ;;  %v16816_v2 = vld [vmem:[%s24185_s1 + $0x17a8] ss:$16 sps:$4 sm:$0xff]  }
 0x2bc   :  { %11653 = vmatprep.subr.bf16.mxu0 %v16730_v59  ;;  %12801 = vmatprep.subr.bf16.mxu1 %v16733_v3  ;;  %v16821_v59 = vld [vmem:[%s24185_s1 + $0x17c4] ss:$16 sps:$4 sm:$0xff]   ;;  %v16824_v3 = vld [vmem:[%s24185_s1 + $0x17cc] ss:$16 sps:$4 sm:$0xff]  }
 0x2bf   :  { %11654 = vmatpush1.bf16.msra.mxu0 %v16728_v4  ;;  %12802 = vmatpush1.bf16.msra.mxu1 %v16731_v5  ;;  %v20866_v4 = vld.sshfl [vmem:[%s24184_s0 + $0x18] sm:$0xff pattern:$0x75316420]  ;;  %v16819_v5 = vld [vmem:[%s24185_s1 + $0x17c0] ss:$16 sps:$4 sm:$0xff]  }
 0x2c0   :  { %11664 = vmatprep.subr.bf16.mxu0 %v16737_v6  ;;  %12812 = vmatprep.subr.bf16.mxu1 %v16740_v60  ;;  %v16822_v6 = vld [vmem:[%s24185_s1 + $0x17c8] ss:$16 sps:$4 sm:$0xff]   ;;  %v16827_v60 = vld [vmem:[%s24185_s1 + $0x17e4] ss:$16 sps:$4 sm:$0xff]  }
 0x2c2   :  { %11656 = vmatmul.mubr.bf16.vlgmr.msra.gmra.mrb[0].mxu0 %v20689_v8  ;;  %12804 = vmatmul.mubr.bf16.vlgmr.msra.gmra.mrb[0].mxu1 %v20689_v8 }
 0x2c3   :  { %11665 = vmatpush1.bf16.msra.mxu0 %v16735_v9  ;;  %12813 = vmatpush1.bf16.msra.mxu1 %v16738_v10  ;;  %v16830_v9 = vld [vmem:[%s24185_s1 + $0x17ec] ss:$16 sps:$4 sm:$0xff]   ;;  %v16825_v10 = vld [vmem:[%s24185_s1 + $0x17e0] ss:$16 sps:$4 sm:$0xff]  }
 0x2c4   :  { %11666 = vmatprep.subr.bf16.mxu0 %v16743_v11  ;;  %12814 = vmatprep.subr.bf16.mxu1 %v16746_v63  ;;  %v16828_v11 = vld [vmem:[%s24185_s1 + $0x17e8] ss:$16 sps:$4 sm:$0xff]   ;;  %v16833_v63 = vld [vmem:[%s24185_s1 + $0x1804] ss:$16 sps:$4 sm:$0xff]  }
 0x2c5   :  { %11696 = vmatprep.mubr.bf16.mxu0 %v2000_v12  ;;  %12844 = vmatprep.mubr.bf16.mxu1 %v2000_v12  ;;  %v16836_v12 = vld [vmem:[%s24185_s1 + $0x180c] ss:$16 sps:$4 sm:$0xff]  }
 0x2c7   :  { %11667 = vmatpush1.bf16.msra.mxu0 %v16741_v52  ;;  %12815 = vmatpush1.bf16.msra.mxu1 %v16744_v15  ;;  %v2016_v52 = vcombine.high %v20866_v4, %v20866_v4  ;;  %v1998_v15 = vcombine.high %v20689_v8, %v20689_v8  ;;  %v16842_v8 = vld [vmem:[%s24185_s1 + $0x182c] ss:$16 sps:$4 sm:$0xff]  }
 0x2c8   :  { %11668 = vmatprep.subr.bf16.mxu0 %v16749_v7  ;;  %12816 = vmatprep.subr.bf16.mxu1 %v16752_v16  ;;  %v16831_v7 = vld [vmem:[%s24185_s1 + $0x1800] ss:$16 sps:$4 sm:$0xff]   ;;  %v16834_v16 = vld [vmem:[%s24185_s1 + $0x1808] ss:$16 sps:$4 sm:$0xff]  }
 0x2cb   :  { %11669 = vmatpush1.bf16.msra.mxu0 %v16747_v17  ;;  %12817 = vmatpush1.bf16.msra.mxu1 %v16750_v18  ;;  %v16839_v17 = vld [vmem:[%s24185_s1 + $0x1824] ss:$16 sps:$4 sm:$0xff]   ;;  %v20909_v18 = vrot.slane %v2016_v52, %v18582_v49 }
 0x2cc   :  { %11670 = vmatprep.subr.bf16.mxu0 %v16755_v19  ;;  %12818 = vmatprep.subr.bf16.mxu1 %v16758_v20  ;;  %v16837_v19 = vld [vmem:[%s24185_s1 + $0x1820] ss:$16 sps:$4 sm:$0xff]   ;;  %v16840_v20 = vld [vmem:[%s24185_s1 + $0x1828] ss:$16 sps:$4 sm:$0xff]   ;;  %v16923_v52 = vld [vmem:[%s24185_s1 + $0x19e4] ss:$16 sps:$4 sm:$0xff]  }
 0x2cf   :  { %11671 = vmatpush1.bf16.msra.mxu0 %v16753_v22  ;;  %12819 = vmatpush1.bf16.msra.mxu1 %v16756_v23  ;;  %v16845_v22 = vld [vmem:[%s24185_s1 + $0x1844] ss:$16 sps:$4 sm:$0xff]   ;;  %v16848_v23 = vld [vmem:[%s24185_s1 + $0x184c] ss:$16 sps:$4 sm:$0xff]  }
 0x2d0   :  { %11672 = vmatprep.subr.bf16.mxu0 %v16761_v24  ;;  %12820 = vmatprep.subr.bf16.mxu1 %v16764_v13  ;;  %v16843_v24 = vld [vmem:[%s24185_s1 + $0x1840] ss:$16 sps:$4 sm:$0xff]   ;;  %v16846_v13 = vld [vmem:[%s24185_s1 + $0x1848] ss:$16 sps:$4 sm:$0xff]  }
 0x2d3   :  { %11673 = vmatpush1.bf16.msra.mxu0 %v16759_v27  ;;  %12821 = vmatpush1.bf16.msra.mxu1 %v16762_v28  ;;  %v16851_v27 = vld [vmem:[%s24185_s1 + $0x1864] ss:$16 sps:$4 sm:$0xff]   ;;  %v16854_v28 = vld [vmem:[%s24185_s1 + $0x186c] ss:$16 sps:$4 sm:$0xff]  }
 0x2d4   :  { %11674 = vmatprep.subr.bf16.mxu0 %v16767_v29  ;;  %12822 = vmatprep.subr.bf16.mxu1 %v16770_v14  ;;  %v16849_v29 = vld [vmem:[%s24185_s1 + $0x1860] ss:$16 sps:$4 sm:$0xff]   ;;  %v16852_v14 = vld [vmem:[%s24185_s1 + $0x1868] ss:$16 sps:$4 sm:$0xff]  }
 0x2d7   :  { %11675 = vmatpush1.bf16.msra.mxu0 %v16765_v30  ;;  %12823 = vmatpush1.bf16.msra.mxu1 %v16768_v31  ;;  %v16857_v30 = vld [vmem:[%s24185_s1 + $0x1884] ss:$16 sps:$4 sm:$0xff]   ;;  %v16860_v31 = vld [vmem:[%s24185_s1 + $0x188c] ss:$16 sps:$4 sm:$0xff]  }
 0x2d8   :  { %11676 = vmatprep.subr.bf16.mxu0 %v16773_v25  ;;  %12824 = vmatprep.subr.bf16.mxu1 %v16776_v32  ;;  %v16855_v25 = vld [vmem:[%s24185_s1 + $0x1880] ss:$16 sps:$4 sm:$0xff]   ;;  %v16858_v32 = vld [vmem:[%s24185_s1 + $0x1888] ss:$16 sps:$4 sm:$0xff]  }
 0x2db   :  { %11677 = vmatpush1.bf16.msra.mxu0 %v16771_v33  ;;  %12825 = vmatpush1.bf16.msra.mxu1 %v16774_v26  ;;  %v16863_v33 = vld [vmem:[%s24185_s1 + $0x18a4] ss:$16 sps:$4 sm:$0xff]   ;;  %v16866_v26 = vld [vmem:[%s24185_s1 + $0x18ac] ss:$16 sps:$4 sm:$0xff]  }
 0x2dc   :  { %11678 = vmatprep.subr.bf16.mxu0 %v16779_v36  ;;  %12826 = vmatprep.subr.bf16.mxu1 %v16782_v37  ;;  %v16861_v36 = vld [vmem:[%s24185_s1 + $0x18a0] ss:$16 sps:$4 sm:$0xff]   ;;  %v16864_v37 = vld [vmem:[%s24185_s1 + $0x18a8] ss:$16 sps:$4 sm:$0xff]  }
 0x2df   :  { %11679 = vmatpush1.bf16.msra.mxu0 %v16777_v21  ;;  %12827 = vmatpush1.bf16.msra.mxu1 %v16780_v39  ;;  %v16869_v21 = vld [vmem:[%s24185_s1 + $0x18c4] ss:$16 sps:$4 sm:$0xff]   ;;  %v16872_v39 = vld [vmem:[%s24185_s1 + $0x18cc] ss:$16 sps:$4 sm:$0xff]  }
 0x2e0   :  { %11680 = vmatprep.subr.bf16.mxu0 %v16785_v40  ;;  %12828 = vmatprep.subr.bf16.mxu1 %v16788_v41  ;;  %v16867_v40 = vld [vmem:[%s24185_s1 + $0x18c0] ss:$16 sps:$4 sm:$0xff]   ;;  %v16870_v41 = vld [vmem:[%s24185_s1 + $0x18c8] ss:$16 sps:$4 sm:$0xff]  }
 0x2e3   :  { %11681 = vmatpush1.bf16.msra.mxu0 %v16783_v34  ;;  %12829 = vmatpush1.bf16.msra.mxu1 %v16786_v43  ;;  %v16875_v34 = vld [vmem:[%s24185_s1 + $0x18e4] ss:$16 sps:$4 sm:$0xff]   ;;  %v16878_v43 = vld [vmem:[%s24185_s1 + $0x18ec] ss:$16 sps:$4 sm:$0xff]  }
 0x2e4   :  { %11682 = vmatprep.subr.bf16.mxu0 %v16791_v45  ;;  %12830 = vmatprep.subr.bf16.mxu1 %v16794_v46  ;;  %v16873_v45 = vld [vmem:[%s24185_s1 + $0x18e0] ss:$16 sps:$4 sm:$0xff]   ;;  %v16876_v46 = vld [vmem:[%s24185_s1 + $0x18e8] ss:$16 sps:$4 sm:$0xff]  }
 0x2e7   :  { %11683 = vmatpush1.bf16.msra.mxu0 %v16789_v35  ;;  %12831 = vmatpush1.bf16.msra.mxu1 %v16792_v50  ;;  %v16881_v35 = vld [vmem:[%s24185_s1 + $0x1904] ss:$16 sps:$4 sm:$0xff]   ;;  %v16884_v50 = vld [vmem:[%s24185_s1 + $0x190c] ss:$16 sps:$4 sm:$0xff]  }
 0x2e8   :  { %11684 = vmatprep.subr.bf16.mxu0 %v16797_v51  ;;  %12832 = vmatprep.subr.bf16.mxu1 %v16800_v53  ;;  %v16879_v51 = vld [vmem:[%s24185_s1 + $0x1900] ss:$16 sps:$4 sm:$0xff]   ;;  %v16882_v53 = vld [vmem:[%s24185_s1 + $0x1908] ss:$16 sps:$4 sm:$0xff]  }
 0x2eb   :  { %11685 = vmatpush1.bf16.msra.mxu0 %v16795_v38  ;;  %12833 = vmatpush1.bf16.msra.mxu1 %v16798_v54  ;;  %v16887_v38 = vld [vmem:[%s24185_s1 + $0x1924] ss:$16 sps:$4 sm:$0xff]   ;;  %v16890_v54 = vld [vmem:[%s24185_s1 + $0x192c] ss:$16 sps:$4 sm:$0xff]  }
 0x2ec   :  { %11686 = vmatprep.subr.bf16.mxu0 %v16803_v55  ;;  %12834 = vmatprep.subr.bf16.mxu1 %v16806_v56  ;;  %v16885_v55 = vld [vmem:[%s24185_s1 + $0x1920] ss:$16 sps:$4 sm:$0xff]   ;;  %v16888_v56 = vld [vmem:[%s24185_s1 + $0x1928] ss:$16 sps:$4 sm:$0xff]  }
 0x2ef   :  { %11687 = vmatpush1.bf16.msra.mxu0 %v16801_v47  ;;  %12835 = vmatpush1.bf16.msra.mxu1 %v16804_v57  ;;  %v16893_v47 = vld [vmem:[%s24185_s1 + $0x1944] ss:$16 sps:$4 sm:$0xff]   ;;  %v16896_v57 = vld [vmem:[%s24185_s1 + $0x194c] ss:$16 sps:$4 sm:$0xff]  }
 0x2f0   :  { %11688 = vmatprep.subr.bf16.mxu0 %v16809_v58  ;;  %12836 = vmatprep.subr.bf16.mxu1 %v16812_v48  ;;  %v16891_v58 = vld [vmem:[%s24185_s1 + $0x1940] ss:$16 sps:$4 sm:$0xff]   ;;  %v16894_v48 = vld [vmem:[%s24185_s1 + $0x1948] ss:$16 sps:$4 sm:$0xff]  }
 0x2f3   :  { %11689 = vmatpush1.bf16.msra.mxu0 %v16807_v61  ;;  %12837 = vmatpush1.bf16.msra.mxu1 %v16810_v62  ;;  %v16899_v61 = vld [vmem:[%s24185_s1 + $0x1964] ss:$16 sps:$4 sm:$0xff]   ;;  %v16902_v62 = vld [vmem:[%s24185_s1 + $0x196c] ss:$16 sps:$4 sm:$0xff]  }
 0x2f4   :  { %11690 = vmatprep.subr.bf16.mxu0 %v16815_v44  ;;  %12838 = vmatprep.subr.bf16.mxu1 %v16818_v0  ;;  %v16897_v44 = vld [vmem:[%s24185_s1 + $0x1960] ss:$16 sps:$4 sm:$0xff]   ;;  %v16900_v0 = vld [vmem:[%s24185_s1 + $0x1968] ss:$16 sps:$4 sm:$0xff]  }
 0x2f7   :  { %11691 = vmatpush1.bf16.msra.mxu0 %v16813_v1  ;;  %12839 = vmatpush1.bf16.msra.mxu1 %v16816_v2  ;;  %v16905_v1 = vld [vmem:[%s24185_s1 + $0x1984] ss:$16 sps:$4 sm:$0xff]   ;;  %v16908_v2 = vld [vmem:[%s24185_s1 + $0x198c] ss:$16 sps:$4 sm:$0xff]  }
 0x2f8   :  { %11692 = vmatprep.subr.bf16.mxu0 %v16821_v59  ;;  %12840 = vmatprep.subr.bf16.mxu1 %v16824_v3  ;;  %v16903_v59 = vld [vmem:[%s24185_s1 + $0x1980] ss:$16 sps:$4 sm:$0xff]   ;;  %v16906_v3 = vld [vmem:[%s24185_s1 + $0x1988] ss:$16 sps:$4 sm:$0xff]  }
 0x2fb   :  { %11693 = vmatpush1.bf16.msra.mxu0 %v16819_v5  ;;  %12841 = vmatpush1.bf16.msra.mxu1 %v16822_v6  ;;  %v16911_v5 = vld [vmem:[%s24185_s1 + $0x19a4] ss:$16 sps:$4 sm:$0xff]   ;;  %v16914_v6 = vld [vmem:[%s24185_s1 + $0x19ac] ss:$16 sps:$4 sm:$0xff]  }
 0x2fc   :  { %11694 = vmatprep.subr.bf16.mxu0 %v16827_v60  ;;  %12842 = vmatprep.subr.bf16.mxu1 %v16830_v9  ;;  %v16909_v60 = vld [vmem:[%s24185_s1 + $0x19a0] ss:$16 sps:$4 sm:$0xff]   ;;  %v16912_v9 = vld [vmem:[%s24185_s1 + $0x19a8] ss:$16 sps:$4 sm:$0xff]  }
 0x2ff   :  { %11695 = vmatpush1.bf16.msra.mxu0 %v16825_v10  ;;  %12843 = vmatpush1.bf16.msra.mxu1 %v16828_v11  ;;  %v16917_v10 = vld [vmem:[%s24185_s1 + $0x19c4] ss:$16 sps:$4 sm:$0xff]   ;;  %v16920_v11 = vld [vmem:[%s24185_s1 + $0x19cc] ss:$16 sps:$4 sm:$0xff]  }
 0x300   :  { %11705 = vmatprep.subr.bf16.mxu0 %v16833_v63  ;;  %12853 = vmatprep.subr.bf16.mxu1 %v16836_v12  ;;  %v16915_v63 = vld [vmem:[%s24185_s1 + $0x19c0] ss:$16 sps:$4 sm:$0xff]   ;;  %v16918_v12 = vld [vmem:[%s24185_s1 + $0x19c8] ss:$16 sps:$4 sm:$0xff]  }
 0x302   :  { %11697 = vmatmul.mubr.bf16.vlgmr.msra.gmra.mrb[0].mxu0 %v1998_v15  ;;  %12845 = vmatmul.mubr.bf16.vlgmr.msra.gmra.mrb[0].mxu1 %v1998_v15  ;;  %v16926_v15 = vld [vmem:[%s24185_s1 + $0x19ec] ss:$16 sps:$4 sm:$0xff]  }
 0x303   :  { %11706 = vmatpush1.bf16.msra.mxu0 %v16831_v7  ;;  %12854 = vmatpush1.bf16.msra.mxu1 %v16834_v16  ;;  %v16921_v7 = vld [vmem:[%s24185_s1 + $0x19e0] ss:$16 sps:$4 sm:$0xff]   ;;  %v16924_v16 = vld [vmem:[%s24185_s1 + $0x19e8] ss:$16 sps:$4 sm:$0xff]  }
 0x304   :  { %11707 = vmatprep.subr.bf16.mxu0 %v16839_v17  ;;  %12855 = vmatprep.subr.bf16.mxu1 %v16842_v8  ;;  %v16929_v17 = vld [vmem:[%s24185_s1 + $0x1a04] ss:$16 sps:$4 sm:$0xff]   ;;  %v16932_v8 = vld [vmem:[%s24185_s1 + $0x1a0c] ss:$16 sps:$4 sm:$0xff]  }
 0x305   :  { %11737 = vmatprep.mubr.bf16.mxu0 %v20909_v18  ;;  %12885 = vmatprep.mubr.bf16.mxu1 %v20909_v18 }
 0x307   :  { %11708 = vmatpush1.bf16.msra.mxu0 %v16837_v19  ;;  %12856 = vmatpush1.bf16.msra.mxu1 %v16840_v20  ;;  %v21095_v19 = vrot.slane %v20866_v4, %v18582_v49  ;;  %v16927_v20 = vld [vmem:[%s24185_s1 + $0x1a00] ss:$16 sps:$4 sm:$0xff]   ;;  %v16938_v4 = vld [vmem:[%s24185_s1 + $0x1a2c] ss:$16 sps:$4 sm:$0xff]  }
 0x308   :  { %11709 = vmatprep.subr.bf16.mxu0 %v16845_v22  ;;  %12857 = vmatprep.subr.bf16.mxu1 %v16848_v23  ;;  %v16930_v22 = vld [vmem:[%s24185_s1 + $0x1a08] ss:$16 sps:$4 sm:$0xff]   ;;  %v16935_v23 = vld [vmem:[%s24185_s1 + $0x1a24] ss:$16 sps:$4 sm:$0xff]  }
 0x30b   :  { %11710 = vmatpush1.bf16.msra.mxu0 %v16843_v24  ;;  %12858 = vmatpush1.bf16.msra.mxu1 %v16846_v13  ;;  %v2048_v24 = vcombine.high %v20909_v18, %v20909_v18  ;;  %v16933_v13 = vld [vmem:[%s24185_s1 + $0x1a20] ss:$16 sps:$4 sm:$0xff]   ;;  %v16941_v18 = vld [vmem:[%s24185_s1 + $0x1a44] ss:$16 sps:$4 sm:$0xff]  }
 0x30c   :  { %11711 = vmatprep.subr.bf16.mxu0 %v16851_v27  ;;  %12859 = vmatprep.subr.bf16.mxu1 %v16854_v28  ;;  %v16936_v27 = vld [vmem:[%s24185_s1 + $0x1a28] ss:$16 sps:$4 sm:$0xff]   ;;  %v16944_v28 = vld [vmem:[%s24185_s1 + $0x1a4c] ss:$16 sps:$4 sm:$0xff]  }
 0x30f   :  { %11712 = vmatpush1.bf16.msra.mxu0 %v16849_v29  ;;  %12860 = vmatpush1.bf16.msra.mxu1 %v16852_v14  ;;  %v16939_v29 = vld [vmem:[%s24185_s1 + $0x1a40] ss:$16 sps:$4 sm:$0xff]   ;;  %v16942_v14 = vld [vmem:[%s24185_s1 + $0x1a48] ss:$16 sps:$4 sm:$0xff]  }
 0x310   :  { %11713 = vmatprep.subr.bf16.mxu0 %v16857_v30  ;;  %12861 = vmatprep.subr.bf16.mxu1 %v16860_v31  ;;  %v16947_v30 = vld [vmem:[%s24185_s1 + $0x1a64] ss:$16 sps:$4 sm:$0xff]   ;;  %v16950_v31 = vld [vmem:[%s24185_s1 + $0x1a6c] ss:$16 sps:$4 sm:$0xff]  }
 0x313   :  { %11714 = vmatpush1.bf16.msra.mxu0 %v16855_v25  ;;  %12862 = vmatpush1.bf16.msra.mxu1 %v16858_v32  ;;  %v16945_v25 = vld [vmem:[%s24185_s1 + $0x1a60] ss:$16 sps:$4 sm:$0xff]   ;;  %v16948_v32 = vld [vmem:[%s24185_s1 + $0x1a68] ss:$16 sps:$4 sm:$0xff]  }
 0x314   :  { %11715 = vmatprep.subr.bf16.mxu0 %v16863_v33  ;;  %12863 = vmatprep.subr.bf16.mxu1 %v16866_v26  ;;  %v16953_v33 = vld [vmem:[%s24185_s1 + $0x1a84] ss:$16 sps:$4 sm:$0xff]   ;;  %v16956_v26 = vld [vmem:[%s24185_s1 + $0x1a8c] ss:$16 sps:$4 sm:$0xff]  }
 0x317   :  { %11716 = vmatpush1.bf16.msra.mxu0 %v16861_v36  ;;  %12864 = vmatpush1.bf16.msra.mxu1 %v16864_v37  ;;  %v16951_v36 = vld [vmem:[%s24185_s1 + $0x1a80] ss:$16 sps:$4 sm:$0xff]   ;;  %v16954_v37 = vld [vmem:[%s24185_s1 + $0x1a88] ss:$16 sps:$4 sm:$0xff]  }
 0x318   :  { %11717 = vmatprep.subr.bf16.mxu0 %v16869_v21  ;;  %12865 = vmatprep.subr.bf16.mxu1 %v16872_v39  ;;  %v16959_v21 = vld [vmem:[%s24185_s1 + $0x1aa4] ss:$16 sps:$4 sm:$0xff]   ;;  %v16962_v39 = vld [vmem:[%s24185_s1 + $0x1aac] ss:$16 sps:$4 sm:$0xff]  }
 0x31b   :  { %11718 = vmatpush1.bf16.msra.mxu0 %v16867_v40  ;;  %12866 = vmatpush1.bf16.msra.mxu1 %v16870_v41  ;;  %v16957_v40 = vld [vmem:[%s24185_s1 + $0x1aa0] ss:$16 sps:$4 sm:$0xff]   ;;  %v16960_v41 = vld [vmem:[%s24185_s1 + $0x1aa8] ss:$16 sps:$4 sm:$0xff]  }
 0x31c   :  { %11719 = vmatprep.subr.bf16.mxu0 %v16875_v34  ;;  %12867 = vmatprep.subr.bf16.mxu1 %v16878_v43  ;;  %v16965_v34 = vld [vmem:[%s24185_s1 + $0x1ac4] ss:$16 sps:$4 sm:$0xff]   ;;  %v16968_v43 = vld [vmem:[%s24185_s1 + $0x1acc] ss:$16 sps:$4 sm:$0xff]  }
 0x31f   :  { %11720 = vmatpush1.bf16.msra.mxu0 %v16873_v45  ;;  %12868 = vmatpush1.bf16.msra.mxu1 %v16876_v46  ;;  %v16963_v45 = vld [vmem:[%s24185_s1 + $0x1ac0] ss:$16 sps:$4 sm:$0xff]   ;;  %v16966_v46 = vld [vmem:[%s24185_s1 + $0x1ac8] ss:$16 sps:$4 sm:$0xff]  }
 0x320   :  { %11721 = vmatprep.subr.bf16.mxu0 %v16881_v35  ;;  %12869 = vmatprep.subr.bf16.mxu1 %v16884_v50  ;;  %v16971_v35 = vld [vmem:[%s24185_s1 + $0x1ae4] ss:$16 sps:$4 sm:$0xff]   ;;  %v16974_v50 = vld [vmem:[%s24185_s1 + $0x1aec] ss:$16 sps:$4 sm:$0xff]  }
 0x323   :  { %11722 = vmatpush1.bf16.msra.mxu0 %v16879_v51  ;;  %12870 = vmatpush1.bf16.msra.mxu1 %v16882_v53  ;;  %v16969_v51 = vld [vmem:[%s24185_s1 + $0x1ae0] ss:$16 sps:$4 sm:$0xff]   ;;  %v16972_v53 = vld [vmem:[%s24185_s1 + $0x1ae8] ss:$16 sps:$4 sm:$0xff]  }
 0x324   :  { %11723 = vmatprep.subr.bf16.mxu0 %v16887_v38  ;;  %12871 = vmatprep.subr.bf16.mxu1 %v16890_v54  ;;  %v16977_v38 = vld [vmem:[%s24185_s1 + $0x1b04] ss:$16 sps:$4 sm:$0xff]   ;;  %v16980_v54 = vld [vmem:[%s24185_s1 + $0x1b0c] ss:$16 sps:$4 sm:$0xff]  }
 0x327   :  { %11724 = vmatpush1.bf16.msra.mxu0 %v16885_v55  ;;  %12872 = vmatpush1.bf16.msra.mxu1 %v16888_v56  ;;  %v16975_v55 = vld [vmem:[%s24185_s1 + $0x1b00] ss:$16 sps:$4 sm:$0xff]   ;;  %v16978_v56 = vld [vmem:[%s24185_s1 + $0x1b08] ss:$16 sps:$4 sm:$0xff]  }
 0x328   :  { %11725 = vmatprep.subr.bf16.mxu0 %v16893_v47  ;;  %12873 = vmatprep.subr.bf16.mxu1 %v16896_v57  ;;  %v16983_v47 = vld [vmem:[%s24185_s1 + $0x1b24] ss:$16 sps:$4 sm:$0xff]   ;;  %v16986_v57 = vld [vmem:[%s24185_s1 + $0x1b2c] ss:$16 sps:$4 sm:$0xff]  }
 0x32b   :  { %11726 = vmatpush1.bf16.msra.mxu0 %v16891_v58  ;;  %12874 = vmatpush1.bf16.msra.mxu1 %v16894_v48  ;;  %v16981_v58 = vld [vmem:[%s24185_s1 + $0x1b20] ss:$16 sps:$4 sm:$0xff]   ;;  %v16984_v48 = vld [vmem:[%s24185_s1 + $0x1b28] ss:$16 sps:$4 sm:$0xff]  }
 0x32c   :  { %11727 = vmatprep.subr.bf16.mxu0 %v16899_v61  ;;  %12875 = vmatprep.subr.bf16.mxu1 %v16902_v62  ;;  %v16989_v61 = vld [vmem:[%s24185_s1 + $0x1b44] ss:$16 sps:$4 sm:$0xff]   ;;  %v16992_v62 = vld [vmem:[%s24185_s1 + $0x1b4c] ss:$16 sps:$4 sm:$0xff]  }
 0x32f   :  { %11728 = vmatpush1.bf16.msra.mxu0 %v16897_v44  ;;  %12876 = vmatpush1.bf16.msra.mxu1 %v16900_v0  ;;  %v16987_v44 = vld [vmem:[%s24185_s1 + $0x1b40] ss:$16 sps:$4 sm:$0xff]   ;;  %v16990_v0 = vld [vmem:[%s24185_s1 + $0x1b48] ss:$16 sps:$4 sm:$0xff]  }
 0x330   :  { %11729 = vmatprep.subr.bf16.mxu0 %v16905_v1  ;;  %12877 = vmatprep.subr.bf16.mxu1 %v16908_v2  ;;  %v16995_v1 = vld [vmem:[%s24185_s1 + $0x1b64] ss:$16 sps:$4 sm:$0xff]   ;;  %v16998_v2 = vld [vmem:[%s24185_s1 + $0x1b6c] ss:$16 sps:$4 sm:$0xff]  }
 0x333   :  { %11730 = vmatpush1.bf16.msra.mxu0 %v16903_v59  ;;  %12878 = vmatpush1.bf16.msra.mxu1 %v16906_v3  ;;  %v16993_v59 = vld [vmem:[%s24185_s1 + $0x1b60] ss:$16 sps:$4 sm:$0xff]   ;;  %v16996_v3 = vld [vmem:[%s24185_s1 + $0x1b68] ss:$16 sps:$4 sm:$0xff]  }
 0x334   :  { %11731 = vmatprep.subr.bf16.mxu0 %v16911_v5  ;;  %12879 = vmatprep.subr.bf16.mxu1 %v16914_v6  ;;  %v17001_v5 = vld [vmem:[%s24185_s1 + $0x1b84] ss:$16 sps:$4 sm:$0xff]   ;;  %v17004_v6 = vld [vmem:[%s24185_s1 + $0x1b8c] ss:$16 sps:$4 sm:$0xff]  }
 0x337   :  { %11732 = vmatpush1.bf16.msra.mxu0 %v16909_v60  ;;  %12880 = vmatpush1.bf16.msra.mxu1 %v16912_v9  ;;  %v16999_v60 = vld [vmem:[%s24185_s1 + $0x1b80] ss:$16 sps:$4 sm:$0xff]   ;;  %v17002_v9 = vld [vmem:[%s24185_s1 + $0x1b88] ss:$16 sps:$4 sm:$0xff]  }
 0x338   :  { %11733 = vmatprep.subr.bf16.mxu0 %v16917_v10  ;;  %12881 = vmatprep.subr.bf16.mxu1 %v16920_v11  ;;  %v17007_v10 = vld [vmem:[%s24185_s1 + $0x1ba4] ss:$16 sps:$4 sm:$0xff]   ;;  %v17010_v11 = vld [vmem:[%s24185_s1 + $0x1bac] ss:$16 sps:$4 sm:$0xff]  }
 0x33b   :  { %11734 = vmatpush1.bf16.msra.mxu0 %v16915_v63  ;;  %12882 = vmatpush1.bf16.msra.mxu1 %v16918_v12  ;;  %v17005_v63 = vld [vmem:[%s24185_s1 + $0x1ba0] ss:$16 sps:$4 sm:$0xff]   ;;  %v17008_v12 = vld [vmem:[%s24185_s1 + $0x1ba8] ss:$16 sps:$4 sm:$0xff]  }
 0x33c   :  { %11735 = vmatprep.subr.bf16.mxu0 %v16923_v52  ;;  %12883 = vmatprep.subr.bf16.mxu1 %v16926_v15  ;;  %v17013_v52 = vld [vmem:[%s24185_s1 + $0x1bc4] ss:$16 sps:$4 sm:$0xff]   ;;  %v17016_v15 = vld [vmem:[%s24185_s1 + $0x1bcc] ss:$16 sps:$4 sm:$0xff]  }
 0x33f   :  { %11736 = vmatpush1.bf16.msra.mxu0 %v16921_v7  ;;  %12884 = vmatpush1.bf16.msra.mxu1 %v16924_v16  ;;  %v18376_v7 = vld [vmem:[%s24184_s0 + $0x18] sm:$0xff] }
 0x340   :  { %11746 = vmatprep.subr.bf16.mxu0 %v16929_v17  ;;  %12894 = vmatprep.subr.bf16.mxu1 %v16932_v8  ;;  %v2001_v16 = vcombine.high %v18376_v7, %v18376_v7  ;;  %v17011_v17 = vld [vmem:[%s24185_s1 + $0x1bc0] ss:$16 sps:$4 sm:$0xff]   ;;  %v17014_v8 = vld [vmem:[%s24185_s1 + $0x1bc8] ss:$16 sps:$4 sm:$0xff]  }
 0x341   :  { %v17095_v7 = vld [vmem:[%s24185_s1 + $0x1d80] ss:$16 sps:$4 sm:$0xff]  }
 0x342   :  { %11738 = vmatmul.mubr.bf16.vlgmr.msra.gmra.mrb[0].mxu0 %v21095_v19  ;;  %12886 = vmatmul.mubr.bf16.vlgmr.msra.gmra.mrb[0].mxu1 %v21095_v19 }
 0x343   :  { %11747 = vmatpush1.bf16.msra.mxu0 %v16927_v20  ;;  %12895 = vmatpush1.bf16.msra.mxu1 %v16930_v22  ;;  %v17019_v20 = vld [vmem:[%s24185_s1 + $0x1be4] ss:$16 sps:$4 sm:$0xff]   ;;  %v17022_v22 = vld [vmem:[%s24185_s1 + $0x1bec] ss:$16 sps:$4 sm:$0xff]  }
 0x344   :  { %11748 = vmatprep.subr.bf16.mxu0 %v16935_v23  ;;  %12896 = vmatprep.subr.bf16.mxu1 %v16938_v4  ;;  %v21285_v23 = vrot.slane %v2001_v16, %v18582_v49  ;;  %v17017_v4 = vld [vmem:[%s24185_s1 + $0x1be0] ss:$16 sps:$4 sm:$0xff]   ;;  %v17098_v16 = vld [vmem:[%s24185_s1 + $0x1d88] ss:$16 sps:$4 sm:$0xff]  }
 0x345   :  { %11778 = vmatprep.mubr.bf16.mxu0 %v2048_v24  ;;  %12926 = vmatprep.mubr.bf16.mxu1 %v2048_v24  ;;  %v17020_v24 = vld [vmem:[%s24185_s1 + $0x1be8] ss:$16 sps:$4 sm:$0xff]  }
 0x347   :  { %11749 = vmatpush1.bf16.msra.mxu0 %v16933_v13  ;;  %12897 = vmatpush1.bf16.msra.mxu1 %v16936_v27  ;;  %v17025_v13 = vld [vmem:[%s24185_s1 + $0x1c04] ss:$16 sps:$4 sm:$0xff]   ;;  %v17028_v27 = vld [vmem:[%s24185_s1 + $0x1c0c] ss:$16 sps:$4 sm:$0xff]  }
 0x348   :  { %11750 = vmatprep.subr.bf16.mxu0 %v16941_v18  ;;  %12898 = vmatprep.subr.bf16.mxu1 %v16944_v28  ;;  %v2017_v18 = vcombine.high %v21285_v23, %v21285_v23  ;;  %v2046_v28 = vcombine.high %v21095_v19, %v21095_v19  ;;  %v17034_v19 = vld [vmem:[%s24185_s1 + $0x1c2c] ss:$16 sps:$4 sm:$0xff]  }
 0x34b   :  { %11751 = vmatpush1.bf16.msra.mxu0 %v16939_v29  ;;  %12899 = vmatpush1.bf16.msra.mxu1 %v16942_v14  ;;  %v17023_v29 = vld [vmem:[%s24185_s1 + $0x1c00] ss:$16 sps:$4 sm:$0xff]   ;;  %v17026_v14 = vld [vmem:[%s24185_s1 + $0x1c08] ss:$16 sps:$4 sm:$0xff]  }
 0x34c   :  { %11752 = vmatprep.subr.bf16.mxu0 %v16947_v30  ;;  %12900 = vmatprep.subr.bf16.mxu1 %v16950_v31  ;;  %v17031_v30 = vld [vmem:[%s24185_s1 + $0x1c24] ss:$16 sps:$4 sm:$0xff]   ;;  %v21316_v31 = vrot.slane %v2017_v18, %v18582_v49 }
 0x34d   :  { %v17115_v18 = vld [vmem:[%s24185_s1 + $0x1de4] ss:$16 sps:$4 sm:$0xff]  }
 0x34f   :  { %11753 = vmatpush1.bf16.msra.mxu0 %v16945_v25  ;;  %12901 = vmatpush1.bf16.msra.mxu1 %v16948_v32  ;;  %v17029_v25 = vld [vmem:[%s24185_s1 + $0x1c20] ss:$16 sps:$4 sm:$0xff]   ;;  %v17032_v32 = vld [vmem:[%s24185_s1 + $0x1c28] ss:$16 sps:$4 sm:$0xff]  }
 0x350   :  { %11754 = vmatprep.subr.bf16.mxu0 %v16953_v33  ;;  %12902 = vmatprep.subr.bf16.mxu1 %v16956_v26  ;;  %v17037_v33 = vld [vmem:[%s24185_s1 + $0x1c44] ss:$16 sps:$4 sm:$0xff]   ;;  %v17040_v26 = vld [vmem:[%s24185_s1 + $0x1c4c] ss:$16 sps:$4 sm:$0xff]  }
 0x353   :  { %11755 = vmatpush1.bf16.msra.mxu0 %v16951_v36  ;;  %12903 = vmatpush1.bf16.msra.mxu1 %v16954_v37  ;;  %v17035_v36 = vld [vmem:[%s24185_s1 + $0x1c40] ss:$16 sps:$4 sm:$0xff]   ;;  %v17038_v37 = vld [vmem:[%s24185_s1 + $0x1c48] ss:$16 sps:$4 sm:$0xff]  }
 0x354   :  { %11756 = vmatprep.subr.bf16.mxu0 %v16959_v21  ;;  %12904 = vmatprep.subr.bf16.mxu1 %v16962_v39  ;;  %v17043_v21 = vld [vmem:[%s24185_s1 + $0x1c64] ss:$16 sps:$4 sm:$0xff]   ;;  %v17046_v39 = vld [vmem:[%s24185_s1 + $0x1c6c] ss:$16 sps:$4 sm:$0xff]  }
 0x357   :  { %11757 = vmatpush1.bf16.msra.mxu0 %v16957_v40  ;;  %12905 = vmatpush1.bf16.msra.mxu1 %v16960_v41  ;;  %v17041_v40 = vld [vmem:[%s24185_s1 + $0x1c60] ss:$16 sps:$4 sm:$0xff]   ;;  %v17044_v41 = vld [vmem:[%s24185_s1 + $0x1c68] ss:$16 sps:$4 sm:$0xff]  }
 0x358   :  { %11758 = vmatprep.subr.bf16.mxu0 %v16965_v34  ;;  %12906 = vmatprep.subr.bf16.mxu1 %v16968_v43  ;;  %v17049_v34 = vld [vmem:[%s24185_s1 + $0x1c84] ss:$16 sps:$4 sm:$0xff]   ;;  %v17052_v43 = vld [vmem:[%s24185_s1 + $0x1c8c] ss:$16 sps:$4 sm:$0xff]  }
 0x35b   :  { %11759 = vmatpush1.bf16.msra.mxu0 %v16963_v45  ;;  %12907 = vmatpush1.bf16.msra.mxu1 %v16966_v46  ;;  %v17047_v45 = vld [vmem:[%s24185_s1 + $0x1c80] ss:$16 sps:$4 sm:$0xff]   ;;  %v17050_v46 = vld [vmem:[%s24185_s1 + $0x1c88] ss:$16 sps:$4 sm:$0xff]  }
 0x35c   :  { %11760 = vmatprep.subr.bf16.mxu0 %v16971_v35  ;;  %12908 = vmatprep.subr.bf16.mxu1 %v16974_v50  ;;  %v17055_v35 = vld [vmem:[%s24185_s1 + $0x1ca4] ss:$16 sps:$4 sm:$0xff]   ;;  %v17058_v50 = vld [vmem:[%s24185_s1 + $0x1cac] ss:$16 sps:$4 sm:$0xff]  }
 0x35f   :  { %11761 = vmatpush1.bf16.msra.mxu0 %v16969_v51  ;;  %12909 = vmatpush1.bf16.msra.mxu1 %v16972_v53  ;;  %v17053_v51 = vld [vmem:[%s24185_s1 + $0x1ca0] ss:$16 sps:$4 sm:$0xff]   ;;  %v17056_v53 = vld [vmem:[%s24185_s1 + $0x1ca8] ss:$16 sps:$4 sm:$0xff]  }
 0x360   :  { %11762 = vmatprep.subr.bf16.mxu0 %v16977_v38  ;;  %12910 = vmatprep.subr.bf16.mxu1 %v16980_v54  ;;  %v17061_v38 = vld [vmem:[%s24185_s1 + $0x1cc4] ss:$16 sps:$4 sm:$0xff]   ;;  %v17064_v54 = vld [vmem:[%s24185_s1 + $0x1ccc] ss:$16 sps:$4 sm:$0xff]  }
 0x363   :  { %11763 = vmatpush1.bf16.msra.mxu0 %v16975_v55  ;;  %12911 = vmatpush1.bf16.msra.mxu1 %v16978_v56  ;;  %v17059_v55 = vld [vmem:[%s24185_s1 + $0x1cc0] ss:$16 sps:$4 sm:$0xff]   ;;  %v17062_v56 = vld [vmem:[%s24185_s1 + $0x1cc8] ss:$16 sps:$4 sm:$0xff]  }
 0x364   :  { %11764 = vmatprep.subr.bf16.mxu0 %v16983_v47  ;;  %12912 = vmatprep.subr.bf16.mxu1 %v16986_v57  ;;  %v17067_v47 = vld [vmem:[%s24185_s1 + $0x1ce4] ss:$16 sps:$4 sm:$0xff]   ;;  %v17070_v57 = vld [vmem:[%s24185_s1 + $0x1cec] ss:$16 sps:$4 sm:$0xff]  }
 0x367   :  { %11765 = vmatpush1.bf16.msra.mxu0 %v16981_v58  ;;  %12913 = vmatpush1.bf16.msra.mxu1 %v16984_v48  ;;  %v17065_v58 = vld [vmem:[%s24185_s1 + $0x1ce0] ss:$16 sps:$4 sm:$0xff]   ;;  %v17068_v48 = vld [vmem:[%s24185_s1 + $0x1ce8] ss:$16 sps:$4 sm:$0xff]  }
 0x368   :  { %11766 = vmatprep.subr.bf16.mxu0 %v16989_v61  ;;  %12914 = vmatprep.subr.bf16.mxu1 %v16992_v62  ;;  %v17073_v61 = vld [vmem:[%s24185_s1 + $0x1d04] ss:$16 sps:$4 sm:$0xff]   ;;  %v17076_v62 = vld [vmem:[%s24185_s1 + $0x1d0c] ss:$16 sps:$4 sm:$0xff]  }
 0x36b   :  { %11767 = vmatpush1.bf16.msra.mxu0 %v16987_v44  ;;  %12915 = vmatpush1.bf16.msra.mxu1 %v16990_v0  ;;  %v17071_v44 = vld [vmem:[%s24185_s1 + $0x1d00] ss:$16 sps:$4 sm:$0xff]   ;;  %v17074_v0 = vld [vmem:[%s24185_s1 + $0x1d08] ss:$16 sps:$4 sm:$0xff]  }
 0x36c   :  { %11768 = vmatprep.subr.bf16.mxu0 %v16995_v1  ;;  %12916 = vmatprep.subr.bf16.mxu1 %v16998_v2  ;;  %v17079_v1 = vld [vmem:[%s24185_s1 + $0x1d24] ss:$16 sps:$4 sm:$0xff]   ;;  %v17082_v2 = vld [vmem:[%s24185_s1 + $0x1d2c] ss:$16 sps:$4 sm:$0xff]  }
 0x36f   :  { %11769 = vmatpush1.bf16.msra.mxu0 %v16993_v59  ;;  %12917 = vmatpush1.bf16.msra.mxu1 %v16996_v3  ;;  %v17077_v59 = vld [vmem:[%s24185_s1 + $0x1d20] ss:$16 sps:$4 sm:$0xff]   ;;  %v17080_v3 = vld [vmem:[%s24185_s1 + $0x1d28] ss:$16 sps:$4 sm:$0xff]  }
 0x370   :  { %11770 = vmatprep.subr.bf16.mxu0 %v17001_v5  ;;  %12918 = vmatprep.subr.bf16.mxu1 %v17004_v6  ;;  %v17085_v5 = vld [vmem:[%s24185_s1 + $0x1d44] ss:$16 sps:$4 sm:$0xff]   ;;  %v17088_v6 = vld [vmem:[%s24185_s1 + $0x1d4c] ss:$16 sps:$4 sm:$0xff]  }
 0x373   :  { %11771 = vmatpush1.bf16.msra.mxu0 %v16999_v60  ;;  %12919 = vmatpush1.bf16.msra.mxu1 %v17002_v9  ;;  %v17083_v60 = vld [vmem:[%s24185_s1 + $0x1d40] ss:$16 sps:$4 sm:$0xff]   ;;  %v17086_v9 = vld [vmem:[%s24185_s1 + $0x1d48] ss:$16 sps:$4 sm:$0xff]  }
 0x374   :  { %11772 = vmatprep.subr.bf16.mxu0 %v17007_v10  ;;  %12920 = vmatprep.subr.bf16.mxu1 %v17010_v11  ;;  %v17091_v10 = vld [vmem:[%s24185_s1 + $0x1d64] ss:$16 sps:$4 sm:$0xff]   ;;  %v17094_v11 = vld [vmem:[%s24185_s1 + $0x1d6c] ss:$16 sps:$4 sm:$0xff]  }
 0x377   :  { %11773 = vmatpush1.bf16.msra.mxu0 %v17005_v63  ;;  %12921 = vmatpush1.bf16.msra.mxu1 %v17008_v12  ;;  %v17089_v63 = vld [vmem:[%s24185_s1 + $0x1d60] ss:$16 sps:$4 sm:$0xff]   ;;  %v17092_v12 = vld [vmem:[%s24185_s1 + $0x1d68] ss:$16 sps:$4 sm:$0xff]  }
 0x378   :  { %11774 = vmatprep.subr.bf16.mxu0 %v17013_v52  ;;  %12922 = vmatprep.subr.bf16.mxu1 %v17016_v15  ;;  %v17097_v52 = vld [vmem:[%s24185_s1 + $0x1d84] ss:$16 sps:$4 sm:$0xff]   ;;  %v17100_v15 = vld [vmem:[%s24185_s1 + $0x1d8c] ss:$16 sps:$4 sm:$0xff]  }
 0x37b   :  { %11775 = vmatpush1.bf16.msra.mxu0 %v17011_v17  ;;  %12923 = vmatpush1.bf16.msra.mxu1 %v17014_v8  ;;  %v17103_v17 = vld [vmem:[%s24185_s1 + $0x1da4] ss:$16 sps:$4 sm:$0xff]   ;;  %v17106_v8 = vld [vmem:[%s24185_s1 + $0x1dac] ss:$16 sps:$4 sm:$0xff]  }
 0x37c   :  { %11776 = vmatprep.subr.bf16.mxu0 %v17019_v20  ;;  %12924 = vmatprep.subr.bf16.mxu1 %v17022_v22  ;;  %v17101_v20 = vld [vmem:[%s24185_s1 + $0x1da0] ss:$16 sps:$4 sm:$0xff]   ;;  %v17104_v22 = vld [vmem:[%s24185_s1 + $0x1da8] ss:$16 sps:$4 sm:$0xff]  }
 0x37f   :  { %11777 = vmatpush1.bf16.msra.mxu0 %v17017_v4  ;;  %12925 = vmatpush1.bf16.msra.mxu1 %v17020_v24  ;;  %v17109_v4 = vld [vmem:[%s24185_s1 + $0x1dc4] ss:$16 sps:$4 sm:$0xff]   ;;  %v17112_v24 = vld [vmem:[%s24185_s1 + $0x1dcc] ss:$16 sps:$4 sm:$0xff]  }
 0x380   :  { %11787 = vmatprep.subr.bf16.mxu0 %v17025_v13  ;;  %12935 = vmatprep.subr.bf16.mxu1 %v17028_v27  ;;  %v17107_v13 = vld [vmem:[%s24185_s1 + $0x1dc0] ss:$16 sps:$4 sm:$0xff]   ;;  %v17110_v27 = vld [vmem:[%s24185_s1 + $0x1dc8] ss:$16 sps:$4 sm:$0xff]  }
 0x382   :  { %11779 = vmatmul.mubr.bf16.vlgmr.msra.gmra.mrb[0].mxu0 %v2046_v28  ;;  %12927 = vmatmul.mubr.bf16.vlgmr.msra.gmra.mrb[0].mxu1 %v2046_v28  ;;  %v17118_v28 = vld [vmem:[%s24185_s1 + $0x1dec] ss:$16 sps:$4 sm:$0xff]  }
 0x383   :  { %11788 = vmatpush1.bf16.msra.mxu0 %v17023_v29  ;;  %12936 = vmatpush1.bf16.msra.mxu1 %v17026_v14  ;;  %v17113_v29 = vld [vmem:[%s24185_s1 + $0x1de0] ss:$16 sps:$4 sm:$0xff]   ;;  %v17116_v14 = vld [vmem:[%s24185_s1 + $0x1de8] ss:$16 sps:$4 sm:$0xff]  }
 0x384   :  { %11789 = vmatprep.subr.bf16.mxu0 %v17031_v30  ;;  %12937 = vmatprep.subr.bf16.mxu1 %v17034_v19  ;;  %v17122_v30 = vld [vmem:[%s24185_s1 + $0x1e04] ss:$16 sps:$4 sm:$0xff]   ;;  %v17125_v19 = vld [vmem:[%s24185_s1 + $0x1e0c] ss:$16 sps:$4 sm:$0xff]  }
 0x385   :  { %11819 = vmatprep.mubr.bf16.mxu0 %v21316_v31  ;;  %12967 = vmatprep.mubr.bf16.mxu1 %v21316_v31 }
 0x387   :  { %11790 = vmatpush1.bf16.msra.mxu0 %v17029_v25  ;;  %12938 = vmatpush1.bf16.msra.mxu1 %v17032_v32  ;;  %v21502_v25 = vrot.slane %v21285_v23, %v18582_v49  ;;  %v17120_v32 = vld [vmem:[%s24185_s1 + $0x1e00] ss:$16 sps:$4 sm:$0xff]   ;;  %v17131_v23 = vld [vmem:[%s24185_s1 + $0x1e2c] ss:$16 sps:$4 sm:$0xff]  }
 0x388   :  { %11791 = vmatprep.subr.bf16.mxu0 %v17037_v33  ;;  %12939 = vmatprep.subr.bf16.mxu1 %v17040_v26  ;;  %v17123_v33 = vld [vmem:[%s24185_s1 + $0x1e08] ss:$16 sps:$4 sm:$0xff]   ;;  %v17128_v26 = vld [vmem:[%s24185_s1 + $0x1e24] ss:$16 sps:$4 sm:$0xff]  }
 0x38b   :  { %11792 = vmatpush1.bf16.msra.mxu0 %v17035_v36  ;;  %12940 = vmatpush1.bf16.msra.mxu1 %v17038_v37  ;;  %v2049_v36 = vcombine.high %v21316_v31, %v21316_v31 }
 0x38c   :  { %11793 = vmatprep.subr.bf16.mxu0 %v17043_v21  ;;  %12941 = vmatprep.subr.bf16.mxu1 %v17046_v39 }
 0x38f   :  { %11794 = vmatpush1.bf16.msra.mxu0 %v17041_v40  ;;  %12942 = vmatpush1.bf16.msra.mxu1 %v17044_v41 }
 0x390   :  { %11795 = vmatprep.subr.bf16.mxu0 %v17049_v34  ;;  %12943 = vmatprep.subr.bf16.mxu1 %v17052_v43 }
 0x393   :  { %11796 = vmatpush1.bf16.msra.mxu0 %v17047_v45  ;;  %12944 = vmatpush1.bf16.msra.mxu1 %v17050_v46 }
 0x394   :  { %11797 = vmatprep.subr.bf16.mxu0 %v17055_v35  ;;  %12945 = vmatprep.subr.bf16.mxu1 %v17058_v50 }
 0x397   :  { %11798 = vmatpush1.bf16.msra.mxu0 %v17053_v51  ;;  %12946 = vmatpush1.bf16.msra.mxu1 %v17056_v53 }
 0x398   :  { %11799 = vmatprep.subr.bf16.mxu0 %v17061_v38  ;;  %12947 = vmatprep.subr.bf16.mxu1 %v17064_v54 }
 0x39b   :  { %11800 = vmatpush1.bf16.msra.mxu0 %v17059_v55  ;;  %12948 = vmatpush1.bf16.msra.mxu1 %v17062_v56 }
 0x39c   :  { %11801 = vmatprep.subr.bf16.mxu0 %v17067_v47  ;;  %12949 = vmatprep.subr.bf16.mxu1 %v17070_v57 }
 0x39f   :  { %11802 = vmatpush1.bf16.msra.mxu0 %v17065_v58  ;;  %12950 = vmatpush1.bf16.msra.mxu1 %v17068_v48 }
 0x3a0   :  { %11803 = vmatprep.subr.bf16.mxu0 %v17073_v61  ;;  %12951 = vmatprep.subr.bf16.mxu1 %v17076_v62 }
 0x3a3   :  { %11804 = vmatpush1.bf16.msra.mxu0 %v17071_v44  ;;  %12952 = vmatpush1.bf16.msra.mxu1 %v17074_v0 }
 0x3a4   :  { %11805 = vmatprep.subr.bf16.mxu0 %v17079_v1  ;;  %12953 = vmatprep.subr.bf16.mxu1 %v17082_v2 }
 0x3a7   :  { %11806 = vmatpush1.bf16.msra.mxu0 %v17077_v59  ;;  %12954 = vmatpush1.bf16.msra.mxu1 %v17080_v3 }
 0x3a8   :  { %11807 = vmatprep.subr.bf16.mxu0 %v17085_v5  ;;  %12955 = vmatprep.subr.bf16.mxu1 %v17088_v6 }
 0x3ab   :  { %11808 = vmatpush1.bf16.msra.mxu0 %v17083_v60  ;;  %12956 = vmatpush1.bf16.msra.mxu1 %v17086_v9 }
 0x3ac   :  { %11809 = vmatprep.subr.bf16.mxu0 %v17091_v10  ;;  %12957 = vmatprep.subr.bf16.mxu1 %v17094_v11 }
 0x3af   :  { %11810 = vmatpush1.bf16.msra.mxu0 %v17089_v63  ;;  %12958 = vmatpush1.bf16.msra.mxu1 %v17092_v12 }
 0x3b0   :  { %11811 = vmatprep.subr.bf16.mxu0 %v17097_v52  ;;  %12959 = vmatprep.subr.bf16.mxu1 %v17100_v15 }
 0x3b3   :  { %11812 = vmatpush1.bf16.msra.mxu0 %v17095_v7  ;;  %12960 = vmatpush1.bf16.msra.mxu1 %v17098_v16 }
 0x3b4   :  { %11813 = vmatprep.subr.bf16.mxu0 %v17103_v17  ;;  %12961 = vmatprep.subr.bf16.mxu1 %v17106_v8 }
 0x3b7   :  { %11814 = vmatpush1.bf16.msra.mxu0 %v17101_v20  ;;  %12962 = vmatpush1.bf16.msra.mxu1 %v17104_v22 }
 0x3b8   :  { %11815 = vmatprep.subr.bf16.mxu0 %v17109_v4  ;;  %12963 = vmatprep.subr.bf16.mxu1 %v17112_v24 }
 0x3bb   :  { %11816 = vmatpush1.bf16.msra.mxu0 %v17107_v13  ;;  %12964 = vmatpush1.bf16.msra.mxu1 %v17110_v27 }
 0x3bc   :  { %11817 = vmatprep.subr.bf16.mxu0 %v17115_v18  ;;  %12965 = vmatprep.subr.bf16.mxu1 %v17118_v28 }
 0x3bf   :  { %11818 = vmatpush1.bf16.msra.mxu0 %v17113_v29  ;;  %12966 = vmatpush1.bf16.msra.mxu1 %v17116_v14 }
 0x3c0   :  { %11828 = vmatprep.subr.bf16.mxu0 %v17122_v30  ;;  %12976 = vmatprep.subr.bf16.mxu1 %v17125_v19 }
 0x3c2   :  { %11820 = vmatmul.mubr.bf16.vlgmr.msra.gmra.mrb[0].mxu0 %v21502_v25  ;;  %12968 = vmatmul.mubr.bf16.vlgmr.msra.gmra.mrb[0].mxu1 %v21502_v25 }
 0x3c3   :  { %13 = vsyncpa [#allocation3], 0  ;;  %11829 = vmatpush1.bf16.msra.mxu0 %v17120_v32  ;;  %12977 = vmatpush1.bf16.msra.mxu1 %v17123_v33  ;;  %v17126_v37 = vld [vmem:[%s24185_s1 + $0x1e20] ss:$16 sps:$4 sm:$0xff]   ;;  %v17129_v21 = vld [vmem:[%s24185_s1 + $0x1e28] ss:$16 sps:$4 sm:$0xff]  }
 0x3c4   :  { %11830 = vmatprep.subr.bf16.mxu0 %v17128_v26  ;;  %12978 = vmatprep.subr.bf16.mxu1 %v17131_v23  ;;  %v17134_v31 = vld [vmem:[%s24185_s1 + $0x1e44] ss:$16 sps:$4 sm:$0xff]   ;;  %v17137_v39 = vld [vmem:[%s24185_s1 + $0x1e4c] ss:$16 sps:$4 sm:$0xff]   ;;  %v17132_v40 = vld [vmem:[%s24185_s1 + $0x1e40] ss:$16 sps:$4 sm:$0xff]  }
 0x3c5   :  { %11860 = vmatprep.mubr.bf16.mxu0 %v2049_v36  ;;  %13008 = vmatprep.mubr.bf16.mxu1 %v2049_v36  ;;  %v17135_v41 = vld [vmem:[%s24185_s1 + $0x1e48] ss:$16 sps:$4 sm:$0xff]   ;;  %v17140_v34 = vld [vmem:[%s24185_s1 + $0x1e64] ss:$16 sps:$4 sm:$0xff]   ;;  %v17143_v43 = vld [vmem:[%s24185_s1 + $0x1e6c] ss:$16 sps:$4 sm:$0xff]  }
 0x3c6   :  { %v17138_v45 = vld [vmem:[%s24185_s1 + $0x1e60] ss:$16 sps:$4 sm:$0xff]   ;;  %v17141_v46 = vld [vmem:[%s24185_s1 + $0x1e68] ss:$16 sps:$4 sm:$0xff]   ;;  %v17146_v35 = vld [vmem:[%s24185_s1 + $0x1e84] ss:$16 sps:$4 sm:$0xff]  }
 0x3c7   :  { %11831 = vmatpush1.bf16.msra.mxu0 %v17126_v37  ;;  %12979 = vmatpush1.bf16.msra.mxu1 %v17129_v21  ;;  %v17149_v50 = vld [vmem:[%s24185_s1 + $0x1e8c] ss:$16 sps:$4 sm:$0xff]   ;;  %v17144_v51 = vld [vmem:[%s24185_s1 + $0x1e80] ss:$16 sps:$4 sm:$0xff]   ;;  %v17147_v53 = vld [vmem:[%s24185_s1 + $0x1e88] ss:$16 sps:$4 sm:$0xff]  }
 0x3c8   :  { %11832 = vmatprep.subr.bf16.mxu0 %v17134_v31  ;;  %12980 = vmatprep.subr.bf16.mxu1 %v17137_v39  ;;  %v17152_v38 = vld [vmem:[%s24185_s1 + $0x1ea4] ss:$16 sps:$4 sm:$0xff]   ;;  %v17155_v54 = vld [vmem:[%s24185_s1 + $0x1eac] ss:$16 sps:$4 sm:$0xff]   ;;  %v17150_v55 = vld [vmem:[%s24185_s1 + $0x1ea0] ss:$16 sps:$4 sm:$0xff]   ;;  %v2047_v31 = vcombine.high %v21502_v25, %v21502_v25 }
 0x3c9   :  { %v17153_v56 = vld [vmem:[%s24185_s1 + $0x1ea8] ss:$16 sps:$4 sm:$0xff]   ;;  %v17158_v47 = vld [vmem:[%s24185_s1 + $0x1ec4] ss:$16 sps:$4 sm:$0xff]   ;;  %v17161_v57 = vld [vmem:[%s24185_s1 + $0x1ecc] ss:$16 sps:$4 sm:$0xff]  }
 0x3ca   :  { %v17156_v58 = vld [vmem:[%s24185_s1 + $0x1ec0] ss:$16 sps:$4 sm:$0xff]   ;;  %v17159_v48 = vld [vmem:[%s24185_s1 + $0x1ec8] ss:$16 sps:$4 sm:$0xff]   ;;  %v17164_v61 = vld [vmem:[%s24185_s1 + $0x1ee4] ss:$16 sps:$4 sm:$0xff]  }
 0x3cb   :  { %11833 = vmatpush1.bf16.msra.mxu0 %v17132_v40  ;;  %12981 = vmatpush1.bf16.msra.mxu1 %v17135_v41  ;;  %v17167_v62 = vld [vmem:[%s24185_s1 + $0x1eec] ss:$16 sps:$4 sm:$0xff]   ;;  %v17162_v44 = vld [vmem:[%s24185_s1 + $0x1ee0] ss:$16 sps:$4 sm:$0xff]   ;;  %v17165_v0 = vld [vmem:[%s24185_s1 + $0x1ee8] ss:$16 sps:$4 sm:$0xff]  }
 0x3cc   :  { %11834 = vmatprep.subr.bf16.mxu0 %v17140_v34  ;;  %12982 = vmatprep.subr.bf16.mxu1 %v17143_v43  ;;  %v17170_v1 = vld [vmem:[%s24185_s1 + $0x1f04] ss:$16 sps:$4 sm:$0xff]   ;;  %v17173_v2 = vld [vmem:[%s24185_s1 + $0x1f0c] ss:$16 sps:$4 sm:$0xff]   ;;  %v17168_v59 = vld [vmem:[%s24185_s1 + $0x1f00] ss:$16 sps:$4 sm:$0xff]  }
 0x3cd   :  { %v17171_v3 = vld [vmem:[%s24185_s1 + $0x1f08] ss:$16 sps:$4 sm:$0xff]   ;;  %v17176_v5 = vld [vmem:[%s24185_s1 + $0x1f24] ss:$16 sps:$4 sm:$0xff]   ;;  %v17179_v6 = vld [vmem:[%s24185_s1 + $0x1f2c] ss:$16 sps:$4 sm:$0xff]  }
 0x3ce   :  { %v17174_v60 = vld [vmem:[%s24185_s1 + $0x1f20] ss:$16 sps:$4 sm:$0xff]   ;;  %v17177_v9 = vld [vmem:[%s24185_s1 + $0x1f28] ss:$16 sps:$4 sm:$0xff]   ;;  %v17182_v10 = vld [vmem:[%s24185_s1 + $0x1f44] ss:$16 sps:$4 sm:$0xff]  }
 0x3cf   :  { %11835 = vmatpush1.bf16.msra.mxu0 %v17138_v45  ;;  %12983 = vmatpush1.bf16.msra.mxu1 %v17141_v46  ;;  %v17185_v11 = vld [vmem:[%s24185_s1 + $0x1f4c] ss:$16 sps:$4 sm:$0xff]   ;;  %v17180_v63 = vld [vmem:[%s24185_s1 + $0x1f40] ss:$16 sps:$4 sm:$0xff]   ;;  %v17183_v12 = vld [vmem:[%s24185_s1 + $0x1f48] ss:$16 sps:$4 sm:$0xff]  }
 0x3d0   :  { %11836 = vmatprep.subr.bf16.mxu0 %v17146_v35  ;;  %12984 = vmatprep.subr.bf16.mxu1 %v17149_v50  ;;  %v17188_v52 = vld [vmem:[%s24185_s1 + $0x1f64] ss:$16 sps:$4 sm:$0xff]   ;;  %v17191_v15 = vld [vmem:[%s24185_s1 + $0x1f6c] ss:$16 sps:$4 sm:$0xff]   ;;  %v17186_v7 = vld [vmem:[%s24185_s1 + $0x1f60] ss:$16 sps:$4 sm:$0xff]  }
 0x3d1   :  { %v17189_v16 = vld [vmem:[%s24185_s1 + $0x1f68] ss:$16 sps:$4 sm:$0xff]   ;;  %v17194_v17 = vld [vmem:[%s24185_s1 + $0x1f84] ss:$16 sps:$4 sm:$0xff]   ;;  %v17197_v8 = vld [vmem:[%s24185_s1 + $0x1f8c] ss:$16 sps:$4 sm:$0xff]  }
 0x3d2   :  { %v17192_v20 = vld [vmem:[%s24185_s1 + $0x1f80] ss:$16 sps:$4 sm:$0xff]   ;;  %v17195_v22 = vld [vmem:[%s24185_s1 + $0x1f88] ss:$16 sps:$4 sm:$0xff]   ;;  %v17200_v4 = vld [vmem:[%s24185_s1 + $0x1fa4] ss:$16 sps:$4 sm:$0xff]  }
 0x3d3   :  { %11837 = vmatpush1.bf16.msra.mxu0 %v17144_v51  ;;  %12985 = vmatpush1.bf16.msra.mxu1 %v17147_v53  ;;  %v17203_v24 = vld [vmem:[%s24185_s1 + $0x1fac] ss:$16 sps:$4 sm:$0xff]   ;;  %v17198_v13 = vld [vmem:[%s24185_s1 + $0x1fa0] ss:$16 sps:$4 sm:$0xff]   ;;  %v17201_v27 = vld [vmem:[%s24185_s1 + $0x1fa8] ss:$16 sps:$4 sm:$0xff]  }
 0x3d4   :  { %11838 = vmatprep.subr.bf16.mxu0 %v17152_v38  ;;  %12986 = vmatprep.subr.bf16.mxu1 %v17155_v54  ;;  %v17206_v18 = vld [vmem:[%s24185_s1 + $0x1fc4] ss:$16 sps:$4 sm:$0xff]   ;;  %v17209_v28 = vld [vmem:[%s24185_s1 + $0x1fcc] ss:$16 sps:$4 sm:$0xff]   ;;  %v17204_v14 = vld [vmem:[%s24185_s1 + $0x1fc0] ss:$16 sps:$4 sm:$0xff]  }
 0x3d5   :  { %v21679_v29 = vld [vmem:[%s24184_s0 + $0x20] sm:$0xff]  ;;  %v17207_v30 = vld [vmem:[%s24185_s1 + $0x1fc8] ss:$16 sps:$4 sm:$0xff]   ;;  %v17215_v32 = vld [vmem:[%s24185_s1 + $0x1fec] ss:$16 sps:$4 sm:$0xff]   ;;  %vm13565_vm0 = vcmask 1041408  }
 0x3d6   :  { %v17212_v19 = vld [vmem:[%s24185_s1 + $0x1fe4] ss:$16 sps:$4 sm:$0xff]   ;;  %v21695_v33 = vrot.slane %v21679_v29, %v18582_v49  ;;  %v17210_v26 = vld [vmem:[%s24185_s1 + $0x1fe0] ss:$16 sps:$4 sm:$0xff]   ;;  %v17213_v23 = vld [vmem:[%s24185_s1 + $0x1fe8] ss:$16 sps:$4 sm:$0xff]  }
 0x3d7   :  { %11839 = vmatpush1.bf16.msra.mxu0 %v17150_v55  ;;  %12987 = vmatpush1.bf16.msra.mxu1 %v17153_v56  ;;  %v17218_v36 = vld [vmem:[%s24185_s1 + $0x2004] ss:$16 sps:$4 sm:$0xff]   ;;  %v17221_v37 = vld [vmem:[%s24185_s1 + $0x200c] ss:$16 sps:$4 sm:$0xff]   ;;  %v17216_v39 = vld [vmem:[%s24185_s1 + $0x2000] ss:$16 sps:$4 sm:$0xff]  }
 0x3d8   :  { %11840 = vmatprep.subr.bf16.mxu0 %v17158_v47  ;;  %12988 = vmatprep.subr.bf16.mxu1 %v17161_v57  ;;  %v2065_v21 = vcombine.high %v21695_v33, %v21695_v33  ;;  %v17219_v40 = vld [vmem:[%s24185_s1 + $0x2008] ss:$16 sps:$4 sm:$0xff]   ;;  %v17224_v41 = vld [vmem:[%s24185_s1 + $0x2024] ss:$16 sps:$4 sm:$0xff]   ;;  %v17227_v25 = vld [vmem:[%s24185_s1 + $0x202c] ss:$16 sps:$4 sm:$0xff]  }
 0x3d9   :  { %v17222_v43 = vld [vmem:[%s24185_s1 + $0x2020] ss:$16 sps:$4 sm:$0xff]   ;;  %v17225_v45 = vld [vmem:[%s24185_s1 + $0x2028] ss:$16 sps:$4 sm:$0xff]   ;;  %v17230_v46 = vld [vmem:[%s24185_s1 + $0x2044] ss:$16 sps:$4 sm:$0xff]  }
 0x3da   :  { %v21726_v34 = vrot.slane %v2065_v21, %v18582_v49  ;;  %v17233_v35 = vld [vmem:[%s24185_s1 + $0x204c] ss:$16 sps:$4 sm:$0xff]   ;;  %v17228_v50 = vld [vmem:[%s24185_s1 + $0x2040] ss:$16 sps:$4 sm:$0xff]   ;;  %v17231_v51 = vld [vmem:[%s24185_s1 + $0x2048] ss:$16 sps:$4 sm:$0xff]  }
 0x3db   :  { %11841 = vmatpush1.bf16.msra.mxu0 %v17156_v58  ;;  %12989 = vmatpush1.bf16.msra.mxu1 %v17159_v48  ;;  %v17236_v53 = vld [vmem:[%s24185_s1 + $0x2064] ss:$16 sps:$4 sm:$0xff]   ;;  %v17239_v38 = vld [vmem:[%s24185_s1 + $0x206c] ss:$16 sps:$4 sm:$0xff]   ;;  %v17234_v54 = vld [vmem:[%s24185_s1 + $0x2060] ss:$16 sps:$4 sm:$0xff]  }
 0x3dc   :  { %11842 = vmatprep.subr.bf16.mxu0 %v17164_v61  ;;  %12990 = vmatprep.subr.bf16.mxu1 %v17167_v62  ;;  %v17237_v55 = vld [vmem:[%s24185_s1 + $0x2068] ss:$16 sps:$4 sm:$0xff]   ;;  %v17242_v56 = vld [vmem:[%s24185_s1 + $0x2084] ss:$16 sps:$4 sm:$0xff]   ;;  %v17245_v47 = vld [vmem:[%s24185_s1 + $0x208c] ss:$16 sps:$4 sm:$0xff]  }
 0x3dd   :  { %v17240_v57 = vld [vmem:[%s24185_s1 + $0x2080] ss:$16 sps:$4 sm:$0xff]   ;;  %v17243_v58 = vld [vmem:[%s24185_s1 + $0x2088] ss:$16 sps:$4 sm:$0xff]   ;;  %v17248_v48 = vld [vmem:[%s24185_s1 + $0x20a4] ss:$16 sps:$4 sm:$0xff]  }
 0x3de   :  { %v17251_v61 = vld [vmem:[%s24185_s1 + $0x20ac] ss:$16 sps:$4 sm:$0xff]   ;;  %v17246_v62 = vld [vmem:[%s24185_s1 + $0x20a0] ss:$16 sps:$4 sm:$0xff]   ;;  %v17303_v21 = vld [vmem:[%s24185_s1 + $0x21c8] ss:$16 sps:$4 sm:$0xff]  }
 0x3df   :  { %11843 = vmatpush1.bf16.msra.mxu0 %v17162_v44  ;;  %12991 = vmatpush1.bf16.msra.mxu1 %v17165_v0  ;;  %v17249_v44 = vld [vmem:[%s24185_s1 + $0x20a8] ss:$16 sps:$4 sm:$0xff]   ;;  %v17254_v0 = vld [vmem:[%s24185_s1 + $0x20c4] ss:$16 sps:$4 sm:$0xff]  }
 0x3e0   :  { %11844 = vmatprep.subr.bf16.mxu0 %v17170_v1  ;;  %12992 = vmatprep.subr.bf16.mxu1 %v17173_v2  ;;  %v17257_v1 = vld [vmem:[%s24185_s1 + $0x20cc] ss:$16 sps:$4 sm:$0xff]   ;;  %v17252_v2 = vld [vmem:[%s24185_s1 + $0x20c0] ss:$16 sps:$4 sm:$0xff]  }
 0x3e3   :  { %11845 = vmatpush1.bf16.msra.mxu0 %v17168_v59  ;;  %12993 = vmatpush1.bf16.msra.mxu1 %v17171_v3  ;;  %v17255_v59 = vld [vmem:[%s24185_s1 + $0x20c8] ss:$16 sps:$4 sm:$0xff]   ;;  %v17260_v3 = vld [vmem:[%s24185_s1 + $0x20e4] ss:$16 sps:$4 sm:$0xff]  }
 0x3e4   :  { %11846 = vmatprep.subr.bf16.mxu0 %v17176_v5  ;;  %12994 = vmatprep.subr.bf16.mxu1 %v17179_v6  ;;  %v17263_v5 = vld [vmem:[%s24185_s1 + $0x20ec] ss:$16 sps:$4 sm:$0xff]   ;;  %v17258_v6 = vld [vmem:[%s24185_s1 + $0x20e0] ss:$16 sps:$4 sm:$0xff]  }
 0x3e7   :  { %11847 = vmatpush1.bf16.msra.mxu0 %v17174_v60  ;;  %12995 = vmatpush1.bf16.msra.mxu1 %v17177_v9  ;;  %v17261_v60 = vld [vmem:[%s24185_s1 + $0x20e8] ss:$16 sps:$4 sm:$0xff]   ;;  %v17266_v9 = vld [vmem:[%s24185_s1 + $0x2104] ss:$16 sps:$4 sm:$0xff]  }
 0x3e8   :  { %11848 = vmatprep.subr.bf16.mxu0 %v17182_v10  ;;  %12996 = vmatprep.subr.bf16.mxu1 %v17185_v11  ;;  %v17269_v10 = vld [vmem:[%s24185_s1 + $0x210c] ss:$16 sps:$4 sm:$0xff]   ;;  %v17264_v11 = vld [vmem:[%s24185_s1 + $0x2100] ss:$16 sps:$4 sm:$0xff]  }
 0x3eb   :  { %11849 = vmatpush1.bf16.msra.mxu0 %v17180_v63  ;;  %12997 = vmatpush1.bf16.msra.mxu1 %v17183_v12  ;;  %v17267_v63 = vld [vmem:[%s24185_s1 + $0x2108] ss:$16 sps:$4 sm:$0xff]   ;;  %v17272_v12 = vld [vmem:[%s24185_s1 + $0x2124] ss:$16 sps:$4 sm:$0xff]  }
 0x3ec   :  { %11850 = vmatprep.subr.bf16.mxu0 %v17188_v52  ;;  %12998 = vmatprep.subr.bf16.mxu1 %v17191_v15  ;;  %v17275_v52 = vld [vmem:[%s24185_s1 + $0x212c] ss:$16 sps:$4 sm:$0xff]   ;;  %v17270_v15 = vld [vmem:[%s24185_s1 + $0x2120] ss:$16 sps:$4 sm:$0xff]  }
 0x3ef   :  { %11851 = vmatpush1.bf16.msra.mxu0 %v17186_v7  ;;  %12999 = vmatpush1.bf16.msra.mxu1 %v17189_v16  ;;  %v17273_v7 = vld [vmem:[%s24185_s1 + $0x2128] ss:$16 sps:$4 sm:$0xff]   ;;  %v17278_v16 = vld [vmem:[%s24185_s1 + $0x2144] ss:$16 sps:$4 sm:$0xff]  }
 0x3f0   :  { %11852 = vmatprep.subr.bf16.mxu0 %v17194_v17  ;;  %13000 = vmatprep.subr.bf16.mxu1 %v17197_v8  ;;  %v17281_v17 = vld [vmem:[%s24185_s1 + $0x214c] ss:$16 sps:$4 sm:$0xff]   ;;  %v17276_v8 = vld [vmem:[%s24185_s1 + $0x2140] ss:$16 sps:$4 sm:$0xff]  }
 0x3f3   :  { %11853 = vmatpush1.bf16.msra.mxu0 %v17192_v20  ;;  %13001 = vmatpush1.bf16.msra.mxu1 %v17195_v22  ;;  %v17279_v20 = vld [vmem:[%s24185_s1 + $0x2148] ss:$16 sps:$4 sm:$0xff]   ;;  %v17284_v22 = vld [vmem:[%s24185_s1 + $0x2164] ss:$16 sps:$4 sm:$0xff]  }
 0x3f4   :  { %11854 = vmatprep.subr.bf16.mxu0 %v17200_v4  ;;  %13002 = vmatprep.subr.bf16.mxu1 %v17203_v24  ;;  %v17287_v4 = vld [vmem:[%s24185_s1 + $0x216c] ss:$16 sps:$4 sm:$0xff]   ;;  %v17282_v24 = vld [vmem:[%s24185_s1 + $0x2160] ss:$16 sps:$4 sm:$0xff]  }
 0x3f7   :  { %11855 = vmatpush1.bf16.msra.mxu0 %v17198_v13  ;;  %13003 = vmatpush1.bf16.msra.mxu1 %v17201_v27  ;;  %v17285_v13 = vld [vmem:[%s24185_s1 + $0x2168] ss:$16 sps:$4 sm:$0xff]   ;;  %v17290_v27 = vld [vmem:[%s24185_s1 + $0x2184] ss:$16 sps:$4 sm:$0xff]  }
 0x3f8   :  { %11856 = vmatprep.subr.bf16.mxu0 %v17206_v18  ;;  %13004 = vmatprep.subr.bf16.mxu1 %v17209_v28  ;;  %v17293_v18 = vld [vmem:[%s24185_s1 + $0x218c] ss:$16 sps:$4 sm:$0xff]   ;;  %v17288_v28 = vld [vmem:[%s24185_s1 + $0x2180] ss:$16 sps:$4 sm:$0xff]  }
 0x3fb   :  { %11857 = vmatpush1.bf16.msra.mxu0 %v17204_v14  ;;  %13005 = vmatpush1.bf16.msra.mxu1 %v17207_v30  ;;  %v17291_v14 = vld [vmem:[%s24185_s1 + $0x2188] ss:$16 sps:$4 sm:$0xff]   ;;  %v17296_v30 = vld [vmem:[%s24185_s1 + $0x21a4] ss:$16 sps:$4 sm:$0xff]  }
 0x3fc   :  { %11858 = vmatprep.subr.bf16.mxu0 %v17212_v19  ;;  %13006 = vmatprep.subr.bf16.mxu1 %v17215_v32  ;;  %v17299_v19 = vld [vmem:[%s24185_s1 + $0x21ac] ss:$16 sps:$4 sm:$0xff]   ;;  %v17294_v32 = vld [vmem:[%s24185_s1 + $0x21a0] ss:$16 sps:$4 sm:$0xff]  }
 0x3ff   :  { %11859 = vmatpush1.bf16.msra.mxu0 %v17210_v26  ;;  %13007 = vmatpush1.bf16.msra.mxu1 %v17213_v23  ;;  %v17297_v26 = vld [vmem:[%s24185_s1 + $0x21a8] ss:$16 sps:$4 sm:$0xff]   ;;  %v17302_v23 = vld [vmem:[%s24185_s1 + $0x21c4] ss:$16 sps:$4 sm:$0xff]  }
 0x400   :  { %11869 = vmatprep.subr.bf16.mxu0 %v17218_v36  ;;  %13017 = vmatprep.subr.bf16.mxu1 %v17221_v37  ;;  %v17305_v36 = vld [vmem:[%s24185_s1 + $0x21cc] ss:$16 sps:$4 sm:$0xff]   ;;  %v17300_v37 = vld [vmem:[%s24185_s1 + $0x21c0] ss:$16 sps:$4 sm:$0xff]  }
 0x402   :  { %11861 = vmatmul.mubr.bf16.vlgmr.msra.gmra.mrb[0].mxu0 %v2047_v31  ;;  %13009 = vmatmul.mubr.bf16.vlgmr.msra.gmra.mrb[0].mxu1 %v2047_v31  ;;  %v17308_v31 = vld [vmem:[%s24185_s1 + $0x21e4] ss:$16 sps:$4 sm:$0xff]  }
 0x403   :  { %11870 = vmatpush1.bf16.msra.mxu0 %v17216_v39  ;;  %13018 = vmatpush1.bf16.msra.mxu1 %v17219_v40  ;;  %v17311_v39 = vld [vmem:[%s24185_s1 + $0x21ec] ss:$16 sps:$4 sm:$0xff]   ;;  %v17306_v40 = vld [vmem:[%s24185_s1 + $0x21e0] ss:$16 sps:$4 sm:$0xff]  }
 0x404   :  { %11871 = vmatprep.subr.bf16.mxu0 %v17224_v41  ;;  %13019 = vmatprep.subr.bf16.mxu1 %v17227_v25  ;;  %v17309_v41 = vld [vmem:[%s24185_s1 + $0x21e8] ss:$16 sps:$4 sm:$0xff]   ;;  %v17314_v25 = vld [vmem:[%s24185_s1 + $0x2204] ss:$16 sps:$4 sm:$0xff]  }
 0x405   :  { %11901 = vmatprep.mubr.bf16.mxu0 %v21726_v34  ;;  %13049 = vmatprep.mubr.bf16.mxu1 %v21726_v34 }
 0x407   :  { %11872 = vmatpush1.bf16.msra.mxu0 %v17222_v43  ;;  %13020 = vmatpush1.bf16.msra.mxu1 %v17225_v45  ;;  %v17317_v43 = vld [vmem:[%s24185_s1 + $0x220c] ss:$16 sps:$4 sm:$0xff]   ;;  %v21912_v45 = vrot.slane %v21695_v33, %v18582_v49 }
 0x408   :  { %11873 = vmatprep.subr.bf16.mxu0 %v17230_v46  ;;  %13021 = vmatprep.subr.bf16.mxu1 %v17233_v35  ;;  %v17312_v46 = vld [vmem:[%s24185_s1 + $0x2200] ss:$16 sps:$4 sm:$0xff]   ;;  %v17315_v35 = vld [vmem:[%s24185_s1 + $0x2208] ss:$16 sps:$4 sm:$0xff]   ;;  %v17323_v33 = vld [vmem:[%s24185_s1 + $0x222c] ss:$16 sps:$4 sm:$0xff]  }
 0x40b   :  { %11874 = vmatpush1.bf16.msra.mxu0 %v17228_v50  ;;  %13022 = vmatpush1.bf16.msra.mxu1 %v17231_v51  ;;  %v17320_v50 = vld [vmem:[%s24185_s1 + $0x2224] ss:$16 sps:$4 sm:$0xff]   ;;  %v2097_v51 = vcombine.high %v21726_v34, %v21726_v34 }
 0x40c   :  { %11875 = vmatprep.subr.bf16.mxu0 %v17236_v53  ;;  %13023 = vmatprep.subr.bf16.mxu1 %v17239_v38  ;;  %v17318_v53 = vld [vmem:[%s24185_s1 + $0x2220] ss:$16 sps:$4 sm:$0xff]   ;;  %v17321_v38 = vld [vmem:[%s24185_s1 + $0x2228] ss:$16 sps:$4 sm:$0xff]   ;;  %v17326_v34 = vld [vmem:[%s24185_s1 + $0x2244] ss:$16 sps:$4 sm:$0xff]  }
 0x40f   :  { %11876 = vmatpush1.bf16.msra.mxu0 %v17234_v54  ;;  %13024 = vmatpush1.bf16.msra.mxu1 %v17237_v55  ;;  %v17329_v54 = vld [vmem:[%s24185_s1 + $0x224c] ss:$16 sps:$4 sm:$0xff]   ;;  %v17324_v55 = vld [vmem:[%s24185_s1 + $0x2240] ss:$16 sps:$4 sm:$0xff]  }
 0x410   :  { %11877 = vmatprep.subr.bf16.mxu0 %v17242_v56  ;;  %13025 = vmatprep.subr.bf16.mxu1 %v17245_v47  ;;  %v17327_v56 = vld [vmem:[%s24185_s1 + $0x2248] ss:$16 sps:$4 sm:$0xff]   ;;  %v17332_v47 = vld [vmem:[%s24185_s1 + $0x2264] ss:$16 sps:$4 sm:$0xff]  }
 0x413   :  { %11878 = vmatpush1.bf16.msra.mxu0 %v17240_v57  ;;  %13026 = vmatpush1.bf16.msra.mxu1 %v17243_v58  ;;  %v17335_v57 = vld [vmem:[%s24185_s1 + $0x226c] ss:$16 sps:$4 sm:$0xff]   ;;  %v17330_v58 = vld [vmem:[%s24185_s1 + $0x2260] ss:$16 sps:$4 sm:$0xff]  }
 0x414   :  { %11879 = vmatprep.subr.bf16.mxu0 %v17248_v48  ;;  %13027 = vmatprep.subr.bf16.mxu1 %v17251_v61  ;;  %v17333_v48 = vld [vmem:[%s24185_s1 + $0x2268] ss:$16 sps:$4 sm:$0xff]   ;;  %v17338_v61 = vld [vmem:[%s24185_s1 + $0x2284] ss:$16 sps:$4 sm:$0xff]  }
 0x417   :  { %11880 = vmatpush1.bf16.msra.mxu0 %v17246_v62  ;;  %13028 = vmatpush1.bf16.msra.mxu1 %v17249_v44  ;;  %v17341_v62 = vld [vmem:[%s24185_s1 + $0x228c] ss:$16 sps:$4 sm:$0xff]   ;;  %v17336_v44 = vld [vmem:[%s24185_s1 + $0x2280] ss:$16 sps:$4 sm:$0xff]  }
 0x418   :  { %11881 = vmatprep.subr.bf16.mxu0 %v17254_v0  ;;  %13029 = vmatprep.subr.bf16.mxu1 %v17257_v1  ;;  %v17339_v0 = vld [vmem:[%s24185_s1 + $0x2288] ss:$16 sps:$4 sm:$0xff]   ;;  %v17344_v1 = vld [vmem:[%s24185_s1 + $0x22a4] ss:$16 sps:$4 sm:$0xff]  }
 0x41b   :  { %11882 = vmatpush1.bf16.msra.mxu0 %v17252_v2  ;;  %13030 = vmatpush1.bf16.msra.mxu1 %v17255_v59  ;;  %v17347_v2 = vld [vmem:[%s24185_s1 + $0x22ac] ss:$16 sps:$4 sm:$0xff]   ;;  %v17342_v59 = vld [vmem:[%s24185_s1 + $0x22a0] ss:$16 sps:$4 sm:$0xff]  }
 0x41c   :  { %11883 = vmatprep.subr.bf16.mxu0 %v17260_v3  ;;  %13031 = vmatprep.subr.bf16.mxu1 %v17263_v5  ;;  %v17345_v3 = vld [vmem:[%s24185_s1 + $0x22a8] ss:$16 sps:$4 sm:$0xff]   ;;  %v17350_v5 = vld [vmem:[%s24185_s1 + $0x22c4] ss:$16 sps:$4 sm:$0xff]  }
 0x41f   :  { %11884 = vmatpush1.bf16.msra.mxu0 %v17258_v6  ;;  %13032 = vmatpush1.bf16.msra.mxu1 %v17261_v60  ;;  %v17353_v6 = vld [vmem:[%s24185_s1 + $0x22cc] ss:$16 sps:$4 sm:$0xff]   ;;  %v17348_v60 = vld [vmem:[%s24185_s1 + $0x22c0] ss:$16 sps:$4 sm:$0xff]  }
 0x420   :  { %11885 = vmatprep.subr.bf16.mxu0 %v17266_v9  ;;  %13033 = vmatprep.subr.bf16.mxu1 %v17269_v10  ;;  %v17351_v9 = vld [vmem:[%s24185_s1 + $0x22c8] ss:$16 sps:$4 sm:$0xff]   ;;  %v17356_v10 = vld [vmem:[%s24185_s1 + $0x22e4] ss:$16 sps:$4 sm:$0xff]  }
 0x423   :  { %11886 = vmatpush1.bf16.msra.mxu0 %v17264_v11  ;;  %13034 = vmatpush1.bf16.msra.mxu1 %v17267_v63  ;;  %v17359_v11 = vld [vmem:[%s24185_s1 + $0x22ec] ss:$16 sps:$4 sm:$0xff]   ;;  %v17354_v63 = vld [vmem:[%s24185_s1 + $0x22e0] ss:$16 sps:$4 sm:$0xff]  }
 0x424   :  { %11887 = vmatprep.subr.bf16.mxu0 %v17272_v12  ;;  %13035 = vmatprep.subr.bf16.mxu1 %v17275_v52  ;;  %v17357_v12 = vld [vmem:[%s24185_s1 + $0x22e8] ss:$16 sps:$4 sm:$0xff]   ;;  %v17362_v52 = vld [vmem:[%s24185_s1 + $0x2304] ss:$16 sps:$4 sm:$0xff]  }
 0x427   :  { %11888 = vmatpush1.bf16.msra.mxu0 %v17270_v15  ;;  %13036 = vmatpush1.bf16.msra.mxu1 %v17273_v7  ;;  %v17365_v15 = vld [vmem:[%s24185_s1 + $0x230c] ss:$16 sps:$4 sm:$0xff]   ;;  %v17360_v7 = vld [vmem:[%s24185_s1 + $0x2300] ss:$16 sps:$4 sm:$0xff]  }
 0x428   :  { %11889 = vmatprep.subr.bf16.mxu0 %v17278_v16  ;;  %13037 = vmatprep.subr.bf16.mxu1 %v17281_v17  ;;  %v17363_v16 = vld [vmem:[%s24185_s1 + $0x2308] ss:$16 sps:$4 sm:$0xff]   ;;  %v17368_v17 = vld [vmem:[%s24185_s1 + $0x2324] ss:$16 sps:$4 sm:$0xff]  }
 0x42b   :  { %11890 = vmatpush1.bf16.msra.mxu0 %v17276_v8  ;;  %13038 = vmatpush1.bf16.msra.mxu1 %v17279_v20  ;;  %v17371_v8 = vld [vmem:[%s24185_s1 + $0x232c] ss:$16 sps:$4 sm:$0xff]   ;;  %v17366_v20 = vld [vmem:[%s24185_s1 + $0x2320] ss:$16 sps:$4 sm:$0xff]  }
 0x42c   :  { %11891 = vmatprep.subr.bf16.mxu0 %v17284_v22  ;;  %13039 = vmatprep.subr.bf16.mxu1 %v17287_v4  ;;  %v17369_v22 = vld [vmem:[%s24185_s1 + $0x2328] ss:$16 sps:$4 sm:$0xff]   ;;  %v17374_v4 = vld [vmem:[%s24185_s1 + $0x2344] ss:$16 sps:$4 sm:$0xff]  }
 0x42f   :  { %11892 = vmatpush1.bf16.msra.mxu0 %v17282_v24  ;;  %13040 = vmatpush1.bf16.msra.mxu1 %v17285_v13  ;;  %v17377_v24 = vld [vmem:[%s24185_s1 + $0x234c] ss:$16 sps:$4 sm:$0xff]   ;;  %v17372_v13 = vld [vmem:[%s24185_s1 + $0x2340] ss:$16 sps:$4 sm:$0xff]  }
 0x430   :  { %11893 = vmatprep.subr.bf16.mxu0 %v17290_v27  ;;  %13041 = vmatprep.subr.bf16.mxu1 %v17293_v18  ;;  %v17375_v27 = vld [vmem:[%s24185_s1 + $0x2348] ss:$16 sps:$4 sm:$0xff]   ;;  %v17380_v18 = vld [vmem:[%s24185_s1 + $0x2364] ss:$16 sps:$4 sm:$0xff]  }
 0x433   :  { %11894 = vmatpush1.bf16.msra.mxu0 %v17288_v28  ;;  %13042 = vmatpush1.bf16.msra.mxu1 %v17291_v14  ;;  %v17383_v28 = vld [vmem:[%s24185_s1 + $0x236c] ss:$16 sps:$4 sm:$0xff]   ;;  %v17378_v14 = vld [vmem:[%s24185_s1 + $0x2360] ss:$16 sps:$4 sm:$0xff]  }
 0x434   :  { %11895 = vmatprep.subr.bf16.mxu0 %v17296_v30  ;;  %13043 = vmatprep.subr.bf16.mxu1 %v17299_v19  ;;  %v17381_v30 = vld [vmem:[%s24185_s1 + $0x2368] ss:$16 sps:$4 sm:$0xff]   ;;  %v17386_v19 = vld [vmem:[%s24185_s1 + $0x2384] ss:$16 sps:$4 sm:$0xff]  }
 0x437   :  { %11896 = vmatpush1.bf16.msra.mxu0 %v17294_v32  ;;  %13044 = vmatpush1.bf16.msra.mxu1 %v17297_v26  ;;  %v17389_v32 = vld [vmem:[%s24185_s1 + $0x238c] ss:$16 sps:$4 sm:$0xff]   ;;  %v17384_v26 = vld [vmem:[%s24185_s1 + $0x2380] ss:$16 sps:$4 sm:$0xff]  }
 0x438   :  { %11897 = vmatprep.subr.bf16.mxu0 %v17302_v23  ;;  %13045 = vmatprep.subr.bf16.mxu1 %v17305_v36  ;;  %v17387_v23 = vld [vmem:[%s24185_s1 + $0x2388] ss:$16 sps:$4 sm:$0xff]   ;;  %v17392_v36 = vld [vmem:[%s24185_s1 + $0x23a4] ss:$16 sps:$4 sm:$0xff]  }
 0x43b   :  { %11898 = vmatpush1.bf16.msra.mxu0 %v17300_v37  ;;  %13046 = vmatpush1.bf16.msra.mxu1 %v17303_v21  ;;  %v17395_v37 = vld [vmem:[%s24185_s1 + $0x23ac] ss:$16 sps:$4 sm:$0xff]   ;;  %v17390_v21 = vld [vmem:[%s24185_s1 + $0x23a0] ss:$16 sps:$4 sm:$0xff]  }
 0x43c   :  { %11899 = vmatprep.subr.bf16.mxu0 %v17308_v31  ;;  %13047 = vmatprep.subr.bf16.mxu1 %v17311_v39  ;;  %v17393_v31 = vld [vmem:[%s24185_s1 + $0x23a8] ss:$16 sps:$4 sm:$0xff]   ;;  %v17398_v39 = vld [vmem:[%s24185_s1 + $0x23c4] ss:$16 sps:$4 sm:$0xff]  }
 0x43f   :  { %11900 = vmatpush1.bf16.msra.mxu0 %v17306_v40  ;;  %13048 = vmatpush1.bf16.msra.mxu1 %v17309_v41  ;;  %v17401_v40 = vld [vmem:[%s24185_s1 + $0x23cc] ss:$16 sps:$4 sm:$0xff]   ;;  %v2050_v41 = vcombine.high %v21679_v29, %v21679_v29 }
 0x440   :  { %11910 = vmatprep.subr.bf16.mxu0 %v17314_v25  ;;  %13058 = vmatprep.subr.bf16.mxu1 %v17317_v43  ;;  %v17396_v25 = vld [vmem:[%s24185_s1 + $0x23c0] ss:$16 sps:$4 sm:$0xff]   ;;  %v17399_v43 = vld [vmem:[%s24185_s1 + $0x23c8] ss:$16 sps:$4 sm:$0xff]   ;;  %v17407_v29 = vld [vmem:[%s24185_s1 + $0x23ec] ss:$16 sps:$4 sm:$0xff]  }
 0x442   :  { %11902 = vmatmul.mubr.bf16.vlgmr.msra.gmra.mrb[0].mxu0 %v21912_v45  ;;  %13050 = vmatmul.mubr.bf16.vlgmr.msra.gmra.mrb[0].mxu1 %v21912_v45 }
 0x443   :  { %11911 = vmatpush1.bf16.msra.mxu0 %v17312_v46  ;;  %13059 = vmatpush1.bf16.msra.mxu1 %v17315_v35  ;;  %v17404_v46 = vld [vmem:[%s24185_s1 + $0x23e4] ss:$16 sps:$4 sm:$0xff]   ;;  %v22101_v35 = vrot.slane %v2050_v41, %v18582_v49  ;;  %v17483_v41 = vld [vmem:[%s24185_s1 + $0x2588] ss:$16 sps:$4 sm:$0xff]  }
 0x444   :  { %11912 = vmatprep.subr.bf16.mxu0 %v17320_v50  ;;  %13060 = vmatprep.subr.bf16.mxu1 %v17323_v33  ;;  %v17402_v50 = vld [vmem:[%s24185_s1 + $0x23e0] ss:$16 sps:$4 sm:$0xff]   ;;  %v17405_v33 = vld [vmem:[%s24185_s1 + $0x23e8] ss:$16 sps:$4 sm:$0xff]  }
 0x445   :  { %11942 = vmatprep.mubr.bf16.mxu0 %v2097_v51  ;;  %13090 = vmatprep.mubr.bf16.mxu1 %v2097_v51  ;;  %v17410_v51 = vld [vmem:[%s24185_s1 + $0x2404] ss:$16 sps:$4 sm:$0xff]  }
 0x447   :  { %11913 = vmatpush1.bf16.msra.mxu0 %v17318_v53  ;;  %13061 = vmatpush1.bf16.msra.mxu1 %v17321_v38  ;;  %v17413_v53 = vld [vmem:[%s24185_s1 + $0x240c] ss:$16 sps:$4 sm:$0xff]   ;;  %v2066_v38 = vcombine.high %v22101_v35, %v22101_v35 }
 0x448   :  { %11914 = vmatprep.subr.bf16.mxu0 %v17326_v34  ;;  %13062 = vmatprep.subr.bf16.mxu1 %v17329_v54  ;;  %v2095_v34 = vcombine.high %v21912_v45, %v21912_v45  ;;  %v17408_v54 = vld [vmem:[%s24185_s1 + $0x2400] ss:$16 sps:$4 sm:$0xff]   ;;  %v17419_v45 = vld [vmem:[%s24185_s1 + $0x242c] ss:$16 sps:$4 sm:$0xff]  }
 0x44b   :  { %11915 = vmatpush1.bf16.msra.mxu0 %v17324_v55  ;;  %13063 = vmatpush1.bf16.msra.mxu1 %v17327_v56  ;;  %v17411_v55 = vld [vmem:[%s24185_s1 + $0x2408] ss:$16 sps:$4 sm:$0xff]   ;;  %v17416_v56 = vld [vmem:[%s24185_s1 + $0x2424] ss:$16 sps:$4 sm:$0xff]  }
 0x44c   :  { %11916 = vmatprep.subr.bf16.mxu0 %v17332_v47  ;;  %13064 = vmatprep.subr.bf16.mxu1 %v17335_v57  ;;  %v22132_v47 = vrot.slane %v2066_v38, %v18582_v49  ;;  %v17414_v57 = vld [vmem:[%s24185_s1 + $0x2420] ss:$16 sps:$4 sm:$0xff]   ;;  %v17500_v38 = vld [vmem:[%s24185_s1 + $0x25e4] ss:$16 sps:$4 sm:$0xff]  }
 0x44f   :  { %11917 = vmatpush1.bf16.msra.mxu0 %v17330_v58  ;;  %13065 = vmatpush1.bf16.msra.mxu1 %v17333_v48  ;;  %v17417_v58 = vld [vmem:[%s24185_s1 + $0x2428] ss:$16 sps:$4 sm:$0xff]   ;;  %v17422_v48 = vld [vmem:[%s24185_s1 + $0x2444] ss:$16 sps:$4 sm:$0xff]  }
 0x450   :  { %11918 = vmatprep.subr.bf16.mxu0 %v17338_v61  ;;  %13066 = vmatprep.subr.bf16.mxu1 %v17341_v62  ;;  %v17425_v61 = vld [vmem:[%s24185_s1 + $0x244c] ss:$16 sps:$4 sm:$0xff]   ;;  %v17420_v62 = vld [vmem:[%s24185_s1 + $0x2440] ss:$16 sps:$4 sm:$0xff]  }
 0x453   :  { %11919 = vmatpush1.bf16.msra.mxu0 %v17336_v44  ;;  %13067 = vmatpush1.bf16.msra.mxu1 %v17339_v0  ;;  %v17423_v44 = vld [vmem:[%s24185_s1 + $0x2448] ss:$16 sps:$4 sm:$0xff]   ;;  %v17428_v0 = vld [vmem:[%s24185_s1 + $0x2464] ss:$16 sps:$4 sm:$0xff]  }
 0x454   :  { %11920 = vmatprep.subr.bf16.mxu0 %v17344_v1  ;;  %13068 = vmatprep.subr.bf16.mxu1 %v17347_v2  ;;  %v17431_v1 = vld [vmem:[%s24185_s1 + $0x246c] ss:$16 sps:$4 sm:$0xff]   ;;  %v17426_v2 = vld [vmem:[%s24185_s1 + $0x2460] ss:$16 sps:$4 sm:$0xff]  }
 0x457   :  { %11921 = vmatpush1.bf16.msra.mxu0 %v17342_v59  ;;  %13069 = vmatpush1.bf16.msra.mxu1 %v17345_v3  ;;  %v17429_v59 = vld [vmem:[%s24185_s1 + $0x2468] ss:$16 sps:$4 sm:$0xff]   ;;  %v17434_v3 = vld [vmem:[%s24185_s1 + $0x2484] ss:$16 sps:$4 sm:$0xff]  }
 0x458   :  { %11922 = vmatprep.subr.bf16.mxu0 %v17350_v5  ;;  %13070 = vmatprep.subr.bf16.mxu1 %v17353_v6  ;;  %v17437_v5 = vld [vmem:[%s24185_s1 + $0x248c] ss:$16 sps:$4 sm:$0xff]   ;;  %v17432_v6 = vld [vmem:[%s24185_s1 + $0x2480] ss:$16 sps:$4 sm:$0xff]  }
 0x45b   :  { %11923 = vmatpush1.bf16.msra.mxu0 %v17348_v60  ;;  %13071 = vmatpush1.bf16.msra.mxu1 %v17351_v9  ;;  %v17435_v60 = vld [vmem:[%s24185_s1 + $0x2488] ss:$16 sps:$4 sm:$0xff]   ;;  %v17440_v9 = vld [vmem:[%s24185_s1 + $0x24a4] ss:$16 sps:$4 sm:$0xff]  }
 0x45c   :  { %11924 = vmatprep.subr.bf16.mxu0 %v17356_v10  ;;  %13072 = vmatprep.subr.bf16.mxu1 %v17359_v11  ;;  %v17443_v10 = vld [vmem:[%s24185_s1 + $0x24ac] ss:$16 sps:$4 sm:$0xff]   ;;  %v17438_v11 = vld [vmem:[%s24185_s1 + $0x24a0] ss:$16 sps:$4 sm:$0xff]  }
 0x45f   :  { %11925 = vmatpush1.bf16.msra.mxu0 %v17354_v63  ;;  %13073 = vmatpush1.bf16.msra.mxu1 %v17357_v12  ;;  %v17441_v63 = vld [vmem:[%s24185_s1 + $0x24a8] ss:$16 sps:$4 sm:$0xff]   ;;  %v17446_v12 = vld [vmem:[%s24185_s1 + $0x24c4] ss:$16 sps:$4 sm:$0xff]  }
 0x460   :  { %11926 = vmatprep.subr.bf16.mxu0 %v17362_v52  ;;  %13074 = vmatprep.subr.bf16.mxu1 %v17365_v15  ;;  %v17449_v52 = vld [vmem:[%s24185_s1 + $0x24cc] ss:$16 sps:$4 sm:$0xff]   ;;  %v17444_v15 = vld [vmem:[%s24185_s1 + $0x24c0] ss:$16 sps:$4 sm:$0xff]  }
 0x463   :  { %11927 = vmatpush1.bf16.msra.mxu0 %v17360_v7  ;;  %13075 = vmatpush1.bf16.msra.mxu1 %v17363_v16  ;;  %v17447_v7 = vld [vmem:[%s24185_s1 + $0x24c8] ss:$16 sps:$4 sm:$0xff]   ;;  %v17452_v16 = vld [vmem:[%s24185_s1 + $0x24e4] ss:$16 sps:$4 sm:$0xff]  }
 0x464   :  { %11928 = vmatprep.subr.bf16.mxu0 %v17368_v17  ;;  %13076 = vmatprep.subr.bf16.mxu1 %v17371_v8  ;;  %v17455_v17 = vld [vmem:[%s24185_s1 + $0x24ec] ss:$16 sps:$4 sm:$0xff]   ;;  %v17450_v8 = vld [vmem:[%s24185_s1 + $0x24e0] ss:$16 sps:$4 sm:$0xff]  }
 0x467   :  { %11929 = vmatpush1.bf16.msra.mxu0 %v17366_v20  ;;  %13077 = vmatpush1.bf16.msra.mxu1 %v17369_v22  ;;  %v17453_v20 = vld [vmem:[%s24185_s1 + $0x24e8] ss:$16 sps:$4 sm:$0xff]   ;;  %v17458_v22 = vld [vmem:[%s24185_s1 + $0x2504] ss:$16 sps:$4 sm:$0xff]  }
 0x468   :  { %11930 = vmatprep.subr.bf16.mxu0 %v17374_v4  ;;  %13078 = vmatprep.subr.bf16.mxu1 %v17377_v24  ;;  %v17461_v4 = vld [vmem:[%s24185_s1 + $0x250c] ss:$16 sps:$4 sm:$0xff]   ;;  %v17456_v24 = vld [vmem:[%s24185_s1 + $0x2500] ss:$16 sps:$4 sm:$0xff]  }
 0x46b   :  { %11931 = vmatpush1.bf16.msra.mxu0 %v17372_v13  ;;  %13079 = vmatpush1.bf16.msra.mxu1 %v17375_v27  ;;  %v17459_v13 = vld [vmem:[%s24185_s1 + $0x2508] ss:$16 sps:$4 sm:$0xff]   ;;  %v17464_v27 = vld [vmem:[%s24185_s1 + $0x2524] ss:$16 sps:$4 sm:$0xff]  }
 0x46c   :  { %11932 = vmatprep.subr.bf16.mxu0 %v17380_v18  ;;  %13080 = vmatprep.subr.bf16.mxu1 %v17383_v28  ;;  %v17467_v18 = vld [vmem:[%s24185_s1 + $0x252c] ss:$16 sps:$4 sm:$0xff]   ;;  %v17462_v28 = vld [vmem:[%s24185_s1 + $0x2520] ss:$16 sps:$4 sm:$0xff]  }
 0x46f   :  { %11933 = vmatpush1.bf16.msra.mxu0 %v17378_v14  ;;  %13081 = vmatpush1.bf16.msra.mxu1 %v17381_v30  ;;  %v17465_v14 = vld [vmem:[%s24185_s1 + $0x2528] ss:$16 sps:$4 sm:$0xff]   ;;  %v17470_v30 = vld [vmem:[%s24185_s1 + $0x2544] ss:$16 sps:$4 sm:$0xff]  }
 0x470   :  { %11934 = vmatprep.subr.bf16.mxu0 %v17386_v19  ;;  %13082 = vmatprep.subr.bf16.mxu1 %v17389_v32  ;;  %v17473_v19 = vld [vmem:[%s24185_s1 + $0x254c] ss:$16 sps:$4 sm:$0xff]   ;;  %v17468_v32 = vld [vmem:[%s24185_s1 + $0x2540] ss:$16 sps:$4 sm:$0xff]  }
 0x473   :  { %11935 = vmatpush1.bf16.msra.mxu0 %v17384_v26  ;;  %13083 = vmatpush1.bf16.msra.mxu1 %v17387_v23  ;;  %v17471_v26 = vld [vmem:[%s24185_s1 + $0x2548] ss:$16 sps:$4 sm:$0xff]   ;;  %v17476_v23 = vld [vmem:[%s24185_s1 + $0x2564] ss:$16 sps:$4 sm:$0xff]  }
 0x474   :  { %11936 = vmatprep.subr.bf16.mxu0 %v17392_v36  ;;  %13084 = vmatprep.subr.bf16.mxu1 %v17395_v37  ;;  %v17479_v36 = vld [vmem:[%s24185_s1 + $0x256c] ss:$16 sps:$4 sm:$0xff]   ;;  %v17474_v37 = vld [vmem:[%s24185_s1 + $0x2560] ss:$16 sps:$4 sm:$0xff]  }
 0x477   :  { %11937 = vmatpush1.bf16.msra.mxu0 %v17390_v21  ;;  %13085 = vmatpush1.bf16.msra.mxu1 %v17393_v31  ;;  %v17477_v21 = vld [vmem:[%s24185_s1 + $0x2568] ss:$16 sps:$4 sm:$0xff]   ;;  %v17482_v31 = vld [vmem:[%s24185_s1 + $0x2584] ss:$16 sps:$4 sm:$0xff]  }
 0x478   :  { %11938 = vmatprep.subr.bf16.mxu0 %v17398_v39  ;;  %13086 = vmatprep.subr.bf16.mxu1 %v17401_v40  ;;  %v17485_v39 = vld [vmem:[%s24185_s1 + $0x258c] ss:$16 sps:$4 sm:$0xff]   ;;  %v17480_v40 = vld [vmem:[%s24185_s1 + $0x2580] ss:$16 sps:$4 sm:$0xff]  }
 0x47b   :  { %11939 = vmatpush1.bf16.msra.mxu0 %v17396_v25  ;;  %13087 = vmatpush1.bf16.msra.mxu1 %v17399_v43  ;;  %v17488_v25 = vld [vmem:[%s24185_s1 + $0x25a4] ss:$16 sps:$4 sm:$0xff]   ;;  %v17491_v43 = vld [vmem:[%s24185_s1 + $0x25ac] ss:$16 sps:$4 sm:$0xff]  }
 0x47c   :  { %11940 = vmatprep.subr.bf16.mxu0 %v17404_v46  ;;  %13088 = vmatprep.subr.bf16.mxu1 %v17407_v29  ;;  %v17486_v46 = vld [vmem:[%s24185_s1 + $0x25a0] ss:$16 sps:$4 sm:$0xff]   ;;  %v17489_v29 = vld [vmem:[%s24185_s1 + $0x25a8] ss:$16 sps:$4 sm:$0xff]  }
 0x47f   :  { %11941 = vmatpush1.bf16.msra.mxu0 %v17402_v50  ;;  %13089 = vmatpush1.bf16.msra.mxu1 %v17405_v33  ;;  %v17494_v50 = vld [vmem:[%s24185_s1 + $0x25c4] ss:$16 sps:$4 sm:$0xff]   ;;  %v17497_v33 = vld [vmem:[%s24185_s1 + $0x25cc] ss:$16 sps:$4 sm:$0xff]  }
 0x480   :  { %11951 = vmatprep.subr.bf16.mxu0 %v17410_v51  ;;  %13099 = vmatprep.subr.bf16.mxu1 %v17413_v53  ;;  %v17492_v51 = vld [vmem:[%s24185_s1 + $0x25c0] ss:$16 sps:$4 sm:$0xff]   ;;  %v17495_v53 = vld [vmem:[%s24185_s1 + $0x25c8] ss:$16 sps:$4 sm:$0xff]  }
 0x482   :  { %11943 = vmatmul.mubr.bf16.vlgmr.msra.gmra.mrb[0].mxu0 %v2095_v34  ;;  %13091 = vmatmul.mubr.bf16.vlgmr.msra.gmra.mrb[0].mxu1 %v2095_v34  ;;  %v17503_v34 = vld [vmem:[%s24185_s1 + $0x25ec] ss:$16 sps:$4 sm:$0xff]  }
 0x483   :  { %11952 = vmatpush1.bf16.msra.mxu0 %v17408_v54  ;;  %13100 = vmatpush1.bf16.msra.mxu1 %v17411_v55  ;;  %v17498_v54 = vld [vmem:[%s24185_s1 + $0x25e0] ss:$16 sps:$4 sm:$0xff]   ;;  %v17501_v55 = vld [vmem:[%s24185_s1 + $0x25e8] ss:$16 sps:$4 sm:$0xff]  }
 0x484   :  { %11953 = vmatprep.subr.bf16.mxu0 %v17416_v56  ;;  %13101 = vmatprep.subr.bf16.mxu1 %v17419_v45  ;;  %v17507_v56 = vld [vmem:[%s24185_s1 + $0x2604] ss:$16 sps:$4 sm:$0xff]   ;;  %v17510_v45 = vld [vmem:[%s24185_s1 + $0x260c] ss:$16 sps:$4 sm:$0xff]  }
 0x485   :  { %11983 = vmatprep.mubr.bf16.mxu0 %v22132_v47  ;;  %13131 = vmatprep.mubr.bf16.mxu1 %v22132_v47 }
 0x487   :  { %11954 = vmatpush1.bf16.msra.mxu0 %v17414_v57  ;;  %13102 = vmatpush1.bf16.msra.mxu1 %v17417_v58  ;;  %v22318_v57 = vrot.slane %v22101_v35, %v18582_v49  ;;  %v17505_v58 = vld [vmem:[%s24185_s1 + $0x2600] ss:$16 sps:$4 sm:$0xff]   ;;  %v17516_v35 = vld [vmem:[%s24185_s1 + $0x262c] ss:$16 sps:$4 sm:$0xff]  }
 0x488   :  { %11955 = vmatprep.subr.bf16.mxu0 %v17422_v48  ;;  %13103 = vmatprep.subr.bf16.mxu1 %v17425_v61  ;;  %v17508_v48 = vld [vmem:[%s24185_s1 + $0x2608] ss:$16 sps:$4 sm:$0xff]   ;;  %v17513_v61 = vld [vmem:[%s24185_s1 + $0x2624] ss:$16 sps:$4 sm:$0xff]  }
 0x48b   :  { %11956 = vmatpush1.bf16.msra.mxu0 %v17420_v62  ;;  %13104 = vmatpush1.bf16.msra.mxu1 %v17423_v44  ;;  %v2098_v62 = vcombine.high %v22132_v47, %v22132_v47  ;;  %v17511_v44 = vld [vmem:[%s24185_s1 + $0x2620] ss:$16 sps:$4 sm:$0xff]   ;;  %v17519_v47 = vld [vmem:[%s24185_s1 + $0x2644] ss:$16 sps:$4 sm:$0xff]  }
 0x48c   :  { %11957 = vmatprep.subr.bf16.mxu0 %v17428_v0  ;;  %13105 = vmatprep.subr.bf16.mxu1 %v17431_v1  ;;  %v17514_v0 = vld [vmem:[%s24185_s1 + $0x2628] ss:$16 sps:$4 sm:$0xff]   ;;  %v17522_v1 = vld [vmem:[%s24185_s1 + $0x264c] ss:$16 sps:$4 sm:$0xff]  }
 0x48f   :  { %11958 = vmatpush1.bf16.msra.mxu0 %v17426_v2  ;;  %13106 = vmatpush1.bf16.msra.mxu1 %v17429_v59  ;;  %v17517_v2 = vld [vmem:[%s24185_s1 + $0x2640] ss:$16 sps:$4 sm:$0xff]   ;;  %v17520_v59 = vld [vmem:[%s24185_s1 + $0x2648] ss:$16 sps:$4 sm:$0xff]  }
 0x490   :  { %11959 = vmatprep.subr.bf16.mxu0 %v17434_v3  ;;  %13107 = vmatprep.subr.bf16.mxu1 %v17437_v5  ;;  %v17525_v3 = vld [vmem:[%s24185_s1 + $0x2664] ss:$16 sps:$4 sm:$0xff]   ;;  %v17528_v5 = vld [vmem:[%s24185_s1 + $0x266c] ss:$16 sps:$4 sm:$0xff]  }
 0x493   :  { %11960 = vmatpush1.bf16.msra.mxu0 %v17432_v6  ;;  %13108 = vmatpush1.bf16.msra.mxu1 %v17435_v60  ;;  %v17523_v6 = vld [vmem:[%s24185_s1 + $0x2660] ss:$16 sps:$4 sm:$0xff]   ;;  %v17526_v60 = vld [vmem:[%s24185_s1 + $0x2668] ss:$16 sps:$4 sm:$0xff]  }
 0x494   :  { %11961 = vmatprep.subr.bf16.mxu0 %v17440_v9  ;;  %13109 = vmatprep.subr.bf16.mxu1 %v17443_v10  ;;  %v17531_v9 = vld [vmem:[%s24185_s1 + $0x2684] ss:$16 sps:$4 sm:$0xff]   ;;  %v17534_v10 = vld [vmem:[%s24185_s1 + $0x268c] ss:$16 sps:$4 sm:$0xff]  }
 0x497   :  { %11962 = vmatpush1.bf16.msra.mxu0 %v17438_v11  ;;  %13110 = vmatpush1.bf16.msra.mxu1 %v17441_v63  ;;  %v17529_v11 = vld [vmem:[%s24185_s1 + $0x2680] ss:$16 sps:$4 sm:$0xff]   ;;  %v17532_v63 = vld [vmem:[%s24185_s1 + $0x2688] ss:$16 sps:$4 sm:$0xff]  }
 0x498   :  { %11963 = vmatprep.subr.bf16.mxu0 %v17446_v12  ;;  %13111 = vmatprep.subr.bf16.mxu1 %v17449_v52  ;;  %v17537_v12 = vld [vmem:[%s24185_s1 + $0x26a4] ss:$16 sps:$4 sm:$0xff]   ;;  %v17540_v52 = vld [vmem:[%s24185_s1 + $0x26ac] ss:$16 sps:$4 sm:$0xff]  }
 0x49b   :  { %11964 = vmatpush1.bf16.msra.mxu0 %v17444_v15  ;;  %13112 = vmatpush1.bf16.msra.mxu1 %v17447_v7  ;;  %v17535_v15 = vld [vmem:[%s24185_s1 + $0x26a0] ss:$16 sps:$4 sm:$0xff]   ;;  %v17538_v7 = vld [vmem:[%s24185_s1 + $0x26a8] ss:$16 sps:$4 sm:$0xff]  }
 0x49c   :  { %11965 = vmatprep.subr.bf16.mxu0 %v17452_v16  ;;  %13113 = vmatprep.subr.bf16.mxu1 %v17455_v17  ;;  %v17543_v16 = vld [vmem:[%s24185_s1 + $0x26c4] ss:$16 sps:$4 sm:$0xff]   ;;  %v17546_v17 = vld [vmem:[%s24185_s1 + $0x26cc] ss:$16 sps:$4 sm:$0xff]  }
 0x49f   :  { %11966 = vmatpush1.bf16.msra.mxu0 %v17450_v8  ;;  %13114 = vmatpush1.bf16.msra.mxu1 %v17453_v20  ;;  %v17541_v8 = vld [vmem:[%s24185_s1 + $0x26c0] ss:$16 sps:$4 sm:$0xff]   ;;  %v17544_v20 = vld [vmem:[%s24185_s1 + $0x26c8] ss:$16 sps:$4 sm:$0xff]  }
 0x4a0   :  { %11967 = vmatprep.subr.bf16.mxu0 %v17458_v22  ;;  %13115 = vmatprep.subr.bf16.mxu1 %v17461_v4  ;;  %v17549_v22 = vld [vmem:[%s24185_s1 + $0x26e4] ss:$16 sps:$4 sm:$0xff]   ;;  %v17552_v4 = vld [vmem:[%s24185_s1 + $0x26ec] ss:$16 sps:$4 sm:$0xff]  }
 0x4a3   :  { %11968 = vmatpush1.bf16.msra.mxu0 %v17456_v24  ;;  %13116 = vmatpush1.bf16.msra.mxu1 %v17459_v13  ;;  %v17547_v24 = vld [vmem:[%s24185_s1 + $0x26e0] ss:$16 sps:$4 sm:$0xff]   ;;  %v17550_v13 = vld [vmem:[%s24185_s1 + $0x26e8] ss:$16 sps:$4 sm:$0xff]  }
 0x4a4   :  { %11969 = vmatprep.subr.bf16.mxu0 %v17464_v27  ;;  %13117 = vmatprep.subr.bf16.mxu1 %v17467_v18  ;;  %v17555_v27 = vld [vmem:[%s24185_s1 + $0x2704] ss:$16 sps:$4 sm:$0xff]   ;;  %v17558_v18 = vld [vmem:[%s24185_s1 + $0x270c] ss:$16 sps:$4 sm:$0xff]  }
 0x4a7   :  { %11970 = vmatpush1.bf16.msra.mxu0 %v17462_v28  ;;  %13118 = vmatpush1.bf16.msra.mxu1 %v17465_v14  ;;  %v17553_v28 = vld [vmem:[%s24185_s1 + $0x2700] ss:$16 sps:$4 sm:$0xff]   ;;  %v17556_v14 = vld [vmem:[%s24185_s1 + $0x2708] ss:$16 sps:$4 sm:$0xff]  }
 0x4a8   :  { %11971 = vmatprep.subr.bf16.mxu0 %v17470_v30  ;;  %13119 = vmatprep.subr.bf16.mxu1 %v17473_v19  ;;  %v17561_v30 = vld [vmem:[%s24185_s1 + $0x2724] ss:$16 sps:$4 sm:$0xff]   ;;  %v17564_v19 = vld [vmem:[%s24185_s1 + $0x272c] ss:$16 sps:$4 sm:$0xff]  }
 0x4ab   :  { %11972 = vmatpush1.bf16.msra.mxu0 %v17468_v32  ;;  %13120 = vmatpush1.bf16.msra.mxu1 %v17471_v26  ;;  %v17559_v32 = vld [vmem:[%s24185_s1 + $0x2720] ss:$16 sps:$4 sm:$0xff]   ;;  %v17562_v26 = vld [vmem:[%s24185_s1 + $0x2728] ss:$16 sps:$4 sm:$0xff]  }
 0x4ac   :  { %11973 = vmatprep.subr.bf16.mxu0 %v17476_v23  ;;  %13121 = vmatprep.subr.bf16.mxu1 %v17479_v36  ;;  %v17567_v23 = vld [vmem:[%s24185_s1 + $0x2744] ss:$16 sps:$4 sm:$0xff]   ;;  %v17570_v36 = vld [vmem:[%s24185_s1 + $0x274c] ss:$16 sps:$4 sm:$0xff]  }
 0x4af   :  { %11974 = vmatpush1.bf16.msra.mxu0 %v17474_v37  ;;  %13122 = vmatpush1.bf16.msra.mxu1 %v17477_v21  ;;  %v17565_v37 = vld [vmem:[%s24185_s1 + $0x2740] ss:$16 sps:$4 sm:$0xff]   ;;  %v17568_v21 = vld [vmem:[%s24185_s1 + $0x2748] ss:$16 sps:$4 sm:$0xff]  }
 0x4b0   :  { %11975 = vmatprep.subr.bf16.mxu0 %v17482_v31  ;;  %13123 = vmatprep.subr.bf16.mxu1 %v17485_v39  ;;  %v17573_v31 = vld [vmem:[%s24185_s1 + $0x2764] ss:$16 sps:$4 sm:$0xff]   ;;  %v17576_v39 = vld [vmem:[%s24185_s1 + $0x276c] ss:$16 sps:$4 sm:$0xff]  }
 0x4b3   :  { %11976 = vmatpush1.bf16.msra.mxu0 %v17480_v40  ;;  %13124 = vmatpush1.bf16.msra.mxu1 %v17483_v41  ;;  %v17571_v40 = vld [vmem:[%s24185_s1 + $0x2760] ss:$16 sps:$4 sm:$0xff]   ;;  %v17574_v41 = vld [vmem:[%s24185_s1 + $0x2768] ss:$16 sps:$4 sm:$0xff]  }
 0x4b4   :  { %11977 = vmatprep.subr.bf16.mxu0 %v17488_v25  ;;  %13125 = vmatprep.subr.bf16.mxu1 %v17491_v43  ;;  %v17579_v25 = vld [vmem:[%s24185_s1 + $0x2784] ss:$16 sps:$4 sm:$0xff]   ;;  %v17582_v43 = vld [vmem:[%s24185_s1 + $0x278c] ss:$16 sps:$4 sm:$0xff]  }
 0x4b7   :  { %11978 = vmatpush1.bf16.msra.mxu0 %v17486_v46  ;;  %13126 = vmatpush1.bf16.msra.mxu1 %v17489_v29  ;;  %v17577_v46 = vld [vmem:[%s24185_s1 + $0x2780] ss:$16 sps:$4 sm:$0xff]   ;;  %v17580_v29 = vld [vmem:[%s24185_s1 + $0x2788] ss:$16 sps:$4 sm:$0xff]  }
 0x4b8   :  { %11979 = vmatprep.subr.bf16.mxu0 %v17494_v50  ;;  %13127 = vmatprep.subr.bf16.mxu1 %v17497_v33  ;;  %v17585_v50 = vld [vmem:[%s24185_s1 + $0x27a4] ss:$16 sps:$4 sm:$0xff]   ;;  %v17588_v33 = vld [vmem:[%s24185_s1 + $0x27ac] ss:$16 sps:$4 sm:$0xff]  }
 0x4bb   :  { %11980 = vmatpush1.bf16.msra.mxu0 %v17492_v51  ;;  %13128 = vmatpush1.bf16.msra.mxu1 %v17495_v53  ;;  %v17583_v51 = vld [vmem:[%s24185_s1 + $0x27a0] ss:$16 sps:$4 sm:$0xff]   ;;  %v17586_v53 = vld [vmem:[%s24185_s1 + $0x27a8] ss:$16 sps:$4 sm:$0xff]  }
 0x4bc   :  { %11981 = vmatprep.subr.bf16.mxu0 %v17500_v38  ;;  %13129 = vmatprep.subr.bf16.mxu1 %v17503_v34  ;;  %v17591_v38 = vld [vmem:[%s24185_s1 + $0x27c4] ss:$16 sps:$4 sm:$0xff]   ;;  %v17594_v34 = vld [vmem:[%s24185_s1 + $0x27cc] ss:$16 sps:$4 sm:$0xff]  }
 0x4bf   :  { %11982 = vmatpush1.bf16.msra.mxu0 %v17498_v54  ;;  %13130 = vmatpush1.bf16.msra.mxu1 %v17501_v55  ;;  %v22495_v54 = vld [vmem:[%s24184_s0 + $0x28] sm:$0xff]  ;;  %v17589_v55 = vld [vmem:[%s24185_s1 + $0x27c0] ss:$16 sps:$4 sm:$0xff]  }
 0x4c0   :  { %11992 = vmatprep.subr.bf16.mxu0 %v17507_v56  ;;  %13140 = vmatprep.subr.bf16.mxu1 %v17510_v45  ;;  %v17592_v56 = vld [vmem:[%s24185_s1 + $0x27c8] ss:$16 sps:$4 sm:$0xff]   ;;  %v17597_v45 = vld [vmem:[%s24185_s1 + $0x27e4] ss:$16 sps:$4 sm:$0xff]  }
 0x4c2   :  { %11984 = vmatmul.mubr.bf16.vlgmr.msra.gmra.mrb[0].mxu0 %v22318_v57  ;;  %13132 = vmatmul.mubr.bf16.vlgmr.msra.gmra.mrb[0].mxu1 %v22318_v57 }
 0x4c3   :  { %11993 = vmatpush1.bf16.msra.mxu0 %v17505_v58  ;;  %13141 = vmatpush1.bf16.msra.mxu1 %v17508_v48  ;;  %v17600_v58 = vld [vmem:[%s24185_s1 + $0x27ec] ss:$16 sps:$4 sm:$0xff]   ;;  %v22511_v48 = vrot.slane %v22495_v54, %v18582_v49 }
 0x4c4   :  { %11994 = vmatprep.subr.bf16.mxu0 %v17513_v61  ;;  %13142 = vmatprep.subr.bf16.mxu1 %v17516_v35  ;;  %v17595_v61 = vld [vmem:[%s24185_s1 + $0x27e0] ss:$16 sps:$4 sm:$0xff]   ;;  %v17598_v35 = vld [vmem:[%s24185_s1 + $0x27e8] ss:$16 sps:$4 sm:$0xff]  }
 0x4c5   :  { %12024 = vmatprep.mubr.bf16.mxu0 %v2098_v62  ;;  %13172 = vmatprep.mubr.bf16.mxu1 %v2098_v62  ;;  %v17603_v62 = vld [vmem:[%s24185_s1 + $0x2804] ss:$16 sps:$4 sm:$0xff]  }
 0x4c7   :  { %11995 = vmatpush1.bf16.msra.mxu0 %v17511_v44  ;;  %13143 = vmatpush1.bf16.msra.mxu1 %v17514_v0  ;;  %v17606_v44 = vld [vmem:[%s24185_s1 + $0x280c] ss:$16 sps:$4 sm:$0xff]   ;;  %v2114_v0 = vcombine.high %v22511_v48, %v22511_v48 }
 0x4c8   :  { %11996 = vmatprep.subr.bf16.mxu0 %v17519_v47  ;;  %13144 = vmatprep.subr.bf16.mxu1 %v17522_v1  ;;  %v2096_v47 = vcombine.high %v22318_v57, %v22318_v57  ;;  %v17601_v1 = vld [vmem:[%s24185_s1 + $0x2800] ss:$16 sps:$4 sm:$0xff]   ;;  %v17612_v57 = vld [vmem:[%s24185_s1 + $0x282c] ss:$16 sps:$4 sm:$0xff]  }
 0x4cb   :  { %11997 = vmatpush1.bf16.msra.mxu0 %v17517_v2  ;;  %13145 = vmatpush1.bf16.msra.mxu1 %v17520_v59  ;;  %v17604_v2 = vld [vmem:[%s24185_s1 + $0x2808] ss:$16 sps:$4 sm:$0xff]   ;;  %v17609_v59 = vld [vmem:[%s24185_s1 + $0x2824] ss:$16 sps:$4 sm:$0xff]  }
 0x4cc   :  { %11998 = vmatprep.subr.bf16.mxu0 %v17525_v3  ;;  %13146 = vmatprep.subr.bf16.mxu1 %v17528_v5  ;;  %v22542_v3 = vrot.slane %v2114_v0, %v18582_v49  ;;  %v17607_v5 = vld [vmem:[%s24185_s1 + $0x2820] ss:$16 sps:$4 sm:$0xff]   ;;  %v17688_v0 = vld [vmem:[%s24185_s1 + $0x29c8] ss:$16 sps:$4 sm:$0xff]  }
 0x4cf   :  { %11999 = vmatpush1.bf16.msra.mxu0 %v17523_v6  ;;  %13147 = vmatpush1.bf16.msra.mxu1 %v17526_v60  ;;  %v17610_v6 = vld [vmem:[%s24185_s1 + $0x2828] ss:$16 sps:$4 sm:$0xff]   ;;  %v17615_v60 = vld [vmem:[%s24185_s1 + $0x2844] ss:$16 sps:$4 sm:$0xff]  }
 0x4d0   :  { %12000 = vmatprep.subr.bf16.mxu0 %v17531_v9  ;;  %13148 = vmatprep.subr.bf16.mxu1 %v17534_v10  ;;  %v17618_v9 = vld [vmem:[%s24185_s1 + $0x284c] ss:$16 sps:$4 sm:$0xff]   ;;  %v17613_v10 = vld [vmem:[%s24185_s1 + $0x2840] ss:$16 sps:$4 sm:$0xff]  }
 0x4d3   :  { %12001 = vmatpush1.bf16.msra.mxu0 %v17529_v11  ;;  %13149 = vmatpush1.bf16.msra.mxu1 %v17532_v63  ;;  %v17616_v11 = vld [vmem:[%s24185_s1 + $0x2848] ss:$16 sps:$4 sm:$0xff]   ;;  %v17621_v63 = vld [vmem:[%s24185_s1 + $0x2864] ss:$16 sps:$4 sm:$0xff]  }
 0x4d4   :  { %12002 = vmatprep.subr.bf16.mxu0 %v17537_v12  ;;  %13150 = vmatprep.subr.bf16.mxu1 %v17540_v52  ;;  %v17624_v12 = vld [vmem:[%s24185_s1 + $0x286c] ss:$16 sps:$4 sm:$0xff]   ;;  %v17619_v52 = vld [vmem:[%s24185_s1 + $0x2860] ss:$16 sps:$4 sm:$0xff]  }
 0x4d7   :  { %12003 = vmatpush1.bf16.msra.mxu0 %v17535_v15  ;;  %13151 = vmatpush1.bf16.msra.mxu1 %v17538_v7  ;;  %v17622_v15 = vld [vmem:[%s24185_s1 + $0x2868] ss:$16 sps:$4 sm:$0xff]   ;;  %v17627_v7 = vld [vmem:[%s24185_s1 + $0x2884] ss:$16 sps:$4 sm:$0xff]  }
 0x4d8   :  { %12004 = vmatprep.subr.bf16.mxu0 %v17543_v16  ;;  %13152 = vmatprep.subr.bf16.mxu1 %v17546_v17  ;;  %v17630_v16 = vld [vmem:[%s24185_s1 + $0x288c] ss:$16 sps:$4 sm:$0xff]   ;;  %v17625_v17 = vld [vmem:[%s24185_s1 + $0x2880] ss:$16 sps:$4 sm:$0xff]  }
 0x4db   :  { %12005 = vmatpush1.bf16.msra.mxu0 %v17541_v8  ;;  %13153 = vmatpush1.bf16.msra.mxu1 %v17544_v20  ;;  %v17628_v8 = vld [vmem:[%s24185_s1 + $0x2888] ss:$16 sps:$4 sm:$0xff]   ;;  %v17633_v20 = vld [vmem:[%s24185_s1 + $0x28a4] ss:$16 sps:$4 sm:$0xff]  }
 0x4dc   :  { %12006 = vmatprep.subr.bf16.mxu0 %v17549_v22  ;;  %13154 = vmatprep.subr.bf16.mxu1 %v17552_v4  ;;  %v17636_v22 = vld [vmem:[%s24185_s1 + $0x28ac] ss:$16 sps:$4 sm:$0xff]   ;;  %v17631_v4 = vld [vmem:[%s24185_s1 + $0x28a0] ss:$16 sps:$4 sm:$0xff]  }
 0x4df   :  { %12007 = vmatpush1.bf16.msra.mxu0 %v17547_v24  ;;  %13155 = vmatpush1.bf16.msra.mxu1 %v17550_v13  ;;  %v17634_v24 = vld [vmem:[%s24185_s1 + $0x28a8] ss:$16 sps:$4 sm:$0xff]   ;;  %v17639_v13 = vld [vmem:[%s24185_s1 + $0x28c4] ss:$16 sps:$4 sm:$0xff]  }
 0x4e0   :  { %12008 = vmatprep.subr.bf16.mxu0 %v17555_v27  ;;  %13156 = vmatprep.subr.bf16.mxu1 %v17558_v18  ;;  %v17642_v27 = vld [vmem:[%s24185_s1 + $0x28cc] ss:$16 sps:$4 sm:$0xff]   ;;  %v17637_v18 = vld [vmem:[%s24185_s1 + $0x28c0] ss:$16 sps:$4 sm:$0xff]  }
 0x4e3   :  { %12009 = vmatpush1.bf16.msra.mxu0 %v17553_v28  ;;  %13157 = vmatpush1.bf16.msra.mxu1 %v17556_v14  ;;  %v17640_v28 = vld [vmem:[%s24185_s1 + $0x28c8] ss:$16 sps:$4 sm:$0xff]   ;;  %v17645_v14 = vld [vmem:[%s24185_s1 + $0x28e4] ss:$16 sps:$4 sm:$0xff]  }
 0x4e4   :  { %12010 = vmatprep.subr.bf16.mxu0 %v17561_v30  ;;  %13158 = vmatprep.subr.bf16.mxu1 %v17564_v19  ;;  %v17648_v30 = vld [vmem:[%s24185_s1 + $0x28ec] ss:$16 sps:$4 sm:$0xff]   ;;  %v17643_v19 = vld [vmem:[%s24185_s1 + $0x28e0] ss:$16 sps:$4 sm:$0xff]  }
 0x4e7   :  { %12011 = vmatpush1.bf16.msra.mxu0 %v17559_v32  ;;  %13159 = vmatpush1.bf16.msra.mxu1 %v17562_v26  ;;  %v17646_v32 = vld [vmem:[%s24185_s1 + $0x28e8] ss:$16 sps:$4 sm:$0xff]   ;;  %v17651_v26 = vld [vmem:[%s24185_s1 + $0x2904] ss:$16 sps:$4 sm:$0xff]  }
 0x4e8   :  { %12012 = vmatprep.subr.bf16.mxu0 %v17567_v23  ;;  %13160 = vmatprep.subr.bf16.mxu1 %v17570_v36  ;;  %v17654_v23 = vld [vmem:[%s24185_s1 + $0x290c] ss:$16 sps:$4 sm:$0xff]   ;;  %v17649_v36 = vld [vmem:[%s24185_s1 + $0x2900] ss:$16 sps:$4 sm:$0xff]  }
 0x4eb   :  { %12013 = vmatpush1.bf16.msra.mxu0 %v17565_v37  ;;  %13161 = vmatpush1.bf16.msra.mxu1 %v17568_v21  ;;  %v17652_v37 = vld [vmem:[%s24185_s1 + $0x2908] ss:$16 sps:$4 sm:$0xff]   ;;  %v17657_v21 = vld [vmem:[%s24185_s1 + $0x2924] ss:$16 sps:$4 sm:$0xff]  }
 0x4ec   :  { %12014 = vmatprep.subr.bf16.mxu0 %v17573_v31  ;;  %13162 = vmatprep.subr.bf16.mxu1 %v17576_v39  ;;  %v17660_v31 = vld [vmem:[%s24185_s1 + $0x292c] ss:$16 sps:$4 sm:$0xff]   ;;  %v17655_v39 = vld [vmem:[%s24185_s1 + $0x2920] ss:$16 sps:$4 sm:$0xff]  }
 0x4ef   :  { %12015 = vmatpush1.bf16.msra.mxu0 %v17571_v40  ;;  %13163 = vmatpush1.bf16.msra.mxu1 %v17574_v41  ;;  %v17658_v40 = vld [vmem:[%s24185_s1 + $0x2928] ss:$16 sps:$4 sm:$0xff]   ;;  %v17663_v41 = vld [vmem:[%s24185_s1 + $0x2944] ss:$16 sps:$4 sm:$0xff]  }
 0x4f0   :  { %12016 = vmatprep.subr.bf16.mxu0 %v17579_v25  ;;  %13164 = vmatprep.subr.bf16.mxu1 %v17582_v43  ;;  %v17666_v25 = vld [vmem:[%s24185_s1 + $0x294c] ss:$16 sps:$4 sm:$0xff]   ;;  %v17661_v43 = vld [vmem:[%s24185_s1 + $0x2940] ss:$16 sps:$4 sm:$0xff]  }
 0x4f3   :  { %12017 = vmatpush1.bf16.msra.mxu0 %v17577_v46  ;;  %13165 = vmatpush1.bf16.msra.mxu1 %v17580_v29  ;;  %v17664_v46 = vld [vmem:[%s24185_s1 + $0x2948] ss:$16 sps:$4 sm:$0xff]   ;;  %v17669_v29 = vld [vmem:[%s24185_s1 + $0x2964] ss:$16 sps:$4 sm:$0xff]  }
 0x4f4   :  { %12018 = vmatprep.subr.bf16.mxu0 %v17585_v50  ;;  %13166 = vmatprep.subr.bf16.mxu1 %v17588_v33  ;;  %v17672_v50 = vld [vmem:[%s24185_s1 + $0x296c] ss:$16 sps:$4 sm:$0xff]   ;;  %v17667_v33 = vld [vmem:[%s24185_s1 + $0x2960] ss:$16 sps:$4 sm:$0xff]  }
 0x4f7   :  { %12019 = vmatpush1.bf16.msra.mxu0 %v17583_v51  ;;  %13167 = vmatpush1.bf16.msra.mxu1 %v17586_v53  ;;  %v17670_v51 = vld [vmem:[%s24185_s1 + $0x2968] ss:$16 sps:$4 sm:$0xff]   ;;  %v17675_v53 = vld [vmem:[%s24185_s1 + $0x2984] ss:$16 sps:$4 sm:$0xff]  }
 0x4f8   :  { %12020 = vmatprep.subr.bf16.mxu0 %v17591_v38  ;;  %13168 = vmatprep.subr.bf16.mxu1 %v17594_v34  ;;  %v17678_v38 = vld [vmem:[%s24185_s1 + $0x298c] ss:$16 sps:$4 sm:$0xff]   ;;  %v17673_v34 = vld [vmem:[%s24185_s1 + $0x2980] ss:$16 sps:$4 sm:$0xff]  }
 0x4fb   :  { %12021 = vmatpush1.bf16.msra.mxu0 %v17589_v55  ;;  %13169 = vmatpush1.bf16.msra.mxu1 %v17592_v56  ;;  %v17676_v55 = vld [vmem:[%s24185_s1 + $0x2988] ss:$16 sps:$4 sm:$0xff]   ;;  %v17681_v56 = vld [vmem:[%s24185_s1 + $0x29a4] ss:$16 sps:$4 sm:$0xff]  }
 0x4fc   :  { %12022 = vmatprep.subr.bf16.mxu0 %v17597_v45  ;;  %13170 = vmatprep.subr.bf16.mxu1 %v17600_v58  ;;  %v17684_v45 = vld [vmem:[%s24185_s1 + $0x29ac] ss:$16 sps:$4 sm:$0xff]   ;;  %v17679_v58 = vld [vmem:[%s24185_s1 + $0x29a0] ss:$16 sps:$4 sm:$0xff]  }
 0x4ff   :  { %12023 = vmatpush1.bf16.msra.mxu0 %v17595_v61  ;;  %13171 = vmatpush1.bf16.msra.mxu1 %v17598_v35  ;;  %v17682_v61 = vld [vmem:[%s24185_s1 + $0x29a8] ss:$16 sps:$4 sm:$0xff]   ;;  %v17687_v35 = vld [vmem:[%s24185_s1 + $0x29c4] ss:$16 sps:$4 sm:$0xff]  }
 0x500   :  { %12033 = vmatprep.subr.bf16.mxu0 %v17603_v62  ;;  %13181 = vmatprep.subr.bf16.mxu1 %v17606_v44  ;;  %v17690_v62 = vld [vmem:[%s24185_s1 + $0x29cc] ss:$16 sps:$4 sm:$0xff]   ;;  %v17685_v44 = vld [vmem:[%s24185_s1 + $0x29c0] ss:$16 sps:$4 sm:$0xff]  }
 0x502   :  { %12025 = vmatmul.mubr.bf16.vlgmr.msra.gmra.mrb[0].mxu0 %v2096_v47  ;;  %13173 = vmatmul.mubr.bf16.vlgmr.msra.gmra.mrb[0].mxu1 %v2096_v47  ;;  %v17693_v47 = vld [vmem:[%s24185_s1 + $0x29e4] ss:$16 sps:$4 sm:$0xff]  }
 0x503   :  { %12034 = vmatpush1.bf16.msra.mxu0 %v17601_v1  ;;  %13182 = vmatpush1.bf16.msra.mxu1 %v17604_v2  ;;  %v17696_v1 = vld [vmem:[%s24185_s1 + $0x29ec] ss:$16 sps:$4 sm:$0xff]   ;;  %v17691_v2 = vld [vmem:[%s24185_s1 + $0x29e0] ss:$16 sps:$4 sm:$0xff]  }
 0x504   :  { %12035 = vmatprep.subr.bf16.mxu0 %v17609_v59  ;;  %13183 = vmatprep.subr.bf16.mxu1 %v17612_v57  ;;  %v17694_v59 = vld [vmem:[%s24185_s1 + $0x29e8] ss:$16 sps:$4 sm:$0xff]   ;;  %v17699_v57 = vld [vmem:[%s24185_s1 + $0x2a04] ss:$16 sps:$4 sm:$0xff]  }
 0x505   :  { %12065 = vmatprep.mubr.bf16.mxu0 %v22542_v3  ;;  %13213 = vmatprep.mubr.bf16.mxu1 %v22542_v3 }
 0x507   :  { %12036 = vmatpush1.bf16.msra.mxu0 %v17607_v5  ;;  %13184 = vmatpush1.bf16.msra.mxu1 %v17610_v6  ;;  %v17702_v5 = vld [vmem:[%s24185_s1 + $0x2a0c] ss:$16 sps:$4 sm:$0xff]   ;;  %v22728_v6 = vrot.slane %v22511_v48, %v18582_v49 }
 0x508   :  { %12037 = vmatprep.subr.bf16.mxu0 %v17615_v60  ;;  %13185 = vmatprep.subr.bf16.mxu1 %v17618_v9  ;;  %v17697_v60 = vld [vmem:[%s24185_s1 + $0x2a00] ss:$16 sps:$4 sm:$0xff]   ;;  %v17700_v9 = vld [vmem:[%s24185_s1 + $0x2a08] ss:$16 sps:$4 sm:$0xff]   ;;  %v17708_v48 = vld [vmem:[%s24185_s1 + $0x2a2c] ss:$16 sps:$4 sm:$0xff]  }
 0x50b   :  { %12038 = vmatpush1.bf16.msra.mxu0 %v17613_v10  ;;  %13186 = vmatpush1.bf16.msra.mxu1 %v17616_v11  ;;  %v17705_v10 = vld [vmem:[%s24185_s1 + $0x2a24] ss:$16 sps:$4 sm:$0xff]   ;;  %v2146_v11 = vcombine.high %v22542_v3, %v22542_v3 }
 0x50c   :  { %12039 = vmatprep.subr.bf16.mxu0 %v17621_v63  ;;  %13187 = vmatprep.subr.bf16.mxu1 %v17624_v12  ;;  %v17703_v63 = vld [vmem:[%s24185_s1 + $0x2a20] ss:$16 sps:$4 sm:$0xff]   ;;  %v17706_v12 = vld [vmem:[%s24185_s1 + $0x2a28] ss:$16 sps:$4 sm:$0xff]   ;;  %v17711_v3 = vld [vmem:[%s24185_s1 + $0x2a44] ss:$16 sps:$4 sm:$0xff]  }
 0x50f   :  { %12040 = vmatpush1.bf16.msra.mxu0 %v17619_v52  ;;  %13188 = vmatpush1.bf16.msra.mxu1 %v17622_v15  ;;  %v17714_v52 = vld [vmem:[%s24185_s1 + $0x2a4c] ss:$16 sps:$4 sm:$0xff]   ;;  %v17709_v15 = vld [vmem:[%s24185_s1 + $0x2a40] ss:$16 sps:$4 sm:$0xff]  }
 0x510   :  { %12041 = vmatprep.subr.bf16.mxu0 %v17627_v7  ;;  %13189 = vmatprep.subr.bf16.mxu1 %v17630_v16  ;;  %v17712_v7 = vld [vmem:[%s24185_s1 + $0x2a48] ss:$16 sps:$4 sm:$0xff]   ;;  %v17717_v16 = vld [vmem:[%s24185_s1 + $0x2a64] ss:$16 sps:$4 sm:$0xff]  }
 0x513   :  { %12042 = vmatpush1.bf16.msra.mxu0 %v17625_v17  ;;  %13190 = vmatpush1.bf16.msra.mxu1 %v17628_v8  ;;  %v17720_v17 = vld [vmem:[%s24185_s1 + $0x2a6c] ss:$16 sps:$4 sm:$0xff]   ;;  %v17715_v8 = vld [vmem:[%s24185_s1 + $0x2a60] ss:$16 sps:$4 sm:$0xff]  }
 0x514   :  { %12043 = vmatprep.subr.bf16.mxu0 %v17633_v20  ;;  %13191 = vmatprep.subr.bf16.mxu1 %v17636_v22  ;;  %v17718_v20 = vld [vmem:[%s24185_s1 + $0x2a68] ss:$16 sps:$4 sm:$0xff]   ;;  %v17723_v22 = vld [vmem:[%s24185_s1 + $0x2a84] ss:$16 sps:$4 sm:$0xff]  }
 0x517   :  { %12044 = vmatpush1.bf16.msra.mxu0 %v17631_v4  ;;  %13192 = vmatpush1.bf16.msra.mxu1 %v17634_v24  ;;  %v17726_v4 = vld [vmem:[%s24185_s1 + $0x2a8c] ss:$16 sps:$4 sm:$0xff]   ;;  %v17721_v24 = vld [vmem:[%s24185_s1 + $0x2a80] ss:$16 sps:$4 sm:$0xff]  }
 0x518   :  { %12045 = vmatprep.subr.bf16.mxu0 %v17639_v13  ;;  %13193 = vmatprep.subr.bf16.mxu1 %v17642_v27  ;;  %v17724_v13 = vld [vmem:[%s24185_s1 + $0x2a88] ss:$16 sps:$4 sm:$0xff]   ;;  %v17729_v27 = vld [vmem:[%s24185_s1 + $0x2aa4] ss:$16 sps:$4 sm:$0xff]  }
 0x51b   :  { %12046 = vmatpush1.bf16.msra.mxu0 %v17637_v18  ;;  %13194 = vmatpush1.bf16.msra.mxu1 %v17640_v28  ;;  %v17732_v18 = vld [vmem:[%s24185_s1 + $0x2aac] ss:$16 sps:$4 sm:$0xff]   ;;  %v17727_v28 = vld [vmem:[%s24185_s1 + $0x2aa0] ss:$16 sps:$4 sm:$0xff]  }
 0x51c   :  { %12047 = vmatprep.subr.bf16.mxu0 %v17645_v14  ;;  %13195 = vmatprep.subr.bf16.mxu1 %v17648_v30  ;;  %v17730_v14 = vld [vmem:[%s24185_s1 + $0x2aa8] ss:$16 sps:$4 sm:$0xff]   ;;  %v17735_v30 = vld [vmem:[%s24185_s1 + $0x2ac4] ss:$16 sps:$4 sm:$0xff]  }
 0x51f   :  { %12048 = vmatpush1.bf16.msra.mxu0 %v17643_v19  ;;  %13196 = vmatpush1.bf16.msra.mxu1 %v17646_v32  ;;  %v17738_v19 = vld [vmem:[%s24185_s1 + $0x2acc] ss:$16 sps:$4 sm:$0xff]   ;;  %v17733_v32 = vld [vmem:[%s24185_s1 + $0x2ac0] ss:$16 sps:$4 sm:$0xff]  }
 0x520   :  { %12049 = vmatprep.subr.bf16.mxu0 %v17651_v26  ;;  %13197 = vmatprep.subr.bf16.mxu1 %v17654_v23  ;;  %v17736_v26 = vld [vmem:[%s24185_s1 + $0x2ac8] ss:$16 sps:$4 sm:$0xff]   ;;  %v17741_v23 = vld [vmem:[%s24185_s1 + $0x2ae4] ss:$16 sps:$4 sm:$0xff]  }
 0x523   :  { %12050 = vmatpush1.bf16.msra.mxu0 %v17649_v36  ;;  %13198 = vmatpush1.bf16.msra.mxu1 %v17652_v37  ;;  %v17744_v36 = vld [vmem:[%s24185_s1 + $0x2aec] ss:$16 sps:$4 sm:$0xff]   ;;  %v17739_v37 = vld [vmem:[%s24185_s1 + $0x2ae0] ss:$16 sps:$4 sm:$0xff]  }
 0x524   :  { %12051 = vmatprep.subr.bf16.mxu0 %v17657_v21  ;;  %13199 = vmatprep.subr.bf16.mxu1 %v17660_v31  ;;  %v17742_v21 = vld [vmem:[%s24185_s1 + $0x2ae8] ss:$16 sps:$4 sm:$0xff]   ;;  %v17747_v31 = vld [vmem:[%s24185_s1 + $0x2b04] ss:$16 sps:$4 sm:$0xff]  }
 0x527   :  { %12052 = vmatpush1.bf16.msra.mxu0 %v17655_v39  ;;  %13200 = vmatpush1.bf16.msra.mxu1 %v17658_v40  ;;  %v17750_v39 = vld [vmem:[%s24185_s1 + $0x2b0c] ss:$16 sps:$4 sm:$0xff]   ;;  %v17745_v40 = vld [vmem:[%s24185_s1 + $0x2b00] ss:$16 sps:$4 sm:$0xff]  }
 0x528   :  { %12053 = vmatprep.subr.bf16.mxu0 %v17663_v41  ;;  %13201 = vmatprep.subr.bf16.mxu1 %v17666_v25  ;;  %v17748_v41 = vld [vmem:[%s24185_s1 + $0x2b08] ss:$16 sps:$4 sm:$0xff]   ;;  %v17753_v25 = vld [vmem:[%s24185_s1 + $0x2b24] ss:$16 sps:$4 sm:$0xff]  }
 0x52b   :  { %12054 = vmatpush1.bf16.msra.mxu0 %v17661_v43  ;;  %13202 = vmatpush1.bf16.msra.mxu1 %v17664_v46  ;;  %v17756_v43 = vld [vmem:[%s24185_s1 + $0x2b2c] ss:$16 sps:$4 sm:$0xff]   ;;  %v17751_v46 = vld [vmem:[%s24185_s1 + $0x2b20] ss:$16 sps:$4 sm:$0xff]  }
 0x52c   :  { %12055 = vmatprep.subr.bf16.mxu0 %v17669_v29  ;;  %13203 = vmatprep.subr.bf16.mxu1 %v17672_v50  ;;  %v17754_v29 = vld [vmem:[%s24185_s1 + $0x2b28] ss:$16 sps:$4 sm:$0xff]   ;;  %v17759_v50 = vld [vmem:[%s24185_s1 + $0x2b44] ss:$16 sps:$4 sm:$0xff]  }
 0x52f   :  { %12056 = vmatpush1.bf16.msra.mxu0 %v17667_v33  ;;  %13204 = vmatpush1.bf16.msra.mxu1 %v17670_v51  ;;  %v17762_v33 = vld [vmem:[%s24185_s1 + $0x2b4c] ss:$16 sps:$4 sm:$0xff]   ;;  %v17757_v51 = vld [vmem:[%s24185_s1 + $0x2b40] ss:$16 sps:$4 sm:$0xff]  }
 0x530   :  { %12057 = vmatprep.subr.bf16.mxu0 %v17675_v53  ;;  %13205 = vmatprep.subr.bf16.mxu1 %v17678_v38  ;;  %v17760_v53 = vld [vmem:[%s24185_s1 + $0x2b48] ss:$16 sps:$4 sm:$0xff]   ;;  %v17765_v38 = vld [vmem:[%s24185_s1 + $0x2b64] ss:$16 sps:$4 sm:$0xff]  }
 0x533   :  { %12058 = vmatpush1.bf16.msra.mxu0 %v17673_v34  ;;  %13206 = vmatpush1.bf16.msra.mxu1 %v17676_v55  ;;  %v17768_v34 = vld [vmem:[%s24185_s1 + $0x2b6c] ss:$16 sps:$4 sm:$0xff]   ;;  %v17763_v55 = vld [vmem:[%s24185_s1 + $0x2b60] ss:$16 sps:$4 sm:$0xff]  }
 0x534   :  { %12059 = vmatprep.subr.bf16.mxu0 %v17681_v56  ;;  %13207 = vmatprep.subr.bf16.mxu1 %v17684_v45  ;;  %v17766_v56 = vld [vmem:[%s24185_s1 + $0x2b68] ss:$16 sps:$4 sm:$0xff]   ;;  %v17771_v45 = vld [vmem:[%s24185_s1 + $0x2b84] ss:$16 sps:$4 sm:$0xff]  }
 0x537   :  { %12060 = vmatpush1.bf16.msra.mxu0 %v17679_v58  ;;  %13208 = vmatpush1.bf16.msra.mxu1 %v17682_v61  ;;  %v17774_v58 = vld [vmem:[%s24185_s1 + $0x2b8c] ss:$16 sps:$4 sm:$0xff]   ;;  %v17769_v61 = vld [vmem:[%s24185_s1 + $0x2b80] ss:$16 sps:$4 sm:$0xff]  }
 0x538   :  { %12061 = vmatprep.subr.bf16.mxu0 %v17687_v35  ;;  %13209 = vmatprep.subr.bf16.mxu1 %v17690_v62  ;;  %v17772_v35 = vld [vmem:[%s24185_s1 + $0x2b88] ss:$16 sps:$4 sm:$0xff]   ;;  %v17777_v62 = vld [vmem:[%s24185_s1 + $0x2ba4] ss:$16 sps:$4 sm:$0xff]  }
 0x53b   :  { %12062 = vmatpush1.bf16.msra.mxu0 %v17685_v44  ;;  %13210 = vmatpush1.bf16.msra.mxu1 %v17688_v0  ;;  %v17780_v44 = vld [vmem:[%s24185_s1 + $0x2bac] ss:$16 sps:$4 sm:$0xff]   ;;  %v17775_v0 = vld [vmem:[%s24185_s1 + $0x2ba0] ss:$16 sps:$4 sm:$0xff]  }
 0x53c   :  { %12063 = vmatprep.subr.bf16.mxu0 %v17693_v47  ;;  %13211 = vmatprep.subr.bf16.mxu1 %v17696_v1  ;;  %v17778_v47 = vld [vmem:[%s24185_s1 + $0x2ba8] ss:$16 sps:$4 sm:$0xff]   ;;  %v17783_v1 = vld [vmem:[%s24185_s1 + $0x2bc4] ss:$16 sps:$4 sm:$0xff]  }
 0x53f   :  { %12064 = vmatpush1.bf16.msra.mxu0 %v17691_v2  ;;  %13212 = vmatpush1.bf16.msra.mxu1 %v17694_v59  ;;  %v17786_v2 = vld [vmem:[%s24185_s1 + $0x2bcc] ss:$16 sps:$4 sm:$0xff]   ;;  %v2099_v59 = vcombine.high %v22495_v54, %v22495_v54 }
 0x540   :  { %12074 = vmatprep.subr.bf16.mxu0 %v17699_v57  ;;  %13222 = vmatprep.subr.bf16.mxu1 %v17702_v5  ;;  %v17781_v57 = vld [vmem:[%s24185_s1 + $0x2bc0] ss:$16 sps:$4 sm:$0xff]   ;;  %v17784_v5 = vld [vmem:[%s24185_s1 + $0x2bc8] ss:$16 sps:$4 sm:$0xff]   ;;  %v17792_v54 = vld [vmem:[%s24185_s1 + $0x2bec] ss:$16 sps:$4 sm:$0xff]  }
 0x542   :  { %12066 = vmatmul.mubr.bf16.vlgmr.msra.gmra.mrb[0].mxu0 %v22728_v6  ;;  %13214 = vmatmul.mubr.bf16.vlgmr.msra.gmra.mrb[0].mxu1 %v22728_v6 }
 0x543   :  { %12075 = vmatpush1.bf16.msra.mxu0 %v17697_v60  ;;  %13223 = vmatpush1.bf16.msra.mxu1 %v17700_v9  ;;  %v17789_v60 = vld [vmem:[%s24185_s1 + $0x2be4] ss:$16 sps:$4 sm:$0xff]   ;;  %v22917_v9 = vrot.slane %v2099_v59, %v18582_v49  ;;  %v17868_v59 = vld [vmem:[%s24185_s1 + $0x2d88] ss:$16 sps:$4 sm:$0xff]  }
 0x544   :  { %12076 = vmatprep.subr.bf16.mxu0 %v17705_v10  ;;  %13224 = vmatprep.subr.bf16.mxu1 %v17708_v48  ;;  %v17787_v10 = vld [vmem:[%s24185_s1 + $0x2be0] ss:$16 sps:$4 sm:$0xff]   ;;  %v17790_v48 = vld [vmem:[%s24185_s1 + $0x2be8] ss:$16 sps:$4 sm:$0xff]  }
 0x545   :  { %12106 = vmatprep.mubr.bf16.mxu0 %v2146_v11  ;;  %13254 = vmatprep.mubr.bf16.mxu1 %v2146_v11  ;;  %v17795_v11 = vld [vmem:[%s24185_s1 + $0x2c04] ss:$16 sps:$4 sm:$0xff]  }
 0x547   :  { %12077 = vmatpush1.bf16.msra.mxu0 %v17703_v63  ;;  %13225 = vmatpush1.bf16.msra.mxu1 %v17706_v12  ;;  %v17798_v63 = vld [vmem:[%s24185_s1 + $0x2c0c] ss:$16 sps:$4 sm:$0xff]   ;;  %v2115_v12 = vcombine.high %v22917_v9, %v22917_v9 }
 0x548   :  { %12078 = vmatprep.subr.bf16.mxu0 %v17711_v3  ;;  %13226 = vmatprep.subr.bf16.mxu1 %v17714_v52  ;;  %v2144_v3 = vcombine.high %v22728_v6, %v22728_v6  ;;  %v17793_v52 = vld [vmem:[%s24185_s1 + $0x2c00] ss:$16 sps:$4 sm:$0xff]   ;;  %v17804_v6 = vld [vmem:[%s24185_s1 + $0x2c2c] ss:$16 sps:$4 sm:$0xff]  }
 0x54b   :  { %12079 = vmatpush1.bf16.msra.mxu0 %v17709_v15  ;;  %13227 = vmatpush1.bf16.msra.mxu1 %v17712_v7  ;;  %v17796_v15 = vld [vmem:[%s24185_s1 + $0x2c08] ss:$16 sps:$4 sm:$0xff]   ;;  %v17801_v7 = vld [vmem:[%s24185_s1 + $0x2c24] ss:$16 sps:$4 sm:$0xff]  }
 0x54c   :  { %12080 = vmatprep.subr.bf16.mxu0 %v17717_v16  ;;  %13228 = vmatprep.subr.bf16.mxu1 %v17720_v17  ;;  %v22948_v16 = vrot.slane %v2115_v12, %v18582_v49  ;;  %v17799_v17 = vld [vmem:[%s24185_s1 + $0x2c20] ss:$16 sps:$4 sm:$0xff]   ;;  %v17885_v12 = vld [vmem:[%s24185_s1 + $0x2de4] ss:$16 sps:$4 sm:$0xff]  }
 0x54f   :  { %12081 = vmatpush1.bf16.msra.mxu0 %v17715_v8  ;;  %13229 = vmatpush1.bf16.msra.mxu1 %v17718_v20  ;;  %v17802_v8 = vld [vmem:[%s24185_s1 + $0x2c28] ss:$16 sps:$4 sm:$0xff]   ;;  %v17807_v20 = vld [vmem:[%s24185_s1 + $0x2c44] ss:$16 sps:$4 sm:$0xff]  }
 0x550   :  { %12082 = vmatprep.subr.bf16.mxu0 %v17723_v22  ;;  %13230 = vmatprep.subr.bf16.mxu1 %v17726_v4  ;;  %v17810_v22 = vld [vmem:[%s24185_s1 + $0x2c4c] ss:$16 sps:$4 sm:$0xff]   ;;  %v17805_v4 = vld [vmem:[%s24185_s1 + $0x2c40] ss:$16 sps:$4 sm:$0xff]  }
 0x553   :  { %12083 = vmatpush1.bf16.msra.mxu0 %v17721_v24  ;;  %13231 = vmatpush1.bf16.msra.mxu1 %v17724_v13  ;;  %v17808_v24 = vld [vmem:[%s24185_s1 + $0x2c48] ss:$16 sps:$4 sm:$0xff]   ;;  %v17813_v13 = vld [vmem:[%s24185_s1 + $0x2c64] ss:$16 sps:$4 sm:$0xff]  }
 0x554   :  { %12084 = vmatprep.subr.bf16.mxu0 %v17729_v27  ;;  %13232 = vmatprep.subr.bf16.mxu1 %v17732_v18  ;;  %v17816_v27 = vld [vmem:[%s24185_s1 + $0x2c6c] ss:$16 sps:$4 sm:$0xff]   ;;  %v17811_v18 = vld [vmem:[%s24185_s1 + $0x2c60] ss:$16 sps:$4 sm:$0xff]  }
 0x557   :  { %12085 = vmatpush1.bf16.msra.mxu0 %v17727_v28  ;;  %13233 = vmatpush1.bf16.msra.mxu1 %v17730_v14  ;;  %v17814_v28 = vld [vmem:[%s24185_s1 + $0x2c68] ss:$16 sps:$4 sm:$0xff]   ;;  %v17819_v14 = vld [vmem:[%s24185_s1 + $0x2c84] ss:$16 sps:$4 sm:$0xff]  }
 0x558   :  { %12086 = vmatprep.subr.bf16.mxu0 %v17735_v30  ;;  %13234 = vmatprep.subr.bf16.mxu1 %v17738_v19  ;;  %v17822_v30 = vld [vmem:[%s24185_s1 + $0x2c8c] ss:$16 sps:$4 sm:$0xff]   ;;  %v17817_v19 = vld [vmem:[%s24185_s1 + $0x2c80] ss:$16 sps:$4 sm:$0xff]  }
 0x55b   :  { %12087 = vmatpush1.bf16.msra.mxu0 %v17733_v32  ;;  %13235 = vmatpush1.bf16.msra.mxu1 %v17736_v26  ;;  %v17820_v32 = vld [vmem:[%s24185_s1 + $0x2c88] ss:$16 sps:$4 sm:$0xff]   ;;  %v17825_v26 = vld [vmem:[%s24185_s1 + $0x2ca4] ss:$16 sps:$4 sm:$0xff]  }
 0x55c   :  { %12088 = vmatprep.subr.bf16.mxu0 %v17741_v23  ;;  %13236 = vmatprep.subr.bf16.mxu1 %v17744_v36  ;;  %v17828_v23 = vld [vmem:[%s24185_s1 + $0x2cac] ss:$16 sps:$4 sm:$0xff]   ;;  %v17823_v36 = vld [vmem:[%s24185_s1 + $0x2ca0] ss:$16 sps:$4 sm:$0xff]  }
 0x55f   :  { %12089 = vmatpush1.bf16.msra.mxu0 %v17739_v37  ;;  %13237 = vmatpush1.bf16.msra.mxu1 %v17742_v21  ;;  %v17826_v37 = vld [vmem:[%s24185_s1 + $0x2ca8] ss:$16 sps:$4 sm:$0xff]   ;;  %v17831_v21 = vld [vmem:[%s24185_s1 + $0x2cc4] ss:$16 sps:$4 sm:$0xff]  }
 0x560   :  { %12090 = vmatprep.subr.bf16.mxu0 %v17747_v31  ;;  %13238 = vmatprep.subr.bf16.mxu1 %v17750_v39  ;;  %v17834_v31 = vld [vmem:[%s24185_s1 + $0x2ccc] ss:$16 sps:$4 sm:$0xff]   ;;  %v17829_v39 = vld [vmem:[%s24185_s1 + $0x2cc0] ss:$16 sps:$4 sm:$0xff]  }
 0x563   :  { %12091 = vmatpush1.bf16.msra.mxu0 %v17745_v40  ;;  %13239 = vmatpush1.bf16.msra.mxu1 %v17748_v41  ;;  %v17832_v40 = vld [vmem:[%s24185_s1 + $0x2cc8] ss:$16 sps:$4 sm:$0xff]   ;;  %v17837_v41 = vld [vmem:[%s24185_s1 + $0x2ce4] ss:$16 sps:$4 sm:$0xff]  }
 0x564   :  { %12092 = vmatprep.subr.bf16.mxu0 %v17753_v25  ;;  %13240 = vmatprep.subr.bf16.mxu1 %v17756_v43  ;;  %v17840_v25 = vld [vmem:[%s24185_s1 + $0x2cec] ss:$16 sps:$4 sm:$0xff]   ;;  %v17835_v43 = vld [vmem:[%s24185_s1 + $0x2ce0] ss:$16 sps:$4 sm:$0xff]  }
 0x567   :  { %12093 = vmatpush1.bf16.msra.mxu0 %v17751_v46  ;;  %13241 = vmatpush1.bf16.msra.mxu1 %v17754_v29  ;;  %v17838_v46 = vld [vmem:[%s24185_s1 + $0x2ce8] ss:$16 sps:$4 sm:$0xff]   ;;  %v17843_v29 = vld [vmem:[%s24185_s1 + $0x2d04] ss:$16 sps:$4 sm:$0xff]  }
 0x568   :  { %12094 = vmatprep.subr.bf16.mxu0 %v17759_v50  ;;  %13242 = vmatprep.subr.bf16.mxu1 %v17762_v33  ;;  %v17846_v50 = vld [vmem:[%s24185_s1 + $0x2d0c] ss:$16 sps:$4 sm:$0xff]   ;;  %v17841_v33 = vld [vmem:[%s24185_s1 + $0x2d00] ss:$16 sps:$4 sm:$0xff]  }
 0x56b   :  { %12095 = vmatpush1.bf16.msra.mxu0 %v17757_v51  ;;  %13243 = vmatpush1.bf16.msra.mxu1 %v17760_v53  ;;  %v17844_v51 = vld [vmem:[%s24185_s1 + $0x2d08] ss:$16 sps:$4 sm:$0xff]   ;;  %v17849_v53 = vld [vmem:[%s24185_s1 + $0x2d24] ss:$16 sps:$4 sm:$0xff]  }
 0x56c   :  { %12096 = vmatprep.subr.bf16.mxu0 %v17765_v38  ;;  %13244 = vmatprep.subr.bf16.mxu1 %v17768_v34  ;;  %v17852_v38 = vld [vmem:[%s24185_s1 + $0x2d2c] ss:$16 sps:$4 sm:$0xff]   ;;  %v17847_v34 = vld [vmem:[%s24185_s1 + $0x2d20] ss:$16 sps:$4 sm:$0xff]  }
 0x56f   :  { %12097 = vmatpush1.bf16.msra.mxu0 %v17763_v55  ;;  %13245 = vmatpush1.bf16.msra.mxu1 %v17766_v56  ;;  %v17850_v55 = vld [vmem:[%s24185_s1 + $0x2d28] ss:$16 sps:$4 sm:$0xff]   ;;  %v17855_v56 = vld [vmem:[%s24185_s1 + $0x2d44] ss:$16 sps:$4 sm:$0xff]  }
 0x570   :  { %12098 = vmatprep.subr.bf16.mxu0 %v17771_v45  ;;  %13246 = vmatprep.subr.bf16.mxu1 %v17774_v58  ;;  %v17858_v45 = vld [vmem:[%s24185_s1 + $0x2d4c] ss:$16 sps:$4 sm:$0xff]   ;;  %v17853_v58 = vld [vmem:[%s24185_s1 + $0x2d40] ss:$16 sps:$4 sm:$0xff]  }
 0x573   :  { %12099 = vmatpush1.bf16.msra.mxu0 %v17769_v61  ;;  %13247 = vmatpush1.bf16.msra.mxu1 %v17772_v35  ;;  %v17856_v61 = vld [vmem:[%s24185_s1 + $0x2d48] ss:$16 sps:$4 sm:$0xff]   ;;  %v17861_v35 = vld [vmem:[%s24185_s1 + $0x2d64] ss:$16 sps:$4 sm:$0xff]  }
 0x574   :  { %12100 = vmatprep.subr.bf16.mxu0 %v17777_v62  ;;  %13248 = vmatprep.subr.bf16.mxu1 %v17780_v44  ;;  %v17864_v62 = vld [vmem:[%s24185_s1 + $0x2d6c] ss:$16 sps:$4 sm:$0xff]   ;;  %v17859_v44 = vld [vmem:[%s24185_s1 + $0x2d60] ss:$16 sps:$4 sm:$0xff]  }
 0x577   :  { %12101 = vmatpush1.bf16.msra.mxu0 %v17775_v0  ;;  %13249 = vmatpush1.bf16.msra.mxu1 %v17778_v47  ;;  %v17862_v0 = vld [vmem:[%s24185_s1 + $0x2d68] ss:$16 sps:$4 sm:$0xff]   ;;  %v17867_v47 = vld [vmem:[%s24185_s1 + $0x2d84] ss:$16 sps:$4 sm:$0xff]  }
 0x578   :  { %12102 = vmatprep.subr.bf16.mxu0 %v17783_v1  ;;  %13250 = vmatprep.subr.bf16.mxu1 %v17786_v2  ;;  %v17870_v1 = vld [vmem:[%s24185_s1 + $0x2d8c] ss:$16 sps:$4 sm:$0xff]   ;;  %v17865_v2 = vld [vmem:[%s24185_s1 + $0x2d80] ss:$16 sps:$4 sm:$0xff]  }
 0x57b   :  { %12103 = vmatpush1.bf16.msra.mxu0 %v17781_v57  ;;  %13251 = vmatpush1.bf16.msra.mxu1 %v17784_v5  ;;  %v17873_v57 = vld [vmem:[%s24185_s1 + $0x2da4] ss:$16 sps:$4 sm:$0xff]   ;;  %v17876_v5 = vld [vmem:[%s24185_s1 + $0x2dac] ss:$16 sps:$4 sm:$0xff]  }
 0x57c   :  { %12104 = vmatprep.subr.bf16.mxu0 %v17789_v60  ;;  %13252 = vmatprep.subr.bf16.mxu1 %v17792_v54  ;;  %v17871_v60 = vld [vmem:[%s24185_s1 + $0x2da0] ss:$16 sps:$4 sm:$0xff]   ;;  %v17874_v54 = vld [vmem:[%s24185_s1 + $0x2da8] ss:$16 sps:$4 sm:$0xff]  }
 0x57f   :  { %12105 = vmatpush1.bf16.msra.mxu0 %v17787_v10  ;;  %13253 = vmatpush1.bf16.msra.mxu1 %v17790_v48  ;;  %v17879_v10 = vld [vmem:[%s24185_s1 + $0x2dc4] ss:$16 sps:$4 sm:$0xff]   ;;  %v17882_v48 = vld [vmem:[%s24185_s1 + $0x2dcc] ss:$16 sps:$4 sm:$0xff]  }
 0x580   :  { %12115 = vmatprep.subr.bf16.mxu0 %v17795_v11  ;;  %13263 = vmatprep.subr.bf16.mxu1 %v17798_v63  ;;  %v17877_v11 = vld [vmem:[%s24185_s1 + $0x2dc0] ss:$16 sps:$4 sm:$0xff]   ;;  %v17880_v63 = vld [vmem:[%s24185_s1 + $0x2dc8] ss:$16 sps:$4 sm:$0xff]  }
 0x582   :  { %12107 = vmatmul.mubr.bf16.vlgmr.msra.gmra.mrb[0].mxu0 %v2144_v3  ;;  %13255 = vmatmul.mubr.bf16.vlgmr.msra.gmra.mrb[0].mxu1 %v2144_v3  ;;  %v17888_v3 = vld [vmem:[%s24185_s1 + $0x2dec] ss:$16 sps:$4 sm:$0xff]  }
 0x583   :  { %12116 = vmatpush1.bf16.msra.mxu0 %v17793_v52  ;;  %13264 = vmatpush1.bf16.msra.mxu1 %v17796_v15  ;;  %v17883_v52 = vld [vmem:[%s24185_s1 + $0x2de0] ss:$16 sps:$4 sm:$0xff]   ;;  %v17886_v15 = vld [vmem:[%s24185_s1 + $0x2de8] ss:$16 sps:$4 sm:$0xff]  }
 0x584   :  { %12117 = vmatprep.subr.bf16.mxu0 %v17801_v7  ;;  %13265 = vmatprep.subr.bf16.mxu1 %v17804_v6  ;;  %v17892_v7 = vld [vmem:[%s24185_s1 + $0x2e04] ss:$16 sps:$4 sm:$0xff]   ;;  %v17895_v6 = vld [vmem:[%s24185_s1 + $0x2e0c] ss:$16 sps:$4 sm:$0xff]  }
 0x585   :  { %12147 = vmatprep.mubr.bf16.mxu0 %v22948_v16  ;;  %13295 = vmatprep.mubr.bf16.mxu1 %v22948_v16 }
 0x587   :  { %12118 = vmatpush1.bf16.msra.mxu0 %v17799_v17  ;;  %13266 = vmatpush1.bf16.msra.mxu1 %v17802_v8  ;;  %v23134_v17 = vrot.slane %v22917_v9, %v18582_v49  ;;  %v17890_v8 = vld [vmem:[%s24185_s1 + $0x2e00] ss:$16 sps:$4 sm:$0xff]   ;;  %v17901_v9 = vld [vmem:[%s24185_s1 + $0x2e2c] ss:$16 sps:$4 sm:$0xff]  }
 0x588   :  { %12119 = vmatprep.subr.bf16.mxu0 %v17807_v20  ;;  %13267 = vmatprep.subr.bf16.mxu1 %v17810_v22  ;;  %v17893_v20 = vld [vmem:[%s24185_s1 + $0x2e08] ss:$16 sps:$4 sm:$0xff]   ;;  %v17898_v22 = vld [vmem:[%s24185_s1 + $0x2e24] ss:$16 sps:$4 sm:$0xff]  }
 0x58b   :  { %12120 = vmatpush1.bf16.msra.mxu0 %v17805_v4  ;;  %13268 = vmatpush1.bf16.msra.mxu1 %v17808_v24  ;;  %v2147_v4 = vcombine.high %v22948_v16, %v22948_v16  ;;  %v17896_v24 = vld [vmem:[%s24185_s1 + $0x2e20] ss:$16 sps:$4 sm:$0xff]   ;;  %v17904_v16 = vld [vmem:[%s24185_s1 + $0x2e44] ss:$16 sps:$4 sm:$0xff]  }
 0x58c   :  { %12121 = vmatprep.subr.bf16.mxu0 %v17813_v13  ;;  %13269 = vmatprep.subr.bf16.mxu1 %v17816_v27  ;;  %v17899_v13 = vld [vmem:[%s24185_s1 + $0x2e28] ss:$16 sps:$4 sm:$0xff]   ;;  %v17907_v27 = vld [vmem:[%s24185_s1 + $0x2e4c] ss:$16 sps:$4 sm:$0xff]  }
 0x58f   :  { %12122 = vmatpush1.bf16.msra.mxu0 %v17811_v18  ;;  %13270 = vmatpush1.bf16.msra.mxu1 %v17814_v28  ;;  %v17902_v18 = vld [vmem:[%s24185_s1 + $0x2e40] ss:$16 sps:$4 sm:$0xff]   ;;  %v17905_v28 = vld [vmem:[%s24185_s1 + $0x2e48] ss:$16 sps:$4 sm:$0xff]  }
 0x590   :  { %12123 = vmatprep.subr.bf16.mxu0 %v17819_v14  ;;  %13271 = vmatprep.subr.bf16.mxu1 %v17822_v30  ;;  %v17910_v14 = vld [vmem:[%s24185_s1 + $0x2e64] ss:$16 sps:$4 sm:$0xff]   ;;  %v17913_v30 = vld [vmem:[%s24185_s1 + $0x2e6c] ss:$16 sps:$4 sm:$0xff]  }
 0x593   :  { %12124 = vmatpush1.bf16.msra.mxu0 %v17817_v19  ;;  %13272 = vmatpush1.bf16.msra.mxu1 %v17820_v32  ;;  %v17908_v19 = vld [vmem:[%s24185_s1 + $0x2e60] ss:$16 sps:$4 sm:$0xff]   ;;  %v17911_v32 = vld [vmem:[%s24185_s1 + $0x2e68] ss:$16 sps:$4 sm:$0xff]  }
 0x594   :  { %12125 = vmatprep.subr.bf16.mxu0 %v17825_v26  ;;  %13273 = vmatprep.subr.bf16.mxu1 %v17828_v23  ;;  %v17916_v26 = vld [vmem:[%s24185_s1 + $0x2e84] ss:$16 sps:$4 sm:$0xff]   ;;  %v17919_v23 = vld [vmem:[%s24185_s1 + $0x2e8c] ss:$16 sps:$4 sm:$0xff]  }
 0x597   :  { %12126 = vmatpush1.bf16.msra.mxu0 %v17823_v36  ;;  %13274 = vmatpush1.bf16.msra.mxu1 %v17826_v37  ;;  %v17914_v36 = vld [vmem:[%s24185_s1 + $0x2e80] ss:$16 sps:$4 sm:$0xff]   ;;  %v17917_v37 = vld [vmem:[%s24185_s1 + $0x2e88] ss:$16 sps:$4 sm:$0xff]  }
 0x598   :  { %12127 = vmatprep.subr.bf16.mxu0 %v17831_v21  ;;  %13275 = vmatprep.subr.bf16.mxu1 %v17834_v31  ;;  %v17922_v21 = vld [vmem:[%s24185_s1 + $0x2ea4] ss:$16 sps:$4 sm:$0xff]   ;;  %v17925_v31 = vld [vmem:[%s24185_s1 + $0x2eac] ss:$16 sps:$4 sm:$0xff]  }
 0x59b   :  { %12128 = vmatpush1.bf16.msra.mxu0 %v17829_v39  ;;  %13276 = vmatpush1.bf16.msra.mxu1 %v17832_v40  ;;  %v17920_v39 = vld [vmem:[%s24185_s1 + $0x2ea0] ss:$16 sps:$4 sm:$0xff]   ;;  %v17923_v40 = vld [vmem:[%s24185_s1 + $0x2ea8] ss:$16 sps:$4 sm:$0xff]  }
 0x59c   :  { %12129 = vmatprep.subr.bf16.mxu0 %v17837_v41  ;;  %13277 = vmatprep.subr.bf16.mxu1 %v17840_v25  ;;  %v17928_v41 = vld [vmem:[%s24185_s1 + $0x2ec4] ss:$16 sps:$4 sm:$0xff]   ;;  %v17931_v25 = vld [vmem:[%s24185_s1 + $0x2ecc] ss:$16 sps:$4 sm:$0xff]  }
 0x59f   :  { %12130 = vmatpush1.bf16.msra.mxu0 %v17835_v43  ;;  %13278 = vmatpush1.bf16.msra.mxu1 %v17838_v46  ;;  %v17926_v43 = vld [vmem:[%s24185_s1 + $0x2ec0] ss:$16 sps:$4 sm:$0xff]   ;;  %v17929_v46 = vld [vmem:[%s24185_s1 + $0x2ec8] ss:$16 sps:$4 sm:$0xff]  }
 0x5a0   :  { %12131 = vmatprep.subr.bf16.mxu0 %v17843_v29  ;;  %13279 = vmatprep.subr.bf16.mxu1 %v17846_v50  ;;  %v17934_v29 = vld [vmem:[%s24185_s1 + $0x2ee4] ss:$16 sps:$4 sm:$0xff]   ;;  %v17937_v50 = vld [vmem:[%s24185_s1 + $0x2eec] ss:$16 sps:$4 sm:$0xff]  }
 0x5a3   :  { %12132 = vmatpush1.bf16.msra.mxu0 %v17841_v33  ;;  %13280 = vmatpush1.bf16.msra.mxu1 %v17844_v51  ;;  %v17932_v33 = vld [vmem:[%s24185_s1 + $0x2ee0] ss:$16 sps:$4 sm:$0xff]   ;;  %v17935_v51 = vld [vmem:[%s24185_s1 + $0x2ee8] ss:$16 sps:$4 sm:$0xff]  }
 0x5a4   :  { %12133 = vmatprep.subr.bf16.mxu0 %v17849_v53  ;;  %13281 = vmatprep.subr.bf16.mxu1 %v17852_v38  ;;  %v17940_v53 = vld [vmem:[%s24185_s1 + $0x2f04] ss:$16 sps:$4 sm:$0xff]   ;;  %v17943_v38 = vld [vmem:[%s24185_s1 + $0x2f0c] ss:$16 sps:$4 sm:$0xff]  }
 0x5a7   :  { %12134 = vmatpush1.bf16.msra.mxu0 %v17847_v34  ;;  %13282 = vmatpush1.bf16.msra.mxu1 %v17850_v55  ;;  %v17938_v34 = vld [vmem:[%s24185_s1 + $0x2f00] ss:$16 sps:$4 sm:$0xff]   ;;  %v17941_v55 = vld [vmem:[%s24185_s1 + $0x2f08] ss:$16 sps:$4 sm:$0xff]  }
 0x5a8   :  { %12135 = vmatprep.subr.bf16.mxu0 %v17855_v56  ;;  %13283 = vmatprep.subr.bf16.mxu1 %v17858_v45  ;;  %v17946_v56 = vld [vmem:[%s24185_s1 + $0x2f24] ss:$16 sps:$4 sm:$0xff]   ;;  %v17949_v45 = vld [vmem:[%s24185_s1 + $0x2f2c] ss:$16 sps:$4 sm:$0xff]  }
 0x5ab   :  { %12136 = vmatpush1.bf16.msra.mxu0 %v17853_v58  ;;  %13284 = vmatpush1.bf16.msra.mxu1 %v17856_v61  ;;  %v17944_v58 = vld [vmem:[%s24185_s1 + $0x2f20] ss:$16 sps:$4 sm:$0xff]   ;;  %v17947_v61 = vld [vmem:[%s24185_s1 + $0x2f28] ss:$16 sps:$4 sm:$0xff]  }
 0x5ac   :  { %12137 = vmatprep.subr.bf16.mxu0 %v17861_v35  ;;  %13285 = vmatprep.subr.bf16.mxu1 %v17864_v62  ;;  %v17952_v35 = vld [vmem:[%s24185_s1 + $0x2f44] ss:$16 sps:$4 sm:$0xff]   ;;  %v17955_v62 = vld [vmem:[%s24185_s1 + $0x2f4c] ss:$16 sps:$4 sm:$0xff]  }
 0x5af   :  { %12138 = vmatpush1.bf16.msra.mxu0 %v17859_v44  ;;  %13286 = vmatpush1.bf16.msra.mxu1 %v17862_v0  ;;  %v17950_v44 = vld [vmem:[%s24185_s1 + $0x2f40] ss:$16 sps:$4 sm:$0xff]   ;;  %v17953_v0 = vld [vmem:[%s24185_s1 + $0x2f48] ss:$16 sps:$4 sm:$0xff]  }
 0x5b0   :  { %12139 = vmatprep.subr.bf16.mxu0 %v17867_v47  ;;  %13287 = vmatprep.subr.bf16.mxu1 %v17870_v1  ;;  %v17958_v47 = vld [vmem:[%s24185_s1 + $0x2f64] ss:$16 sps:$4 sm:$0xff]   ;;  %v17961_v1 = vld [vmem:[%s24185_s1 + $0x2f6c] ss:$16 sps:$4 sm:$0xff]  }
 0x5b3   :  { %12140 = vmatpush1.bf16.msra.mxu0 %v17865_v2  ;;  %13288 = vmatpush1.bf16.msra.mxu1 %v17868_v59  ;;  %v17956_v2 = vld [vmem:[%s24185_s1 + $0x2f60] ss:$16 sps:$4 sm:$0xff]   ;;  %v17959_v59 = vld [vmem:[%s24185_s1 + $0x2f68] ss:$16 sps:$4 sm:$0xff]  }
 0x5b4   :  { %12141 = vmatprep.subr.bf16.mxu0 %v17873_v57  ;;  %13289 = vmatprep.subr.bf16.mxu1 %v17876_v5  ;;  %v17964_v57 = vld [vmem:[%s24185_s1 + $0x2f84] ss:$16 sps:$4 sm:$0xff]   ;;  %v17967_v5 = vld [vmem:[%s24185_s1 + $0x2f8c] ss:$16 sps:$4 sm:$0xff]  }
 0x5b7   :  { %12142 = vmatpush1.bf16.msra.mxu0 %v17871_v60  ;;  %13290 = vmatpush1.bf16.msra.mxu1 %v17874_v54  ;;  %v17962_v60 = vld [vmem:[%s24185_s1 + $0x2f80] ss:$16 sps:$4 sm:$0xff]   ;;  %v17965_v54 = vld [vmem:[%s24185_s1 + $0x2f88] ss:$16 sps:$4 sm:$0xff]  }
 0x5b8   :  { %12143 = vmatprep.subr.bf16.mxu0 %v17879_v10  ;;  %13291 = vmatprep.subr.bf16.mxu1 %v17882_v48  ;;  %v17970_v10 = vld [vmem:[%s24185_s1 + $0x2fa4] ss:$16 sps:$4 sm:$0xff]   ;;  %v17973_v48 = vld [vmem:[%s24185_s1 + $0x2fac] ss:$16 sps:$4 sm:$0xff]  }
 0x5bb   :  { %12144 = vmatpush1.bf16.msra.mxu0 %v17877_v11  ;;  %13292 = vmatpush1.bf16.msra.mxu1 %v17880_v63  ;;  %v17968_v11 = vld [vmem:[%s24185_s1 + $0x2fa0] ss:$16 sps:$4 sm:$0xff]   ;;  %v17971_v63 = vld [vmem:[%s24185_s1 + $0x2fa8] ss:$16 sps:$4 sm:$0xff]  }
 0x5bc   :  { %12145 = vmatprep.subr.bf16.mxu0 %v17885_v12  ;;  %13293 = vmatprep.subr.bf16.mxu1 %v17888_v3  ;;  %v17976_v12 = vld [vmem:[%s24185_s1 + $0x2fc4] ss:$16 sps:$4 sm:$0xff]   ;;  %v17979_v3 = vld [vmem:[%s24185_s1 + $0x2fcc] ss:$16 sps:$4 sm:$0xff]  }
 0x5bf   :  { %12146 = vmatpush1.bf16.msra.mxu0 %v17883_v52  ;;  %13294 = vmatpush1.bf16.msra.mxu1 %v17886_v15  ;;  %v23311_v52 = vld [vmem:[%s24184_s0 + $0x30] sm:$0xff] }
 0x5c0   :  { %12156 = vmatprep.subr.bf16.mxu0 %v17892_v7  ;;  %13304 = vmatprep.subr.bf16.mxu1 %v17895_v6  ;;  %v17974_v15 = vld [vmem:[%s24185_s1 + $0x2fc0] ss:$16 sps:$4 sm:$0xff]   ;;  %v17977_v7 = vld [vmem:[%s24185_s1 + $0x2fc8] ss:$16 sps:$4 sm:$0xff]   ;;  %v17982_v6 = vld [vmem:[%s24185_s1 + $0x2fe4] ss:$16 sps:$4 sm:$0xff]  }
 0x5c2   :  { %12148 = vmatmul.mubr.bf16.vlgmr.msra.gmra.mrb[0].mxu0 %v23134_v17  ;;  %13296 = vmatmul.mubr.bf16.vlgmr.msra.gmra.mrb[0].mxu1 %v23134_v17 }
 0x5c3   :  { %12157 = vmatpush1.bf16.msra.mxu0 %v17890_v8  ;;  %13305 = vmatpush1.bf16.msra.mxu1 %v17893_v20  ;;  %v17985_v8 = vld [vmem:[%s24185_s1 + $0x2fec] ss:$16 sps:$4 sm:$0xff]   ;;  %v23327_v20 = vrot.slane %v23311_v52, %v18582_v49 }
 0x5c4   :  { %12158 = vmatprep.subr.bf16.mxu0 %v17898_v22  ;;  %13306 = vmatprep.subr.bf16.mxu1 %v17901_v9  ;;  %v17980_v22 = vld [vmem:[%s24185_s1 + $0x2fe0] ss:$16 sps:$4 sm:$0xff]   ;;  %v17983_v9 = vld [vmem:[%s24185_s1 + $0x2fe8] ss:$16 sps:$4 sm:$0xff]  }
 0x5c5   :  { %12188 = vmatprep.mubr.bf16.mxu0 %v2147_v4  ;;  %13336 = vmatprep.mubr.bf16.mxu1 %v2147_v4  ;;  %v17988_v4 = vld [vmem:[%s24185_s1 + $0x3004] ss:$16 sps:$4 sm:$0xff]  }
 0x5c7   :  { %12159 = vmatpush1.bf16.msra.mxu0 %v17896_v24  ;;  %13307 = vmatpush1.bf16.msra.mxu1 %v17899_v13  ;;  %v17991_v24 = vld [vmem:[%s24185_s1 + $0x300c] ss:$16 sps:$4 sm:$0xff]   ;;  %v2163_v13 = vcombine.high %v23327_v20, %v23327_v20 }
 0x5c8   :  { %12160 = vmatprep.subr.bf16.mxu0 %v17904_v16  ;;  %13308 = vmatprep.subr.bf16.mxu1 %v17907_v27  ;;  %v2145_v16 = vcombine.high %v23134_v17, %v23134_v17  ;;  %v17986_v27 = vld [vmem:[%s24185_s1 + $0x3000] ss:$16 sps:$4 sm:$0xff]   ;;  %v17997_v17 = vld [vmem:[%s24185_s1 + $0x302c] ss:$16 sps:$4 sm:$0xff]  }
 0x5cb   :  { %12161 = vmatpush1.bf16.msra.mxu0 %v17902_v18  ;;  %13309 = vmatpush1.bf16.msra.mxu1 %v17905_v28  ;;  %v17989_v18 = vld [vmem:[%s24185_s1 + $0x3008] ss:$16 sps:$4 sm:$0xff]   ;;  %v17994_v28 = vld [vmem:[%s24185_s1 + $0x3024] ss:$16 sps:$4 sm:$0xff]  }
 0x5cc   :  { %12162 = vmatprep.subr.bf16.mxu0 %v17910_v14  ;;  %13310 = vmatprep.subr.bf16.mxu1 %v17913_v30  ;;  %v23358_v14 = vrot.slane %v2163_v13, %v18582_v49  ;;  %v17992_v30 = vld [vmem:[%s24185_s1 + $0x3020] ss:$16 sps:$4 sm:$0xff]   ;;  %v18073_v13 = vld [vmem:[%s24185_s1 + $0x31c8] ss:$16 sps:$4 sm:$0xff]  }
 0x5cf   :  { %12163 = vmatpush1.bf16.msra.mxu0 %v17908_v19  ;;  %13311 = vmatpush1.bf16.msra.mxu1 %v17911_v32  ;;  %v17995_v19 = vld [vmem:[%s24185_s1 + $0x3028] ss:$16 sps:$4 sm:$0xff]   ;;  %v18000_v32 = vld [vmem:[%s24185_s1 + $0x3044] ss:$16 sps:$4 sm:$0xff]  }
 0x5d0   :  { %12164 = vmatprep.subr.bf16.mxu0 %v17916_v26  ;;  %13312 = vmatprep.subr.bf16.mxu1 %v17919_v23  ;;  %v18003_v26 = vld [vmem:[%s24185_s1 + $0x304c] ss:$16 sps:$4 sm:$0xff]   ;;  %v17998_v23 = vld [vmem:[%s24185_s1 + $0x3040] ss:$16 sps:$4 sm:$0xff]  }
 0x5d3   :  { %12165 = vmatpush1.bf16.msra.mxu0 %v17914_v36  ;;  %13313 = vmatpush1.bf16.msra.mxu1 %v17917_v37  ;;  %v18001_v36 = vld [vmem:[%s24185_s1 + $0x3048] ss:$16 sps:$4 sm:$0xff]   ;;  %v18006_v37 = vld [vmem:[%s24185_s1 + $0x3064] ss:$16 sps:$4 sm:$0xff]  }
 0x5d4   :  { %12166 = vmatprep.subr.bf16.mxu0 %v17922_v21  ;;  %13314 = vmatprep.subr.bf16.mxu1 %v17925_v31  ;;  %v18009_v21 = vld [vmem:[%s24185_s1 + $0x306c] ss:$16 sps:$4 sm:$0xff]   ;;  %v18004_v31 = vld [vmem:[%s24185_s1 + $0x3060] ss:$16 sps:$4 sm:$0xff]  }
 0x5d7   :  { %12167 = vmatpush1.bf16.msra.mxu0 %v17920_v39  ;;  %13315 = vmatpush1.bf16.msra.mxu1 %v17923_v40  ;;  %v18007_v39 = vld [vmem:[%s24185_s1 + $0x3068] ss:$16 sps:$4 sm:$0xff]   ;;  %v18012_v40 = vld [vmem:[%s24185_s1 + $0x3084] ss:$16 sps:$4 sm:$0xff]  }
 0x5d8   :  { %12168 = vmatprep.subr.bf16.mxu0 %v17928_v41  ;;  %13316 = vmatprep.subr.bf16.mxu1 %v17931_v25  ;;  %v18015_v41 = vld [vmem:[%s24185_s1 + $0x308c] ss:$16 sps:$4 sm:$0xff]   ;;  %v18010_v25 = vld [vmem:[%s24185_s1 + $0x3080] ss:$16 sps:$4 sm:$0xff]  }
 0x5db   :  { %12169 = vmatpush1.bf16.msra.mxu0 %v17926_v43  ;;  %13317 = vmatpush1.bf16.msra.mxu1 %v17929_v46  ;;  %v18013_v43 = vld [vmem:[%s24185_s1 + $0x3088] ss:$16 sps:$4 sm:$0xff]   ;;  %v18018_v46 = vld [vmem:[%s24185_s1 + $0x30a4] ss:$16 sps:$4 sm:$0xff]  }
 0x5dc   :  { %12170 = vmatprep.subr.bf16.mxu0 %v17934_v29  ;;  %13318 = vmatprep.subr.bf16.mxu1 %v17937_v50  ;;  %v18021_v29 = vld [vmem:[%s24185_s1 + $0x30ac] ss:$16 sps:$4 sm:$0xff]   ;;  %v18016_v50 = vld [vmem:[%s24185_s1 + $0x30a0] ss:$16 sps:$4 sm:$0xff]  }
 0x5df   :  { %12171 = vmatpush1.bf16.msra.mxu0 %v17932_v33  ;;  %13319 = vmatpush1.bf16.msra.mxu1 %v17935_v51  ;;  %v18019_v33 = vld [vmem:[%s24185_s1 + $0x30a8] ss:$16 sps:$4 sm:$0xff]   ;;  %v18024_v51 = vld [vmem:[%s24185_s1 + $0x30c4] ss:$16 sps:$4 sm:$0xff]  }
 0x5e0   :  { %12172 = vmatprep.subr.bf16.mxu0 %v17940_v53  ;;  %13320 = vmatprep.subr.bf16.mxu1 %v17943_v38  ;;  %v18027_v53 = vld [vmem:[%s24185_s1 + $0x30cc] ss:$16 sps:$4 sm:$0xff]   ;;  %v18022_v38 = vld [vmem:[%s24185_s1 + $0x30c0] ss:$16 sps:$4 sm:$0xff]  }
 0x5e3   :  { %12173 = vmatpush1.bf16.msra.mxu0 %v17938_v34  ;;  %13321 = vmatpush1.bf16.msra.mxu1 %v17941_v55  ;;  %v18025_v34 = vld [vmem:[%s24185_s1 + $0x30c8] ss:$16 sps:$4 sm:$0xff]   ;;  %v18030_v55 = vld [vmem:[%s24185_s1 + $0x30e4] ss:$16 sps:$4 sm:$0xff]  }
 0x5e4   :  { %12174 = vmatprep.subr.bf16.mxu0 %v17946_v56  ;;  %13322 = vmatprep.subr.bf16.mxu1 %v17949_v45  ;;  %v18033_v56 = vld [vmem:[%s24185_s1 + $0x30ec] ss:$16 sps:$4 sm:$0xff]   ;;  %v18028_v45 = vld [vmem:[%s24185_s1 + $0x30e0] ss:$16 sps:$4 sm:$0xff]  }
 0x5e7   :  { %12175 = vmatpush1.bf16.msra.mxu0 %v17944_v58  ;;  %13323 = vmatpush1.bf16.msra.mxu1 %v17947_v61  ;;  %v18031_v58 = vld [vmem:[%s24185_s1 + $0x30e8] ss:$16 sps:$4 sm:$0xff]   ;;  %v18036_v61 = vld [vmem:[%s24185_s1 + $0x3104] ss:$16 sps:$4 sm:$0xff]  }
 0x5e8   :  { %12176 = vmatprep.subr.bf16.mxu0 %v17952_v35  ;;  %13324 = vmatprep.subr.bf16.mxu1 %v17955_v62  ;;  %v18039_v35 = vld [vmem:[%s24185_s1 + $0x310c] ss:$16 sps:$4 sm:$0xff]   ;;  %v18034_v62 = vld [vmem:[%s24185_s1 + $0x3100] ss:$16 sps:$4 sm:$0xff]  }
 0x5eb   :  { %12177 = vmatpush1.bf16.msra.mxu0 %v17950_v44  ;;  %13325 = vmatpush1.bf16.msra.mxu1 %v17953_v0  ;;  %v18037_v44 = vld [vmem:[%s24185_s1 + $0x3108] ss:$16 sps:$4 sm:$0xff]   ;;  %v18042_v0 = vld [vmem:[%s24185_s1 + $0x3124] ss:$16 sps:$4 sm:$0xff]  }
 0x5ec   :  { %12178 = vmatprep.subr.bf16.mxu0 %v17958_v47  ;;  %13326 = vmatprep.subr.bf16.mxu1 %v17961_v1  ;;  %v18045_v47 = vld [vmem:[%s24185_s1 + $0x312c] ss:$16 sps:$4 sm:$0xff]   ;;  %v18040_v1 = vld [vmem:[%s24185_s1 + $0x3120] ss:$16 sps:$4 sm:$0xff]  }
 0x5ef   :  { %12179 = vmatpush1.bf16.msra.mxu0 %v17956_v2  ;;  %13327 = vmatpush1.bf16.msra.mxu1 %v17959_v59  ;;  %v18043_v2 = vld [vmem:[%s24185_s1 + $0x3128] ss:$16 sps:$4 sm:$0xff]   ;;  %v18048_v59 = vld [vmem:[%s24185_s1 + $0x3144] ss:$16 sps:$4 sm:$0xff]  }
 0x5f0   :  { %12180 = vmatprep.subr.bf16.mxu0 %v17964_v57  ;;  %13328 = vmatprep.subr.bf16.mxu1 %v17967_v5  ;;  %v18051_v57 = vld [vmem:[%s24185_s1 + $0x314c] ss:$16 sps:$4 sm:$0xff]   ;;  %v18046_v5 = vld [vmem:[%s24185_s1 + $0x3140] ss:$16 sps:$4 sm:$0xff]  }
 0x5f3   :  { %12181 = vmatpush1.bf16.msra.mxu0 %v17962_v60  ;;  %13329 = vmatpush1.bf16.msra.mxu1 %v17965_v54  ;;  %v18049_v60 = vld [vmem:[%s24185_s1 + $0x3148] ss:$16 sps:$4 sm:$0xff]   ;;  %v18054_v54 = vld [vmem:[%s24185_s1 + $0x3164] ss:$16 sps:$4 sm:$0xff]  }
 0x5f4   :  { %12182 = vmatprep.subr.bf16.mxu0 %v17970_v10  ;;  %13330 = vmatprep.subr.bf16.mxu1 %v17973_v48  ;;  %v18057_v10 = vld [vmem:[%s24185_s1 + $0x316c] ss:$16 sps:$4 sm:$0xff]   ;;  %v18052_v48 = vld [vmem:[%s24185_s1 + $0x3160] ss:$16 sps:$4 sm:$0xff]  }
 0x5f7   :  { %12183 = vmatpush1.bf16.msra.mxu0 %v17968_v11  ;;  %13331 = vmatpush1.bf16.msra.mxu1 %v17971_v63  ;;  %v18055_v11 = vld [vmem:[%s24185_s1 + $0x3168] ss:$16 sps:$4 sm:$0xff]   ;;  %v18060_v63 = vld [vmem:[%s24185_s1 + $0x3184] ss:$16 sps:$4 sm:$0xff]  }
 0x5f8   :  { %12184 = vmatprep.subr.bf16.mxu0 %v17976_v12  ;;  %13332 = vmatprep.subr.bf16.mxu1 %v17979_v3  ;;  %v18063_v12 = vld [vmem:[%s24185_s1 + $0x318c] ss:$16 sps:$4 sm:$0xff]   ;;  %v18058_v3 = vld [vmem:[%s24185_s1 + $0x3180] ss:$16 sps:$4 sm:$0xff]  }
 0x5fb   :  { %12185 = vmatpush1.bf16.msra.mxu0 %v17974_v15  ;;  %13333 = vmatpush1.bf16.msra.mxu1 %v17977_v7  ;;  %v18061_v15 = vld [vmem:[%s24185_s1 + $0x3188] ss:$16 sps:$4 sm:$0xff]   ;;  %v18066_v7 = vld [vmem:[%s24185_s1 + $0x31a4] ss:$16 sps:$4 sm:$0xff]  }
 0x5fc   :  { %12186 = vmatprep.subr.bf16.mxu0 %v17982_v6  ;;  %13334 = vmatprep.subr.bf16.mxu1 %v17985_v8  ;;  %v18069_v6 = vld [vmem:[%s24185_s1 + $0x31ac] ss:$16 sps:$4 sm:$0xff]   ;;  %v18064_v8 = vld [vmem:[%s24185_s1 + $0x31a0] ss:$16 sps:$4 sm:$0xff]  }
 0x5ff   :  { %12187 = vmatpush1.bf16.msra.mxu0 %v17980_v22  ;;  %13335 = vmatpush1.bf16.msra.mxu1 %v17983_v9  ;;  %v18067_v22 = vld [vmem:[%s24185_s1 + $0x31a8] ss:$16 sps:$4 sm:$0xff]   ;;  %v18072_v9 = vld [vmem:[%s24185_s1 + $0x31c4] ss:$16 sps:$4 sm:$0xff]  }
 0x600   :  { %12197 = vmatprep.subr.bf16.mxu0 %v17988_v4  ;;  %13345 = vmatprep.subr.bf16.mxu1 %v17991_v24  ;;  %v18075_v4 = vld [vmem:[%s24185_s1 + $0x31cc] ss:$16 sps:$4 sm:$0xff]   ;;  %v18070_v24 = vld [vmem:[%s24185_s1 + $0x31c0] ss:$16 sps:$4 sm:$0xff]  }
 0x602   :  { %12189 = vmatmul.mubr.bf16.vlgmr.msra.gmra.mrb[0].mxu0 %v2145_v16  ;;  %13337 = vmatmul.mubr.bf16.vlgmr.msra.gmra.mrb[0].mxu1 %v2145_v16  ;;  %v18078_v16 = vld [vmem:[%s24185_s1 + $0x31e4] ss:$16 sps:$4 sm:$0xff]  }
 0x603   :  { %12198 = vmatpush1.bf16.msra.mxu0 %v17986_v27  ;;  %13346 = vmatpush1.bf16.msra.mxu1 %v17989_v18  ;;  %v18081_v27 = vld [vmem:[%s24185_s1 + $0x31ec] ss:$16 sps:$4 sm:$0xff]   ;;  %v18076_v18 = vld [vmem:[%s24185_s1 + $0x31e0] ss:$16 sps:$4 sm:$0xff]  }
 0x604   :  { %12199 = vmatprep.subr.bf16.mxu0 %v17994_v28  ;;  %13347 = vmatprep.subr.bf16.mxu1 %v17997_v17  ;;  %v18079_v28 = vld [vmem:[%s24185_s1 + $0x31e8] ss:$16 sps:$4 sm:$0xff]   ;;  %v18084_v17 = vld [vmem:[%s24185_s1 + $0x3204] ss:$16 sps:$4 sm:$0xff]  }
 0x605   :  { %12229 = vmatprep.mubr.bf16.mxu0 %v23358_v14  ;;  %13377 = vmatprep.mubr.bf16.mxu1 %v23358_v14 }
 0x607   :  { %12200 = vmatpush1.bf16.msra.mxu0 %v17992_v30  ;;  %13348 = vmatpush1.bf16.msra.mxu1 %v17995_v19  ;;  %v18087_v30 = vld [vmem:[%s24185_s1 + $0x320c] ss:$16 sps:$4 sm:$0xff]   ;;  %v23544_v19 = vrot.slane %v23327_v20, %v18582_v49 }
 0x608   :  { %12201 = vmatprep.subr.bf16.mxu0 %v18000_v32  ;;  %13349 = vmatprep.subr.bf16.mxu1 %v18003_v26  ;;  %v18082_v32 = vld [vmem:[%s24185_s1 + $0x3200] ss:$16 sps:$4 sm:$0xff]   ;;  %v18085_v26 = vld [vmem:[%s24185_s1 + $0x3208] ss:$16 sps:$4 sm:$0xff]   ;;  %v18093_v20 = vld [vmem:[%s24185_s1 + $0x322c] ss:$16 sps:$4 sm:$0xff]  }
 0x60b   :  { %12202 = vmatpush1.bf16.msra.mxu0 %v17998_v23  ;;  %13350 = vmatpush1.bf16.msra.mxu1 %v18001_v36  ;;  %v18090_v23 = vld [vmem:[%s24185_s1 + $0x3224] ss:$16 sps:$4 sm:$0xff]   ;;  %v2195_v36 = vcombine.high %v23358_v14, %v23358_v14 }
 0x60c   :  { %12203 = vmatprep.subr.bf16.mxu0 %v18006_v37  ;;  %13351 = vmatprep.subr.bf16.mxu1 %v18009_v21  ;;  %v18088_v37 = vld [vmem:[%s24185_s1 + $0x3220] ss:$16 sps:$4 sm:$0xff]   ;;  %v18091_v21 = vld [vmem:[%s24185_s1 + $0x3228] ss:$16 sps:$4 sm:$0xff]   ;;  %v18096_v14 = vld [vmem:[%s24185_s1 + $0x3244] ss:$16 sps:$4 sm:$0xff]  }
 0x60f   :  { %12204 = vmatpush1.bf16.msra.mxu0 %v18004_v31  ;;  %13352 = vmatpush1.bf16.msra.mxu1 %v18007_v39  ;;  %v18099_v31 = vld [vmem:[%s24185_s1 + $0x324c] ss:$16 sps:$4 sm:$0xff]   ;;  %v18094_v39 = vld [vmem:[%s24185_s1 + $0x3240] ss:$16 sps:$4 sm:$0xff]  }
 0x610   :  { %12205 = vmatprep.subr.bf16.mxu0 %v18012_v40  ;;  %13353 = vmatprep.subr.bf16.mxu1 %v18015_v41  ;;  %v18097_v40 = vld [vmem:[%s24185_s1 + $0x3248] ss:$16 sps:$4 sm:$0xff]   ;;  %v18102_v41 = vld [vmem:[%s24185_s1 + $0x3264] ss:$16 sps:$4 sm:$0xff]  }
 0x613   :  { %12206 = vmatpush1.bf16.msra.mxu0 %v18010_v25  ;;  %13354 = vmatpush1.bf16.msra.mxu1 %v18013_v43  ;;  %v18105_v25 = vld [vmem:[%s24185_s1 + $0x326c] ss:$16 sps:$4 sm:$0xff]   ;;  %v18100_v43 = vld [vmem:[%s24185_s1 + $0x3260] ss:$16 sps:$4 sm:$0xff]  }
 0x614   :  { %12207 = vmatprep.subr.bf16.mxu0 %v18018_v46  ;;  %13355 = vmatprep.subr.bf16.mxu1 %v18021_v29  ;;  %v18103_v46 = vld [vmem:[%s24185_s1 + $0x3268] ss:$16 sps:$4 sm:$0xff]   ;;  %v18108_v29 = vld [vmem:[%s24185_s1 + $0x3284] ss:$16 sps:$4 sm:$0xff]  }
 0x617   :  { %12208 = vmatpush1.bf16.msra.mxu0 %v18016_v50  ;;  %13356 = vmatpush1.bf16.msra.mxu1 %v18019_v33  ;;  %v18111_v50 = vld [vmem:[%s24185_s1 + $0x328c] ss:$16 sps:$4 sm:$0xff]   ;;  %v18106_v33 = vld [vmem:[%s24185_s1 + $0x3280] ss:$16 sps:$4 sm:$0xff]  }
 0x618   :  { %12209 = vmatprep.subr.bf16.mxu0 %v18024_v51  ;;  %13357 = vmatprep.subr.bf16.mxu1 %v18027_v53  ;;  %v18109_v51 = vld [vmem:[%s24185_s1 + $0x3288] ss:$16 sps:$4 sm:$0xff]   ;;  %v18114_v53 = vld [vmem:[%s24185_s1 + $0x32a4] ss:$16 sps:$4 sm:$0xff]  }
 0x61b   :  { %12210 = vmatpush1.bf16.msra.mxu0 %v18022_v38  ;;  %13358 = vmatpush1.bf16.msra.mxu1 %v18025_v34  ;;  %v18117_v38 = vld [vmem:[%s24185_s1 + $0x32ac] ss:$16 sps:$4 sm:$0xff]   ;;  %v18112_v34 = vld [vmem:[%s24185_s1 + $0x32a0] ss:$16 sps:$4 sm:$0xff]  }
 0x61c   :  { %12211 = vmatprep.subr.bf16.mxu0 %v18030_v55  ;;  %13359 = vmatprep.subr.bf16.mxu1 %v18033_v56  ;;  %v18115_v55 = vld [vmem:[%s24185_s1 + $0x32a8] ss:$16 sps:$4 sm:$0xff]   ;;  %v18120_v56 = vld [vmem:[%s24185_s1 + $0x32c4] ss:$16 sps:$4 sm:$0xff]  }
 0x61f   :  { %12212 = vmatpush1.bf16.msra.mxu0 %v18028_v45  ;;  %13360 = vmatpush1.bf16.msra.mxu1 %v18031_v58  ;;  %v18123_v45 = vld [vmem:[%s24185_s1 + $0x32cc] ss:$16 sps:$4 sm:$0xff]   ;;  %v18118_v58 = vld [vmem:[%s24185_s1 + $0x32c0] ss:$16 sps:$4 sm:$0xff]  }
 0x620   :  { %12213 = vmatprep.subr.bf16.mxu0 %v18036_v61  ;;  %13361 = vmatprep.subr.bf16.mxu1 %v18039_v35  ;;  %v18121_v61 = vld [vmem:[%s24185_s1 + $0x32c8] ss:$16 sps:$4 sm:$0xff]   ;;  %v18126_v35 = vld [vmem:[%s24185_s1 + $0x32e4] ss:$16 sps:$4 sm:$0xff]  }
 0x623   :  { %12214 = vmatpush1.bf16.msra.mxu0 %v18034_v62  ;;  %13362 = vmatpush1.bf16.msra.mxu1 %v18037_v44  ;;  %v18129_v62 = vld [vmem:[%s24185_s1 + $0x32ec] ss:$16 sps:$4 sm:$0xff]   ;;  %v18124_v44 = vld [vmem:[%s24185_s1 + $0x32e0] ss:$16 sps:$4 sm:$0xff]  }
 0x624   :  { %12215 = vmatprep.subr.bf16.mxu0 %v18042_v0  ;;  %13363 = vmatprep.subr.bf16.mxu1 %v18045_v47  ;;  %v18127_v0 = vld [vmem:[%s24185_s1 + $0x32e8] ss:$16 sps:$4 sm:$0xff]   ;;  %v18132_v47 = vld [vmem:[%s24185_s1 + $0x3304] ss:$16 sps:$4 sm:$0xff]  }
 0x627   :  { %12216 = vmatpush1.bf16.msra.mxu0 %v18040_v1  ;;  %13364 = vmatpush1.bf16.msra.mxu1 %v18043_v2  ;;  %v18135_v1 = vld [vmem:[%s24185_s1 + $0x330c] ss:$16 sps:$4 sm:$0xff]   ;;  %v18130_v2 = vld [vmem:[%s24185_s1 + $0x3300] ss:$16 sps:$4 sm:$0xff]  }
 0x628   :  { %12217 = vmatprep.subr.bf16.mxu0 %v18048_v59  ;;  %13365 = vmatprep.subr.bf16.mxu1 %v18051_v57  ;;  %v18133_v59 = vld [vmem:[%s24185_s1 + $0x3308] ss:$16 sps:$4 sm:$0xff]   ;;  %v18138_v57 = vld [vmem:[%s24185_s1 + $0x3324] ss:$16 sps:$4 sm:$0xff]  }
 0x62b   :  { %12218 = vmatpush1.bf16.msra.mxu0 %v18046_v5  ;;  %13366 = vmatpush1.bf16.msra.mxu1 %v18049_v60  ;;  %v18141_v5 = vld [vmem:[%s24185_s1 + $0x332c] ss:$16 sps:$4 sm:$0xff]   ;;  %v18136_v60 = vld [vmem:[%s24185_s1 + $0x3320] ss:$16 sps:$4 sm:$0xff]  }
 0x62c   :  { %12219 = vmatprep.subr.bf16.mxu0 %v18054_v54  ;;  %13367 = vmatprep.subr.bf16.mxu1 %v18057_v10  ;;  %v18139_v54 = vld [vmem:[%s24185_s1 + $0x3328] ss:$16 sps:$4 sm:$0xff]   ;;  %v18144_v10 = vld [vmem:[%s24185_s1 + $0x3344] ss:$16 sps:$4 sm:$0xff]  }
 0x62f   :  { %12220 = vmatpush1.bf16.msra.mxu0 %v18052_v48  ;;  %13368 = vmatpush1.bf16.msra.mxu1 %v18055_v11  ;;  %v18147_v48 = vld [vmem:[%s24185_s1 + $0x334c] ss:$16 sps:$4 sm:$0xff]   ;;  %v18142_v11 = vld [vmem:[%s24185_s1 + $0x3340] ss:$16 sps:$4 sm:$0xff]  }
 0x630   :  { %12221 = vmatprep.subr.bf16.mxu0 %v18060_v63  ;;  %13369 = vmatprep.subr.bf16.mxu1 %v18063_v12  ;;  %v18145_v63 = vld [vmem:[%s24185_s1 + $0x3348] ss:$16 sps:$4 sm:$0xff]   ;;  %v18150_v12 = vld [vmem:[%s24185_s1 + $0x3364] ss:$16 sps:$4 sm:$0xff]  }
 0x633   :  { %12222 = vmatpush1.bf16.msra.mxu0 %v18058_v3  ;;  %13370 = vmatpush1.bf16.msra.mxu1 %v18061_v15  ;;  %v18153_v3 = vld [vmem:[%s24185_s1 + $0x336c] ss:$16 sps:$4 sm:$0xff]   ;;  %v18148_v15 = vld [vmem:[%s24185_s1 + $0x3360] ss:$16 sps:$4 sm:$0xff]  }
 0x634   :  { %12223 = vmatprep.subr.bf16.mxu0 %v18066_v7  ;;  %13371 = vmatprep.subr.bf16.mxu1 %v18069_v6  ;;  %v18151_v7 = vld [vmem:[%s24185_s1 + $0x3368] ss:$16 sps:$4 sm:$0xff]   ;;  %v18156_v6 = vld [vmem:[%s24185_s1 + $0x3384] ss:$16 sps:$4 sm:$0xff]  }
 0x637   :  { %12224 = vmatpush1.bf16.msra.mxu0 %v18064_v8  ;;  %13372 = vmatpush1.bf16.msra.mxu1 %v18067_v22  ;;  %v18159_v8 = vld [vmem:[%s24185_s1 + $0x338c] ss:$16 sps:$4 sm:$0xff]   ;;  %v18154_v22 = vld [vmem:[%s24185_s1 + $0x3380] ss:$16 sps:$4 sm:$0xff]  }
 0x638   :  { %12225 = vmatprep.subr.bf16.mxu0 %v18072_v9  ;;  %13373 = vmatprep.subr.bf16.mxu1 %v18075_v4  ;;  %v18157_v9 = vld [vmem:[%s24185_s1 + $0x3388] ss:$16 sps:$4 sm:$0xff]   ;;  %v18162_v4 = vld [vmem:[%s24185_s1 + $0x33a4] ss:$16 sps:$4 sm:$0xff]  }
 0x63b   :  { %12226 = vmatpush1.bf16.msra.mxu0 %v18070_v24  ;;  %13374 = vmatpush1.bf16.msra.mxu1 %v18073_v13  ;;  %v18165_v24 = vld [vmem:[%s24185_s1 + $0x33ac] ss:$16 sps:$4 sm:$0xff]   ;;  %v18160_v13 = vld [vmem:[%s24185_s1 + $0x33a0] ss:$16 sps:$4 sm:$0xff]  }
 0x63c   :  { %12227 = vmatprep.subr.bf16.mxu0 %v18078_v16  ;;  %13375 = vmatprep.subr.bf16.mxu1 %v18081_v27  ;;  %v18163_v16 = vld [vmem:[%s24185_s1 + $0x33a8] ss:$16 sps:$4 sm:$0xff]   ;;  %v18168_v27 = vld [vmem:[%s24185_s1 + $0x33c4] ss:$16 sps:$4 sm:$0xff]  }
 0x63f   :  { %12228 = vmatpush1.bf16.msra.mxu0 %v18076_v18  ;;  %13376 = vmatpush1.bf16.msra.mxu1 %v18079_v28  ;;  %v18171_v18 = vld [vmem:[%s24185_s1 + $0x33cc] ss:$16 sps:$4 sm:$0xff]   ;;  %v2148_v28 = vcombine.high %v23311_v52, %v23311_v52 }
 0x640   :  { %12238 = vmatprep.subr.bf16.mxu0 %v18084_v17  ;;  %13386 = vmatprep.subr.bf16.mxu1 %v18087_v30  ;;  %v18166_v17 = vld [vmem:[%s24185_s1 + $0x33c0] ss:$16 sps:$4 sm:$0xff]   ;;  %v18169_v30 = vld [vmem:[%s24185_s1 + $0x33c8] ss:$16 sps:$4 sm:$0xff]   ;;  %v18177_v52 = vld [vmem:[%s24185_s1 + $0x33ec] ss:$16 sps:$4 sm:$0xff]  }
 0x642   :  { %12230 = vmatmul.mubr.bf16.vlgmr.msra.gmra.mrb[0].mxu0 %v23544_v19  ;;  %13378 = vmatmul.mubr.bf16.vlgmr.msra.gmra.mrb[0].mxu1 %v23544_v19 }
 0x643   :  { %12239 = vmatpush1.bf16.msra.mxu0 %v18082_v32  ;;  %13387 = vmatpush1.bf16.msra.mxu1 %v18085_v26  ;;  %v18174_v32 = vld [vmem:[%s24185_s1 + $0x33e4] ss:$16 sps:$4 sm:$0xff]   ;;  %v23733_v26 = vrot.slane %v2148_v28, %v18582_v49  ;;  %v18253_v28 = vld [vmem:[%s24185_s1 + $0x3588] ss:$16 sps:$4 sm:$0xff]  }
 0x644   :  { %12240 = vmatprep.subr.bf16.mxu0 %v18090_v23  ;;  %13388 = vmatprep.subr.bf16.mxu1 %v18093_v20  ;;  %v18172_v23 = vld [vmem:[%s24185_s1 + $0x33e0] ss:$16 sps:$4 sm:$0xff]   ;;  %v18175_v20 = vld [vmem:[%s24185_s1 + $0x33e8] ss:$16 sps:$4 sm:$0xff]  }
 0x645   :  { %12270 = vmatprep.mubr.bf16.mxu0 %v2195_v36  ;;  %13418 = vmatprep.mubr.bf16.mxu1 %v2195_v36  ;;  %v18180_v36 = vld [vmem:[%s24185_s1 + $0x3404] ss:$16 sps:$4 sm:$0xff]  }
 0x647   :  { %12241 = vmatpush1.bf16.msra.mxu0 %v18088_v37  ;;  %13389 = vmatpush1.bf16.msra.mxu1 %v18091_v21  ;;  %v18183_v37 = vld [vmem:[%s24185_s1 + $0x340c] ss:$16 sps:$4 sm:$0xff]   ;;  %v2164_v21 = vcombine.high %v23733_v26, %v23733_v26 }
 0x648   :  { %12242 = vmatprep.subr.bf16.mxu0 %v18096_v14  ;;  %13390 = vmatprep.subr.bf16.mxu1 %v18099_v31  ;;  %v2193_v14 = vcombine.high %v23544_v19, %v23544_v19  ;;  %v18178_v31 = vld [vmem:[%s24185_s1 + $0x3400] ss:$16 sps:$4 sm:$0xff]   ;;  %v18189_v19 = vld [vmem:[%s24185_s1 + $0x342c] ss:$16 sps:$4 sm:$0xff]  }
 0x64b   :  { %12243 = vmatpush1.bf16.msra.mxu0 %v18094_v39  ;;  %13391 = vmatpush1.bf16.msra.mxu1 %v18097_v40  ;;  %v18181_v39 = vld [vmem:[%s24185_s1 + $0x3408] ss:$16 sps:$4 sm:$0xff]   ;;  %v18186_v40 = vld [vmem:[%s24185_s1 + $0x3424] ss:$16 sps:$4 sm:$0xff]  }
 0x64c   :  { %12244 = vmatprep.subr.bf16.mxu0 %v18102_v41  ;;  %13392 = vmatprep.subr.bf16.mxu1 %v18105_v25  ;;  %v23764_v41 = vrot.slane %v2164_v21, %v18582_v49  ;;  %v18184_v25 = vld [vmem:[%s24185_s1 + $0x3420] ss:$16 sps:$4 sm:$0xff]   ;;  %v18270_v21 = vld [vmem:[%s24185_s1 + $0x35e4] ss:$16 sps:$4 sm:$0xff]  }
 0x64f   :  { %12245 = vmatpush1.bf16.msra.mxu0 %v18100_v43  ;;  %13393 = vmatpush1.bf16.msra.mxu1 %v18103_v46  ;;  %v18187_v43 = vld [vmem:[%s24185_s1 + $0x3428] ss:$16 sps:$4 sm:$0xff]   ;;  %v18192_v46 = vld [vmem:[%s24185_s1 + $0x3444] ss:$16 sps:$4 sm:$0xff]  }
 0x650   :  { %12246 = vmatprep.subr.bf16.mxu0 %v18108_v29  ;;  %13394 = vmatprep.subr.bf16.mxu1 %v18111_v50  ;;  %v18195_v29 = vld [vmem:[%s24185_s1 + $0x344c] ss:$16 sps:$4 sm:$0xff]   ;;  %v18190_v50 = vld [vmem:[%s24185_s1 + $0x3440] ss:$16 sps:$4 sm:$0xff]  }
 0x653   :  { %12247 = vmatpush1.bf16.msra.mxu0 %v18106_v33  ;;  %13395 = vmatpush1.bf16.msra.mxu1 %v18109_v51  ;;  %v18193_v33 = vld [vmem:[%s24185_s1 + $0x3448] ss:$16 sps:$4 sm:$0xff]   ;;  %v18198_v51 = vld [vmem:[%s24185_s1 + $0x3464] ss:$16 sps:$4 sm:$0xff]  }
 0x654   :  { %12248 = vmatprep.subr.bf16.mxu0 %v18114_v53  ;;  %13396 = vmatprep.subr.bf16.mxu1 %v18117_v38  ;;  %v18201_v53 = vld [vmem:[%s24185_s1 + $0x346c] ss:$16 sps:$4 sm:$0xff]   ;;  %v18196_v38 = vld [vmem:[%s24185_s1 + $0x3460] ss:$16 sps:$4 sm:$0xff]  }
 0x657   :  { %12249 = vmatpush1.bf16.msra.mxu0 %v18112_v34  ;;  %13397 = vmatpush1.bf16.msra.mxu1 %v18115_v55  ;;  %v18199_v34 = vld [vmem:[%s24185_s1 + $0x3468] ss:$16 sps:$4 sm:$0xff]   ;;  %v18204_v55 = vld [vmem:[%s24185_s1 + $0x3484] ss:$16 sps:$4 sm:$0xff]  }
 0x658   :  { %12250 = vmatprep.subr.bf16.mxu0 %v18120_v56  ;;  %13398 = vmatprep.subr.bf16.mxu1 %v18123_v45  ;;  %v18207_v56 = vld [vmem:[%s24185_s1 + $0x348c] ss:$16 sps:$4 sm:$0xff]   ;;  %v18202_v45 = vld [vmem:[%s24185_s1 + $0x3480] ss:$16 sps:$4 sm:$0xff]  }
 0x65b   :  { %12251 = vmatpush1.bf16.msra.mxu0 %v18118_v58  ;;  %13399 = vmatpush1.bf16.msra.mxu1 %v18121_v61  ;;  %v18205_v58 = vld [vmem:[%s24185_s1 + $0x3488] ss:$16 sps:$4 sm:$0xff]   ;;  %v18210_v61 = vld [vmem:[%s24185_s1 + $0x34a4] ss:$16 sps:$4 sm:$0xff]  }
 0x65c   :  { %12252 = vmatprep.subr.bf16.mxu0 %v18126_v35  ;;  %13400 = vmatprep.subr.bf16.mxu1 %v18129_v62  ;;  %v18213_v35 = vld [vmem:[%s24185_s1 + $0x34ac] ss:$16 sps:$4 sm:$0xff]   ;;  %v18208_v62 = vld [vmem:[%s24185_s1 + $0x34a0] ss:$16 sps:$4 sm:$0xff]  }
 0x65f   :  { %12253 = vmatpush1.bf16.msra.mxu0 %v18124_v44  ;;  %13401 = vmatpush1.bf16.msra.mxu1 %v18127_v0  ;;  %v18211_v44 = vld [vmem:[%s24185_s1 + $0x34a8] ss:$16 sps:$4 sm:$0xff]   ;;  %v18216_v0 = vld [vmem:[%s24185_s1 + $0x34c4] ss:$16 sps:$4 sm:$0xff]  }
 0x660   :  { %12254 = vmatprep.subr.bf16.mxu0 %v18132_v47  ;;  %13402 = vmatprep.subr.bf16.mxu1 %v18135_v1  ;;  %v18219_v47 = vld [vmem:[%s24185_s1 + $0x34cc] ss:$16 sps:$4 sm:$0xff]   ;;  %v18214_v1 = vld [vmem:[%s24185_s1 + $0x34c0] ss:$16 sps:$4 sm:$0xff]  }
 0x663   :  { %12255 = vmatpush1.bf16.msra.mxu0 %v18130_v2  ;;  %13403 = vmatpush1.bf16.msra.mxu1 %v18133_v59  ;;  %v18217_v2 = vld [vmem:[%s24185_s1 + $0x34c8] ss:$16 sps:$4 sm:$0xff]   ;;  %v18222_v59 = vld [vmem:[%s24185_s1 + $0x34e4] ss:$16 sps:$4 sm:$0xff]  }
 0x664   :  { %12256 = vmatprep.subr.bf16.mxu0 %v18138_v57  ;;  %13404 = vmatprep.subr.bf16.mxu1 %v18141_v5  ;;  %v18225_v57 = vld [vmem:[%s24185_s1 + $0x34ec] ss:$16 sps:$4 sm:$0xff]   ;;  %v18220_v5 = vld [vmem:[%s24185_s1 + $0x34e0] ss:$16 sps:$4 sm:$0xff]  }
 0x667   :  { %12257 = vmatpush1.bf16.msra.mxu0 %v18136_v60  ;;  %13405 = vmatpush1.bf16.msra.mxu1 %v18139_v54  ;;  %v18223_v60 = vld [vmem:[%s24185_s1 + $0x34e8] ss:$16 sps:$4 sm:$0xff]   ;;  %v18228_v54 = vld [vmem:[%s24185_s1 + $0x3504] ss:$16 sps:$4 sm:$0xff]  }
 0x668   :  { %12258 = vmatprep.subr.bf16.mxu0 %v18144_v10  ;;  %13406 = vmatprep.subr.bf16.mxu1 %v18147_v48  ;;  %v18231_v10 = vld [vmem:[%s24185_s1 + $0x350c] ss:$16 sps:$4 sm:$0xff]   ;;  %v18226_v48 = vld [vmem:[%s24185_s1 + $0x3500] ss:$16 sps:$4 sm:$0xff]  }
 0x66b   :  { %12259 = vmatpush1.bf16.msra.mxu0 %v18142_v11  ;;  %13407 = vmatpush1.bf16.msra.mxu1 %v18145_v63  ;;  %v18229_v11 = vld [vmem:[%s24185_s1 + $0x3508] ss:$16 sps:$4 sm:$0xff]   ;;  %v18234_v63 = vld [vmem:[%s24185_s1 + $0x3524] ss:$16 sps:$4 sm:$0xff]  }
 0x66c   :  { %12260 = vmatprep.subr.bf16.mxu0 %v18150_v12  ;;  %13408 = vmatprep.subr.bf16.mxu1 %v18153_v3  ;;  %v18237_v12 = vld [vmem:[%s24185_s1 + $0x352c] ss:$16 sps:$4 sm:$0xff]   ;;  %v18232_v3 = vld [vmem:[%s24185_s1 + $0x3520] ss:$16 sps:$4 sm:$0xff]  }
 0x66f   :  { %12261 = vmatpush1.bf16.msra.mxu0 %v18148_v15  ;;  %13409 = vmatpush1.bf16.msra.mxu1 %v18151_v7  ;;  %v18235_v15 = vld [vmem:[%s24185_s1 + $0x3528] ss:$16 sps:$4 sm:$0xff]   ;;  %v18240_v7 = vld [vmem:[%s24185_s1 + $0x3544] ss:$16 sps:$4 sm:$0xff]  }
 0x670   :  { %12262 = vmatprep.subr.bf16.mxu0 %v18156_v6  ;;  %13410 = vmatprep.subr.bf16.mxu1 %v18159_v8  ;;  %v18243_v6 = vld [vmem:[%s24185_s1 + $0x354c] ss:$16 sps:$4 sm:$0xff]   ;;  %v18238_v8 = vld [vmem:[%s24185_s1 + $0x3540] ss:$16 sps:$4 sm:$0xff]  }
 0x673   :  { %12263 = vmatpush1.bf16.msra.mxu0 %v18154_v22  ;;  %13411 = vmatpush1.bf16.msra.mxu1 %v18157_v9  ;;  %v18241_v22 = vld [vmem:[%s24185_s1 + $0x3548] ss:$16 sps:$4 sm:$0xff]   ;;  %v18246_v9 = vld [vmem:[%s24185_s1 + $0x3564] ss:$16 sps:$4 sm:$0xff]  }
 0x674   :  { %12264 = vmatprep.subr.bf16.mxu0 %v18162_v4  ;;  %13412 = vmatprep.subr.bf16.mxu1 %v18165_v24  ;;  %v18249_v4 = vld [vmem:[%s24185_s1 + $0x356c] ss:$16 sps:$4 sm:$0xff]   ;;  %v18244_v24 = vld [vmem:[%s24185_s1 + $0x3560] ss:$16 sps:$4 sm:$0xff]  }
 0x677   :  { %12265 = vmatpush1.bf16.msra.mxu0 %v18160_v13  ;;  %13413 = vmatpush1.bf16.msra.mxu1 %v18163_v16  ;;  %v18247_v13 = vld [vmem:[%s24185_s1 + $0x3568] ss:$16 sps:$4 sm:$0xff]   ;;  %v18252_v16 = vld [vmem:[%s24185_s1 + $0x3584] ss:$16 sps:$4 sm:$0xff]  }
 0x678   :  { %12266 = vmatprep.subr.bf16.mxu0 %v18168_v27  ;;  %13414 = vmatprep.subr.bf16.mxu1 %v18171_v18  ;;  %v18255_v27 = vld [vmem:[%s24185_s1 + $0x358c] ss:$16 sps:$4 sm:$0xff]   ;;  %v18250_v18 = vld [vmem:[%s24185_s1 + $0x3580] ss:$16 sps:$4 sm:$0xff]  }
 0x67b   :  { %12267 = vmatpush1.bf16.msra.mxu0 %v18166_v17  ;;  %13415 = vmatpush1.bf16.msra.mxu1 %v18169_v30  ;;  %v18258_v17 = vld [vmem:[%s24185_s1 + $0x35a4] ss:$16 sps:$4 sm:$0xff]   ;;  %v18261_v30 = vld [vmem:[%s24185_s1 + $0x35ac] ss:$16 sps:$4 sm:$0xff]  }
 0x67c   :  { %12268 = vmatprep.subr.bf16.mxu0 %v18174_v32  ;;  %13416 = vmatprep.subr.bf16.mxu1 %v18177_v52  ;;  %v18256_v32 = vld [vmem:[%s24185_s1 + $0x35a0] ss:$16 sps:$4 sm:$0xff]   ;;  %v18259_v52 = vld [vmem:[%s24185_s1 + $0x35a8] ss:$16 sps:$4 sm:$0xff]  }
 0x67f   :  { %12269 = vmatpush1.bf16.msra.mxu0 %v18172_v23  ;;  %13417 = vmatpush1.bf16.msra.mxu1 %v18175_v20  ;;  %v18264_v23 = vld [vmem:[%s24185_s1 + $0x35c4] ss:$16 sps:$4 sm:$0xff]   ;;  %v18267_v20 = vld [vmem:[%s24185_s1 + $0x35cc] ss:$16 sps:$4 sm:$0xff]  }
 0x680   :  { %12279 = vmatprep.subr.bf16.mxu0 %v18180_v36  ;;  %13427 = vmatprep.subr.bf16.mxu1 %v18183_v37  ;;  %v18262_v36 = vld [vmem:[%s24185_s1 + $0x35c0] ss:$16 sps:$4 sm:$0xff]   ;;  %v18265_v37 = vld [vmem:[%s24185_s1 + $0x35c8] ss:$16 sps:$4 sm:$0xff]  }
 0x682   :  { %12271 = vmatmul.mubr.bf16.vlgmr.msra.gmra.mrb[0].mxu0 %v2193_v14  ;;  %13419 = vmatmul.mubr.bf16.vlgmr.msra.gmra.mrb[0].mxu1 %v2193_v14  ;;  %v18273_v14 = vld [vmem:[%s24185_s1 + $0x35ec] ss:$16 sps:$4 sm:$0xff]  }
 0x683   :  { %12280 = vmatpush1.bf16.msra.mxu0 %v18178_v31  ;;  %13428 = vmatpush1.bf16.msra.mxu1 %v18181_v39  ;;  %v18268_v31 = vld [vmem:[%s24185_s1 + $0x35e0] ss:$16 sps:$4 sm:$0xff]   ;;  %v18271_v39 = vld [vmem:[%s24185_s1 + $0x35e8] ss:$16 sps:$4 sm:$0xff]  }
 0x684   :  { %12281 = vmatprep.subr.bf16.mxu0 %v18186_v40  ;;  %13429 = vmatprep.subr.bf16.mxu1 %v18189_v19  ;;  %v18277_v40 = vld [vmem:[%s24185_s1 + $0x3604] ss:$16 sps:$4 sm:$0xff]   ;;  %v18280_v19 = vld [vmem:[%s24185_s1 + $0x360c] ss:$16 sps:$4 sm:$0xff]  }
 0x685   :  { %12311 = vmatprep.mubr.bf16.mxu0 %v23764_v41  ;;  %13459 = vmatprep.mubr.bf16.mxu1 %v23764_v41 }
 0x687   :  { %12282 = vmatpush1.bf16.msra.mxu0 %v18184_v25  ;;  %13430 = vmatpush1.bf16.msra.mxu1 %v18187_v43  ;;  %v23950_v25 = vrot.slane %v23733_v26, %v18582_v49  ;;  %v18275_v43 = vld [vmem:[%s24185_s1 + $0x3600] ss:$16 sps:$4 sm:$0xff]   ;;  %v18286_v49 = vld [vmem:[%s24185_s1 + $0x362c] ss:$16 sps:$4 sm:$0xff]   ;;  %v2196_v26 = vcombine.high %v23764_v41, %v23764_v41  ;;  %v18289_v41 = vld [vmem:[%s24185_s1 + $0x3644] ss:$16 sps:$4 sm:$0xff]  }
 0x688   :  { %12283 = vmatprep.subr.bf16.mxu0 %v18192_v46  ;;  %13431 = vmatprep.subr.bf16.mxu1 %v18195_v29  ;;  %v18278_v46 = vld [vmem:[%s24185_s1 + $0x3608] ss:$16 sps:$4 sm:$0xff]   ;;  %v18283_v29 = vld [vmem:[%s24185_s1 + $0x3624] ss:$16 sps:$4 sm:$0xff]  }
 0x68b   :  { %12284 = vmatpush1.bf16.msra.mxu0 %v18190_v50  ;;  %13432 = vmatpush1.bf16.msra.mxu1 %v18193_v33  ;;  %v18281_v50 = vld [vmem:[%s24185_s1 + $0x3620] ss:$16 sps:$4 sm:$0xff]   ;;  %v18284_v33 = vld [vmem:[%s24185_s1 + $0x3628] ss:$16 sps:$4 sm:$0xff]  }
 0x68c   :  { %12285 = vmatprep.subr.bf16.mxu0 %v18198_v51  ;;  %13433 = vmatprep.subr.bf16.mxu1 %v18201_v53  ;;  %v18292_v51 = vld [vmem:[%s24185_s1 + $0x364c] ss:$16 sps:$4 sm:$0xff]   ;;  %v18287_v53 = vld [vmem:[%s24185_s1 + $0x3640] ss:$16 sps:$4 sm:$0xff]  }
 0x68f   :  { %12286 = vmatpush1.bf16.msra.mxu0 %v18196_v38  ;;  %13434 = vmatpush1.bf16.msra.mxu1 %v18199_v34  ;;  %v18290_v38 = vld [vmem:[%s24185_s1 + $0x3648] ss:$16 sps:$4 sm:$0xff]   ;;  %v18295_v34 = vld [vmem:[%s24185_s1 + $0x3664] ss:$16 sps:$4 sm:$0xff]  }
 0x690   :  { %12287 = vmatprep.subr.bf16.mxu0 %v18204_v55  ;;  %13435 = vmatprep.subr.bf16.mxu1 %v18207_v56  ;;  %v18298_v55 = vld [vmem:[%s24185_s1 + $0x366c] ss:$16 sps:$4 sm:$0xff]   ;;  %v18293_v56 = vld [vmem:[%s24185_s1 + $0x3660] ss:$16 sps:$4 sm:$0xff]  }
 0x693   :  { %12288 = vmatpush1.bf16.msra.mxu0 %v18202_v45  ;;  %13436 = vmatpush1.bf16.msra.mxu1 %v18205_v58  ;;  %v18296_v45 = vld [vmem:[%s24185_s1 + $0x3668] ss:$16 sps:$4 sm:$0xff]   ;;  %v18301_v58 = vld [vmem:[%s24185_s1 + $0x3684] ss:$16 sps:$4 sm:$0xff]  }
 0x694   :  { %12289 = vmatprep.subr.bf16.mxu0 %v18210_v61  ;;  %13437 = vmatprep.subr.bf16.mxu1 %v18213_v35  ;;  %v18304_v61 = vld [vmem:[%s24185_s1 + $0x368c] ss:$16 sps:$4 sm:$0xff]   ;;  %v18299_v35 = vld [vmem:[%s24185_s1 + $0x3680] ss:$16 sps:$4 sm:$0xff]  }
 0x697   :  { %12290 = vmatpush1.bf16.msra.mxu0 %v18208_v62  ;;  %13438 = vmatpush1.bf16.msra.mxu1 %v18211_v44  ;;  %v18302_v62 = vld [vmem:[%s24185_s1 + $0x3688] ss:$16 sps:$4 sm:$0xff]   ;;  %v18307_v44 = vld [vmem:[%s24185_s1 + $0x36a4] ss:$16 sps:$4 sm:$0xff]  }
 0x698   :  { %12291 = vmatprep.subr.bf16.mxu0 %v18216_v0  ;;  %13439 = vmatprep.subr.bf16.mxu1 %v18219_v47  ;;  %v18310_v0 = vld [vmem:[%s24185_s1 + $0x36ac] ss:$16 sps:$4 sm:$0xff]   ;;  %v18305_v47 = vld [vmem:[%s24185_s1 + $0x36a0] ss:$16 sps:$4 sm:$0xff]  }
 0x69b   :  { %12292 = vmatpush1.bf16.msra.mxu0 %v18214_v1  ;;  %13440 = vmatpush1.bf16.msra.mxu1 %v18217_v2  ;;  %v18308_v1 = vld [vmem:[%s24185_s1 + $0x36a8] ss:$16 sps:$4 sm:$0xff]   ;;  %v18313_v2 = vld [vmem:[%s24185_s1 + $0x36c4] ss:$16 sps:$4 sm:$0xff]  }
 0x69c   :  { %12293 = vmatprep.subr.bf16.mxu0 %v18222_v59  ;;  %13441 = vmatprep.subr.bf16.mxu1 %v18225_v57  ;;  %v18316_v59 = vld [vmem:[%s24185_s1 + $0x36cc] ss:$16 sps:$4 sm:$0xff]   ;;  %v18311_v57 = vld [vmem:[%s24185_s1 + $0x36c0] ss:$16 sps:$4 sm:$0xff]  }
 0x69f   :  { %12294 = vmatpush1.bf16.msra.mxu0 %v18220_v5  ;;  %13442 = vmatpush1.bf16.msra.mxu1 %v18223_v60  ;;  %v18314_v5 = vld [vmem:[%s24185_s1 + $0x36c8] ss:$16 sps:$4 sm:$0xff]   ;;  %v18319_v60 = vld [vmem:[%s24185_s1 + $0x36e4] ss:$16 sps:$4 sm:$0xff]  }
 0x6a0   :  { %12295 = vmatprep.subr.bf16.mxu0 %v18228_v54  ;;  %13443 = vmatprep.subr.bf16.mxu1 %v18231_v10  ;;  %v18322_v54 = vld [vmem:[%s24185_s1 + $0x36ec] ss:$16 sps:$4 sm:$0xff]   ;;  %v18317_v10 = vld [vmem:[%s24185_s1 + $0x36e0] ss:$16 sps:$4 sm:$0xff]  }
 0x6a3   :  { %12296 = vmatpush1.bf16.msra.mxu0 %v18226_v48  ;;  %13444 = vmatpush1.bf16.msra.mxu1 %v18229_v11  ;;  %v18320_v48 = vld [vmem:[%s24185_s1 + $0x36e8] ss:$16 sps:$4 sm:$0xff]   ;;  %v18325_v11 = vld [vmem:[%s24185_s1 + $0x3704] ss:$16 sps:$4 sm:$0xff]  }
 0x6a4   :  { %12297 = vmatprep.subr.bf16.mxu0 %v18234_v63  ;;  %13445 = vmatprep.subr.bf16.mxu1 %v18237_v12  ;;  %v18328_v63 = vld [vmem:[%s24185_s1 + $0x370c] ss:$16 sps:$4 sm:$0xff]   ;;  %v18323_v12 = vld [vmem:[%s24185_s1 + $0x3700] ss:$16 sps:$4 sm:$0xff]  }
 0x6a7   :  { %12298 = vmatpush1.bf16.msra.mxu0 %v18232_v3  ;;  %13446 = vmatpush1.bf16.msra.mxu1 %v18235_v15  ;;  %v18326_v3 = vld [vmem:[%s24185_s1 + $0x3708] ss:$16 sps:$4 sm:$0xff]   ;;  %v18331_v15 = vld [vmem:[%s24185_s1 + $0x3724] ss:$16 sps:$4 sm:$0xff]  }
 0x6a8   :  { %12299 = vmatprep.subr.bf16.mxu0 %v18240_v7  ;;  %13447 = vmatprep.subr.bf16.mxu1 %v18243_v6  ;;  %v18334_v7 = vld [vmem:[%s24185_s1 + $0x372c] ss:$16 sps:$4 sm:$0xff]   ;;  %v18329_v6 = vld [vmem:[%s24185_s1 + $0x3720] ss:$16 sps:$4 sm:$0xff]  }
 0x6ab   :  { %12300 = vmatpush1.bf16.msra.mxu0 %v18238_v8  ;;  %13448 = vmatpush1.bf16.msra.mxu1 %v18241_v22  ;;  %v18332_v8 = vld [vmem:[%s24185_s1 + $0x3728] ss:$16 sps:$4 sm:$0xff]   ;;  %v18337_v22 = vld [vmem:[%s24185_s1 + $0x3744] ss:$16 sps:$4 sm:$0xff]  }
 0x6ac   :  { %12301 = vmatprep.subr.bf16.mxu0 %v18246_v9  ;;  %13449 = vmatprep.subr.bf16.mxu1 %v18249_v4  ;;  %v18340_v9 = vld [vmem:[%s24185_s1 + $0x374c] ss:$16 sps:$4 sm:$0xff]   ;;  %v18335_v4 = vld [vmem:[%s24185_s1 + $0x3740] ss:$16 sps:$4 sm:$0xff]  }
 0x6af   :  { %12302 = vmatpush1.bf16.msra.mxu0 %v18244_v24  ;;  %13450 = vmatpush1.bf16.msra.mxu1 %v18247_v13  ;;  %v18338_v24 = vld [vmem:[%s24185_s1 + $0x3748] ss:$16 sps:$4 sm:$0xff]   ;;  %v18343_v13 = vld [vmem:[%s24185_s1 + $0x3764] ss:$16 sps:$4 sm:$0xff]  }
 0x6b0   :  { %12303 = vmatprep.subr.bf16.mxu0 %v18252_v16  ;;  %13451 = vmatprep.subr.bf16.mxu1 %v18255_v27  ;;  %v18346_v16 = vld [vmem:[%s24185_s1 + $0x376c] ss:$16 sps:$4 sm:$0xff]   ;;  %v18341_v27 = vld [vmem:[%s24185_s1 + $0x3760] ss:$16 sps:$4 sm:$0xff]  }
 0x6b3   :  { %12304 = vmatpush1.bf16.msra.mxu0 %v18250_v18  ;;  %13452 = vmatpush1.bf16.msra.mxu1 %v18253_v28  ;;  %v18344_v18 = vld [vmem:[%s24185_s1 + $0x3768] ss:$16 sps:$4 sm:$0xff]   ;;  %v18349_v28 = vld [vmem:[%s24185_s1 + $0x3784] ss:$16 sps:$4 sm:$0xff]  }
 0x6b4   :  { %12305 = vmatprep.subr.bf16.mxu0 %v18258_v17  ;;  %13453 = vmatprep.subr.bf16.mxu1 %v18261_v30  ;;  %v18352_v17 = vld [vmem:[%s24185_s1 + $0x378c] ss:$16 sps:$4 sm:$0xff]   ;;  %v18347_v30 = vld [vmem:[%s24185_s1 + $0x3780] ss:$16 sps:$4 sm:$0xff]  }
 0x6b7   :  { %12306 = vmatpush1.bf16.msra.mxu0 %v18256_v32  ;;  %13454 = vmatpush1.bf16.msra.mxu1 %v18259_v52  ;;  %v18350_v32 = vld [vmem:[%s24185_s1 + $0x3788] ss:$16 sps:$4 sm:$0xff]   ;;  %v18355_v52 = vld [vmem:[%s24185_s1 + $0x37a4] ss:$16 sps:$4 sm:$0xff]  }
 0x6b8   :  { %12307 = vmatprep.subr.bf16.mxu0 %v18264_v23  ;;  %13455 = vmatprep.subr.bf16.mxu1 %v18267_v20  ;;  %v18358_v23 = vld [vmem:[%s24185_s1 + $0x37ac] ss:$16 sps:$4 sm:$0xff]   ;;  %v18353_v20 = vld [vmem:[%s24185_s1 + $0x37a0] ss:$16 sps:$4 sm:$0xff]  }
 0x6bb   :  { %12308 = vmatpush1.bf16.msra.mxu0 %v18262_v36  ;;  %13456 = vmatpush1.bf16.msra.mxu1 %v18265_v37  ;;  %v18356_v36 = vld [vmem:[%s24185_s1 + $0x37a8] ss:$16 sps:$4 sm:$0xff]   ;;  %v18361_v37 = vld [vmem:[%s24185_s1 + $0x37c4] ss:$16 sps:$4 sm:$0xff]  }
 0x6bc   :  { %12309 = vmatprep.subr.bf16.mxu0 %v18270_v21  ;;  %13457 = vmatprep.subr.bf16.mxu1 %v18273_v14  ;;  %v18364_v21 = vld [vmem:[%s24185_s1 + $0x37cc] ss:$16 sps:$4 sm:$0xff]   ;;  %v18359_v14 = vld [vmem:[%s24185_s1 + $0x37c0] ss:$16 sps:$4 sm:$0xff]  }
 0x6bf   :  { %12310 = vmatpush1.bf16.msra.mxu0 %v18268_v31  ;;  %13458 = vmatpush1.bf16.msra.mxu1 %v18271_v39  ;;  %v18362_v31 = vld [vmem:[%s24185_s1 + $0x37c8] ss:$16 sps:$4 sm:$0xff]   ;;  %v18367_v39 = vld [vmem:[%s24185_s1 + $0x37e4] ss:$16 sps:$4 sm:$0xff]  }
 0x6c0   :  { %12320 = vmatprep.subr.bf16.mxu0 %v18277_v40  ;;  %13468 = vmatprep.subr.bf16.mxu1 %v18280_v19  ;;  %v18370_v40 = vld [vmem:[%s24185_s1 + $0x37ec] ss:$16 sps:$4 sm:$0xff]   ;;  %v18365_v19 = vld [vmem:[%s24185_s1 + $0x37e0] ss:$16 sps:$4 sm:$0xff]  }
 0x6c2   :  { %12312 = vmatmul.mubr.bf16.vlgmr.msra.gmra.mrb[0].mxu0 %v23950_v25  ;;  %13460 = vmatmul.mubr.bf16.vlgmr.msra.gmra.mrb[0].mxu1 %v23950_v25 }
 0x6c3   :  { %12321 = vmatpush1.bf16.msra.mxu0 %v18275_v43  ;;  %13469 = vmatpush1.bf16.msra.mxu1 %v18278_v46  ;;  %v18368_v43 = vld [vmem:[%s24185_s1 + $0x37e8] ss:$16 sps:$4 sm:$0xff]   ;;  %v2194_v46 = vcombine.high %v23950_v25, %v23950_v25  ;;  %v13509_v25 = vld [vmem:[%s24187_s3] sm:$0xf] }
 0x6c4   :  { %12322 = vmatprep.subr.bf16.mxu0 %v18283_v29  ;;  %13470 = vmatprep.subr.bf16.mxu1 %v18286_v49  ;;  %v1829_v29 = vsub.s32 0, %v18564_v42  ;;  %v1837_v49 = vsub.s32 2, %v18564_v42 }
 0x6c5   :  { %12352 = vmatprep.mubr.bf16.mxu0 %v2196_v26  ;;  %13500 = vmatprep.mubr.bf16.mxu1 %v2196_v26  ;;  %v1825_v26 = vld [vmem:[%s24186_s2] sm:$0xf] }
 0x6c7   :  { %12323 = vmatpush1.bf16.msra.mxu0 %v18281_v50  ;;  %13471 = vmatpush1.bf16.msra.mxu1 %v18284_v33  ;;  %v1833_v50 = vsub.s32 1, %v18564_v42  ;;  %v1841_v33 = vsub.s32 3, %v18564_v42 }
 0x6c8   :  { %12324 = vmatprep.subr.bf16.mxu0 %v18289_v41  ;;  %13472 = vmatprep.subr.bf16.mxu1 %v18292_v51  ;;  %v1830_v41 = vrot.slane %v1825_v26, %v1829_v29  ;;  %v1838_v51 = vrot.slane %v1825_v26, %v1837_v49 }
 0x6cb   :  { %12325 = vmatpush1.bf16.msra.mxu0 %v18287_v53  ;;  %13473 = vmatpush1.bf16.msra.mxu1 %v18290_v38  ;;  %v13535_v53 = vld [vmem:[%s24188_s4] sm:$0xf]  ;;  %v1834_v38 = vrot.slane %v1825_v26, %v1833_v50  ;;  %s18406_s4 = smov [#allocation2]  }
 0x6cc   :  { %12326 = vmatprep.subr.bf16.mxu0 %v18295_v34  ;;  %13474 = vmatprep.subr.bf16.mxu1 %v18298_v55  ;;  %v1842_v34 = vrot.slane %v1825_v26, %v1841_v33  ;;  %v13514_v55 = vrot.slane %v13509_v25, %v1829_v29 }
 0x6cf   :  { %12327 = vmatpush1.bf16.msra.mxu0 %v18293_v56  ;;  %13475 = vmatpush1.bf16.msra.mxu1 %v18296_v45  ;;  %v13522_v56 = vrot.slane %v13509_v25, %v1837_v49 }
 0x6d0   :  { %12328 = vmatprep.subr.bf16.mxu0 %v18301_v58  ;;  %13476 = vmatprep.subr.bf16.mxu1 %v18304_v61  ;;  %v13518_v61 = vrot.slane %v13509_v25, %v1833_v50 }
 0x6d3   :  { %12329 = vmatpush1.bf16.msra.mxu0 %v18299_v35  ;;  %13477 = vmatpush1.bf16.msra.mxu1 %v18302_v62  ;;  %v13526_v35 = vrot.slane %v13509_v25, %v1841_v33 }
 0x6d4   :  { %12330 = vmatprep.subr.bf16.mxu0 %v18307_v44  ;;  %13478 = vmatprep.subr.bf16.mxu1 %v18310_v0  ;;  %v13540_v44 = vrot.slane %v13535_v53, %v1829_v29 }
 0x6d7   :  { %12331 = vmatpush1.bf16.msra.mxu0 %v18305_v47  ;;  %13479 = vmatpush1.bf16.msra.mxu1 %v18308_v1  ;;  %v13548_v47 = vrot.slane %v13535_v53, %v1837_v49 }
 0x6d8   :  { %12332 = vmatprep.subr.bf16.mxu0 %v18313_v2  ;;  %13480 = vmatprep.subr.bf16.mxu1 %v18316_v59 }
 0x6db   :  { %12333 = vmatpush1.bf16.msra.mxu0 %v18311_v57  ;;  %13481 = vmatpush1.bf16.msra.mxu1 %v18314_v5  ;;  %v13544_v57 = vrot.slane %v13535_v53, %v1833_v50 }
 0x6dc   :  { %12334 = vmatprep.subr.bf16.mxu0 %v18319_v60  ;;  %13482 = vmatprep.subr.bf16.mxu1 %v18322_v54  ;;  %v13552_v60 = vrot.slane %v13535_v53, %v1841_v33 }
 0x6df   :  { %12335 = vmatpush1.bf16.msra.mxu0 %v18317_v10  ;;  %13483 = vmatpush1.bf16.msra.mxu1 %v18320_v48 }
 0x6e0   :  { %12336 = vmatprep.subr.bf16.mxu0 %v18325_v11  ;;  %13484 = vmatprep.subr.bf16.mxu1 %v18328_v63 }
 0x6e3   :  { %12337 = vmatpush1.bf16.msra.mxu0 %v18323_v12  ;;  %13485 = vmatpush1.bf16.msra.mxu1 %v18326_v3 }
 0x6e4   :  { %12338 = vmatprep.subr.bf16.mxu0 %v18331_v15  ;;  %13486 = vmatprep.subr.bf16.mxu1 %v18334_v7 }
 0x6e7   :  { %12339 = vmatpush1.bf16.msra.mxu0 %v18329_v6  ;;  %13487 = vmatpush1.bf16.msra.mxu1 %v18332_v8 }
 0x6e8   :  { %12340 = vmatprep.subr.bf16.mxu0 %v18337_v22  ;;  %13488 = vmatprep.subr.bf16.mxu1 %v18340_v9 }
 0x6eb   :  { %12341 = vmatpush1.bf16.msra.mxu0 %v18335_v4  ;;  %13489 = vmatpush1.bf16.msra.mxu1 %v18338_v24 }
 0x6ec   :  { %12342 = vmatprep.subr.bf16.mxu0 %v18343_v13  ;;  %13490 = vmatprep.subr.bf16.mxu1 %v18346_v16 }
 0x6ef   :  { %12343 = vmatpush1.bf16.msra.mxu0 %v18341_v27  ;;  %13491 = vmatpush1.bf16.msra.mxu1 %v18344_v18 }
 0x6f0   :  { %12344 = vmatprep.subr.bf16.mxu0 %v18349_v28  ;;  %13492 = vmatprep.subr.bf16.mxu1 %v18352_v17 }
 0x6f3   :  { %12345 = vmatpush1.bf16.msra.mxu0 %v18347_v30  ;;  %13493 = vmatpush1.bf16.msra.mxu1 %v18350_v32 }
 0x6f4   :  { %12346 = vmatprep.subr.bf16.mxu0 %v18355_v52  ;;  %13494 = vmatprep.subr.bf16.mxu1 %v18358_v23  ;;  %v18405_v52 = vmov 1983009808  }
 0x6f5   :  { %v13588_v23 = vunpack.c.l.s4 %v18405_v52 }
 0x6f7   :  { %12347 = vmatpush1.bf16.msra.mxu0 %v18353_v20  ;;  %13495 = vmatpush1.bf16.msra.mxu1 %v18356_v36  ;;  %v13589_v36 = vunpack.c.0.s8 %v13588_v23 }
 0x6f8   :  { %12348 = vmatprep.subr.bf16.mxu0 %v18361_v37  ;;  %13496 = vmatprep.subr.bf16.mxu1 %v18364_v21  ;;  %v13604_v21 = vld [vmem:[%s24189_s5] sm:$0xff]  ;;  %s13649_s5 = sshll.u32 %s18406_s4, 4  ;;  %s13650_s5 = int_to_ptr.vmem [resolvable:$true] %s13649_s5 }
 0x6f9   :  { %s18380_s23 = scalar_lea.vmem %s13650_s5, 128  ;;  %p18385_p1 = scmp.lt.s32.totalorder %s13650_s5, %s13650_s5 }
 0x6fa   :  { %p18381_p0 = scmp.ne.s32.totalorder %s13650_s5, %s18380_s23  ;;  %p18386_p2 = scmp.lt.s32.totalorder %s18380_s23, %s18380_s23 }
 0x6fb   :  { %12349 = vmatpush1.bf16.msra.mxu0 %v18359_v14  ;;  %13497 = vmatpush1.bf16.msra.mxu1 %v18362_v31  ;;  %v13592_v14 = vsub.s32 %v13589_v36, %v18564_v42  ;;  %v13606_v31 = vcombine.high %v13604_v21, %v13604_v21 }
 0x6fc   :  { %12350 = vmatprep.subr.bf16.mxu0 %v18367_v39  ;;  %13498 = vmatprep.subr.bf16.mxu1 %v18370_v40  ;;  %p18387_p3 = por %p18386_p2, %p18385_p1 }
 0x6fd   :  { %v13613_v39 = vrot.slane %v13604_v21, %v13592_v14  ;;  %v13620_v40 = vrot.slane %v13606_v31, %v13592_v14 }
 0x6fe   :  { %p18388_p4 = pnand %p18387_p3, %p18381_p0 }
 0x6ff   :  { %12351 = vmatpush1.bf16.msra.mxu0 %v18365_v19  ;;  %13499 = vmatpush1.bf16.msra.mxu1 %v18368_v43  ;;  %v13621_v19 = vcombine.high %v13613_v39, %v13613_v39 }
 0x702   :  { %12353 = vmatmul.mubr.bf16.vlgmr.msra.gmra.mrb[0].mxu0 %v2194_v46  ;;  %13501 = vmatmul.mubr.bf16.vlgmr.msra.gmra.mrb[0].mxu1 %v2194_v46  ;;  %v13622_v46 = vcombine.high %v13620_v40, %v13620_v40 }
 0x7d5   :  { %v12354_v45 = vpop.f32.mrb[0].mxu0  ;;  %v13502_v58 = vpop.f32.mrb[0].mxu1 }
 0x7d6   :  { %v15453_v62 = vadd.f32 %v12354_v45, %v1830_v41  ;;  %v15455_v0 = vadd.f32 %v13502_v58, %v1838_v51  ;;  %v12356_v1 = vpop.f32.mrb[1].mxu0  ;;  %v13504_v2 = vpop.f32.mrb[1].mxu1 }
 0x7d7   :  { %v15454_v59 = vadd.f32 %v12356_v1, %v1834_v38  ;;  %v15456_v5 = vadd.f32 %v13504_v2, %v1842_v34  ;;  %v12358_v54 = vpop.f32.mrb[2].mxu0  ;;  %v13506_v10 = vpop.f32.mrb[2].mxu1 }
 0x7d8   :  { %v13531_v48 = vmul.f32 %v15453_v62, %v13514_v55  ;;  %v13533_v11 = vmul.f32 %v15455_v0, %v13522_v56  ;;  %v12359_v63 = vpop.f32.mrb[3].mxu0  ;;  %v13507_v12 = vpop.f32.mrb[3].mxu1 }
 0x7d9   :  { %v13532_v3 = vmul.f32 %v15454_v59, %v13518_v61  ;;  %v13534_v15 = vmul.f32 %v15456_v5, %v13526_v35 }
 0x7da   :  { %v13557_v7 = vadd.f32 %v13540_v44, %v13531_v48  ;;  %v13559_v6 = vadd.f32 %v13548_v47, %v13533_v11 }
 0x7db   :  { %v13558_v8 = vadd.f32 %v13544_v57, %v13532_v3  ;;  %v13560_v22 = vadd.f32 %v13552_v60, %v13534_v15 }
 0x7dc   :  { %v13561_v9 = vmul.f32 %v13557_v7, %v13557_v7  ;;  %v13563_v24 = vmul.f32 %v13559_v6, %v13559_v6 }
 0x7dd   :  { %v13562_v4 = vmul.f32 %v13558_v8, %v13558_v8  ;;  %v13564_v16 = vmul.f32 %v13560_v22, %v13560_v22 }
 0x7de   :  { %v13566_v13 = vsel %vm13565_vm0, %v13561_v9, 0.0  ;;  %v13569_v28 = vsel %vm13565_vm0, %v13563_v24, 0.0 }
 0x7df   :  { %v13567_v27 = vsel %vm13565_vm0, %v13562_v4, 0.0  ;;  %v13571_v30 = vsel %vm13565_vm0, %v13564_v16, 0.0 }
 0x7e0   :  { %v13568_v18 = vadd.f32 %v13567_v27, %v13566_v13 }
 0x7e2   :  { %v13570_v17 = vadd.f32 %v13569_v28, %v13568_v18 }
 0x7e4   :  { %v13572_v32 = vadd.f32 %v13571_v30, %v13570_v17 }
 0x7e6   :  { %13573 = vadd.xlane.f32.xlu0 %v13572_v32 }
 0x873   :  { %v13574_v20 = vpop.xlane.xlu0 %13573 }
 0x874   :  { %v13575_v37 = vmax.f32 %v13574_v20, 1e-24 }
 0x876   :  { %18372 = vrsqrt.f32 %v13575_v37 }
 0x880   :  { %v18373_v43 = vpop.eup %18372 }
 0x881   :  { %v13577_v29 = vmul.f32 %v18373_v43, %v13557_v7  ;;  %v13578_v49 = vmul.f32 %v18373_v43, %v13558_v8  ;;  %v13579_v26 = vmul.f32 %v18373_v43, %v13559_v6  ;;  %v13580_v50 = vmul.f32 %v18373_v43, %v13560_v22 }
 0x883   :  { %v13627_v33 = vmul.f32 %v13613_v39, %v13577_v29  ;;  %v13628_v25 = vmul.f32 %v13621_v19, %v13578_v49  ;;  %v13629_v41 = vmul.f32 %v13620_v40, %v13579_v26  ;;  %v13585_v51 = vcombine.low %v13577_v29, %v13578_v49 }
 0x884   :  { %v13586_v53 = vcombine.low %v13579_v26, %v13580_v50  ;;  %v13630_v38 = vmul.f32 %v13622_v46, %v13580_v50 }
 0x885   :  { %v13631_v34 = vsel %vm13565_vm0, %v13627_v33, 0.0  ;;  %v13632_v42 = vsel %vm13565_vm0, %v13628_v25, 0.0  ;;  %v13593_v56 = vrot.slane %v13585_v51, %v13592_v14  ;;  %v13634_v58 = vsel %vm13565_vm0, %v13629_v41, 0.0 }
 0x886   :  { %v13633_v55 = vadd.f32 %v13632_v42, %v13631_v34  ;;  %v13600_v45 = vrot.slane %v13586_v53, %v13592_v14  ;;  %v13636_v62 = vsel %vm13565_vm0, %v13630_v38, 0.0 }
 0x888   :  { %v13635_v61 = vadd.f32 %v13634_v58, %v13633_v55  ;;  %v13601_v35 = vcombine.low %v13593_v56, %v13600_v45 }
 0x88a   :  { %v13637_v44 = vadd.f32 %v13636_v62, %v13635_v61  ;;  %13603 = vst [vmem:[#allocation2] sm:$0xff] %v13601_v35 }
 0x88c   :  { %13638 = vadd.xlane.f32.xlu0 %v13637_v44 }
 0x88d   :  { %18391 = shalt.err (!%p18388_p4)
}
 0x88e   :  { %s18392_s26 = scalar_lea.hbm %s24190_s6, 128 }
 0x88f   :  { %p18393_p5 = scmp.ne.s32.totalorder %s24190_s6, %s18392_s26  ;;  %p18396_p6 = scmp.lt.u32.totalorder %s18392_s26, %s24190_s6 }
 0x891   :  { %p18398_p7 = pnand %p18396_p6, %p18393_p5 }
 0x893   :  { %18401 = shalt.err (!%p18398_p7)
}
 0x894   :  { %13652 = dma.vmem_to_hbm [thread:$0]  %s13650_s5, 128, %s24190_s6, [#allocation3]   ;;  %vm13641_vm1 = vcmask 1024  }
 0x919   :  { %v13639_v0 = vpop.xlane.xlu0 %13638 }
 0x91a   :  { %v13640_v47 = vsub.f32 1.0, %v13639_v0 }
 0x91c   :  { %13642 = vst.msk [vmem:[%s24191_s7] sm:$0x3] %vm13641_vm1, %v13640_v47 }
 0x91d   :  { %18402 = dma.done.wait [#allocation3], 128  }
 0x91e   :  { %18403 = vsyncadd [#allocation3], 4294967168 }
 0x91f   :  { %13660 = vsyncpa [#allocation3], 1 }

</bundles_post_ra>
